<compile_context>
chip_gen: v5e
topology: v5e:2x2
jax: 0.10.0
libtpu: 0.0.40
codegen_flags: <defaults>
</compile_context>

<pallas_src>
import jax
import jax.numpy as jnp
from jax import lax
from jax.experimental import pallas as pl
from jax.experimental.pallas import tpu as pltpu


# --------------------------- Pallas kernels ---------------------------------

def conv2d_pallas(x, w, b, *, padding=0, post_scale=None, post_shift=None,
                  relu=False, residual=None):
    """2-D convolution (NCHW x HWIO -> NCHW), stride 1, optional zero padding.

    One pallas_call per layer, grid=(B,) ("parallel": both TCs on v7x).  Each
    grid step does the whole layer as ONE MXU matmul
        (Cout, K2*Cin) @ (K2*Cin, Ho*Wo)    bf16 inputs, f32 accumulation
    with bias / eval-mode BN / ReLU / residual fused in a lane-dense f32
    epilogue (spatial axis on the 128 lanes).  The transposed im2col patch
    matrix is built with XLA slicing glue (no FLOPs) in bf16.
    """
    B, Cin, Hi, Wi = x.shape
    KH, KW, _, Cout = w.shape
    if padding:
        x = jnp.pad(x, ((0, 0), (0, 0), (padding, padding), (padding, padding)))
    Ho = Hi + 2 * padding - KH + 1
    Wo = Wi + 2 * padding - KW + 1
    HW = Ho * Wo
    KC = KH * KW * Cin

    # glue: transposed im2col, rows ordered (kh, kw, cin), spatial flattened on
    # the last (lane) axis.  bf16 halves the materialised patch bytes.
    # TODO(synk): at production sizes fold this gather (and pad / upsample /
    #             kron) into in-kernel slicing to avoid the K2x HBM patch blowup.
    xb = x.astype(jnp.bfloat16)
    cols = [xb[:, :, kh:kh + Ho, kw:kw + Wo].reshape(B, Cin, HW)
            for kh in range(KH) for kw in range(KW)]
    patches = jnp.concatenate(cols, axis=1)                      # (B, KC, HW)
    wt = jnp.transpose(w, (3, 0, 1, 2)).reshape(Cout, KC).astype(jnp.bfloat16)

    has_post = post_scale is not None
    has_res = residual is not None

    def kernel(*refs):
        i = 0
        p_ref = refs[i]; i += 1
        w_ref = refs[i]; i += 1
        b_ref = refs[i]; i += 1
        if has_post:
            s_ref, t_ref = refs[i], refs[i + 1]; i += 2
        if has_res:
            r_ref = refs[i]; i += 1
        o_ref = refs[i]

        # single big-K matmul on the MXU, f32 accumulation
        y = jnp.dot(w_ref[...], p_ref[0], preferred_element_type=jnp.float32)
        y = y + b_ref[...]                        # (Cout, 1) lane-broadcast
        if has_post:
            y = y * s_ref[...] + t_ref[...]       # eval-mode BatchNorm
        if relu:
            y = jnp.maximum(y, 0.0)
        if has_res:
            y = y + r_ref[0]
        o_ref[0] = y.astype(o_ref.dtype)

    in_specs = [
        pl.BlockSpec((1, KC, HW), lambda bi: (bi, 0, 0)),
        pl.BlockSpec((Cout, KC), lambda bi: (0, 0)),   # weights: one VMEM block
        pl.BlockSpec((Cout, 1), lambda bi: (0, 0)),
    ]
    args = [patches, wt, b.reshape(Cout, 1)]
    if has_post:
        in_specs += [pl.BlockSpec((Cout, 1), lambda bi: (0, 0)),
                     pl.BlockSpec((Cout, 1), lambda bi: (0, 0))]
        args += [post_scale.reshape(Cout, 1), post_shift.reshape(Cout, 1)]
    if has_res:
        in_specs.append(pl.BlockSpec((1, Cout, HW), lambda bi: (bi, 0, 0)))
        args.append(residual.reshape(B, Cout, HW))

    out = pl.pallas_call(
        kernel,
        out_shape=jax.ShapeDtypeStruct((B, Cout, HW), jnp.float32),
        grid=(B,),
        in_specs=in_specs,
        out_specs=pl.BlockSpec((1, Cout, HW), lambda bi: (bi, 0, 0)),
        compiler_params=pltpu.CompilerParams(
            dimension_semantics=("parallel",)),
    )(*args)
    return out.reshape(B, Cout, Ho, Wo)


def bn_relu_pallas(x, scale, shift):
    """Per-channel affine (eval-mode BatchNorm) + ReLU. x: NCHW, lane-dense HW."""
    B, C, H, W = x.shape
    HW = H * W
    xf = x.reshape(B, C, HW)

    def kernel(x_ref, s_ref, t_ref, o_ref):
        o_ref[0] = jnp.maximum(x_ref[0] * s_ref[...] + t_ref[...], 0.0)

    out = pl.pallas_call(
        kernel,
        out_shape=jax.ShapeDtypeStruct((B, C, HW), x.dtype),
        grid=(B,),
        in_specs=[pl.BlockSpec((1, C, HW), lambda bi: (bi, 0, 0)),
                  pl.BlockSpec((C, 1), lambda bi: (0, 0)),
                  pl.BlockSpec((C, 1), lambda bi: (0, 0))],
        out_specs=pl.BlockSpec((1, C, HW), lambda bi: (bi, 0, 0)),
        compiler_params=pltpu.CompilerParams(dimension_semantics=("parallel",)),
    )(xf, scale.reshape(C, 1), shift.reshape(C, 1))
    return out.reshape(B, C, H, W)


# --------------------------- pure-JAX reference ------------------------------
# Same math as the Pallas path: bf16 matmul inputs, f32 accumulation, f32
# epilogue.  Differences are only in summation order (<< 2e-2).

def conv2d_ref(x, w, b, *, padding=0, post_scale=None, post_shift=None,
               relu=False, residual=None):
    y = lax.conv_general_dilated(
        x.astype(jnp.bfloat16), w.astype(jnp.bfloat16),
        window_strides=(1, 1),
        padding=[(padding, padding), (padding, padding)],
        dimension_numbers=('NCHW', 'HWIO', 'NCHW'),
        preferred_element_type=jnp.float32)
    y = y + b[None, :, None, None]
    if post_scale is not None:
        y = y * post_scale[None, :, None, None] + post_shift[None, :, None, None]
    if relu:
        y = jnp.maximum(y, 0.0)
    if residual is not None:
        y = y + residual
    return y


def bn_relu_ref(x, scale, shift):
    return jnp.maximum(
        x * scale[None, :, None, None] + shift[None, :, None, None], 0.0)


# --------------------------- glue (layout only) ------------------------------

def kron_occlusion(x, occ):
    # torch.kron(x_nchw, occ) with occ of shape (1, 1, ph, pw):
    #   out[b, c, i*ph+p, j*pw+q] = x[b, c, i, j] * occ[0, 0, p, q]
    ph, pw = occ.shape[2], occ.shape[3]
    B, C, H, W = x.shape
    o = occ[0, 0]
    y = x[:, :, :, None, :, None] * o[None, None, None, :, None, :]
    return y.reshape(B, C, H * ph, W * pw)


def upsample_nearest_2x(x):          # F.interpolate(scale_factor=2), nearest
    return jnp.repeat(jnp.repeat(x, 2, axis=2), 2, axis=3)


# --------------------------- Generator forward -------------------------------

def generator_forward(params, x, occlusion, conv2d, bn_relu):
    """x: (B, C, D, H, W) 3-D feature volume (PyTorch NCDHW). Returns NCHW."""
    B, C, D, H, W = x.shape
    x = x.reshape(B, C * D, H, W)                 # Reshape(reshape_channel)
    # conv1: Conv2d(3x3, valid) + BatchNorm + ReLU (fused epilogue)
    x = conv2d(x, params['conv1_w'], params['conv1_b'],
               post_scale=params['bn1_scale'], post_shift=params['bn1_shift'],
               relu=True)
    # conv2: Conv2d(1x1, valid)
    x = conv2d(x, params['conv2_w'], params['conv2_b'])
    # torch.kron(x, occlusion)
    x = kron_occlusion(x, occlusion)
    # ResBlock2D stack (pre-activation); the 2nd BN+ReLU is fused into conv1's
    # epilogue of the block, the residual add into conv2's epilogue.
    for rp in params['res']:
        h = bn_relu(x, rp['n1_scale'], rp['n1_shift'])
        h = conv2d(h, rp['c1_w'], rp['c1_b'], padding=1,
                   post_scale=rp['n2_scale'], post_shift=rp['n2_shift'],
                   relu=True)
        x = conv2d(h, rp['c2_w'], rp['c2_b'], padding=1, residual=x)
    # UpBlock2D stack
    for up in params['up']:
        x = upsample_nearest_2x(x)
        x = conv2d(x, up['w'], up['b'], padding=1,
                   post_scale=up['bn_scale'], post_shift=up['bn_shift'],
                   relu=True)
    # conv3: Conv2d(7x7, valid) -> already NCHW
    return conv2d(x, params['conv3_w'], params['conv3_b'])


# --------------------------- deterministic params ----------------------------

def init_params(key, cfg):
    keys = iter(jax.random.split(key, 64))

    def wgt(shape):
        return 0.1 * jax.random.normal(next(keys), shape, jnp.float32)

    def bias(c):
        return 0.05 * jax.random.normal(next(keys), (c,), jnp.float32)

    def bn(c):
        # eval-mode BN folded: running_mean=0, running_var=1
        eps = 1e-5
        gamma = 1.0 + 0.1 * jax.random.normal(next(keys), (c,), jnp.float32)
        beta = 0.1 * jax.random.normal(next(keys), (c,), jnp.float32)
        return gamma / jnp.sqrt(1.0 + eps), beta

    rc = cfg['reshape_channel']
    cc = cfg['conv_channels']
    cf = cfg['conv_filters']
    res_c = cfg['res_channel']
    up_c = cfg['up_channels']

    p = {}
    p['conv1_w'] = wgt((cf[0], cf[0], rc, cc[0])); p['conv1_b'] = bias(cc[0])
    p['bn1_scale'], p['bn1_shift'] = bn(cc[0])
    p['conv2_w'] = wgt((cf[1], cf[1], cc[0], cc[1])); p['conv2_b'] = bias(cc[1])
    p['res'] = []
    for _ in range(cfg['num_res_layers']):
        n1s, n1t = bn(res_c)
        n2s, n2t = bn(res_c)
        p['res'].append(dict(
            n1_scale=n1s, n1_shift=n1t,
            c1_w=wgt((3, 3, res_c, res_c)), c1_b=bias(res_c),
            n2_scale=n2s, n2_shift=n2t,
            c2_w=wgt((3, 3, res_c, res_c)), c2_b=bias(res_c)))
    p['up'] = []
    ins = [res_c] + up_c[:-1]
    for cin, cout in zip(ins, up_c):
        s, t = bn(cout)
        p['up'].append(dict(w=wgt((3, 3, cin, cout)), b=bias(cout),
                            bn_scale=s, bn_shift=t))
    p['conv3_w'] = wgt((cf[2], cf[2], up_c[-1], cc[2])); p['conv3_b'] = bias(cc[2])
    return p


# ------------------------------- main -----------------------------------------

if __name__ == "__main__":
    cfg = dict(input_channel=4, depth=8, reshape_channel=32,
               conv_channels=[16, 16, 3], conv_filters=[3, 1, 7],
               res_channel=16, num_res_layers=2, up_channels=[16, 8])

    key = jax.random.PRNGKey(0)
    k_par, k_x, k_occ = jax.random.split(key, 3)
    params = init_params(k_par, cfg)

    # occlusion tensor used by torch.kron; shape (1, 1, 2, 2) => kron is a
    # 2x spatial block expansion weighted by the occlusion values.
    occlusion = jax.random.uniform(k_occ, (1, 1, 2, 2), jnp.float32, 0.5, 1.5)

    # input: (B, C, D, H, W) feature volume with C*D == reshape_channel
    x = jax.random.normal(
        k_x, (2, cfg['input_channel'], cfg['depth'], 10, 10), jnp.float32)

    fwd_pallas = jax.jit(
        lambda p, xx, occ: generator_forward(p, xx, occ,
                                             conv2d_pallas, bn_relu_pallas))
    fwd_ref = jax.jit(
        lambda p, xx, occ: generator_forward(p, xx, occ,
                                             conv2d_ref, bn_relu_ref))

    y = jax.block_until_ready(fwd_pallas(params, x, occlusion))

    # correctness check against a pure-JAX reference of the same forward pass
    # (identical bf16-input / f32-accumulate matmul numerics)
    y_ref = jax.block_until_ready(fwd_ref(params, x, occlusion))
    assert y.shape == (2, 3, 58, 58), y.shape
    assert bool(jnp.all(jnp.isfinite(y)))
    err = float(jnp.max(jnp.abs(y - y_ref)))
    assert err < 2e-2, f"max abs err {err}"
    print("KERNEL_OK")
</pallas_src>

<mosaic_0001>
module attributes {stable_mosaic.version = 11 : i64} {
  func.func @kernel(%arg0: i32, %arg1: memref<1x288x64xbf16, #tpu.memory_space<vmem>>, %arg2: memref<16x288xbf16, #tpu.memory_space<vmem>>, %arg3: memref<16x1xf32, #tpu.memory_space<vmem>>, %arg4: memref<16x1xf32, #tpu.memory_space<vmem>>, %arg5: memref<16x1xf32, #tpu.memory_space<vmem>>, %arg6: memref<1x16x64xf32, #tpu.memory_space<vmem>>) attributes {dimension_semantics = [#tpu.dimension_semantics<parallel>], iteration_bounds = array<i64: 2>, scalar_prefetch = 0 : i64, scratch_operands = 0 : i64, tpu.core_type = #tpu.core_type<tc>, window_params = [{transform_indices = @transform_0, window_bounds = array<i64: 1, 288, 64>}, {pipeline_mode = #tpu.pipeline_mode<synchronous>, transform_indices = @transform_1, window_bounds = array<i64: 16, 288>}, {pipeline_mode = #tpu.pipeline_mode<synchronous>, transform_indices = @transform_2, window_bounds = array<i64: 16, 1>}, {pipeline_mode = #tpu.pipeline_mode<synchronous>, transform_indices = @transform_3, window_bounds = array<i64: 16, 1>}, {pipeline_mode = #tpu.pipeline_mode<synchronous>, transform_indices = @transform_4, window_bounds = array<i64: 16, 1>}, {transform_indices = @transform_5, window_bounds = array<i64: 1, 16, 64>}]} {
    %c0 = arith.constant 0 : index
    %c0_0 = arith.constant 0 : index
    %0 = vector.load %arg2[%c0, %c0_0] : memref<16x288xbf16, #tpu.memory_space<vmem>>, vector<16x288xbf16>
    %c0_1 = arith.constant 0 : index
    %c0_2 = arith.constant 0 : index
    %c0_3 = arith.constant 0 : index
    %1 = vector.load %arg1[%c0_1, %c0_2, %c0_3] : memref<1x288x64xbf16, #tpu.memory_space<vmem>>, vector<1x288x64xbf16>
    %2 = vector.shape_cast %1 : vector<1x288x64xbf16> to vector<288x64xbf16>
    %cst = arith.constant dense<0.000000e+00> : vector<16x64xf32>
    %3 = tpu.matmul %0, %2, %cst {dimension_numbers = #tpu.dot_dimension_numbers<[1], [0], [0], [1], [0, 0, 1, 1], [], []>} : vector<16x288xbf16>, vector<288x64xbf16>, vector<16x64xf32> -> vector<16x64xf32>
    %c0_4 = arith.constant 0 : index
    %c0_5 = arith.constant 0 : index
    %4 = vector.load %arg3[%c0_4, %c0_5] : memref<16x1xf32, #tpu.memory_space<vmem>>, vector<16x1xf32>
    %5 = vector.broadcast %4 : vector<16x1xf32> to vector<16x64xf32>
    %6 = arith.addf %3, %5 : vector<16x64xf32>
    %c0_6 = arith.constant 0 : index
    %c0_7 = arith.constant 0 : index
    %7 = vector.load %arg4[%c0_6, %c0_7] : memref<16x1xf32, #tpu.memory_space<vmem>>, vector<16x1xf32>
    %8 = vector.broadcast %7 : vector<16x1xf32> to vector<16x64xf32>
    %9 = arith.mulf %6, %8 : vector<16x64xf32>
    %c0_8 = arith.constant 0 : index
    %c0_9 = arith.constant 0 : index
    %10 = vector.load %arg5[%c0_8, %c0_9] : memref<16x1xf32, #tpu.memory_space<vmem>>, vector<16x1xf32>
    %11 = vector.broadcast %10 : vector<16x1xf32> to vector<16x64xf32>
    %12 = arith.addf %9, %11 : vector<16x64xf32>
    %cst_10 = arith.constant 0.000000e+00 : f32
    %13 = vector.broadcast %cst_10 : f32 to vector<16x64xf32>
    %14 = arith.maximumf %12, %13 : vector<16x64xf32>
    %c0_11 = arith.constant 0 : index
    %c0_12 = arith.constant 0 : index
    %c0_13 = arith.constant 0 : index
    %15 = vector.load %arg6[%c0_11, %c0_12, %c0_13] : memref<1x16x64xf32, #tpu.memory_space<vmem>>, vector<1x16x64xf32>
    %16 = vector.shape_cast %15 : vector<1x16x64xf32> to vector<16x64xf32>
    %17 = vector.shape_cast %14 : vector<16x64xf32> to vector<1x16x64xf32>
    tpu.vector_store %arg6[%c0_11, %c0_12, %c0_13], %17 {strides = array<i32>} : memref<1x16x64xf32, #tpu.memory_space<vmem>>, vector<1x16x64xf32>,
    return
  }
  func.func @transform_0(%arg0: i32) -> (i32, i32, i32) {
    %c0_i32 = arith.constant 0 : i32
    %c0_i32_0 = arith.constant 0 : i32
    %c0_i32_1 = arith.constant 0 : i32
    return %arg0, %c0_i32, %c0_i32_0 : i32, i32, i32
  }
  func.func @transform_1(%arg0: i32) -> (i32, i32) {
    %c0_i32 = arith.constant 0 : i32
    %c0_i32_0 = arith.constant 0 : i32
    %c0_i32_1 = arith.constant 0 : i32
    return %c0_i32, %c0_i32_0 : i32, i32
  }
  func.func @transform_2(%arg0: i32) -> (i32, i32) {
    %c0_i32 = arith.constant 0 : i32
    %c0_i32_0 = arith.constant 0 : i32
    %c0_i32_1 = arith.constant 0 : i32
    return %c0_i32, %c0_i32_0 : i32, i32
  }
  func.func @transform_3(%arg0: i32) -> (i32, i32) {
    %c0_i32 = arith.constant 0 : i32
    %c0_i32_0 = arith.constant 0 : i32
    %c0_i32_1 = arith.constant 0 : i32
    return %c0_i32, %c0_i32_0 : i32, i32
  }
  func.func @transform_4(%arg0: i32) -> (i32, i32) {
    %c0_i32 = arith.constant 0 : i32
    %c0_i32_0 = arith.constant 0 : i32
    %c0_i32_1 = arith.constant 0 : i32
    return %c0_i32, %c0_i32_0 : i32, i32
  }
  func.func @transform_5(%arg0: i32) -> (i32, i32, i32) {
    %c0_i32 = arith.constant 0 : i32
    %c0_i32_0 = arith.constant 0 : i32
    %c0_i32_1 = arith.constant 0 : i32
    return %arg0, %c0_i32, %c0_i32_0 : i32, i32, i32
  }
}

module attributes {stable_mosaic.version = 11 : i64} {
  func.func @kernel(%arg0: i32, %arg1: memref<1x16x64xbf16, #tpu.memory_space<vmem>>, %arg2: memref<16x16xbf16, #tpu.memory_space<vmem>>, %arg3: memref<16x1xf32, #tpu.memory_space<vmem>>, %arg4: memref<1x16x64xf32, #tpu.memory_space<vmem>>) attributes {dimension_semantics = [#tpu.dimension_semantics<parallel>], iteration_bounds = array<i64: 2>, scalar_prefetch = 0 : i64, scratch_operands = 0 : i64, tpu.core_type = #tpu.core_type<tc>, window_params = [{transform_indices = @transform_0, window_bounds = array<i64: 1, 16, 64>}, {pipeline_mode = #tpu.pipeline_mode<synchronous>, transform_indices = @transform_1, window_bounds = array<i64: 16, 16>}, {pipeline_mode = #tpu.pipeline_mode<synchronous>, transform_indices = @transform_2, window_bounds = array<i64: 16, 1>}, {transform_indices = @transform_3, window_bounds = array<i64: 1, 16, 64>}]} {
    %c0 = arith.constant 0 : index
    %c0_0 = arith.constant 0 : index
    %0 = vector.load %arg2[%c0, %c0_0] : memref<16x16xbf16, #tpu.memory_space<vmem>>, vector<16x16xbf16>
    %c0_1 = arith.constant 0 : index
    %c0_2 = arith.constant 0 : index
    %c0_3 = arith.constant 0 : index
    %1 = vector.load %arg1[%c0_1, %c0_2, %c0_3] : memref<1x16x64xbf16, #tpu.memory_space<vmem>>, vector<1x16x64xbf16>
    %2 = vector.shape_cast %1 : vector<1x16x64xbf16> to vector<16x64xbf16>
    %cst = arith.constant dense<0.000000e+00> : vector<16x64xf32>
    %3 = tpu.matmul %0, %2, %cst {dimension_numbers = #tpu.dot_dimension_numbers<[1], [0], [0], [1], [0, 0, 1, 1], [], []>} : vector<16x16xbf16>, vector<16x64xbf16>, vector<16x64xf32> -> vector<16x64xf32>
    %c0_4 = arith.constant 0 : index
    %c0_5 = arith.constant 0 : index
    %4 = vector.load %arg3[%c0_4, %c0_5] : memref<16x1xf32, #tpu.memory_space<vmem>>, vector<16x1xf32>
    %5 = vector.broadcast %4 : vector<16x1xf32> to vector<16x64xf32>
    %6 = arith.addf %3, %5 : vector<16x64xf32>
    %c0_6 = arith.constant 0 : index
    %c0_7 = arith.constant 0 : index
    %c0_8 = arith.constant 0 : index
    %7 = vector.load %arg4[%c0_6, %c0_7, %c0_8] : memref<1x16x64xf32, #tpu.memory_space<vmem>>, vector<1x16x64xf32>
    %8 = vector.shape_cast %7 : vector<1x16x64xf32> to vector<16x64xf32>
    %9 = vector.shape_cast %6 : vector<16x64xf32> to vector<1x16x64xf32>
    tpu.vector_store %arg4[%c0_6, %c0_7, %c0_8], %9 {strides = array<i32>} : memref<1x16x64xf32, #tpu.memory_space<vmem>>, vector<1x16x64xf32>,
    return
  }
  func.func @transform_0(%arg0: i32) -> (i32, i32, i32) {
    %c0_i32 = arith.constant 0 : i32
    %c0_i32_0 = arith.constant 0 : i32
    %c0_i32_1 = arith.constant 0 : i32
    return %arg0, %c0_i32, %c0_i32_0 : i32, i32, i32
  }
  func.func @transform_1(%arg0: i32) -> (i32, i32) {
    %c0_i32 = arith.constant 0 : i32
    %c0_i32_0 = arith.constant 0 : i32
    %c0_i32_1 = arith.constant 0 : i32
    return %c0_i32, %c0_i32_0 : i32, i32
  }
  func.func @transform_2(%arg0: i32) -> (i32, i32) {
    %c0_i32 = arith.constant 0 : i32
    %c0_i32_0 = arith.constant 0 : i32
    %c0_i32_1 = arith.constant 0 : i32
    return %c0_i32, %c0_i32_0 : i32, i32
  }
  func.func @transform_3(%arg0: i32) -> (i32, i32, i32) {
    %c0_i32 = arith.constant 0 : i32
    %c0_i32_0 = arith.constant 0 : i32
    %c0_i32_1 = arith.constant 0 : i32
    return %arg0, %c0_i32, %c0_i32_0 : i32, i32, i32
  }
}

module attributes {stable_mosaic.version = 11 : i64} {
  func.func @kernel(%arg0: i32, %arg1: memref<1x16x256xf32, #tpu.memory_space<vmem>>, %arg2: memref<16x1xf32, #tpu.memory_space<vmem>>, %arg3: memref<16x1xf32, #tpu.memory_space<vmem>>, %arg4: memref<1x16x256xf32, #tpu.memory_space<vmem>>) attributes {dimension_semantics = [#tpu.dimension_semantics<parallel>], iteration_bounds = array<i64: 2>, scalar_prefetch = 0 : i64, scratch_operands = 0 : i64, tpu.core_type = #tpu.core_type<tc>, window_params = [{transform_indices = @transform_0, window_bounds = array<i64: 1, 16, 256>}, {pipeline_mode = #tpu.pipeline_mode<synchronous>, transform_indices = @transform_1, window_bounds = array<i64: 16, 1>}, {pipeline_mode = #tpu.pipeline_mode<synchronous>, transform_indices = @transform_2, window_bounds = array<i64: 16, 1>}, {transform_indices = @transform_3, window_bounds = array<i64: 1, 16, 256>}]} {
    %c0 = arith.constant 0 : index
    %c0_0 = arith.constant 0 : index
    %c0_1 = arith.constant 0 : index
    %0 = vector.load %arg1[%c0, %c0_0, %c0_1] : memref<1x16x256xf32, #tpu.memory_space<vmem>>, vector<1x16x256xf32>
    %1 = vector.shape_cast %0 : vector<1x16x256xf32> to vector<16x256xf32>
    %c0_2 = arith.constant 0 : index
    %c0_3 = arith.constant 0 : index
    %2 = vector.load %arg2[%c0_2, %c0_3] : memref<16x1xf32, #tpu.memory_space<vmem>>, vector<16x1xf32>
    %3 = vector.broadcast %2 : vector<16x1xf32> to vector<16x256xf32>
    %4 = arith.mulf %1, %3 : vector<16x256xf32>
    %c0_4 = arith.constant 0 : index
    %c0_5 = arith.constant 0 : index
    %5 = vector.load %arg3[%c0_4, %c0_5] : memref<16x1xf32, #tpu.memory_space<vmem>>, vector<16x1xf32>
    %6 = vector.broadcast %5 : vector<16x1xf32> to vector<16x256xf32>
    %7 = arith.addf %4, %6 : vector<16x256xf32>
    %cst = arith.constant 0.000000e+00 : f32
    %8 = vector.broadcast %cst : f32 to vector<16x256xf32>
    %9 = arith.maximumf %7, %8 : vector<16x256xf32>
    %c0_6 = arith.constant 0 : index
    %c0_7 = arith.constant 0 : index
    %c0_8 = arith.constant 0 : index
    %10 = vector.load %arg4[%c0_6, %c0_7, %c0_8] : memref<1x16x256xf32, #tpu.memory_space<vmem>>, vector<1x16x256xf32>
    %11 = vector.shape_cast %10 : vector<1x16x256xf32> to vector<16x256xf32>
    %12 = vector.shape_cast %9 : vector<16x256xf32> to vector<1x16x256xf32>
    tpu.vector_store %arg4[%c0_6, %c0_7, %c0_8], %12 {strides = array<i32>} : memref<1x16x256xf32, #tpu.memory_space<vmem>>, vector<1x16x256xf32>,
    return
  }
  func.func @transform_0(%arg0: i32) -> (i32, i32, i32) {
    %c0_i32 = arith.constant 0 : i32
    %c0_i32_0 = arith.constant 0 : i32
    %c0_i32_1 = arith.constant 0 : i32
    return %arg0, %c0_i32, %c0_i32_0 : i32, i32, i32
  }
  func.func @transform_1(%arg0: i32) -> (i32, i32) {
    %c0_i32 = arith.constant 0 : i32
    %c0_i32_0 = arith.constant 0 : i32
    %c0_i32_1 = arith.constant 0 : i32
    return %c0_i32, %c0_i32_0 : i32, i32
  }
  func.func @transform_2(%arg0: i32) -> (i32, i32) {
    %c0_i32 = arith.constant 0 : i32
    %c0_i32_0 = arith.constant 0 : i32
    %c0_i32_1 = arith.constant 0 : i32
    return %c0_i32, %c0_i32_0 : i32, i32
  }
  func.func @transform_3(%arg0: i32) -> (i32, i32, i32) {
    %c0_i32 = arith.constant 0 : i32
    %c0_i32_0 = arith.constant 0 : i32
    %c0_i32_1 = arith.constant 0 : i32
    return %arg0, %c0_i32, %c0_i32_0 : i32, i32, i32
  }
}

module attributes {stable_mosaic.version = 11 : i64} {
  func.func @kernel(%arg0: i32, %arg1: memref<1x144x256xbf16, #tpu.memory_space<vmem>>, %arg2: memref<16x144xbf16, #tpu.memory_space<vmem>>, %arg3: memref<16x1xf32, #tpu.memory_space<vmem>>, %arg4: memref<16x1xf32, #tpu.memory_space<vmem>>, %arg5: memref<16x1xf32, #tpu.memory_space<vmem>>, %arg6: memref<1x16x256xf32, #tpu.memory_space<vmem>>) attributes {dimension_semantics = [#tpu.dimension_semantics<parallel>], iteration_bounds = array<i64: 2>, scalar_prefetch = 0 : i64, scratch_operands = 0 : i64, tpu.core_type = #tpu.core_type<tc>, window_params = [{transform_indices = @transform_0, window_bounds = array<i64: 1, 144, 256>}, {pipeline_mode = #tpu.pipeline_mode<synchronous>, transform_indices = @transform_1, window_bounds = array<i64: 16, 144>}, {pipeline_mode = #tpu.pipeline_mode<synchronous>, transform_indices = @transform_2, window_bounds = array<i64: 16, 1>}, {pipeline_mode = #tpu.pipeline_mode<synchronous>, transform_indices = @transform_3, window_bounds = array<i64: 16, 1>}, {pipeline_mode = #tpu.pipeline_mode<synchronous>, transform_indices = @transform_4, window_bounds = array<i64: 16, 1>}, {transform_indices = @transform_5, window_bounds = array<i64: 1, 16, 256>}]} {
    %c0 = arith.constant 0 : index
    %c0_0 = arith.constant 0 : index
    %0 = vector.load %arg2[%c0, %c0_0] : memref<16x144xbf16, #tpu.memory_space<vmem>>, vector<16x144xbf16>
    %c0_1 = arith.constant 0 : index
    %c0_2 = arith.constant 0 : index
    %c0_3 = arith.constant 0 : index
    %1 = vector.load %arg1[%c0_1, %c0_2, %c0_3] : memref<1x144x256xbf16, #tpu.memory_space<vmem>>, vector<1x144x256xbf16>
    %2 = vector.shape_cast %1 : vector<1x144x256xbf16> to vector<144x256xbf16>
    %cst = arith.constant dense<0.000000e+00> : vector<16x256xf32>
    %3 = tpu.matmul %0, %2, %cst {dimension_numbers = #tpu.dot_dimension_numbers<[1], [0], [0], [1], [0, 0, 1, 1], [], []>} : vector<16x144xbf16>, vector<144x256xbf16>, vector<16x256xf32> -> vector<16x256xf32>
    %c0_4 = arith.constant 0 : index
    %c0_5 = arith.constant 0 : index
    %4 = vector.load %arg3[%c0_4, %c0_5] : memref<16x1xf32, #tpu.memory_space<vmem>>, vector<16x1xf32>
    %5 = vector.broadcast %4 : vector<16x1xf32> to vector<16x256xf32>
    %6 = arith.addf %3, %5 : vector<16x256xf32>
    %c0_6 = arith.constant 0 : index
    %c0_7 = arith.constant 0 : index
    %7 = vector.load %arg4[%c0_6, %c0_7] : memref<16x1xf32, #tpu.memory_space<vmem>>, vector<16x1xf32>
    %8 = vector.broadcast %7 : vector<16x1xf32> to vector<16x256xf32>
    %9 = arith.mulf %6, %8 : vector<16x256xf32>
    %c0_8 = arith.constant 0 : index
    %c0_9 = arith.constant 0 : index
    %10 = vector.load %arg5[%c0_8, %c0_9] : memref<16x1xf32, #tpu.memory_space<vmem>>, vector<16x1xf32>
    %11 = vector.broadcast %10 : vector<16x1xf32> to vector<16x256xf32>
    %12 = arith.addf %9, %11 : vector<16x256xf32>
    %cst_10 = arith.constant 0.000000e+00 : f32
    %13 = vector.broadcast %cst_10 : f32 to vector<16x256xf32>
    %14 = arith.maximumf %12, %13 : vector<16x256xf32>
    %c0_11 = arith.constant 0 : index
    %c0_12 = arith.constant 0 : index
    %c0_13 = arith.constant 0 : index
    %15 = vector.load %arg6[%c0_11, %c0_12, %c0_13] : memref<1x16x256xf32, #tpu.memory_space<vmem>>, vector<1x16x256xf32>
    %16 = vector.shape_cast %15 : vector<1x16x256xf32> to vector<16x256xf32>
    %17 = vector.shape_cast %14 : vector<16x256xf32> to vector<1x16x256xf32>
    tpu.vector_store %arg6[%c0_11, %c0_12, %c0_13], %17 {strides = array<i32>} : memref<1x16x256xf32, #tpu.memory_space<vmem>>, vector<1x16x256xf32>,
    return
  }
  func.func @transform_0(%arg0: i32) -> (i32, i32, i32) {
    %c0_i32 = arith.constant 0 : i32
    %c0_i32_0 = arith.constant 0 : i32
    %c0_i32_1 = arith.constant 0 : i32
    return %arg0, %c0_i32, %c0_i32_0 : i32, i32, i32
  }
  func.func @transform_1(%arg0: i32) -> (i32, i32) {
    %c0_i32 = arith.constant 0 : i32
    %c0_i32_0 = arith.constant 0 : i32
    %c0_i32_1 = arith.constant 0 : i32
    return %c0_i32, %c0_i32_0 : i32, i32
  }
  func.func @transform_2(%arg0: i32) -> (i32, i32) {
    %c0_i32 = arith.constant 0 : i32
    %c0_i32_0 = arith.constant 0 : i32
    %c0_i32_1 = arith.constant 0 : i32
    return %c0_i32, %c0_i32_0 : i32, i32
  }
  func.func @transform_3(%arg0: i32) -> (i32, i32) {
    %c0_i32 = arith.constant 0 : i32
    %c0_i32_0 = arith.constant 0 : i32
    %c0_i32_1 = arith.constant 0 : i32
    return %c0_i32, %c0_i32_0 : i32, i32
  }
  func.func @transform_4(%arg0: i32) -> (i32, i32) {
    %c0_i32 = arith.constant 0 : i32
    %c0_i32_0 = arith.constant 0 : i32
    %c0_i32_1 = arith.constant 0 : i32
    return %c0_i32, %c0_i32_0 : i32, i32
  }
  func.func @transform_5(%arg0: i32) -> (i32, i32, i32) {
    %c0_i32 = arith.constant 0 : i32
    %c0_i32_0 = arith.constant 0 : i32
    %c0_i32_1 = arith.constant 0 : i32
    return %arg0, %c0_i32, %c0_i32_0 : i32, i32, i32
  }
}

module attributes {stable_mosaic.version = 11 : i64} {
  func.func @kernel(%arg0: i32, %arg1: memref<1x144x256xbf16, #tpu.memory_space<vmem>>, %arg2: memref<16x144xbf16, #tpu.memory_space<vmem>>, %arg3: memref<16x1xf32, #tpu.memory_space<vmem>>, %arg4: memref<1x16x256xf32, #tpu.memory_space<vmem>>, %arg5: memref<1x16x256xf32, #tpu.memory_space<vmem>>) attributes {dimension_semantics = [#tpu.dimension_semantics<parallel>], iteration_bounds = array<i64: 2>, scalar_prefetch = 0 : i64, scratch_operands = 0 : i64, tpu.core_type = #tpu.core_type<tc>, window_params = [{transform_indices = @transform_0, window_bounds = array<i64: 1, 144, 256>}, {pipeline_mode = #tpu.pipeline_mode<synchronous>, transform_indices = @transform_1, window_bounds = array<i64: 16, 144>}, {pipeline_mode = #tpu.pipeline_mode<synchronous>, transform_indices = @transform_2, window_bounds = array<i64: 16, 1>}, {transform_indices = @transform_3, window_bounds = array<i64: 1, 16, 256>}, {transform_indices = @transform_4, window_bounds = array<i64: 1, 16, 256>}]} {
    %c0 = arith.constant 0 : index
    %c0_0 = arith.constant 0 : index
    %0 = vector.load %arg2[%c0, %c0_0] : memref<16x144xbf16, #tpu.memory_space<vmem>>, vector<16x144xbf16>
    %c0_1 = arith.constant 0 : index
    %c0_2 = arith.constant 0 : index
    %c0_3 = arith.constant 0 : index
    %1 = vector.load %arg1[%c0_1, %c0_2, %c0_3] : memref<1x144x256xbf16, #tpu.memory_space<vmem>>, vector<1x144x256xbf16>
    %2 = vector.shape_cast %1 : vector<1x144x256xbf16> to vector<144x256xbf16>
    %cst = arith.constant dense<0.000000e+00> : vector<16x256xf32>
    %3 = tpu.matmul %0, %2, %cst {dimension_numbers = #tpu.dot_dimension_numbers<[1], [0], [0], [1], [0, 0, 1, 1], [], []>} : vector<16x144xbf16>, vector<144x256xbf16>, vector<16x256xf32> -> vector<16x256xf32>
    %c0_4 = arith.constant 0 : index
    %c0_5 = arith.constant 0 : index
    %4 = vector.load %arg3[%c0_4, %c0_5] : memref<16x1xf32, #tpu.memory_space<vmem>>, vector<16x1xf32>
    %5 = vector.broadcast %4 : vector<16x1xf32> to vector<16x256xf32>
    %6 = arith.addf %3, %5 : vector<16x256xf32>
    %c0_6 = arith.constant 0 : index
    %c0_7 = arith.constant 0 : index
    %c0_8 = arith.constant 0 : index
    %7 = vector.load %arg4[%c0_6, %c0_7, %c0_8] : memref<1x16x256xf32, #tpu.memory_space<vmem>>, vector<1x16x256xf32>
    %8 = vector.shape_cast %7 : vector<1x16x256xf32> to vector<16x256xf32>
    %9 = arith.addf %6, %8 : vector<16x256xf32>
    %c0_9 = arith.constant 0 : index
    %c0_10 = arith.constant 0 : index
    %c0_11 = arith.constant 0 : index
    %10 = vector.load %arg5[%c0_9, %c0_10, %c0_11] : memref<1x16x256xf32, #tpu.memory_space<vmem>>, vector<1x16x256xf32>
    %11 = vector.shape_cast %10 : vector<1x16x256xf32> to vector<16x256xf32>
    %12 = vector.shape_cast %9 : vector<16x256xf32> to vector<1x16x256xf32>
    tpu.vector_store %arg5[%c0_9, %c0_10, %c0_11], %12 {strides = array<i32>} : memref<1x16x256xf32, #tpu.memory_space<vmem>>, vector<1x16x256xf32>,
    return
  }
  func.func @transform_0(%arg0: i32) -> (i32, i32, i32) {
    %c0_i32 = arith.constant 0 : i32
    %c0_i32_0 = arith.constant 0 : i32
    %c0_i32_1 = arith.constant 0 : i32
    return %arg0, %c0_i32, %c0_i32_0 : i32, i32, i32
  }
  func.func @transform_1(%arg0: i32) -> (i32, i32) {
    %c0_i32 = arith.constant 0 : i32
    %c0_i32_0 = arith.constant 0 : i32
    %c0_i32_1 = arith.constant 0 : i32
    return %c0_i32, %c0_i32_0 : i32, i32
  }
  func.func @transform_2(%arg0: i32) -> (i32, i32) {
    %c0_i32 = arith.constant 0 : i32
    %c0_i32_0 = arith.constant 0 : i32
    %c0_i32_1 = arith.constant 0 : i32
    return %c0_i32, %c0_i32_0 : i32, i32
  }
  func.func @transform_3(%arg0: i32) -> (i32, i32, i32) {
    %c0_i32 = arith.constant 0 : i32
    %c0_i32_0 = arith.constant 0 : i32
    %c0_i32_1 = arith.constant 0 : i32
    return %arg0, %c0_i32, %c0_i32_0 : i32, i32, i32
  }
  func.func @transform_4(%arg0: i32) -> (i32, i32, i32) {
    %c0_i32 = arith.constant 0 : i32
    %c0_i32_0 = arith.constant 0 : i32
    %c0_i32_1 = arith.constant 0 : i32
    return %arg0, %c0_i32, %c0_i32_0 : i32, i32, i32
  }
}

module attributes {stable_mosaic.version = 11 : i64} {
  func.func @kernel(%arg0: i32, %arg1: memref<1x144x1024xbf16, #tpu.memory_space<vmem>>, %arg2: memref<16x144xbf16, #tpu.memory_space<vmem>>, %arg3: memref<16x1xf32, #tpu.memory_space<vmem>>, %arg4: memref<16x1xf32, #tpu.memory_space<vmem>>, %arg5: memref<16x1xf32, #tpu.memory_space<vmem>>, %arg6: memref<1x16x1024xf32, #tpu.memory_space<vmem>>) attributes {dimension_semantics = [#tpu.dimension_semantics<parallel>], iteration_bounds = array<i64: 2>, scalar_prefetch = 0 : i64, scratch_operands = 0 : i64, tpu.core_type = #tpu.core_type<tc>, window_params = [{transform_indices = @transform_0, window_bounds = array<i64: 1, 144, 1024>}, {pipeline_mode = #tpu.pipeline_mode<synchronous>, transform_indices = @transform_1, window_bounds = array<i64: 16, 144>}, {pipeline_mode = #tpu.pipeline_mode<synchronous>, transform_indices = @transform_2, window_bounds = array<i64: 16, 1>}, {pipeline_mode = #tpu.pipeline_mode<synchronous>, transform_indices = @transform_3, window_bounds = array<i64: 16, 1>}, {pipeline_mode = #tpu.pipeline_mode<synchronous>, transform_indices = @transform_4, window_bounds = array<i64: 16, 1>}, {transform_indices = @transform_5, window_bounds = array<i64: 1, 16, 1024>}]} {
    %c0 = arith.constant 0 : index
    %c0_0 = arith.constant 0 : index
    %0 = vector.load %arg2[%c0, %c0_0] : memref<16x144xbf16, #tpu.memory_space<vmem>>, vector<16x144xbf16>
    %c0_1 = arith.constant 0 : index
    %c0_2 = arith.constant 0 : index
    %c0_3 = arith.constant 0 : index
    %1 = vector.load %arg1[%c0_1, %c0_2, %c0_3] : memref<1x144x1024xbf16, #tpu.memory_space<vmem>>, vector<1x144x1024xbf16>
    %2 = vector.shape_cast %1 : vector<1x144x1024xbf16> to vector<144x1024xbf16>
    %cst = arith.constant dense<0.000000e+00> : vector<16x1024xf32>
    %3 = tpu.matmul %0, %2, %cst {dimension_numbers = #tpu.dot_dimension_numbers<[1], [0], [0], [1], [0, 0, 1, 1], [], []>} : vector<16x144xbf16>, vector<144x1024xbf16>, vector<16x1024xf32> -> vector<16x1024xf32>
    %c0_4 = arith.constant 0 : index
    %c0_5 = arith.constant 0 : index
    %4 = vector.load %arg3[%c0_4, %c0_5] : memref<16x1xf32, #tpu.memory_space<vmem>>, vector<16x1xf32>
    %5 = vector.broadcast %4 : vector<16x1xf32> to vector<16x1024xf32>
    %6 = arith.addf %3, %5 : vector<16x1024xf32>
    %c0_6 = arith.constant 0 : index
    %c0_7 = arith.constant 0 : index
    %7 = vector.load %arg4[%c0_6, %c0_7] : memref<16x1xf32, #tpu.memory_space<vmem>>, vector<16x1xf32>
    %8 = vector.broadcast %7 : vector<16x1xf32> to vector<16x1024xf32>
    %9 = arith.mulf %6, %8 : vector<16x1024xf32>
    %c0_8 = arith.constant 0 : index
    %c0_9 = arith.constant 0 : index
    %10 = vector.load %arg5[%c0_8, %c0_9] : memref<16x1xf32, #tpu.memory_space<vmem>>, vector<16x1xf32>
    %11 = vector.broadcast %10 : vector<16x1xf32> to vector<16x1024xf32>
    %12 = arith.addf %9, %11 : vector<16x1024xf32>
    %cst_10 = arith.constant 0.000000e+00 : f32
    %13 = vector.broadcast %cst_10 : f32 to vector<16x1024xf32>
    %14 = arith.maximumf %12, %13 : vector<16x1024xf32>
    %c0_11 = arith.constant 0 : index
    %c0_12 = arith.constant 0 : index
    %c0_13 = arith.constant 0 : index
    %15 = vector.load %arg6[%c0_11, %c0_12, %c0_13] : memref<1x16x1024xf32, #tpu.memory_space<vmem>>, vector<1x16x1024xf32>
    %16 = vector.shape_cast %15 : vector<1x16x1024xf32> to vector<16x1024xf32>
    %17 = vector.shape_cast %14 : vector<16x1024xf32> to vector<1x16x1024xf32>
    tpu.vector_store %arg6[%c0_11, %c0_12, %c0_13], %17 {strides = array<i32>} : memref<1x16x1024xf32, #tpu.memory_space<vmem>>, vector<1x16x1024xf32>,
    return
  }
  func.func @transform_0(%arg0: i32) -> (i32, i32, i32) {
    %c0_i32 = arith.constant 0 : i32
    %c0_i32_0 = arith.constant 0 : i32
    %c0_i32_1 = arith.constant 0 : i32
    return %arg0, %c0_i32, %c0_i32_0 : i32, i32, i32
  }
  func.func @transform_1(%arg0: i32) -> (i32, i32) {
    %c0_i32 = arith.constant 0 : i32
    %c0_i32_0 = arith.constant 0 : i32
    %c0_i32_1 = arith.constant 0 : i32
    return %c0_i32, %c0_i32_0 : i32, i32
  }
  func.func @transform_2(%arg0: i32) -> (i32, i32) {
    %c0_i32 = arith.constant 0 : i32
    %c0_i32_0 = arith.constant 0 : i32
    %c0_i32_1 = arith.constant 0 : i32
    return %c0_i32, %c0_i32_0 : i32, i32
  }
  func.func @transform_3(%arg0: i32) -> (i32, i32) {
    %c0_i32 = arith.constant 0 : i32
    %c0_i32_0 = arith.constant 0 : i32
    %c0_i32_1 = arith.constant 0 : i32
    return %c0_i32, %c0_i32_0 : i32, i32
  }
  func.func @transform_4(%arg0: i32) -> (i32, i32) {
    %c0_i32 = arith.constant 0 : i32
    %c0_i32_0 = arith.constant 0 : i32
    %c0_i32_1 = arith.constant 0 : i32
    return %c0_i32, %c0_i32_0 : i32, i32
  }
  func.func @transform_5(%arg0: i32) -> (i32, i32, i32) {
    %c0_i32 = arith.constant 0 : i32
    %c0_i32_0 = arith.constant 0 : i32
    %c0_i32_1 = arith.constant 0 : i32
    return %arg0, %c0_i32, %c0_i32_0 : i32, i32, i32
  }
}

module attributes {stable_mosaic.version = 11 : i64} {
  func.func @kernel(%arg0: i32, %arg1: memref<1x144x4096xbf16, #tpu.memory_space<vmem>>, %arg2: memref<8x144xbf16, #tpu.memory_space<vmem>>, %arg3: memref<8x1xf32, #tpu.memory_space<vmem>>, %arg4: memref<8x1xf32, #tpu.memory_space<vmem>>, %arg5: memref<8x1xf32, #tpu.memory_space<vmem>>, %arg6: memref<1x8x4096xf32, #tpu.memory_space<vmem>>) attributes {dimension_semantics = [#tpu.dimension_semantics<parallel>], iteration_bounds = array<i64: 2>, scalar_prefetch = 0 : i64, scratch_operands = 0 : i64, tpu.core_type = #tpu.core_type<tc>, window_params = [{transform_indices = @transform_0, window_bounds = array<i64: 1, 144, 4096>}, {pipeline_mode = #tpu.pipeline_mode<synchronous>, transform_indices = @transform_1, window_bounds = array<i64: 8, 144>}, {pipeline_mode = #tpu.pipeline_mode<synchronous>, transform_indices = @transform_2, window_bounds = array<i64: 8, 1>}, {pipeline_mode = #tpu.pipeline_mode<synchronous>, transform_indices = @transform_3, window_bounds = array<i64: 8, 1>}, {pipeline_mode = #tpu.pipeline_mode<synchronous>, transform_indices = @transform_4, window_bounds = array<i64: 8, 1>}, {transform_indices = @transform_5, window_bounds = array<i64: 1, 8, 4096>}]} {
    %c0 = arith.constant 0 : index
    %c0_0 = arith.constant 0 : index
    %0 = vector.load %arg2[%c0, %c0_0] : memref<8x144xbf16, #tpu.memory_space<vmem>>, vector<8x144xbf16>
    %c0_1 = arith.constant 0 : index
    %c0_2 = arith.constant 0 : index
    %c0_3 = arith.constant 0 : index
    %1 = vector.load %arg1[%c0_1, %c0_2, %c0_3] : memref<1x144x4096xbf16, #tpu.memory_space<vmem>>, vector<1x144x4096xbf16>
    %2 = vector.shape_cast %1 : vector<1x144x4096xbf16> to vector<144x4096xbf16>
    %cst = arith.constant dense<0.000000e+00> : vector<8x4096xf32>
    %3 = tpu.matmul %0, %2, %cst {dimension_numbers = #tpu.dot_dimension_numbers<[1], [0], [0], [1], [0, 0, 1, 1], [], []>} : vector<8x144xbf16>, vector<144x4096xbf16>, vector<8x4096xf32> -> vector<8x4096xf32>
    %c0_4 = arith.constant 0 : index
    %c0_5 = arith.constant 0 : index
    %4 = vector.load %arg3[%c0_4, %c0_5] : memref<8x1xf32, #tpu.memory_space<vmem>>, vector<8x1xf32>
    %5 = vector.broadcast %4 : vector<8x1xf32> to vector<8x4096xf32>
    %6 = arith.addf %3, %5 : vector<8x4096xf32>
    %c0_6 = arith.constant 0 : index
    %c0_7 = arith.constant 0 : index
    %7 = vector.load %arg4[%c0_6, %c0_7] : memref<8x1xf32, #tpu.memory_space<vmem>>, vector<8x1xf32>
    %8 = vector.broadcast %7 : vector<8x1xf32> to vector<8x4096xf32>
    %9 = arith.mulf %6, %8 : vector<8x4096xf32>
    %c0_8 = arith.constant 0 : index
    %c0_9 = arith.constant 0 : index
    %10 = vector.load %arg5[%c0_8, %c0_9] : memref<8x1xf32, #tpu.memory_space<vmem>>, vector<8x1xf32>
    %11 = vector.broadcast %10 : vector<8x1xf32> to vector<8x4096xf32>
    %12 = arith.addf %9, %11 : vector<8x4096xf32>
    %cst_10 = arith.constant 0.000000e+00 : f32
    %13 = vector.broadcast %cst_10 : f32 to vector<8x4096xf32>
    %14 = arith.maximumf %12, %13 : vector<8x4096xf32>
    %c0_11 = arith.constant 0 : index
    %c0_12 = arith.constant 0 : index
    %c0_13 = arith.constant 0 : index
    %15 = vector.load %arg6[%c0_11, %c0_12, %c0_13] : memref<1x8x4096xf32, #tpu.memory_space<vmem>>, vector<1x8x4096xf32>
    %16 = vector.shape_cast %15 : vector<1x8x4096xf32> to vector<8x4096xf32>
    %17 = vector.shape_cast %14 : vector<8x4096xf32> to vector<1x8x4096xf32>
    tpu.vector_store %arg6[%c0_11, %c0_12, %c0_13], %17 {strides = array<i32>} : memref<1x8x4096xf32, #tpu.memory_space<vmem>>, vector<1x8x4096xf32>,
    return
  }
  func.func @transform_0(%arg0: i32) -> (i32, i32, i32) {
    %c0_i32 = arith.constant 0 : i32
    %c0_i32_0 = arith.constant 0 : i32
    %c0_i32_1 = arith.constant 0 : i32
    return %arg0, %c0_i32, %c0_i32_0 : i32, i32, i32
  }
  func.func @transform_1(%arg0: i32) -> (i32, i32) {
    %c0_i32 = arith.constant 0 : i32
    %c0_i32_0 = arith.constant 0 : i32
    %c0_i32_1 = arith.constant 0 : i32
    return %c0_i32, %c0_i32_0 : i32, i32
  }
  func.func @transform_2(%arg0: i32) -> (i32, i32) {
    %c0_i32 = arith.constant 0 : i32
    %c0_i32_0 = arith.constant 0 : i32
    %c0_i32_1 = arith.constant 0 : i32
    return %c0_i32, %c0_i32_0 : i32, i32
  }
  func.func @transform_3(%arg0: i32) -> (i32, i32) {
    %c0_i32 = arith.constant 0 : i32
    %c0_i32_0 = arith.constant 0 : i32
    %c0_i32_1 = arith.constant 0 : i32
    return %c0_i32, %c0_i32_0 : i32, i32
  }
  func.func @transform_4(%arg0: i32) -> (i32, i32) {
    %c0_i32 = arith.constant 0 : i32
    %c0_i32_0 = arith.constant 0 : i32
    %c0_i32_1 = arith.constant 0 : i32
    return %c0_i32, %c0_i32_0 : i32, i32
  }
  func.func @transform_5(%arg0: i32) -> (i32, i32, i32) {
    %c0_i32 = arith.constant 0 : i32
    %c0_i32_0 = arith.constant 0 : i32
    %c0_i32_1 = arith.constant 0 : i32
    return %arg0, %c0_i32, %c0_i32_0 : i32, i32, i32
  }
}

module attributes {stable_mosaic.version = 11 : i64} {
  func.func @kernel(%arg0: i32, %arg1: memref<1x392x3364xbf16, #tpu.memory_space<vmem>>, %arg2: memref<3x392xbf16, #tpu.memory_space<vmem>>, %arg3: memref<3x1xf32, #tpu.memory_space<vmem>>, %arg4: memref<1x3x3364xf32, #tpu.memory_space<vmem>>) attributes {dimension_semantics = [#tpu.dimension_semantics<parallel>], iteration_bounds = array<i64: 2>, scalar_prefetch = 0 : i64, scratch_operands = 0 : i64, tpu.core_type = #tpu.core_type<tc>, window_params = [{transform_indices = @transform_0, window_bounds = array<i64: 1, 392, 3364>}, {pipeline_mode = #tpu.pipeline_mode<synchronous>, transform_indices = @transform_1, window_bounds = array<i64: 3, 392>}, {pipeline_mode = #tpu.pipeline_mode<synchronous>, transform_indices = @transform_2, window_bounds = array<i64: 3, 1>}, {transform_indices = @transform_3, window_bounds = array<i64: 1, 3, 3364>}]} {
    %c0 = arith.constant 0 : index
    %c0_0 = arith.constant 0 : index
    %0 = vector.load %arg2[%c0, %c0_0] : memref<3x392xbf16, #tpu.memory_space<vmem>>, vector<3x392xbf16>
    %c0_1 = arith.constant 0 : index
    %c0_2 = arith.constant 0 : index
    %c0_3 = arith.constant 0 : index
    %1 = vector.load %arg1[%c0_1, %c0_2, %c0_3] : memref<1x392x3364xbf16, #tpu.memory_space<vmem>>, vector<1x392x3364xbf16>
    %2 = vector.shape_cast %1 : vector<1x392x3364xbf16> to vector<392x3364xbf16>
    %cst = arith.constant dense<0.000000e+00> : vector<3x3364xf32>
    %3 = tpu.matmul %0, %2, %cst {dimension_numbers = #tpu.dot_dimension_numbers<[1], [0], [0], [1], [0, 0, 1, 1], [], []>} : vector<3x392xbf16>, vector<392x3364xbf16>, vector<3x3364xf32> -> vector<3x3364xf32>
    %c0_4 = arith.constant 0 : index
    %c0_5 = arith.constant 0 : index
    %4 = vector.load %arg3[%c0_4, %c0_5] : memref<3x1xf32, #tpu.memory_space<vmem>>, vector<3x1xf32>
    %5 = vector.broadcast %4 : vector<3x1xf32> to vector<3x3364xf32>
    %6 = arith.addf %3, %5 : vector<3x3364xf32>
    %c0_6 = arith.constant 0 : index
    %c0_7 = arith.constant 0 : index
    %c0_8 = arith.constant 0 : index
    %7 = vector.load %arg4[%c0_6, %c0_7, %c0_8] : memref<1x3x3364xf32, #tpu.memory_space<vmem>>, vector<1x3x3364xf32>
    %8 = vector.shape_cast %7 : vector<1x3x3364xf32> to vector<3x3364xf32>
    %9 = vector.shape_cast %6 : vector<3x3364xf32> to vector<1x3x3364xf32>
    tpu.vector_store %arg4[%c0_6, %c0_7, %c0_8], %9 {strides = array<i32>} : memref<1x3x3364xf32, #tpu.memory_space<vmem>>, vector<1x3x3364xf32>,
    return
  }
  func.func @transform_0(%arg0: i32) -> (i32, i32, i32) {
    %c0_i32 = arith.constant 0 : i32
    %c0_i32_0 = arith.constant 0 : i32
    %c0_i32_1 = arith.constant 0 : i32
    return %arg0, %c0_i32, %c0_i32_0 : i32, i32, i32
  }
  func.func @transform_1(%arg0: i32) -> (i32, i32) {
    %c0_i32 = arith.constant 0 : i32
    %c0_i32_0 = arith.constant 0 : i32
    %c0_i32_1 = arith.constant 0 : i32
    return %c0_i32, %c0_i32_0 : i32, i32
  }
  func.func @transform_2(%arg0: i32) -> (i32, i32) {
    %c0_i32 = arith.constant 0 : i32
    %c0_i32_0 = arith.constant 0 : i32
    %c0_i32_1 = arith.constant 0 : i32
    return %c0_i32, %c0_i32_0 : i32, i32
  }
  func.func @transform_3(%arg0: i32) -> (i32, i32, i32) {
    %c0_i32 = arith.constant 0 : i32
    %c0_i32_0 = arith.constant 0 : i32
    %c0_i32_1 = arith.constant 0 : i32
    return %arg0, %c0_i32, %c0_i32_0 : i32, i32, i32
  }
}

</mosaic_0001>

<bundles_post_ra>
// kernel: _lambda_.12
= control target key start
LH: loop header
LB: loop body
LE: loop exit
PB: predicated region body
PF: predicated region fallthrough
CT: control target
= control target key end

     0   :  { %s338_s12 = smov 0   ;;  %s364_s0 = inlined_call_operand.vmem [shape: bf16[2,16,64], index: 0, kind: input, shape index: {}]   ;;  %s365_s1 = inlined_call_operand.vmem [shape: bf16[16,16], index: 1, kind: input, shape index: {}]   ;;  %s366_s2 = inlined_call_operand.vmem [shape: f32[16,1], index: 2, kind: input, shape index: {}]   ;;  %s367_s3 = inlined_call_operand.vmem [shape: f32[2,16,64], index: 3, kind: output, shape index: {}]  }
   0x1 LB: > { %s275_s13 = sadd.s32 4294967295, %s315_s12   ;;  %p279_p0 = scmp.ge.s32.totalorder %s315_s12, 1  ;;  %s315_s12 = sphi %s338_s12, %s13_s12  }
   0x2   : > { %p137_p1 = scmp.lt.s32.totalorder %s315_s12, 3 }
   0x4   : > { %p138_p2 = pnand %p279_p0, %p137_p1 }
   0x5   : > { %p161_p3 = scmp.lt.s32.totalorder (!%p138_p2), %s275_s13, 1 }
   0x6   : > { %141 = sbr.rel (%p138_p2) target bundleno = 155 (0x9b), region = 32 }
   0xb   : > { %v176_v0 = vld [vmem:[%s366_s2] sm:$0xff]  ;;  %v317_v1 = vmov 0   ;;  %s369_s13 = smov (!%p161_p3, %s275_s13), 1  ;;  %v177_v4 = vld [vmem:[%s366_s2 + $0x8] sm:$0xff]  ;;  %vm199_vm0 = vcmask 130048   ;;  %vm217_vm1 = vcmask 523264  }
   0xc   : > { %308 = vset.pattern.permute.xlu0 %v317_v1  ;;  %s295_s16 = sshll.u32 %s369_s13, 3  ;;  %v297_v3 = vld [vmem:[%s365_s1] sm:$0xff]  ;;  %s296_s24 = sshll.u32 %s369_s13, 4 }
   0xd   : > { %180 = vperm.xlu0 %308, %v176_v0   ;;  %s165_s19 = scalar_lea.vmem %s364_s0, %s295_s16  ;;  %s170_s27 = scalar_lea.vmem %s367_s3, %s296_s24 }
   0xe   : > { %v298_v2 = vld [vmem:[%s165_s19] sm:$0xff] }
   0xf   : > { %210 = vmatpush.bf16.msra.mxu0 %v298_v2 }
  0x12   : > { %292 = vmatmul.msk.bf16.vlgmr.msra.gmra.mxu0 %vm199_vm0, %v297_v3 }
  0x15   : > { %185 = vperm.xlu0 %308, %v177_v4  }
  0x7f   : > { %v181_v5 = vpop.permute.xlu0 %180 }
  0x87   : > { %v186_v8 = vpop.permute.xlu0 %185 }
  0x8f   : > { %v212_v6 = vpop.f32.mrf.mxu0 }
  0x90   : > { %v213_v7 = vadd.f32 %v212_v6, %v181_v5 }
  0x92   : > { %218 = vst.msk [vmem:[%s170_s27] sm:$0xff] %vm217_vm1, %v213_v7 }
  0x97   : > { %v214_v9 = vpop.f32.mrf.mxu0 }
  0x98   : > { %v215_v10 = vadd.f32 %v214_v9, %v186_v8 }
  0x9a   : > { %219 = vst.msk [vmem:[%s170_s27 + $0x8] sm:$0xff] %vm217_vm1, %v215_v10 }
  0x9b PF: > { %s13_s12 = sadd.s32 1, %s315_s12  }
  0x9c   : > { %p10_p4 = scmp.ge.s32.totalorder %s13_s12, 4  }
  0x9e   :  { %12 = sbr.rel (!%p10_p4) target bundleno = 1 (0x1), region = 62 }

// kernel: _lambda_.11
= control target key start
LH: loop header
LB: loop body
LE: loop exit
PB: predicated region body
PF: predicated region fallthrough
CT: control target
= control target key end

     0   :  { %s704_s18 = smov 0   ;;  %s781_s0 = inlined_call_operand.vmem [shape: bf16[2,288,64], index: 0, kind: input, shape index: {}]   ;;  %s782_s1 = inlined_call_operand.vmem [shape: bf16[16,288], index: 1, kind: input, shape index: {}]   ;;  %s783_s2 = inlined_call_operand.vmem [shape: f32[16,1], index: 2, kind: input, shape index: {}]   ;;  %s784_s3 = inlined_call_operand.vmem [shape: f32[16,1], index: 3, kind: input, shape index: {}]   ;;  %s785_s4 = inlined_call_operand.vmem [shape: f32[16,1], index: 4, kind: input, shape index: {}]   ;;  %s786_s5 = inlined_call_operand.vmem [shape: f32[2,16,64], index: 5, kind: output, shape index: {}]  }
   0x1 LB: > { %s535_s19 = sadd.s32 4294967295, %s671_s18   ;;  %p539_p0 = scmp.ge.s32.totalorder %s671_s18, 1  ;;  %s671_s18 = sphi %s704_s18, %s15_s18  }
   0x2   : > { %p187_p1 = scmp.lt.s32.totalorder %s671_s18, 3 }
   0x4   : > { %p188_p2 = pnand %p539_p0, %p187_p1 }
   0x5   : > { %p215_p3 = scmp.lt.s32.totalorder (!%p188_p2), %s535_s19, 1 }
   0x6   : > { %191 = sbr.rel (%p188_p2) target bundleno = 194 (0xc2), region = 40 }
   0xb   : > { %s788_s19 = smov (!%p215_p3, %s535_s19), 1  ;;  %v673_v5 = vmov 0   ;;  %v553_v7 = vld [vmem:[%s782_s1 + $0x8] sm:$0xf]  ;;  %v633_v8 = vld [vmem:[%s782_s1 + $0x10] sm:$0xf0] }
   0xc   : > { %s652_s20 = smul.u32 144, %s788_s19  ;;  %662 = vset.pattern.permute.xlu0 %v673_v5  ;;  %663 = vset.pattern.permute.xlu1 %v673_v5  ;;  %v266_v11 = vld [vmem:[%s783_s2] sm:$0xff]  ;;  %v554_v13 = vor.u32 %v633_v8, %v553_v7  ;;  %vm401_vm0 = vcmask 261120   ;;  %v267_v17 = vld [vmem:[%s783_s2 + $0x8] sm:$0xff]  ;;  %v547_v31 = vld [vmem:[%s782_s1 + $0xc] sm:$0xf0] }
   0xd   : > { %664 = vset.pattern.permute.xlu2 %v673_v5  ;;  %v447_v12 = vld [vmem:[%s784_s3] sm:$0xff]  ;;  %270 = vperm.xlu0 %662, %v266_v11   ;;  %v448_v18 = vld [vmem:[%s784_s3 + $0x8] sm:$0xff]  ;;  %vm477_vm1 = vcmask 523264  }
   0xe   : > { %s718_s23 = scalar_lea.vmem %s781_s0, %s652_s20  ;;  %451 = vperm.xlu1 %663, %v447_v12   ;;  %v461_v14 = vld [vmem:[%s785_s4] sm:$0xff]  ;;  %v462_v19 = vld [vmem:[%s785_s4 + $0x8] sm:$0xff] }
   0xf   : > { %v641_v0 = vld [vmem:[%s718_s23 + $0x38] sm:$0xff]  ;;  %v640_v2 = vld [vmem:[%s718_s23 + $0x30] sm:$0xff]  ;;  %v651_v4 = vld [vmem:[%s718_s23 + $0x88] sm:$0xff]  ;;  %465 = vperm.xlu2 %664, %v461_v14  }
  0x10   : > { %v649_v1 = vld [vmem:[%s718_s23 + $0x78] sm:$0xff]  ;;  %405 = vmatpush.bf16.msra.mxu0 %v641_v0  ;;  %v648_v3 = vld [vmem:[%s718_s23 + $0x70] sm:$0xff]  ;;  %439 = vmatpush.bf16.msra.mxu2 %v651_v4  ;;  %v650_v6 = vld [vmem:[%s718_s23 + $0x80] sm:$0xff] }
  0x11   : > { %419 = vmatpush.bf16.msra.mxu1 %v649_v1  ;;  %v639_v9 = vld [vmem:[%s718_s23 + $0x28] sm:$0xff]  ;;  %v638_v15 = vld [vmem:[%s718_s23 + $0x20] sm:$0xff]  ;;  %v637_v20 = vld [vmem:[%s718_s23 + $0x18] sm:$0xff] }
  0x12   : > { %v647_v10 = vld [vmem:[%s718_s23 + $0x68] sm:$0xff]  ;;  %v646_v16 = vld [vmem:[%s718_s23 + $0x60] sm:$0xff]  ;;  %v645_v21 = vld [vmem:[%s718_s23 + $0x58] sm:$0xff] }
  0x13   : > { %v636_v22 = vld [vmem:[%s718_s23 + $0x10] sm:$0xff]  ;;  %v635_v24 = vld [vmem:[%s718_s23 + $0x8] sm:$0xff]  ;;  %v545_v26 = vld [vmem:[%s782_s1] sm:$0xf] }
  0x14   : > { %406 = vmatpush.bf16.msra.mxu0 %v640_v2  ;;  %440 = vmatpush.bf16.msra.mxu2 %v650_v6  ;;  %v644_v23 = vld [vmem:[%s718_s23 + $0x50] sm:$0xff]  ;;  %v643_v25 = vld [vmem:[%s718_s23 + $0x48] sm:$0xff]  ;;  %v631_v28 = vld [vmem:[%s782_s1 + $0x4] sm:$0xf] }
  0x15   : > { %420 = vmatpush.bf16.msra.mxu1 %v648_v3  ;;  %275 = vperm.xlu0 %662, %v267_v17   ;;  %v632_v27 = vld [vmem:[%s782_s1 + $0x8] sm:$0xf0]  ;;  %v634_v29 = vld [vmem:[%s718_s23] sm:$0xff]  ;;  %v550_v33 = vor.u32 %v631_v28, %v547_v31 }
  0x16   : > { %456 = vperm.xlu1 %663, %v448_v18   ;;  %v642_v30 = vld [vmem:[%s718_s23 + $0x40] sm:$0xff]  ;;  %v546_v32 = vor.u32 %v632_v27, %v545_v26  ;;  %s630_s23 = sshll.u32 %s788_s19, 4 }
  0x17   : > { %627 = vmatmul.msk.bf16.vlgmr.msra.gmra.mxu2 %vm401_vm0, %v554_v13  ;;  %470 = vperm.xlu2 %664, %v462_v19   ;;  %s224_s28 = scalar_lea.vmem %s786_s5, %s630_s23 }
  0x18   : > { %407 = vmatpush.bf16.msra.mxu0 %v639_v9 }
  0x19   : > { %421 = vmatpush.bf16.msra.mxu1 %v647_v10 }
  0x1c   : > { %408 = vmatpush.bf16.msra.mxu0 %v638_v15 }
  0x1d   : > { %422 = vmatpush.bf16.msra.mxu1 %v646_v16 }
  0x20   : > { %409 = vmatpush.bf16.msra.mxu0 %v637_v20 }
  0x21   : > { %423 = vmatpush.bf16.msra.mxu1 %v645_v21 }
  0x24   : > { %410 = vmatpush.bf16.msra.mxu0 %v636_v22 }
  0x25   : > { %424 = vmatpush.bf16.msra.mxu1 %v644_v23 }
  0x28   : > { %411 = vmatpush.bf16.msra.mxu0 %v635_v24 }
  0x29   : > { %425 = vmatpush.bf16.msra.mxu1 %v643_v25 }
  0x2c   : > { %412 = vmatpush.bf16.msra.mxu0 %v634_v29 }
  0x2d   : > { %426 = vmatpush.bf16.msra.mxu1 %v642_v30 }
  0x2f   : > { %413 = vmatmul.bf16.vlgmr.msra.gmra.mxu0 %v546_v32 }
  0x30   : > { %427 = vmatmul.bf16.vlgmr.msra.gmra.mxu1 %v550_v33 }
  0x69   : > { %v466_v42 = vpop.permute.xlu2 %465 }
  0x71   : > { %v471_v55 = vpop.permute.xlu2 %470 }
  0x7f   : > { %v271_v34 = vpop.permute.xlu0 %270 }
  0x80   : > { %v452_v40 = vpop.permute.xlu1 %451 }
  0x87   : > { %v276_v44 = vpop.permute.xlu0 %275 }
  0x88   : > { %v457_v53 = vpop.permute.xlu1 %456 }
  0x9a   : > { %v442_v38 = vpop.f32.mrf.mxu2 }
  0xa2   : > { %v444_v51 = vpop.f32.mrf.mxu2 }
  0xac   : > { %v414_v35 = vpop.f32.mrf.mxu0 }
  0xad   : > { %v428_v36 = vpop.f32.mrf.mxu1  ;;  %v415_v37 = vadd.f32 %v414_v35, %v271_v34 }
  0xaf   : > { %v429_v39 = vadd.f32 %v428_v36, %v415_v37 }
  0xb1   : > { %v443_v41 = vadd.f32 %v442_v38, %v429_v39 }
  0xb3   : > { %v459_v43 = vmul.f32 %v452_v40, %v443_v41 }
  0xb4   : > { %v416_v45 = vpop.f32.mrf.mxu0 }
  0xb5   : > { %v473_v46 = vadd.f32 %v466_v42, %v459_v43  ;;  %v417_v47 = vadd.f32 %v416_v45, %v276_v44  ;;  %v430_v48 = vpop.f32.mrf.mxu1 }
  0xb7   : > { %v475_v49 = vmax.f32 %v473_v46, 0.0  ;;  %v431_v50 = vadd.f32 %v430_v48, %v417_v47 }
  0xb9   : > { %478 = vst.msk [vmem:[%s224_s28] sm:$0xff] %vm477_vm1, %v475_v49  ;;  %v445_v52 = vadd.f32 %v444_v51, %v431_v50 }
  0xbb   : > { %v460_v54 = vmul.f32 %v457_v53, %v445_v52 }
  0xbd   : > { %v474_v56 = vadd.f32 %v471_v55, %v460_v54 }
  0xbf   : > { %v476_v57 = vmax.f32 %v474_v56, 0.0 }
  0xc1   : > { %479 = vst.msk [vmem:[%s224_s28 + $0x8] sm:$0xff] %vm477_vm1, %v476_v57 }
  0xc2 PF: > { %s15_s18 = sadd.s32 1, %s671_s18  }
  0xc3   : > { %p12_p4 = scmp.ge.s32.totalorder %s15_s18, 4  }
  0xc5   :  { %14 = sbr.rel (!%p12_p4) target bundleno = 1 (0x1), region = 70 }

// kernel: _lambda_.13
= control target key start
LH: loop header
LB: loop body
LE: loop exit
PB: predicated region body
PF: predicated region fallthrough
CT: control target
= control target key end

     0   :  { %s323_s12 = smov 0   ;;  %s352_s0 = inlined_call_operand.vmem [shape: f32[2,16,256], index: 0, kind: input, shape index: {}]   ;;  %s353_s1 = inlined_call_operand.vmem [shape: f32[16,1], index: 1, kind: input, shape index: {}]   ;;  %s354_s2 = inlined_call_operand.vmem [shape: f32[16,1], index: 2, kind: input, shape index: {}]   ;;  %s355_s3 = inlined_call_operand.vmem [shape: f32[2,16,256], index: 3, kind: output, shape index: {}]  }
   0x1 LB: > { %s270_s13 = sadd.s32 4294967295, %s300_s12   ;;  %p274_p0 = scmp.ge.s32.totalorder %s300_s12, 1  ;;  %s300_s12 = sphi %s323_s12, %s13_s12  }
   0x2   : > { %p137_p1 = scmp.lt.s32.totalorder %s300_s12, 3 }
   0x4   : > { %p138_p2 = pnand %p274_p0, %p137_p1 }
   0x5   : > { %p161_p3 = scmp.lt.s32.totalorder (!%p138_p2), %s270_s13, 1 }
   0x6   : > { %141 = sbr.rel (%p138_p2) target bundleno = 144 (0x90), region = 32 }
   0xb   : > { %v191_v0 = vld [vmem:[%s354_s2] sm:$0xff]  ;;  %v302_v2 = vmov 0   ;;  %v192_v3 = vld [vmem:[%s354_s2 + $0x8] sm:$0xff]  ;;  %s357_s13 = smov (!%p161_p3, %s270_s13), 1 }
   0xc   : > { %v175_v1 = vld [vmem:[%s353_s1] sm:$0xff]  ;;  %293 = vset.pattern.permute.xlu1 %v302_v2  ;;  %292 = vset.pattern.permute.xlu0 %v302_v2  ;;  %v176_v4 = vld [vmem:[%s353_s1 + $0x8] sm:$0xff]  ;;  %s281_s22 = sshll.u32 %s357_s13, 5 }
   0xd   : > { %195 = vperm.xlu1 %293, %v191_v0   ;;  %179 = vperm.xlu0 %292, %v175_v1   ;;  %s165_s25 = scalar_lea.vmem %s352_s0, %s281_s22  ;;  %s170_s28 = scalar_lea.vmem %s355_s3, %s281_s22 }
   0xe   : > { %v171_v5 = vld [vmem:[%s165_s25] sm:$0xff]  ;;  %v172_v6 = vld [vmem:[%s165_s25 + $0x8] sm:$0xff]  ;;  %v173_v15 = vld [vmem:[%s165_s25 + $0x10] sm:$0xff] }
   0xf   : > { %v174_v16 = vld [vmem:[%s165_s25 + $0x18] sm:$0xff] }
  0x15   : > { %200 = vperm.xlu1 %293, %v192_v3   ;;  %184 = vperm.xlu0 %292, %v176_v4  }
  0x7f   : > { %v196_v7 = vpop.permute.xlu1 %195  ;;  %v180_v8 = vpop.permute.xlu0 %179 }
  0x80   : > { %v187_v9 = vmul.f32 %v180_v8, %v171_v5  ;;  %v188_v10 = vmul.f32 %v180_v8, %v172_v6 }
  0x82   : > { %v203_v11 = vadd.f32 %v196_v7, %v187_v9  ;;  %v204_v12 = vadd.f32 %v196_v7, %v188_v10 }
  0x84   : > { %v207_v13 = vmax.f32 %v203_v11, 0.0  ;;  %v208_v14 = vmax.f32 %v204_v12, 0.0 }
  0x86   : > { %211 = vst [vmem:[%s170_s28] sm:$0xff] %v207_v13 }
  0x87   : > { %212 = vst [vmem:[%s170_s28 + $0x8] sm:$0xff] %v208_v14  ;;  %v185_v17 = vpop.permute.xlu0 %184  ;;  %v201_v20 = vpop.permute.xlu1 %200 }
  0x88   : > { %v189_v18 = vmul.f32 %v185_v17, %v173_v15  ;;  %v190_v19 = vmul.f32 %v185_v17, %v174_v16 }
  0x8a   : > { %v205_v21 = vadd.f32 %v201_v20, %v189_v18  ;;  %v206_v22 = vadd.f32 %v201_v20, %v190_v19 }
  0x8c   : > { %v209_v23 = vmax.f32 %v205_v21, 0.0  ;;  %v210_v24 = vmax.f32 %v206_v22, 0.0 }
  0x8e   : > { %213 = vst [vmem:[%s170_s28 + $0x10] sm:$0xff] %v209_v23 }
  0x8f   : > { %214 = vst [vmem:[%s170_s28 + $0x18] sm:$0xff] %v210_v24 }
  0x90 PF: > { %s13_s12 = sadd.s32 1, %s300_s12  }
  0x91   : > { %p10_p4 = scmp.ge.s32.totalorder %s13_s12, 4  }
  0x93   :  { %12 = sbr.rel (!%p10_p4) target bundleno = 1 (0x1), region = 62 }

// kernel: _lambda_.14
= control target key start
LH: loop header
LB: loop body
LE: loop exit
PB: predicated region body
PF: predicated region fallthrough
CT: control target
= control target key end

     0   :  { %s677_s18 = smov 0   ;;  %s768_s0 = inlined_call_operand.vmem [shape: bf16[2,144,256], index: 0, kind: input, shape index: {}]   ;;  %s769_s1 = inlined_call_operand.vmem [shape: bf16[16,144], index: 1, kind: input, shape index: {}]   ;;  %s770_s2 = inlined_call_operand.vmem [shape: f32[16,1], index: 2, kind: input, shape index: {}]   ;;  %s771_s3 = inlined_call_operand.vmem [shape: f32[16,1], index: 3, kind: input, shape index: {}]   ;;  %s772_s4 = inlined_call_operand.vmem [shape: f32[16,1], index: 4, kind: input, shape index: {}]   ;;  %s773_s5 = inlined_call_operand.vmem [shape: f32[2,16,256], index: 5, kind: output, shape index: {}]  }
   0x1 LB: > { %s512_s19 = sadd.s32 4294967295, %s644_s18   ;;  %p516_p0 = scmp.ge.s32.totalorder %s644_s18, 1  ;;  %s644_s18 = sphi %s677_s18, %s15_s18  }
   0x2   : > { %p187_p1 = scmp.lt.s32.totalorder %s644_s18, 3 }
   0x4   : > { %p188_p2 = pnand %p516_p0, %p187_p1 }
   0x5   : > { %p215_p3 = scmp.lt.s32.totalorder (!%p188_p2), %s512_s19, 1 }
   0x6   : > { %191 = sbr.rel (%p188_p2) target bundleno = 201 (0xc9), region = 40 }
   0xb   : > { %s775_s19 = smov (!%p215_p3, %s512_s19), 1  ;;  %v605_v18 = vld [vmem:[%s769_s1 + $0x4] sm:$0xf]  ;;  %v524_v19 = vld [vmem:[%s769_s1 + $0x8] sm:$0xf0]  ;;  %vm357_vm0 = vcmask 130048  }
   0xc   : > { %s625_s20 = smul.u32 144, %s775_s19  ;;  %v527_v27 = vor.u32 %v605_v18, %v524_v19  ;;  %v246_v35 = vld [vmem:[%s770_s2] sm:$0xff]  ;;  %v646_v38 = vmov 0   ;;  %v247_v51 = vld [vmem:[%s770_s2 + $0x8] sm:$0xff]  ;;  %s604_s21 = sshll.u32 %s775_s19, 5 }
   0xd   : > { %635 = vset.pattern.permute.xlu0 %v646_v38  ;;  %636 = vset.pattern.permute.xlu1 %v646_v38  ;;  %v417_v39 = vld [vmem:[%s771_s3] sm:$0xff]  ;;  %v418_v54 = vld [vmem:[%s771_s3 + $0x8] sm:$0xff]  ;;  %s224_s24 = scalar_lea.vmem %s773_s5, %s604_s21 }
   0xe   : > { %s691_s23 = scalar_lea.vmem %s768_s0, %s625_s20  ;;  %250 = vperm.xlu0 %635, %v246_v35   ;;  %v433_v41 = vld [vmem:[%s772_s4] sm:$0xff]  ;;  %421 = vperm.xlu1 %636, %v417_v39   ;;  %v434_v56 = vld [vmem:[%s772_s4 + $0x8] sm:$0xff] }
   0xf   : > { %v586_v0 = vld [vmem:[%s691_s23 + $0x70] sm:$0xf]  ;;  %v622_v1 = vld [vmem:[%s691_s23 + $0x74] sm:$0xf0]  ;;  %v621_v2 = vld [vmem:[%s691_s23 + $0x74] sm:$0xf]  ;;  %637 = vset.pattern.permute.xlu2 %v646_v38 }
  0x10   : > { %v587_v3 = vor.u32 %v622_v1, %v586_v0  ;;  %v588_v4 = vld [vmem:[%s691_s23 + $0x78] sm:$0xf0]  ;;  %v578_v5 = vld [vmem:[%s691_s23 + $0x60] sm:$0xf]  ;;  %v620_v6 = vld [vmem:[%s691_s23 + $0x64] sm:$0xf0]  ;;  %437 = vperm.xlu2 %637, %v433_v41  }
  0x11   : > { %v591_v7 = vor.u32 %v621_v2, %v588_v4  ;;  %v619_v8 = vld [vmem:[%s691_s23 + $0x64] sm:$0xf]  ;;  %v580_v9 = vld [vmem:[%s691_s23 + $0x68] sm:$0xf0]  ;;  %v579_v10 = vor.u32 %v620_v6, %v578_v5  ;;  %v570_v12 = vld [vmem:[%s691_s23 + $0x50] sm:$0xf] }
  0x12   : > { %361 = vmatpush.bf16.msra.mxu0 %v587_v3  ;;  %v583_v11 = vor.u32 %v619_v8, %v580_v9  ;;  %v618_v13 = vld [vmem:[%s691_s23 + $0x54] sm:$0xf0]  ;;  %v617_v14 = vld [vmem:[%s691_s23 + $0x54] sm:$0xf]  ;;  %v572_v15 = vld [vmem:[%s691_s23 + $0x58] sm:$0xf0] }
  0x13   : > { %389 = vmatpush.bf16.msra.mxu2 %v591_v7  ;;  %v571_v16 = vor.u32 %v618_v13, %v570_v12  ;;  %v562_v17 = vld [vmem:[%s691_s23 + $0x40] sm:$0xf]  ;;  %v575_v20 = vor.u32 %v617_v14, %v572_v15  ;;  %v616_v21 = vld [vmem:[%s691_s23 + $0x44] sm:$0xf0]  ;;  %v623_v22 = vld [vmem:[%s691_s23 + $0x84] sm:$0xf] }
  0x14   : > { %v596_v23 = vld [vmem:[%s691_s23 + $0x88] sm:$0xf0]  ;;  %v615_v24 = vld [vmem:[%s691_s23 + $0x44] sm:$0xf]  ;;  %v594_v28 = vld [vmem:[%s691_s23 + $0x80] sm:$0xf]  ;;  %v563_v29 = vor.u32 %v616_v21, %v562_v17 }
  0x15   : > { %v564_v25 = vld [vmem:[%s691_s23 + $0x48] sm:$0xf0]  ;;  %v599_v26 = vor.u32 %v623_v22, %v596_v23  ;;  %v624_v30 = vld [vmem:[%s691_s23 + $0x84] sm:$0xf0]  ;;  %v554_v32 = vld [vmem:[%s691_s23 + $0x30] sm:$0xf] }
  0x16   : > { %362 = vmatpush.bf16.msra.mxu0 %v579_v10  ;;  %v567_v31 = vor.u32 %v615_v24, %v564_v25  ;;  %v614_v33 = vld [vmem:[%s691_s23 + $0x34] sm:$0xf0]  ;;  %v595_v34 = vor.u32 %v624_v30, %v594_v28  ;;  %v613_v36 = vld [vmem:[%s691_s23 + $0x34] sm:$0xf]  ;;  %v556_v37 = vld [vmem:[%s691_s23 + $0x38] sm:$0xf0]  ;;  %255 = vperm.xlu0 %635, %v247_v51  }
  0x17   : > { %390 = vmatpush.bf16.msra.mxu2 %v583_v11  ;;  %410 = vmatpush.bf16.msra.mxu3 %v599_v26  ;;  %v555_v40 = vor.u32 %v614_v33, %v554_v32  ;;  %v559_v42 = vor.u32 %v613_v36, %v556_v37  ;;  %v546_v43 = vld [vmem:[%s691_s23 + $0x20] sm:$0xf]  ;;  %v612_v44 = vld [vmem:[%s691_s23 + $0x24] sm:$0xf0]  ;;  %v611_v45 = vld [vmem:[%s691_s23 + $0x24] sm:$0xf] }
  0x18   : > { %382 = vmatpush.bf16.msra.mxu1 %v595_v34  ;;  %v548_v46 = vld [vmem:[%s691_s23 + $0x28] sm:$0xf0]  ;;  %v547_v47 = vor.u32 %v612_v44, %v546_v43  ;;  %v538_v49 = vld [vmem:[%s691_s23 + $0x10] sm:$0xf]  ;;  %v610_v50 = vld [vmem:[%s691_s23 + $0x14] sm:$0xf0]  ;;  %426 = vperm.xlu1 %636, %v418_v54  }
  0x19   : > { %v551_v48 = vor.u32 %v611_v45, %v548_v46  ;;  %v609_v52 = vld [vmem:[%s691_s23 + $0x14] sm:$0xf]  ;;  %v540_v53 = vld [vmem:[%s691_s23 + $0x18] sm:$0xf0]  ;;  %v539_v55 = vor.u32 %v610_v50, %v538_v49  ;;  %v530_v58 = vld [vmem:[%s691_s23] sm:$0xf]  ;;  %442 = vperm.xlu2 %637, %v434_v56  }
  0x1a   : > { %363 = vmatpush.bf16.msra.mxu0 %v571_v16  ;;  %601 = vmatmul.msk.bf16.vlgmr.msra.gmra.mxu3 %vm357_vm0, %v527_v27  ;;  %v543_v57 = vor.u32 %v609_v52, %v540_v53  ;;  %v608_v59 = vld [vmem:[%s691_s23 + $0x4] sm:$0xf0]  ;;  %v607_v60 = vld [vmem:[%s691_s23 + $0x4] sm:$0xf]  ;;  %v532_v61 = vld [vmem:[%s691_s23 + $0x8] sm:$0xf0] }
  0x1b   : > { %391 = vmatpush.bf16.msra.mxu2 %v575_v20  ;;  %600 = vmatmul.msk.bf16.vlgmr.msra.gmra.mxu1 %vm357_vm0, %v527_v27  ;;  %v531_v62 = vor.u32 %v608_v59, %v530_v58  ;;  %v522_v63 = vld [vmem:[%s769_s1] sm:$0xf]  ;;  %v606_v0 = vld [vmem:[%s769_s1 + $0x4] sm:$0xf0]  ;;  %v535_v1 = vor.u32 %v607_v60, %v532_v61 }
  0x1c   : > { %v523_v2 = vor.u32 %v606_v0, %v522_v63 }
  0x1e   : > { %364 = vmatpush.bf16.msra.mxu0 %v563_v29 }
  0x1f   : > { %392 = vmatpush.bf16.msra.mxu2 %v567_v31 }
  0x22   : > { %365 = vmatpush.bf16.msra.mxu0 %v555_v40 }
  0x23   : > { %393 = vmatpush.bf16.msra.mxu2 %v559_v42 }
  0x26   : > { %366 = vmatpush.bf16.msra.mxu0 %v547_v47 }
  0x27   : > { %394 = vmatpush.bf16.msra.mxu2 %v551_v48 }
  0x2a   : > { %367 = vmatpush.bf16.msra.mxu0 %v539_v55 }
  0x2b   : > { %395 = vmatpush.bf16.msra.mxu2 %v543_v57 }
  0x2e   : > { %368 = vmatpush.bf16.msra.mxu0 %v531_v62 }
  0x2f   : > { %396 = vmatpush.bf16.msra.mxu2 %v535_v1 }
  0x31   : > { %369 = vmatmul.bf16.vlgmr.msra.gmra.mxu0 %v523_v2 }
  0x32   : > { %397 = vmatmul.bf16.vlgmr.msra.gmra.mxu2 %v523_v2 }
  0x6a   : > { %v438_v9 = vpop.permute.xlu2 %437 }
  0x73   : > { %v443_v26 = vpop.permute.xlu2 %442 }
  0x80   : > { %v251_v3 = vpop.permute.xlu0 %250  ;;  %v422_v7 = vpop.permute.xlu1 %421 }
  0x88   : > { %v256_v14 = vpop.permute.xlu0 %255 }
  0x8a   : > { %v427_v23 = vpop.permute.xlu1 %426 }
  0x98   : > { %v384_v5 = vpop.f32.mrf.mxu1 }
  0x9d   : > { %v412_v11 = vpop.f32.mrf.mxu3 }
  0xa0   : > { %v386_v20 = vpop.f32.mrf.mxu1 }
  0xa5   : > { %v414_v31 = vpop.f32.mrf.mxu3 }
  0xae   : > { %v370_v4 = vpop.f32.mrf.mxu0 }
  0xaf   : > { %v371_v6 = vadd.f32 %v370_v4, %v251_v3 }
  0xb1   : > { %v385_v8 = vadd.f32 %v384_v5, %v371_v6 }
  0xb3   : > { %v429_v10 = vmul.f32 %v422_v7, %v385_v8 }
  0xb5   : > { %v445_v12 = vadd.f32 %v438_v9, %v429_v10  ;;  %v398_v13 = vpop.f32.mrf.mxu2 }
  0xb6   : > { %v399_v15 = vadd.f32 %v398_v13, %v251_v3  ;;  %v372_v16 = vpop.f32.mrf.mxu0 }
  0xb7   : > { %v449_v17 = vmax.f32 %v445_v12, 0.0  ;;  %v373_v18 = vadd.f32 %v372_v16, %v256_v14 }
  0xb8   : > { %v413_v19 = vadd.f32 %v412_v11, %v399_v15 }
  0xb9   : > { %453 = vst [vmem:[%s224_s24] sm:$0xff] %v449_v17  ;;  %v387_v21 = vadd.f32 %v386_v20, %v373_v18 }
  0xba   : > { %v430_v22 = vmul.f32 %v422_v7, %v413_v19 }
  0xbb   : > { %v431_v24 = vmul.f32 %v427_v23, %v387_v21 }
  0xbc   : > { %v446_v25 = vadd.f32 %v438_v9, %v430_v22 }
  0xbd   : > { %v447_v27 = vadd.f32 %v443_v26, %v431_v24  ;;  %v400_v28 = vpop.f32.mrf.mxu2 }
  0xbe   : > { %v450_v29 = vmax.f32 %v446_v25, 0.0  ;;  %v401_v30 = vadd.f32 %v400_v28, %v256_v14 }
  0xbf   : > { %v451_v32 = vmax.f32 %v447_v27, 0.0 }
  0xc0   : > { %454 = vst [vmem:[%s224_s24 + $0x8] sm:$0xff] %v450_v29  ;;  %v415_v33 = vadd.f32 %v414_v31, %v401_v30 }
  0xc1   : > { %455 = vst [vmem:[%s224_s24 + $0x10] sm:$0xff] %v451_v32 }
  0xc2   : > { %v432_v34 = vmul.f32 %v427_v23, %v415_v33 }
  0xc4   : > { %v448_v35 = vadd.f32 %v443_v26, %v432_v34 }
  0xc6   : > { %v452_v36 = vmax.f32 %v448_v35, 0.0 }
  0xc8   : > { %456 = vst [vmem:[%s224_s24 + $0x18] sm:$0xff] %v452_v36 }
  0xc9 PF: > { %s15_s18 = sadd.s32 1, %s644_s18  }
  0xca   : > { %p12_p4 = scmp.ge.s32.totalorder %s15_s18, 4  }
  0xcc   :  { %14 = sbr.rel (!%p12_p4) target bundleno = 1 (0x1), region = 70 }

// kernel: _lambda_.15
= control target key start
LH: loop header
LB: loop body
LE: loop exit
PB: predicated region body
PF: predicated region fallthrough
CT: control target
= control target key end

     0   :  { %s650_s15 = smov 0   ;;  %s732_s0 = inlined_call_operand.vmem [shape: bf16[2,144,256], index: 0, kind: input, shape index: {}]   ;;  %s733_s1 = inlined_call_operand.vmem [shape: bf16[16,144], index: 1, kind: input, shape index: {}]   ;;  %s734_s2 = inlined_call_operand.vmem [shape: f32[16,1], index: 2, kind: input, shape index: {}]   ;;  %s735_s3 = inlined_call_operand.vmem [shape: f32[2,16,256], index: 3, kind: input, shape index: {}]   ;;  %s736_s4 = inlined_call_operand.vmem [shape: f32[2,16,256], index: 4, kind: output, shape index: {}]  }
   0x1 LB: > { %s489_s16 = sadd.s32 4294967295, %s622_s15   ;;  %p493_p0 = scmp.ge.s32.totalorder %s622_s15, 1  ;;  %s622_s15 = sphi %s650_s15, %s14_s15  }
   0x2   : > { %p172_p1 = scmp.lt.s32.totalorder %s622_s15, 3 }
   0x4   : > { %p173_p2 = pnand %p493_p0, %p172_p1 }
   0x5   : > { %p203_p3 = scmp.lt.s32.totalorder (!%p173_p2), %s489_s16, 1 }
   0x6   : > { %176 = sbr.rel (%p173_p2) target bundleno = 197 (0xc5), region = 36 }
   0xb   : > { %s738_s16 = smov (!%p203_p3, %s489_s16), 1  ;;  %v585_v18 = vld [vmem:[%s733_s1 + $0x4] sm:$0xf]  ;;  %v503_v19 = vld [vmem:[%s733_s1 + $0x8] sm:$0xf0]  ;;  %vm350_vm0 = vcmask 130048  }
   0xc   : > { %s605_s17 = smul.u32 144, %s738_s16  ;;  %v506_v27 = vor.u32 %v585_v18, %v503_v19  ;;  %v239_v35 = vld [vmem:[%s734_s2] sm:$0xff]  ;;  %v624_v38 = vmov 0   ;;  %v240_v49 = vld [vmem:[%s734_s2 + $0x8] sm:$0xff]  ;;  %s583_s7 = sshll.u32 %s738_s16, 5 }
   0xd   : > { %615 = vset.pattern.permute.xlu0 %v624_v38  ;;  %v501_v59 = vld [vmem:[%s733_s1] sm:$0xf]  ;;  %v586_v60 = vld [vmem:[%s733_s1 + $0x4] sm:$0xf0]  ;;  %s212_s10 = scalar_lea.vmem %s735_s3, %s583_s7  ;;  %s217_s13 = scalar_lea.vmem %s736_s4, %s583_s7 }
   0xe   : > { %s664_s20 = scalar_lea.vmem %s732_s0, %s605_s17  ;;  %243 = vperm.xlu0 %615, %v239_v35   ;;  %v502_v62 = vor.u32 %v586_v60, %v501_v59 }
   0xf   : > { %v565_v0 = vld [vmem:[%s664_s20 + $0x70] sm:$0xf]  ;;  %v602_v1 = vld [vmem:[%s664_s20 + $0x74] sm:$0xf0]  ;;  %v601_v2 = vld [vmem:[%s664_s20 + $0x74] sm:$0xf] }
  0x10   : > { %v566_v3 = vor.u32 %v602_v1, %v565_v0  ;;  %v567_v4 = vld [vmem:[%s664_s20 + $0x78] sm:$0xf0]  ;;  %v557_v5 = vld [vmem:[%s664_s20 + $0x60] sm:$0xf]  ;;  %v600_v6 = vld [vmem:[%s664_s20 + $0x64] sm:$0xf0] }
  0x11   : > { %v570_v7 = vor.u32 %v601_v2, %v567_v4  ;;  %v599_v8 = vld [vmem:[%s664_s20 + $0x64] sm:$0xf]  ;;  %v559_v9 = vld [vmem:[%s664_s20 + $0x68] sm:$0xf0]  ;;  %v558_v10 = vor.u32 %v600_v6, %v557_v5  ;;  %v549_v12 = vld [vmem:[%s664_s20 + $0x50] sm:$0xf] }
  0x12   : > { %354 = vmatpush.bf16.msra.mxu0 %v566_v3  ;;  %v562_v11 = vor.u32 %v599_v8, %v559_v9  ;;  %v598_v13 = vld [vmem:[%s664_s20 + $0x54] sm:$0xf0]  ;;  %v597_v14 = vld [vmem:[%s664_s20 + $0x54] sm:$0xf]  ;;  %v551_v15 = vld [vmem:[%s664_s20 + $0x58] sm:$0xf0] }
  0x13   : > { %382 = vmatpush.bf16.msra.mxu2 %v570_v7  ;;  %v550_v16 = vor.u32 %v598_v13, %v549_v12  ;;  %v541_v17 = vld [vmem:[%s664_s20 + $0x40] sm:$0xf]  ;;  %v554_v20 = vor.u32 %v597_v14, %v551_v15  ;;  %v596_v21 = vld [vmem:[%s664_s20 + $0x44] sm:$0xf0]  ;;  %v603_v22 = vld [vmem:[%s664_s20 + $0x84] sm:$0xf] }
  0x14   : > { %v575_v23 = vld [vmem:[%s664_s20 + $0x88] sm:$0xf0]  ;;  %v595_v24 = vld [vmem:[%s664_s20 + $0x44] sm:$0xf]  ;;  %v573_v28 = vld [vmem:[%s664_s20 + $0x80] sm:$0xf]  ;;  %v542_v29 = vor.u32 %v596_v21, %v541_v17 }
  0x15   : > { %v543_v25 = vld [vmem:[%s664_s20 + $0x48] sm:$0xf0]  ;;  %v578_v26 = vor.u32 %v603_v22, %v575_v23  ;;  %v604_v30 = vld [vmem:[%s664_s20 + $0x84] sm:$0xf0]  ;;  %v533_v32 = vld [vmem:[%s664_s20 + $0x30] sm:$0xf] }
  0x16   : > { %355 = vmatpush.bf16.msra.mxu0 %v558_v10  ;;  %v546_v31 = vor.u32 %v595_v24, %v543_v25  ;;  %v594_v33 = vld [vmem:[%s664_s20 + $0x34] sm:$0xf0]  ;;  %v574_v34 = vor.u32 %v604_v30, %v573_v28  ;;  %v593_v36 = vld [vmem:[%s664_s20 + $0x34] sm:$0xf]  ;;  %v535_v37 = vld [vmem:[%s664_s20 + $0x38] sm:$0xf0]  ;;  %248 = vperm.xlu0 %615, %v240_v49  }
  0x17   : > { %383 = vmatpush.bf16.msra.mxu2 %v562_v11  ;;  %403 = vmatpush.bf16.msra.mxu3 %v578_v26  ;;  %v534_v39 = vor.u32 %v594_v33, %v533_v32  ;;  %v538_v40 = vor.u32 %v593_v36, %v535_v37  ;;  %v525_v41 = vld [vmem:[%s664_s20 + $0x20] sm:$0xf]  ;;  %v592_v42 = vld [vmem:[%s664_s20 + $0x24] sm:$0xf0]  ;;  %v591_v43 = vld [vmem:[%s664_s20 + $0x24] sm:$0xf] }
  0x18   : > { %375 = vmatpush.bf16.msra.mxu1 %v574_v34  ;;  %v527_v44 = vld [vmem:[%s664_s20 + $0x28] sm:$0xf0]  ;;  %v526_v45 = vor.u32 %v592_v42, %v525_v41  ;;  %v517_v47 = vld [vmem:[%s664_s20 + $0x10] sm:$0xf]  ;;  %v590_v48 = vld [vmem:[%s664_s20 + $0x14] sm:$0xf0] }
  0x19   : > { %v530_v46 = vor.u32 %v591_v43, %v527_v44  ;;  %v589_v50 = vld [vmem:[%s664_s20 + $0x14] sm:$0xf]  ;;  %v519_v51 = vld [vmem:[%s664_s20 + $0x18] sm:$0xf0]  ;;  %v518_v52 = vor.u32 %v590_v48, %v517_v47  ;;  %v509_v54 = vld [vmem:[%s664_s20] sm:$0xf] }
  0x1a   : > { %356 = vmatpush.bf16.msra.mxu0 %v550_v16  ;;  %580 = vmatmul.msk.bf16.vlgmr.msra.gmra.mxu3 %vm350_vm0, %v506_v27  ;;  %v522_v53 = vor.u32 %v589_v50, %v519_v51  ;;  %v588_v55 = vld [vmem:[%s664_s20 + $0x4] sm:$0xf0]  ;;  %v587_v56 = vld [vmem:[%s664_s20 + $0x4] sm:$0xf]  ;;  %v511_v57 = vld [vmem:[%s664_s20 + $0x8] sm:$0xf0] }
  0x1b   : > { %384 = vmatpush.bf16.msra.mxu2 %v554_v20  ;;  %579 = vmatmul.msk.bf16.vlgmr.msra.gmra.mxu1 %vm350_vm0, %v506_v27  ;;  %v510_v58 = vor.u32 %v588_v55, %v509_v54  ;;  %v514_v61 = vor.u32 %v587_v56, %v511_v57  ;;  %v410_v3 = vld [vmem:[%s212_s10] sm:$0xff]  ;;  %v411_v11 = vld [vmem:[%s212_s10 + $0x8] sm:$0xff]  ;;  %v412_v15 = vld [vmem:[%s212_s10 + $0x10] sm:$0xff] }
  0x1c   : > { %v413_v22 = vld [vmem:[%s212_s10 + $0x18] sm:$0xff] }
  0x1e   : > { %357 = vmatpush.bf16.msra.mxu0 %v542_v29 }
  0x1f   : > { %385 = vmatpush.bf16.msra.mxu2 %v546_v31 }
  0x22   : > { %358 = vmatpush.bf16.msra.mxu0 %v534_v39 }
  0x23   : > { %386 = vmatpush.bf16.msra.mxu2 %v538_v40 }
  0x26   : > { %359 = vmatpush.bf16.msra.mxu0 %v526_v45 }
  0x27   : > { %387 = vmatpush.bf16.msra.mxu2 %v530_v46 }
  0x2a   : > { %360 = vmatpush.bf16.msra.mxu0 %v518_v52 }
  0x2b   : > { %388 = vmatpush.bf16.msra.mxu2 %v522_v53 }
  0x2e   : > { %361 = vmatpush.bf16.msra.mxu0 %v510_v58 }
  0x2f   : > { %389 = vmatpush.bf16.msra.mxu2 %v514_v61 }
  0x31   : > { %362 = vmatmul.bf16.vlgmr.msra.gmra.mxu0 %v502_v62 }
  0x32   : > { %390 = vmatmul.bf16.vlgmr.msra.gmra.mxu2 %v502_v62 }
  0x80   : > { %v244_v63 = vpop.permute.xlu0 %243 }
  0x88   : > { %v249_v8 = vpop.permute.xlu0 %248 }
  0x98   : > { %v377_v1 = vpop.f32.mrf.mxu1 }
  0x9d   : > { %v405_v6 = vpop.f32.mrf.mxu3 }
  0xa0   : > { %v379_v14 = vpop.f32.mrf.mxu1 }
  0xa5   : > { %v407_v21 = vpop.f32.mrf.mxu3 }
  0xae   : > { %v363_v0 = vpop.f32.mrf.mxu0 }
  0xaf   : > { %v364_v2 = vadd.f32 %v363_v0, %v244_v63 }
  0xb1   : > { %v378_v4 = vadd.f32 %v377_v1, %v364_v2 }
  0xb3   : > { %v414_v5 = vadd.f32 %v410_v3, %v378_v4 }
  0xb5   : > { %418 = vst [vmem:[%s217_s13] sm:$0xff] %v414_v5  ;;  %v391_v7 = vpop.f32.mrf.mxu2 }
  0xb6   : > { %v392_v9 = vadd.f32 %v391_v7, %v244_v63  ;;  %v365_v10 = vpop.f32.mrf.mxu0 }
  0xb7   : > { %v366_v12 = vadd.f32 %v365_v10, %v249_v8 }
  0xb8   : > { %v406_v13 = vadd.f32 %v405_v6, %v392_v9 }
  0xb9   : > { %v380_v16 = vadd.f32 %v379_v14, %v366_v12 }
  0xba   : > { %v415_v17 = vadd.f32 %v411_v11, %v406_v13 }
  0xbb   : > { %v416_v18 = vadd.f32 %v412_v15, %v380_v16 }
  0xbc   : > { %419 = vst [vmem:[%s217_s13 + $0x8] sm:$0xff] %v415_v17 }
  0xbd   : > { %420 = vst [vmem:[%s217_s13 + $0x10] sm:$0xff] %v416_v18  ;;  %v393_v19 = vpop.f32.mrf.mxu2 }
  0xbe   : > { %v394_v20 = vadd.f32 %v393_v19, %v249_v8 }
  0xc0   : > { %v408_v23 = vadd.f32 %v407_v21, %v394_v20 }
  0xc2   : > { %v417_v24 = vadd.f32 %v413_v22, %v408_v23 }
  0xc4   : > { %421 = vst [vmem:[%s217_s13 + $0x18] sm:$0xff] %v417_v24 }
  0xc5 PF: > { %s14_s15 = sadd.s32 1, %s622_s15  }
  0xc6   : > { %p11_p4 = scmp.ge.s32.totalorder %s14_s15, 4  }
  0xc8   :  { %13 = sbr.rel (!%p11_p4) target bundleno = 1 (0x1), region = 69 }

// kernel: _lambda_.19
= control target key start
LH: loop header
LB: loop body
LE: loop exit
PB: predicated region body
PF: predicated region fallthrough
CT: control target
= control target key end

     0   :  { %s1493_s18 = smov 0   ;;  %s1796_s0 = inlined_call_operand.vmem [shape: bf16[2,144,1024], index: 0, kind: input, shape index: {}]   ;;  %s1797_s1 = inlined_call_operand.vmem [shape: bf16[16,144], index: 1, kind: input, shape index: {}]   ;;  %s1798_s2 = inlined_call_operand.vmem [shape: f32[16,1], index: 2, kind: input, shape index: {}]   ;;  %s1799_s3 = inlined_call_operand.vmem [shape: f32[16,1], index: 3, kind: input, shape index: {}]   ;;  %s1800_s4 = inlined_call_operand.vmem [shape: f32[16,1], index: 4, kind: input, shape index: {}]   ;;  %s1801_s5 = inlined_call_operand.vmem [shape: f32[2,16,1024], index: 5, kind: output, shape index: {}]  }
   0x1 LB: > { %s1052_s19 = sadd.s32 4294967295, %s1460_s18   ;;  %p1056_p0 = scmp.ge.s32.totalorder %s1460_s18, 1  ;;  %s1460_s18 = sphi %s1493_s18, %s15_s18  }
   0x2   : > { %p187_p1 = scmp.lt.s32.totalorder %s1460_s18, 3 }
   0x4   : > { %p188_p2 = pnand %p1056_p0, %p187_p1 }
   0x5   : > { %p215_p3 = scmp.lt.s32.totalorder (!%p188_p2), %s1052_s19, 1 }
   0x6   : > { %191 = sbr.rel (%p188_p2) target bundleno = 253 (0xfd), region = 40 }
   0xb   : > { %s1803_s19 = smov (!%p215_p3, %s1052_s19), 1  ;;  %vm681_vm0 = vcmask 130048   ;;  %v1367_v3 = vld [vmem:[%s1797_s1 + $0x4] sm:$0xf]  ;;  %v1064_v4 = vld [vmem:[%s1797_s1 + $0x8] sm:$0xf0] }
   0xc   : > { %s1441_s20 = smul.u32 576, %s1803_s19  ;;  %v1533_v27 = vor.u32 %v1367_v3, %v1064_v4  ;;  %s1366_s21 = sshll.u32 %s1803_s19, 7 }
   0xd   : > { %s1728_s24 = scalar_lea.vmem %s1801_s5, %s1366_s21 }
   0xe   : > { %s1507_s23 = scalar_lea.vmem %s1796_s0, %s1441_s20 }
   0xf   : > { %v1294_v0 = vld [vmem:[%s1507_s23 + $0x1c0] sm:$0xf]  ;;  %v1302_v7 = vld [vmem:[%s1507_s23 + $0x1c8] sm:$0xf]  ;;  %v1425_v11 = vld [vmem:[%s1507_s23 + $0x1c4] sm:$0xf] }
  0x10   : > { %v1429_v1 = vld [vmem:[%s1507_s23 + $0x1dc] sm:$0xf0]  ;;  %v1430_v8 = vld [vmem:[%s1507_s23 + $0x1e4] sm:$0xf0]  ;;  %v1296_v12 = vld [vmem:[%s1507_s23 + $0x1e0] sm:$0xf0] }
  0x11   : > { %v1326_v2 = vld [vmem:[%s1507_s23 + $0x200] sm:$0xf]  ;;  %v1295_v5 = vor.u32 %v1429_v1, %v1294_v0  ;;  %v1303_v10 = vor.u32 %v1430_v8, %v1302_v7  ;;  %v1433_v13 = vld [vmem:[%s1507_s23 + $0x204] sm:$0xf]  ;;  %v1299_v14 = vor.u32 %v1425_v11, %v1296_v12  ;;  %v1270_v20 = vld [vmem:[%s1507_s23 + $0x188] sm:$0xf] }
  0x12   : > { %v1437_v6 = vld [vmem:[%s1507_s23 + $0x21c] sm:$0xf0]  ;;  %v1328_v15 = vld [vmem:[%s1507_s23 + $0x220] sm:$0xf0]  ;;  %v1422_v21 = vld [vmem:[%s1507_s23 + $0x1a4] sm:$0xf0] }
  0x13   : > { %v1327_v9 = vor.u32 %v1437_v6, %v1326_v2  ;;  %685 = vmatpush.bf16.msra.mxu0 %v1295_v5  ;;  %v1262_v16 = vld [vmem:[%s1507_s23 + $0x180] sm:$0xf]  ;;  %741 = vmatpush.bf16.msra.mxu1 %v1303_v10  ;;  %v1331_v18 = vor.u32 %v1433_v13, %v1328_v15  ;;  %v1417_v22 = vld [vmem:[%s1507_s23 + $0x184] sm:$0xf]  ;;  %v1271_v23 = vor.u32 %v1422_v21, %v1270_v20  ;;  %v1334_v25 = vld [vmem:[%s1507_s23 + $0x208] sm:$0xf] }
  0x14   : > { %v1421_v17 = vld [vmem:[%s1507_s23 + $0x19c] sm:$0xf0]  ;;  %v1264_v24 = vld [vmem:[%s1507_s23 + $0x1a0] sm:$0xf0]  ;;  %v1438_v26 = vld [vmem:[%s1507_s23 + $0x224] sm:$0xf0] }
  0x15   : > { %706 = vmatpush.bf16.msra.mxu2 %v1327_v9  ;;  %v1263_v19 = vor.u32 %v1421_v17, %v1262_v16  ;;  %734 = vmatpush.bf16.msra.mxu3 %v1331_v18  ;;  %v1267_v28 = vor.u32 %v1417_v22, %v1264_v24  ;;  %v1335_v29 = vor.u32 %v1438_v26, %v1334_v25  ;;  %v1426_v30 = vld [vmem:[%s1507_s23 + $0x1cc] sm:$0xf]  ;;  %v1230_v32 = vld [vmem:[%s1507_s23 + $0x140] sm:$0xf]  ;;  %v1238_v35 = vld [vmem:[%s1507_s23 + $0x148] sm:$0xf] }
  0x16   : > { %v1304_v31 = vld [vmem:[%s1507_s23 + $0x1e8] sm:$0xf0]  ;;  %v1413_v34 = vld [vmem:[%s1507_s23 + $0x15c] sm:$0xf0]  ;;  %v1414_v36 = vld [vmem:[%s1507_s23 + $0x164] sm:$0xf0] }
  0x17   : > { %686 = vmatpush.bf16.msra.mxu0 %v1263_v19  ;;  %v1307_v33 = vor.u32 %v1426_v30, %v1304_v31  ;;  %742 = vmatpush.bf16.msra.mxu1 %v1271_v23  ;;  %v1231_v37 = vor.u32 %v1413_v34, %v1230_v32  ;;  %v1239_v38 = vor.u32 %v1414_v36, %v1238_v35  ;;  %v1409_v39 = vld [vmem:[%s1507_s23 + $0x144] sm:$0xf]  ;;  %v1418_v41 = vld [vmem:[%s1507_s23 + $0x18c] sm:$0xf]  ;;  %v1198_v44 = vld [vmem:[%s1507_s23 + $0x100] sm:$0xf] }
  0x18   : > { %1356 = vmatmul.msk.bf16.vlgmr.msra.gmra.mxu2 %vm681_vm0, %v1533_v27  ;;  %v1232_v40 = vld [vmem:[%s1507_s23 + $0x160] sm:$0xf0]  ;;  %1357 = vmatmul.msk.bf16.vlgmr.msra.gmra.mxu3 %vm681_vm0, %v1533_v27  ;;  %v1272_v43 = vld [vmem:[%s1507_s23 + $0x1a8] sm:$0xf0]  ;;  %v1405_v45 = vld [vmem:[%s1507_s23 + $0x11c] sm:$0xf0] }
  0x19   : > { %713 = vmatpush.bf16.msrb.mxu2 %v1299_v14  ;;  %762 = vmatpush.bf16.msrb.mxu3 %v1335_v29  ;;  %v1235_v42 = vor.u32 %v1409_v39, %v1232_v40  ;;  %v1275_v46 = vor.u32 %v1418_v41, %v1272_v43  ;;  %v1206_v47 = vld [vmem:[%s1507_s23 + $0x108] sm:$0xf]  ;;  %v1401_v49 = vld [vmem:[%s1507_s23 + $0x104] sm:$0xf]  ;;  %v1199_v50 = vor.u32 %v1405_v45, %v1198_v44  ;;  %v1410_v52 = vld [vmem:[%s1507_s23 + $0x14c] sm:$0xf] }
  0x1a   : > { %v1406_v48 = vld [vmem:[%s1507_s23 + $0x124] sm:$0xf0]  ;;  %v1200_v51 = vld [vmem:[%s1507_s23 + $0x120] sm:$0xf0]  ;;  %v1240_v53 = vld [vmem:[%s1507_s23 + $0x168] sm:$0xf0] }
  0x1b   : > { %687 = vmatpush.bf16.msra.mxu0 %v1231_v37  ;;  %743 = vmatpush.bf16.msra.mxu1 %v1239_v38  ;;  %v1207_v54 = vor.u32 %v1406_v48, %v1206_v47  ;;  %v1166_v55 = vld [vmem:[%s1507_s23 + $0xc0] sm:$0xf]  ;;  %v1203_v57 = vor.u32 %v1401_v49, %v1200_v51  ;;  %v1174_v58 = vld [vmem:[%s1507_s23 + $0xc8] sm:$0xf]  ;;  %v1243_v60 = vor.u32 %v1410_v52, %v1240_v53  ;;  %v1393_v61 = vld [vmem:[%s1507_s23 + $0xc4] sm:$0xf] }
  0x1c   : > { %v1397_v56 = vld [vmem:[%s1507_s23 + $0xdc] sm:$0xf0]  ;;  %v1398_v59 = vld [vmem:[%s1507_s23 + $0xe4] sm:$0xf0]  ;;  %v1168_v62 = vld [vmem:[%s1507_s23 + $0xe0] sm:$0xf0] }
  0x1d   : > { %714 = vmatpush.bf16.msrb.mxu2 %v1267_v28  ;;  %769 = vmatpush.bf16.msra.mxu3 %v1307_v33  ;;  %v1167_v63 = vor.u32 %v1397_v56, %v1166_v55  ;;  %v1402_v0 = vld [vmem:[%s1507_s23 + $0x10c] sm:$0xf]  ;;  %v1175_v2 = vor.u32 %v1398_v59, %v1174_v58  ;;  %v1134_v3 = vld [vmem:[%s1507_s23 + $0x80] sm:$0xf]  ;;  %v1171_v5 = vor.u32 %v1393_v61, %v1168_v62  ;;  %v1142_v6 = vld [vmem:[%s1507_s23 + $0x88] sm:$0xf] }
  0x1e   : > { %v1208_v1 = vld [vmem:[%s1507_s23 + $0x128] sm:$0xf0]  ;;  %v1389_v4 = vld [vmem:[%s1507_s23 + $0x9c] sm:$0xf0]  ;;  %v1390_v7 = vld [vmem:[%s1507_s23 + $0xa4] sm:$0xf0] }
  0x1f   : > { %688 = vmatpush.bf16.msra.mxu0 %v1199_v50  ;;  %744 = vmatpush.bf16.msra.mxu1 %v1207_v54  ;;  %v1211_v8 = vor.u32 %v1402_v0, %v1208_v1  ;;  %v1385_v9 = vld [vmem:[%s1507_s23 + $0x84] sm:$0xf]  ;;  %v1135_v11 = vor.u32 %v1389_v4, %v1134_v3  ;;  %v1394_v12 = vld [vmem:[%s1507_s23 + $0xcc] sm:$0xf]  ;;  %v1143_v14 = vor.u32 %v1390_v7, %v1142_v6  ;;  %v1102_v15 = vld [vmem:[%s1507_s23 + $0x40] sm:$0xf] }
  0x20   : > { %v1136_v10 = vld [vmem:[%s1507_s23 + $0xa0] sm:$0xf0]  ;;  %v1176_v13 = vld [vmem:[%s1507_s23 + $0xe8] sm:$0xf0]  ;;  %v1381_v16 = vld [vmem:[%s1507_s23 + $0x5c] sm:$0xf0] }
  0x21   : > { %715 = vmatpush.bf16.msrb.mxu2 %v1235_v42  ;;  %770 = vmatpush.bf16.msra.mxu3 %v1275_v46  ;;  %v1139_v17 = vor.u32 %v1385_v9, %v1136_v10  ;;  %v1110_v18 = vld [vmem:[%s1507_s23 + $0x48] sm:$0xf]  ;;  %v1179_v20 = vor.u32 %v1394_v12, %v1176_v13  ;;  %v1377_v21 = vld [vmem:[%s1507_s23 + $0x44] sm:$0xf]  ;;  %v1386_v23 = vld [vmem:[%s1507_s23 + $0x8c] sm:$0xf]  ;;  %v1103_v24 = vor.u32 %v1381_v16, %v1102_v15 }
  0x22   : > { %v1382_v19 = vld [vmem:[%s1507_s23 + $0x64] sm:$0xf0]  ;;  %v1104_v22 = vld [vmem:[%s1507_s23 + $0x60] sm:$0xf0]  ;;  %v1144_v25 = vld [vmem:[%s1507_s23 + $0xa8] sm:$0xf0] }
  0x23   : > { %689 = vmatpush.bf16.msra.mxu0 %v1167_v63  ;;  %745 = vmatpush.bf16.msra.mxu1 %v1175_v2  ;;  %v1070_v26 = vld [vmem:[%s1507_s23] sm:$0xf]  ;;  %v1111_v29 = vor.u32 %v1382_v19, %v1110_v18  ;;  %v1078_v30 = vld [vmem:[%s1507_s23 + $0x8] sm:$0xf]  ;;  %v1369_v32 = vld [vmem:[%s1507_s23 + $0x4] sm:$0xf]  ;;  %v1107_v33 = vor.u32 %v1377_v21, %v1104_v22  ;;  %v1147_v37 = vor.u32 %v1386_v23, %v1144_v25 }
  0x24   : > { %v1373_v28 = vld [vmem:[%s1507_s23 + $0x1c] sm:$0xf0]  ;;  %v1374_v31 = vld [vmem:[%s1507_s23 + $0x24] sm:$0xf0]  ;;  %v1072_v34 = vld [vmem:[%s1507_s23 + $0x20] sm:$0xf0] }
  0x25   : > { %716 = vmatpush.bf16.msrb.mxu2 %v1203_v57  ;;  %771 = vmatpush.bf16.msra.mxu3 %v1243_v60  ;;  %v1434_v35 = vld [vmem:[%s1507_s23 + $0x20c] sm:$0xf]  ;;  %v1310_v38 = vld [vmem:[%s1507_s23 + $0x1d0] sm:$0xf]  ;;  %v1071_v41 = vor.u32 %v1373_v28, %v1070_v26  ;;  %v1062_v43 = vld [vmem:[%s1797_s1] sm:$0xf]  ;;  %v1079_v45 = vor.u32 %v1374_v31, %v1078_v30  ;;  %v1075_v49 = vor.u32 %v1369_v32, %v1072_v34 }
  0x26   : > { %v1336_v36 = vld [vmem:[%s1507_s23 + $0x228] sm:$0xf0]  ;;  %v1342_v39 = vld [vmem:[%s1507_s23 + $0x210] sm:$0xf]  ;;  %v1368_v44 = vld [vmem:[%s1797_s1 + $0x4] sm:$0xf0] }
  0x27   : > { %690 = vmatpush.bf16.msra.mxu0 %v1135_v11  ;;  %746 = vmatpush.bf16.msra.mxu1 %v1143_v14  ;;  %v1439_v40 = vld [vmem:[%s1507_s23 + $0x22c] sm:$0xf0]  ;;  %v1378_v46 = vld [vmem:[%s1507_s23 + $0x4c] sm:$0xf]  ;;  %v1339_v48 = vor.u32 %v1434_v35, %v1336_v36  ;;  %v1427_v50 = vld [vmem:[%s1507_s23 + $0x1d4] sm:$0xf]  ;;  %v1605_v54 = vor.u32 %v1368_v44, %v1062_v43 }
  0x28   : > { %1358 = vmatmul.msk.bf16.vlgmr.msrb.gmra.mxu3 %vm681_vm0, %v1533_v27  ;;  %v1431_v42 = vld [vmem:[%s1507_s23 + $0x1ec] sm:$0xf0]  ;;  %v1112_v47 = vld [vmem:[%s1507_s23 + $0x68] sm:$0xf0]  ;;  %v1312_v51 = vld [vmem:[%s1507_s23 + $0x1f0] sm:$0xf0]  ;;  %v1343_v52 = vor.u32 %v1439_v40, %v1342_v39 }
  0x29   : > { %717 = vmatpush.bf16.msrb.mxu2 %v1171_v5  ;;  %772 = vmatpush.bf16.msra.mxu3 %v1211_v8  ;;  %v1311_v53 = vor.u32 %v1431_v42, %v1310_v38  ;;  %v1115_v55 = vor.u32 %v1378_v46, %v1112_v47  ;;  %v1278_v56 = vld [vmem:[%s1507_s23 + $0x190] sm:$0xf]  ;;  %v1462_v58 = vmov 0   ;;  %v1315_v59 = vor.u32 %v1427_v50, %v1312_v51  ;;  %v1370_v60 = vld [vmem:[%s1507_s23 + $0xc] sm:$0xf]  ;;  %v300_v3 = vld [vmem:[%s1798_s2] sm:$0xff] }
  0x2a   : > { %v1423_v57 = vld [vmem:[%s1507_s23 + $0x1ac] sm:$0xf0]  ;;  %1451 = vset.pattern.permute.xlu0 %v1462_v58  ;;  %v1080_v61 = vld [vmem:[%s1507_s23 + $0x28] sm:$0xf0]  ;;  %v1419_v62 = vld [vmem:[%s1507_s23 + $0x194] sm:$0xf]  ;;  %1452 = vset.pattern.permute.xlu1 %v1462_v58 }
  0x2b   : > { %691 = vmatpush.bf16.msra.mxu0 %v1103_v24  ;;  %747 = vmatpush.bf16.msra.mxu1 %v1111_v29  ;;  %v1280_v63 = vld [vmem:[%s1507_s23 + $0x1b0] sm:$0xf0]  ;;  %v1318_v0 = vld [vmem:[%s1507_s23 + $0x1d8] sm:$0xf]  ;;  %v1279_v2 = vor.u32 %v1423_v57, %v1278_v56  ;;  %v1083_v6 = vor.u32 %v1370_v60, %v1080_v61  ;;  %v1246_v7 = vld [vmem:[%s1507_s23 + $0x150] sm:$0xf] }
  0x2c   : > { %v1432_v1 = vld [vmem:[%s1507_s23 + $0x1f4] sm:$0xf0]  ;;  %v1435_v4 = vld [vmem:[%s1507_s23 + $0x214] sm:$0xf]  ;;  %v1415_v8 = vld [vmem:[%s1507_s23 + $0x16c] sm:$0xf0]  ;;  %v1283_v11 = vor.u32 %v1419_v62, %v1280_v63  ;;  %304 = vperm.xlu0 %1451, %v300_v3   ;;  %1453 = vset.pattern.permute.xlu2 %v1462_v58 }
  0x2d   : > { %718 = vmatpush.bf16.msrb.mxu2 %v1139_v17  ;;  %773 = vmatpush.bf16.msra.mxu3 %v1179_v20  ;;  %v1344_v5 = vld [vmem:[%s1507_s23 + $0x230] sm:$0xf0]  ;;  %v909_v9 = vld [vmem:[%s1799_s3] sm:$0xff]  ;;  %v1319_v12 = vor.u32 %v1432_v1, %v1318_v0  ;;  %v1286_v15 = vld [vmem:[%s1507_s23 + $0x198] sm:$0xf]  ;;  %v1247_v17 = vor.u32 %v1415_v8, %v1246_v7 }
  0x2e   : > { %v1347_v10 = vor.u32 %v1435_v4, %v1344_v5  ;;  %v1411_v13 = vld [vmem:[%s1507_s23 + $0x154] sm:$0xf]  ;;  %v1424_v16 = vld [vmem:[%s1507_s23 + $0x1b4] sm:$0xf0]  ;;  %913 = vperm.xlu1 %1452, %v909_v9   ;;  %v1214_v18 = vld [vmem:[%s1507_s23 + $0x110] sm:$0xf] }
  0x2f   : > { %692 = vmatpush.bf16.msra.mxu0 %v1071_v41  ;;  %748 = vmatpush.bf16.msra.mxu1 %v1079_v45  ;;  %v1248_v14 = vld [vmem:[%s1507_s23 + $0x170] sm:$0xf0]  ;;  %v1407_v19 = vld [vmem:[%s1507_s23 + $0x12c] sm:$0xf0]  ;;  %v1287_v21 = vor.u32 %v1424_v16, %v1286_v15  ;;  %v1254_v24 = vld [vmem:[%s1507_s23 + $0x158] sm:$0xf] }
  0x30   : > { %v1251_v20 = vor.u32 %v1411_v13, %v1248_v14  ;;  %v1403_v22 = vld [vmem:[%s1507_s23 + $0x114] sm:$0xf]  ;;  %v1416_v25 = vld [vmem:[%s1507_s23 + $0x174] sm:$0xf0]  ;;  %v1215_v26 = vor.u32 %v1407_v19, %v1214_v18  ;;  %v301_v28 = vld [vmem:[%s1798_s2 + $0x8] sm:$0xff] }
  0x31   : > { %719 = vmatpush.bf16.msrb.mxu2 %v1107_v33  ;;  %774 = vmatpush.bf16.msra.mxu3 %v1147_v37  ;;  %v1216_v23 = vld [vmem:[%s1507_s23 + $0x130] sm:$0xf0]  ;;  %v1182_v29 = vld [vmem:[%s1507_s23 + $0xd0] sm:$0xf]  ;;  %v910_v31 = vld [vmem:[%s1799_s3 + $0x8] sm:$0xff]  ;;  %v1255_v33 = vor.u32 %v1416_v25, %v1254_v24 }
  0x32   : > { %693 = vmatmul.bf16.vlgmr.msra.gmra.mxu0 %v1605_v54  ;;  %749 = vmatmul.bf16.vlgmr.msra.gmra.mxu1 %v1605_v54  ;;  %v1399_v30 = vld [vmem:[%s1507_s23 + $0xec] sm:$0xf0]  ;;  %v1219_v32 = vor.u32 %v1403_v22, %v1216_v23  ;;  %v1395_v34 = vld [vmem:[%s1507_s23 + $0xd4] sm:$0xf]  ;;  %v1222_v36 = vld [vmem:[%s1507_s23 + $0x118] sm:$0xf] }
  0x33   : > { %790 = vmatpush.bf16.msrb.mxu0 %v1339_v48  ;;  %818 = vmatpush.bf16.msrb.mxu1 %v1343_v52  ;;  %v1184_v35 = vld [vmem:[%s1507_s23 + $0xf0] sm:$0xf0]  ;;  %v1408_v37 = vld [vmem:[%s1507_s23 + $0x134] sm:$0xf0]  ;;  %v1183_v38 = vor.u32 %v1399_v30, %v1182_v29  ;;  %v1428_v39 = vld [vmem:[%s1507_s23 + $0x1dc] sm:$0xf] }
  0x34   : > { %309 = vperm.xlu0 %1451, %v301_v28   ;;  %v1320_v40 = vld [vmem:[%s1507_s23 + $0x1f8] sm:$0xf0]  ;;  %v1150_v41 = vld [vmem:[%s1507_s23 + $0x90] sm:$0xf]  ;;  %v1187_v43 = vor.u32 %v1395_v34, %v1184_v35  ;;  %v1223_v44 = vor.u32 %v1408_v37, %v1222_v36  ;;  %v1387_v45 = vld [vmem:[%s1507_s23 + $0x94] sm:$0xf] }
  0x35   : > { %720 = vmatpush.bf16.msrb.mxu2 %v1075_v49  ;;  %775 = vmatpush.bf16.msra.mxu3 %v1115_v55  ;;  %v1391_v42 = vld [vmem:[%s1507_s23 + $0xac] sm:$0xf0]  ;;  %v937_v46 = vld [vmem:[%s1800_s4] sm:$0xff]  ;;  %v1323_v47 = vor.u32 %v1428_v39, %v1320_v40  ;;  %v1152_v48 = vld [vmem:[%s1507_s23 + $0xb0] sm:$0xf0] }
  0x36   : > { %918 = vperm.xlu1 %1452, %v910_v31   ;;  %v1190_v49 = vld [vmem:[%s1507_s23 + $0xd8] sm:$0xf]  ;;  %941 = vperm.xlu2 %1453, %v937_v46   ;;  %v1151_v51 = vor.u32 %v1391_v42, %v1150_v41  ;;  %v1420_v52 = vld [vmem:[%s1507_s23 + $0x19c] sm:$0xf]  ;;  %v1118_v55 = vld [vmem:[%s1507_s23 + $0x50] sm:$0xf]  ;;  %v1155_v57 = vor.u32 %v1387_v45, %v1152_v48 }
  0x37   : > { %825 = vmatpush.bf16.msra.mxu0 %v1315_v59  ;;  %846 = vmatpush.bf16.msra.mxu1 %v1347_v10  ;;  %v1400_v50 = vld [vmem:[%s1507_s23 + $0xf4] sm:$0xf0]  ;;  %v1383_v56 = vld [vmem:[%s1507_s23 + $0x6c] sm:$0xf0]  ;;  %v1379_v59 = vld [vmem:[%s1507_s23 + $0x54] sm:$0xf] }
  0x38   : > { %721 = vmatmul.bf16.vlgmr.msrb.gmra.mxu2 %v1605_v54  ;;  %v1191_v58 = vor.u32 %v1400_v50, %v1190_v49  ;;  %v1120_v61 = vld [vmem:[%s1507_s23 + $0x70] sm:$0xf0]  ;;  %v1158_v62 = vld [vmem:[%s1507_s23 + $0x98] sm:$0xf]  ;;  %v1119_v0 = vor.u32 %v1383_v56, %v1118_v55  ;;  %v1412_v1 = vld [vmem:[%s1507_s23 + $0x15c] sm:$0xf] }
  0x39   : > { %797 = vmatpush.bf16.msra.mxu2 %v1311_v53  ;;  %776 = vmatpush.bf16.msra.mxu3 %v1083_v6  ;;  %v1288_v53 = vld [vmem:[%s1507_s23 + $0x1b8] sm:$0xf0]  ;;  %v1392_v63 = vld [vmem:[%s1507_s23 + $0xb4] sm:$0xf0]  ;;  %v938_v3 = vld [vmem:[%s1800_s4 + $0x8] sm:$0xff]  ;;  %v1123_v6 = vor.u32 %v1379_v59, %v1120_v61 }
  0x3a   : > { %v1291_v60 = vor.u32 %v1420_v52, %v1288_v53  ;;  %v1086_v4 = vld [vmem:[%s1507_s23 + $0x10] sm:$0xf]  ;;  %v1159_v7 = vor.u32 %v1392_v63, %v1158_v62  ;;  %v1371_v8 = vld [vmem:[%s1507_s23 + $0x14] sm:$0xf]  ;;  %v1350_v9 = vld [vmem:[%s1507_s23 + $0x218] sm:$0xf] }
  0x3b   : > { %826 = vmatpush.bf16.msra.mxu0 %v1283_v11  ;;  %v1375_v5 = vld [vmem:[%s1507_s23 + $0x2c] sm:$0xf0]  ;;  %v1440_v10 = vld [vmem:[%s1507_s23 + $0x234] sm:$0xf0]  ;;  %v1404_v16 = vld [vmem:[%s1507_s23 + $0x11c] sm:$0xf] }
  0x3c   : > { %777 = vmatmul.bf16.vlgmr.msra.gmra.mxu3 %v1605_v54  ;;  %v1126_v13 = vld [vmem:[%s1507_s23 + $0x58] sm:$0xf]  ;;  %v1087_v15 = vor.u32 %v1375_v5, %v1086_v4  ;;  %v1351_v18 = vor.u32 %v1440_v10, %v1350_v9  ;;  %v1436_v19 = vld [vmem:[%s1507_s23 + $0x21c] sm:$0xf] }
  0x3d   : > { %798 = vmatpush.bf16.msra.mxu2 %v1279_v2  ;;  %853 = vmatpush.bf16.msrb.mxu3 %v1319_v12  ;;  %v1256_v2 = vld [vmem:[%s1507_s23 + $0x178] sm:$0xf0]  ;;  %v1088_v12 = vld [vmem:[%s1507_s23 + $0x30] sm:$0xf0]  ;;  %v1384_v14 = vld [vmem:[%s1507_s23 + $0x74] sm:$0xf0] }
  0x3e   : > { %v1259_v11 = vor.u32 %v1412_v1, %v1256_v2  ;;  %946 = vperm.xlu2 %1453, %v938_v3   ;;  %v1127_v22 = vor.u32 %v1384_v14, %v1126_v13  ;;  %v1094_v24 = vld [vmem:[%s1507_s23 + $0x18] sm:$0xf]  ;;  %v1192_v28 = vld [vmem:[%s1507_s23 + $0xf8] sm:$0xf0] }
  0x3f   : > { %827 = vmatpush.bf16.msra.mxu0 %v1251_v20  ;;  %v1352_v20 = vld [vmem:[%s1507_s23 + $0x238] sm:$0xf0]  ;;  %v1376_v25 = vld [vmem:[%s1507_s23 + $0x34] sm:$0xf0] }
  0x40   : > { %v1355_v29 = vor.u32 %v1436_v19, %v1352_v20  ;;  %v1095_v30 = vor.u32 %v1376_v25, %v1094_v24  ;;  %v1380_v35 = vld [vmem:[%s1507_s23 + $0x5c] sm:$0xf] }
  0x41   : > { %799 = vmatpush.bf16.msra.mxu2 %v1247_v17  ;;  %854 = vmatpush.bf16.msrb.mxu3 %v1287_v21  ;;  %v1224_v17 = vld [vmem:[%s1507_s23 + $0x138] sm:$0xf0]  ;;  %v1091_v21 = vor.u32 %v1371_v8, %v1088_v12 }
  0x42   : > { %1359 = vmatmul.msk.bf16.vlgmr.msrb.gmra.mxu0 %vm681_vm0, %v1533_v27  ;;  %1360 = vmatmul.msk.bf16.vlgmr.msrb.gmra.mxu1 %vm681_vm0, %v1533_v27  ;;  %v1227_v23 = vor.u32 %v1404_v16, %v1224_v17  ;;  %v1128_v36 = vld [vmem:[%s1507_s23 + $0x78] sm:$0xf0] }
  0x43   : > { %828 = vmatpush.bf16.msra.mxu0 %v1219_v32  ;;  %881 = vmatpush.bf16.msrb.mxu1 %v1323_v47  ;;  %v1388_v32 = vld [vmem:[%s1507_s23 + $0x9c] sm:$0xf]  ;;  %v1131_v37 = vor.u32 %v1380_v35, %v1128_v36 }
  0x44   : > { %v1096_v39 = vld [vmem:[%s1507_s23 + $0x38] sm:$0xf0] }
  0x45   : > { %800 = vmatpush.bf16.msra.mxu2 %v1215_v26  ;;  %855 = vmatpush.bf16.msrb.mxu3 %v1255_v33  ;;  %v1396_v26 = vld [vmem:[%s1507_s23 + $0xdc] sm:$0xf] }
  0x46   : > { %v1195_v31 = vor.u32 %v1396_v26, %v1192_v28  ;;  %v1160_v33 = vld [vmem:[%s1507_s23 + $0xb8] sm:$0xf0] }
  0x47   : > { %829 = vmatpush.bf16.msra.mxu0 %v1187_v43  ;;  %882 = vmatpush.bf16.msrb.mxu1 %v1291_v60  ;;  %v1163_v34 = vor.u32 %v1388_v32, %v1160_v33 }
  0x49   : > { %801 = vmatpush.bf16.msra.mxu2 %v1183_v38  ;;  %856 = vmatpush.bf16.msrb.mxu3 %v1223_v44  ;;  %v1372_v38 = vld [vmem:[%s1507_s23 + $0x1c] sm:$0xf] }
  0x4a   : > { %v1099_v40 = vor.u32 %v1372_v38, %v1096_v39 }
  0x4b   : > { %830 = vmatpush.bf16.msra.mxu0 %v1155_v57  ;;  %883 = vmatpush.bf16.msrb.mxu1 %v1259_v11 }
  0x4d   : > { %802 = vmatpush.bf16.msra.mxu2 %v1151_v51  ;;  %857 = vmatpush.bf16.msrb.mxu3 %v1191_v58 }
  0x4f   : > { %831 = vmatpush.bf16.msra.mxu0 %v1123_v6  ;;  %884 = vmatpush.bf16.msrb.mxu1 %v1227_v23 }
  0x51   : > { %803 = vmatpush.bf16.msra.mxu2 %v1119_v0  ;;  %858 = vmatpush.bf16.msrb.mxu3 %v1159_v7 }
  0x52   : > { %1361 = vmatmul.msk.bf16.vlgmr.msra.gmra.mxu1 %vm681_vm0, %v1533_v27 }
  0x53   : > { %832 = vmatpush.bf16.msra.mxu0 %v1091_v21  ;;  %885 = vmatpush.bf16.msrb.mxu1 %v1195_v31 }
  0x55   : > { %804 = vmatpush.bf16.msra.mxu2 %v1087_v15  ;;  %859 = vmatpush.bf16.msrb.mxu3 %v1127_v22 }
  0x56   : > { %833 = vmatmul.bf16.vlgmr.msra.gmra.mxu0 %v1605_v54 }
  0x57   : > { %902 = vmatpush.bf16.msrb.mxu0 %v1355_v29  ;;  %886 = vmatpush.bf16.msrb.mxu1 %v1163_v34 }
  0x58   : > { %805 = vmatmul.bf16.vlgmr.msra.gmra.mxu2 %v1605_v54 }
  0x59   : > { %874 = vmatpush.bf16.msrb.mxu2 %v1351_v18  ;;  %860 = vmatpush.bf16.msrb.mxu3 %v1095_v30 }
  0x5b   : > { %887 = vmatpush.bf16.msrb.mxu1 %v1131_v37 }
  0x5c   : > { %861 = vmatmul.bf16.vlgmr.msrb.gmra.mxu3 %v1605_v54 }
  0x5f   : > { %888 = vmatpush.bf16.msrb.mxu1 %v1099_v40 }
  0x62   : > { %889 = vmatmul.bf16.vlgmr.msrb.gmra.mxu1 %v1605_v54 }
  0x66   : > { %1363 = vmatmul.msk.bf16.vlgmr.msrb.gmra.mxu0 %vm681_vm0, %v1533_v27 }
  0x68   : > { %1362 = vmatmul.msk.bf16.vlgmr.msrb.gmra.mxu2 %vm681_vm0, %v1533_v27 }
  0x90   : > { %v1717_v52 = vpop.permute.xlu2 %941 }
  0x98   : > { %v1738_v8 = vpop.permute.xlu2 %946 }
  0x9b   : > { %v736_v41 = vpop.f32.mrf.mxu3  ;;  %v708_v42 = vpop.f32.mrf.mxu2 }
  0x9e   : > { %v1711_v44 = vpop.permute.xlu0 %304 }
  0xa0   : > { %v1713_v48 = vpop.permute.xlu1 %913 }
  0xa3   : > { %v738_v43 = vpop.f32.mrf.mxu3  ;;  %v710_v46 = vpop.f32.mrf.mxu2 }
  0xa6   : > { %v1722_v57 = vpop.permute.xlu0 %309 }
  0xa8   : > { %v1734_v4 = vpop.permute.xlu1 %918 }
  0xab   : > { %v764_v45 = vpop.f32.mrf.mxu3 }
  0xaf   : > { %v694_v47 = vpop.f32.mrf.mxu0  ;;  %v750_v50 = vpop.f32.mrf.mxu1 }
  0xb0   : > { %v695_v49 = vadd.f32 %v694_v47, %v1711_v44  ;;  %v751_v51 = vadd.f32 %v750_v50, %v1711_v44 }
  0xb2   : > { %v709_v27 = vadd.f32 %v708_v42, %v695_v49  ;;  %v765_v54 = vadd.f32 %v764_v45, %v751_v51 }
  0xb3   : > { %v766_v55 = vpop.f32.mrf.mxu3 }
  0xb4   : > { %v921_v53 = vmul.f32 %v1713_v48, %v709_v27  ;;  %v923_v56 = vmul.f32 %v1713_v48, %v765_v54 }
  0xb6   : > { %v949_v58 = vadd.f32 %v1717_v52, %v921_v53  ;;  %v951_v59 = vadd.f32 %v1717_v52, %v923_v56 }
  0xb7   : > { %v696_v61 = vpop.f32.mrf.mxu0  ;;  %v752_v1 = vpop.f32.mrf.mxu1 }
  0xb8   : > { %v965_v62 = vmax.f32 %v949_v58, 0.0  ;;  %v697_v0 = vadd.f32 %v696_v61, %v1722_v57  ;;  %v967_v2 = vmax.f32 %v951_v59, 0.0  ;;  %v753_v3 = vadd.f32 %v752_v1, %v1722_v57 }
  0xba   : > { %981 = vst [vmem:[%s1728_s24] sm:$0xff] %v965_v62  ;;  %v711_v6 = vadd.f32 %v710_v46, %v697_v0  ;;  %v767_v7 = vadd.f32 %v766_v55, %v753_v3 }
  0xbb   : > { %v722_v60 = vpop.f32.mrf.mxu2  ;;  %983 = vst [vmem:[%s1728_s24 + $0x10] sm:$0xff] %v967_v2 }
  0xbc   : > { %v723_v63 = vadd.f32 %v722_v60, %v1711_v44  ;;  %v929_v10 = vmul.f32 %v1734_v4, %v711_v6  ;;  %v931_v11 = vmul.f32 %v1734_v4, %v767_v7 }
  0xbe   : > { %v737_v5 = vadd.f32 %v736_v41, %v723_v63  ;;  %v957_v14 = vadd.f32 %v1738_v8, %v929_v10  ;;  %v959_v16 = vadd.f32 %v1738_v8, %v931_v11 }
  0xbf   : > { %v778_v12 = vpop.f32.mrf.mxu3  ;;  %v792_v18 = vpop.f32.mrf.mxu0 }
  0xc0   : > { %v922_v9 = vmul.f32 %v1713_v48, %v737_v5  ;;  %v779_v15 = vadd.f32 %v778_v12, %v1711_v44  ;;  %v973_v20 = vmax.f32 %v957_v14, 0.0  ;;  %v820_v23 = vpop.f32.mrf.mxu1  ;;  %v975_v24 = vmax.f32 %v959_v16, 0.0 }
  0xc2   : > { %v950_v13 = vadd.f32 %v1717_v52, %v922_v9  ;;  %v793_v22 = vadd.f32 %v792_v18, %v779_v15  ;;  %989 = vst [vmem:[%s1728_s24 + $0x40] sm:$0xff] %v973_v20 }
  0xc3   : > { %v724_v17 = vpop.f32.mrf.mxu2  ;;  %991 = vst [vmem:[%s1728_s24 + $0x50] sm:$0xff] %v975_v24 }
  0xc4   : > { %v966_v19 = vmax.f32 %v950_v13, 0.0  ;;  %v725_v21 = vadd.f32 %v724_v17, %v1722_v57  ;;  %v924_v26 = vmul.f32 %v1713_v48, %v793_v22 }
  0xc6   : > { %982 = vst [vmem:[%s1728_s24 + $0x8] sm:$0xff] %v966_v19  ;;  %v739_v25 = vadd.f32 %v738_v43, %v725_v21  ;;  %v952_v29 = vadd.f32 %v1717_v52, %v924_v26 }
  0xc7   : > { %v780_v30 = vpop.f32.mrf.mxu3  ;;  %v794_v34 = vpop.f32.mrf.mxu0 }
  0xc8   : > { %v930_v28 = vmul.f32 %v1734_v4, %v739_v25  ;;  %v968_v32 = vmax.f32 %v952_v29, 0.0  ;;  %v781_v33 = vadd.f32 %v780_v30, %v1722_v57  ;;  %v822_v37 = vpop.f32.mrf.mxu1 }
  0xca   : > { %v958_v31 = vadd.f32 %v1738_v8, %v930_v28  ;;  %984 = vst [vmem:[%s1728_s24 + $0x18] sm:$0xff] %v968_v32  ;;  %v795_v36 = vadd.f32 %v794_v34, %v781_v33 }
  0xcc   : > { %v974_v35 = vmax.f32 %v958_v31, 0.0  ;;  %v932_v38 = vmul.f32 %v1734_v4, %v795_v36 }
  0xce   : > { %990 = vst [vmem:[%s1728_s24 + $0x48] sm:$0xff] %v974_v35  ;;  %v960_v39 = vadd.f32 %v1738_v8, %v932_v38 }
  0xd0   : > { %v976_v40 = vmax.f32 %v960_v39, 0.0  ;;  %v848_v42 = vpop.f32.mrf.mxu1 }
  0xd2   : > { %992 = vst [vmem:[%s1728_s24 + $0x58] sm:$0xff] %v976_v40 }
  0xd3   : > { %v834_v41 = vpop.f32.mrf.mxu0 }
  0xd4   : > { %v835_v43 = vadd.f32 %v834_v41, %v1711_v44 }
  0xd6   : > { %v849_v45 = vadd.f32 %v848_v42, %v835_v43 }
  0xd8   : > { %v926_v47 = vmul.f32 %v1713_v48, %v849_v45  ;;  %v850_v54 = vpop.f32.mrf.mxu1 }
  0xda   : > { %v954_v50 = vadd.f32 %v1717_v52, %v926_v47 }
  0xdb   : > { %v806_v46 = vpop.f32.mrf.mxu2  ;;  %v836_v27 = vpop.f32.mrf.mxu0 }
  0xdc   : > { %v807_v49 = vadd.f32 %v806_v46, %v1711_v44  ;;  %v970_v53 = vmax.f32 %v954_v50, 0.0  ;;  %v837_v56 = vadd.f32 %v836_v27, %v1722_v57 }
  0xde   : > { %v821_v51 = vadd.f32 %v820_v23, %v807_v49  ;;  %986 = vst [vmem:[%s1728_s24 + $0x28] sm:$0xff] %v970_v53  ;;  %v851_v59 = vadd.f32 %v850_v54, %v837_v56 }
  0xdf   : > { %v862_v0 = vpop.f32.mrf.mxu3 }
  0xe0   : > { %v925_v55 = vmul.f32 %v1713_v48, %v821_v51  ;;  %v934_v62 = vmul.f32 %v1734_v4, %v851_v59  ;;  %v863_v5 = vadd.f32 %v862_v0, %v1711_v44  ;;  %v890_v7 = vpop.f32.mrf.mxu1 }
  0xe1   : > { %v891_v10 = vadd.f32 %v890_v7, %v1711_v44 }
  0xe2   : > { %v953_v58 = vadd.f32 %v1717_v52, %v925_v55  ;;  %v962_v1 = vadd.f32 %v1738_v8, %v934_v62 }
  0xe3   : > { %v808_v60 = vpop.f32.mrf.mxu2  ;;  %v904_v9 = vpop.f32.mrf.mxu0 }
  0xe4   : > { %v969_v61 = vmax.f32 %v953_v58, 0.0  ;;  %v809_v63 = vadd.f32 %v808_v60, %v1722_v57  ;;  %v978_v3 = vmax.f32 %v962_v1, 0.0  ;;  %v905_v12 = vadd.f32 %v904_v9, %v891_v10 }
  0xe6   : > { %985 = vst [vmem:[%s1728_s24 + $0x20] sm:$0xff] %v969_v61  ;;  %v823_v2 = vadd.f32 %v822_v37, %v809_v63  ;;  %v928_v16 = vmul.f32 %v1713_v48, %v905_v12 }
  0xe7   : > { %994 = vst [vmem:[%s1728_s24 + $0x68] sm:$0xff] %v978_v3  ;;  %v864_v19 = vpop.f32.mrf.mxu3 }
  0xe8   : > { %v933_v6 = vmul.f32 %v1734_v4, %v823_v2  ;;  %v956_v18 = vadd.f32 %v1717_v52, %v928_v16  ;;  %v892_v44 = vpop.f32.mrf.mxu1  ;;  %v865_v23 = vadd.f32 %v864_v19, %v1722_v57 }
  0xe9   : > { %v893_v22 = vadd.f32 %v892_v44, %v1722_v57 }
  0xea   : > { %v961_v11 = vadd.f32 %v1738_v8, %v933_v6  ;;  %v972_v21 = vmax.f32 %v956_v18, 0.0 }
  0xeb   : > { %v876_v13 = vpop.f32.mrf.mxu2  ;;  %v906_v25 = vpop.f32.mrf.mxu0 }
  0xec   : > { %v977_v14 = vmax.f32 %v961_v11, 0.0  ;;  %v877_v15 = vadd.f32 %v876_v13, %v863_v5  ;;  %988 = vst [vmem:[%s1728_s24 + $0x38] sm:$0xff] %v972_v21  ;;  %v907_v26 = vadd.f32 %v906_v25, %v893_v22 }
  0xee   : > { %993 = vst [vmem:[%s1728_s24 + $0x60] sm:$0xff] %v977_v14  ;;  %v927_v17 = vmul.f32 %v1713_v48, %v877_v15  ;;  %v936_v29 = vmul.f32 %v1734_v4, %v907_v26 }
  0xf0   : > { %v955_v20 = vadd.f32 %v1717_v52, %v927_v17  ;;  %v964_v52 = vadd.f32 %v1738_v8, %v936_v29 }
  0xf2   : > { %v971_v24 = vmax.f32 %v955_v20, 0.0  ;;  %v980_v32 = vmax.f32 %v964_v52, 0.0 }
  0xf3   : > { %v878_v28 = vpop.f32.mrf.mxu2 }
  0xf4   : > { %987 = vst [vmem:[%s1728_s24 + $0x30] sm:$0xff] %v971_v24  ;;  %v879_v48 = vadd.f32 %v878_v28, %v865_v23 }
  0xf5   : > { %996 = vst [vmem:[%s1728_s24 + $0x78] sm:$0xff] %v980_v32 }
  0xf6   : > { %v935_v30 = vmul.f32 %v1734_v4, %v879_v48 }
  0xf8   : > { %v963_v31 = vadd.f32 %v1738_v8, %v935_v30 }
  0xfa   : > { %v979_v33 = vmax.f32 %v963_v31, 0.0 }
  0xfc   : > { %995 = vst [vmem:[%s1728_s24 + $0x70] sm:$0xff] %v979_v33 }
  0xfd PF: > { %s15_s18 = sadd.s32 1, %s1460_s18  }
  0xfe   : > { %p12_p4 = scmp.ge.s32.totalorder %s15_s18, 4  }
 0x100   :  { %14 = sbr.rel (!%p12_p4) target bundleno = 1 (0x1), region = 70 }

// kernel: _lambda_.20
= control target key start
LH: loop header
LB: loop body
LE: loop exit
PB: predicated region body
PF: predicated region fallthrough
CT: control target
= control target key end

     0   :  { %s4532_s18 = smov 0   ;;  %s5395_s0 = inlined_call_operand.vmem [shape: bf16[2,144,4096], index: 0, kind: input, shape index: {}]   ;;  %s5396_s1 = inlined_call_operand.vmem [shape: bf16[8,144], index: 1, kind: input, shape index: {}]   ;;  %s5397_s2 = inlined_call_operand.vmem [shape: f32[8,1], index: 2, kind: input, shape index: {}]   ;;  %s5398_s3 = inlined_call_operand.vmem [shape: f32[8,1], index: 3, kind: input, shape index: {}]   ;;  %s5399_s4 = inlined_call_operand.vmem [shape: f32[8,1], index: 4, kind: input, shape index: {}]   ;;  %s5400_s5 = inlined_call_operand.vmem [shape: f32[2,8,4096], index: 5, kind: output, shape index: {}]  }
   0x1 LB: > { %s2998_s19 = sadd.s32 4294967295, %s4499_s18   ;;  %p3002_p0 = scmp.ge.s32.totalorder %s4499_s18, 1  ;;  %s4499_s18 = sphi %s4532_s18, %s15_s18  }
   0x2   : > { %p187_p1 = scmp.lt.s32.totalorder %s4499_s18, 3 }
   0x4   : > { %p188_p2 = pnand %p3002_p0, %p187_p1 }
   0x5   : > { %p215_p3 = scmp.lt.s32.totalorder (!%p188_p2), %s2998_s19, 1 }
   0x6   : > { %191 = sbr.rel (%p188_p2) target bundleno = 461 (0x1cd), region = 40 }
   0xb   : > { %s5402_s19 = smov (!%p215_p3, %s2998_s19), 1  ;;  %v4546_v0 = vld [vmem:[%s5396_s1] sm:$0xff]  ;;  %vm1967_vm0 = vcmask 130048  }
   0xc   : > { %s4481_s20 = smul.u32 2304, %s5402_s19  ;;  %v523_v8 = vunpack.c.h.b16 %v4546_v0  ;;  %s4192_s7 = sshll.u32 %s5402_s19, 8 }
   0xd   : > { %s5018_s10 = scalar_lea.vmem %s5400_s5, %s4192_s7 }
   0xe   : > { %s4551_s25 = scalar_lea.vmem %s5395_s0, %s4481_s20  ;;  %v4572_v27 = vpack.c.b16 %v523_v8, %v523_v8 }
   0xf   : > { %v3904_v1 = vld [vmem:[%s4551_s25 + $0x700] sm:$0xf]  ;;  %v3912_v6 = vld [vmem:[%s4551_s25 + $0x708] sm:$0xf]  ;;  %v4417_v11 = vld [vmem:[%s4551_s25 + $0x704] sm:$0xf] }
  0x10   : > { %v4433_v2 = vld [vmem:[%s4551_s25 + $0x77c] sm:$0xf0]  ;;  %v4434_v7 = vld [vmem:[%s4551_s25 + $0x784] sm:$0xf0]  ;;  %v3906_v12 = vld [vmem:[%s4551_s25 + $0x780] sm:$0xf0] }
  0x11   : > { %v4032_v3 = vld [vmem:[%s4551_s25 + $0x800] sm:$0xf]  ;;  %v3905_v4 = vor.u32 %v4433_v2, %v3904_v1  ;;  %v3913_v10 = vor.u32 %v4434_v7, %v3912_v6  ;;  %v4449_v13 = vld [vmem:[%s4551_s25 + $0x804] sm:$0xf]  ;;  %v3909_v14 = vor.u32 %v4417_v11, %v3906_v12  ;;  %v3784_v20 = vld [vmem:[%s4551_s25 + $0x608] sm:$0xf] }
  0x12   : > { %v4465_v5 = vld [vmem:[%s4551_s25 + $0x87c] sm:$0xf0]  ;;  %v4034_v15 = vld [vmem:[%s4551_s25 + $0x880] sm:$0xf0]  ;;  %v4402_v21 = vld [vmem:[%s4551_s25 + $0x684] sm:$0xf0] }
  0x13   : > { %v4033_v9 = vor.u32 %v4465_v5, %v4032_v3  ;;  %1971 = vmatpush.bf16.msra.mxu0 %v3905_v4  ;;  %v3776_v16 = vld [vmem:[%s4551_s25 + $0x600] sm:$0xf]  ;;  %2023 = vmatpush.bf16.msra.mxu1 %v3913_v10  ;;  %v4037_v18 = vor.u32 %v4449_v13, %v4034_v15  ;;  %v4385_v22 = vld [vmem:[%s4551_s25 + $0x604] sm:$0xf]  ;;  %v3785_v23 = vor.u32 %v4402_v21, %v3784_v20  ;;  %v4040_v25 = vld [vmem:[%s4551_s25 + $0x808] sm:$0xf] }
  0x14   : > { %v4401_v17 = vld [vmem:[%s4551_s25 + $0x67c] sm:$0xf0]  ;;  %v3778_v24 = vld [vmem:[%s4551_s25 + $0x680] sm:$0xf0]  ;;  %v4466_v26 = vld [vmem:[%s4551_s25 + $0x884] sm:$0xf0] }
  0x15   : > { %1991 = vmatpush.bf16.msra.mxu2 %v4033_v9  ;;  %v3777_v19 = vor.u32 %v4401_v17, %v3776_v16  ;;  %2017 = vmatpush.bf16.msra.mxu3 %v4037_v18  ;;  %v3781_v28 = vor.u32 %v4385_v22, %v3778_v24  ;;  %v4041_v29 = vor.u32 %v4466_v26, %v4040_v25  ;;  %v4418_v30 = vld [vmem:[%s4551_s25 + $0x70c] sm:$0xf]  ;;  %v3648_v32 = vld [vmem:[%s4551_s25 + $0x500] sm:$0xf]  ;;  %v3656_v35 = vld [vmem:[%s4551_s25 + $0x508] sm:$0xf] }
  0x16   : > { %v3914_v31 = vld [vmem:[%s4551_s25 + $0x788] sm:$0xf0]  ;;  %v4369_v34 = vld [vmem:[%s4551_s25 + $0x57c] sm:$0xf0]  ;;  %v4370_v36 = vld [vmem:[%s4551_s25 + $0x584] sm:$0xf0] }
  0x17   : > { %1972 = vmatpush.bf16.msra.mxu0 %v3777_v19  ;;  %v3917_v33 = vor.u32 %v4418_v30, %v3914_v31  ;;  %2024 = vmatpush.bf16.msra.mxu1 %v3785_v23  ;;  %v3649_v37 = vor.u32 %v4369_v34, %v3648_v32  ;;  %v3657_v38 = vor.u32 %v4370_v36, %v3656_v35  ;;  %v4353_v39 = vld [vmem:[%s4551_s25 + $0x504] sm:$0xf]  ;;  %v4386_v41 = vld [vmem:[%s4551_s25 + $0x60c] sm:$0xf]  ;;  %v3520_v44 = vld [vmem:[%s4551_s25 + $0x400] sm:$0xf] }
  0x18   : > { %4158 = vmatmul.msk.bf16.vlgmr.msra.gmra.mxu2 %vm1967_vm0, %v4572_v27  ;;  %v3650_v40 = vld [vmem:[%s4551_s25 + $0x580] sm:$0xf0]  ;;  %4159 = vmatmul.msk.bf16.vlgmr.msra.gmra.mxu3 %vm1967_vm0, %v4572_v27  ;;  %v3786_v43 = vld [vmem:[%s4551_s25 + $0x688] sm:$0xf0]  ;;  %v4337_v45 = vld [vmem:[%s4551_s25 + $0x47c] sm:$0xf0] }
  0x19   : > { %1997 = vmatpush.bf16.msrb.mxu2 %v3909_v14  ;;  %2043 = vmatpush.bf16.msrb.mxu3 %v4041_v29  ;;  %v3653_v42 = vor.u32 %v4353_v39, %v3650_v40  ;;  %v3789_v46 = vor.u32 %v4386_v41, %v3786_v43  ;;  %v3528_v47 = vld [vmem:[%s4551_s25 + $0x408] sm:$0xf]  ;;  %v4321_v49 = vld [vmem:[%s4551_s25 + $0x404] sm:$0xf]  ;;  %v3521_v50 = vor.u32 %v4337_v45, %v3520_v44  ;;  %v4354_v52 = vld [vmem:[%s4551_s25 + $0x50c] sm:$0xf]  ;;  %v522_v39 = vunpack.c.l.b16 %v4546_v0 }
  0x1a   : > { %v4338_v48 = vld [vmem:[%s4551_s25 + $0x484] sm:$0xf0]  ;;  %v3522_v51 = vld [vmem:[%s4551_s25 + $0x480] sm:$0xf0]  ;;  %v3658_v53 = vld [vmem:[%s4551_s25 + $0x588] sm:$0xf0] }
  0x1b   : > { %1973 = vmatpush.bf16.msra.mxu0 %v3649_v37  ;;  %2025 = vmatpush.bf16.msra.mxu1 %v3657_v38  ;;  %v3529_v54 = vor.u32 %v4338_v48, %v3528_v47  ;;  %v3392_v55 = vld [vmem:[%s4551_s25 + $0x300] sm:$0xf]  ;;  %v3525_v57 = vor.u32 %v4321_v49, %v3522_v51  ;;  %v3400_v58 = vld [vmem:[%s4551_s25 + $0x308] sm:$0xf]  ;;  %v3661_v60 = vor.u32 %v4354_v52, %v3658_v53  ;;  %v4289_v61 = vld [vmem:[%s4551_s25 + $0x304] sm:$0xf] }
  0x1c   : > { %v4305_v56 = vld [vmem:[%s4551_s25 + $0x37c] sm:$0xf0]  ;;  %v4306_v59 = vld [vmem:[%s4551_s25 + $0x384] sm:$0xf0]  ;;  %v3394_v62 = vld [vmem:[%s4551_s25 + $0x380] sm:$0xf0] }
  0x1d   : > { %1998 = vmatpush.bf16.msrb.mxu2 %v3781_v28  ;;  %2049 = vmatpush.bf16.msra.mxu3 %v3917_v33  ;;  %v3393_v63 = vor.u32 %v4305_v56, %v3392_v55  ;;  %v4322_v1 = vld [vmem:[%s4551_s25 + $0x40c] sm:$0xf]  ;;  %v3401_v3 = vor.u32 %v4306_v59, %v3400_v58  ;;  %v3264_v4 = vld [vmem:[%s4551_s25 + $0x200] sm:$0xf]  ;;  %v3397_v6 = vor.u32 %v4289_v61, %v3394_v62  ;;  %v3272_v7 = vld [vmem:[%s4551_s25 + $0x208] sm:$0xf] }
  0x1e   : > { %v3530_v2 = vld [vmem:[%s4551_s25 + $0x488] sm:$0xf0]  ;;  %v4273_v5 = vld [vmem:[%s4551_s25 + $0x27c] sm:$0xf0]  ;;  %v4274_v8 = vld [vmem:[%s4551_s25 + $0x284] sm:$0xf0]  ;;  %v4642_v55 = vpack.c.b16 %v522_v39, %v522_v39 }
  0x1f   : > { %1974 = vmatpush.bf16.msra.mxu0 %v3521_v50  ;;  %2026 = vmatpush.bf16.msra.mxu1 %v3529_v54  ;;  %v3533_v9 = vor.u32 %v4322_v1, %v3530_v2  ;;  %v4257_v10 = vld [vmem:[%s4551_s25 + $0x204] sm:$0xf]  ;;  %v3265_v12 = vor.u32 %v4273_v5, %v3264_v4  ;;  %v4290_v13 = vld [vmem:[%s4551_s25 + $0x30c] sm:$0xf]  ;;  %v3273_v15 = vor.u32 %v4274_v8, %v3272_v7  ;;  %v3136_v16 = vld [vmem:[%s4551_s25 + $0x100] sm:$0xf] }
  0x20   : > { %v3266_v11 = vld [vmem:[%s4551_s25 + $0x280] sm:$0xf0]  ;;  %v3402_v14 = vld [vmem:[%s4551_s25 + $0x388] sm:$0xf0]  ;;  %v4241_v17 = vld [vmem:[%s4551_s25 + $0x17c] sm:$0xf0] }
  0x21   : > { %1999 = vmatpush.bf16.msrb.mxu2 %v3653_v42  ;;  %2050 = vmatpush.bf16.msra.mxu3 %v3789_v46  ;;  %v3269_v18 = vor.u32 %v4257_v10, %v3266_v11  ;;  %v3144_v19 = vld [vmem:[%s4551_s25 + $0x108] sm:$0xf]  ;;  %v3405_v21 = vor.u32 %v4290_v13, %v3402_v14  ;;  %v4225_v22 = vld [vmem:[%s4551_s25 + $0x104] sm:$0xf]  ;;  %v3137_v24 = vor.u32 %v4241_v17, %v3136_v16  ;;  %v4258_v25 = vld [vmem:[%s4551_s25 + $0x20c] sm:$0xf] }
  0x22   : > { %v4242_v20 = vld [vmem:[%s4551_s25 + $0x184] sm:$0xf0]  ;;  %v3138_v23 = vld [vmem:[%s4551_s25 + $0x180] sm:$0xf0]  ;;  %v3274_v26 = vld [vmem:[%s4551_s25 + $0x288] sm:$0xf0] }
  0x23   : > { %1975 = vmatpush.bf16.msra.mxu0 %v3393_v63  ;;  %2027 = vmatpush.bf16.msra.mxu1 %v3401_v3  ;;  %v3008_v28 = vld [vmem:[%s4551_s25] sm:$0xf]  ;;  %v3145_v29 = vor.u32 %v4242_v20, %v3144_v19  ;;  %v3016_v31 = vld [vmem:[%s4551_s25 + $0x8] sm:$0xf]  ;;  %v3141_v33 = vor.u32 %v4225_v22, %v3138_v23  ;;  %v4193_v34 = vld [vmem:[%s4551_s25 + $0x4] sm:$0xf]  ;;  %v3277_v37 = vor.u32 %v4258_v25, %v3274_v26 }
  0x24   : > { %v4209_v30 = vld [vmem:[%s4551_s25 + $0x7c] sm:$0xf0]  ;;  %v4210_v32 = vld [vmem:[%s4551_s25 + $0x84] sm:$0xf0]  ;;  %v4450_v35 = vld [vmem:[%s4551_s25 + $0x80c] sm:$0xf] }
  0x25   : > { %2000 = vmatpush.bf16.msrb.mxu2 %v3525_v57  ;;  %2051 = vmatpush.bf16.msra.mxu3 %v3661_v60  ;;  %v4042_v36 = vld [vmem:[%s4551_s25 + $0x888] sm:$0xf0]  ;;  %v3010_v38 = vld [vmem:[%s4551_s25 + $0x80] sm:$0xf0]  ;;  %v4048_v40 = vld [vmem:[%s4551_s25 + $0x810] sm:$0xf]  ;;  %v3009_v42 = vor.u32 %v4209_v30, %v3008_v28  ;;  %v3017_v45 = vor.u32 %v4210_v32, %v3016_v31 }
  0x26   : > { %v4467_v41 = vld [vmem:[%s4551_s25 + $0x88c] sm:$0xf0]  ;;  %v4226_v46 = vld [vmem:[%s4551_s25 + $0x10c] sm:$0xf]  ;;  %v4045_v48 = vor.u32 %v4450_v35, %v4042_v36  ;;  %v515_v49 = vld [vmem:[%s5397_s2] sm:$0xff]  ;;  %v3013_v0 = vor.u32 %v4193_v34, %v3010_v38  ;;  %v4501_v53 = vmov 0  }
  0x27   : > { %1976 = vmatpush.bf16.msra.mxu0 %v3265_v12  ;;  %2028 = vmatpush.bf16.msra.mxu1 %v3273_v15  ;;  %v3920_v43 = vld [vmem:[%s4551_s25 + $0x710] sm:$0xf]  ;;  %v3146_v47 = vld [vmem:[%s4551_s25 + $0x188] sm:$0xf0]  ;;  %v4419_v50 = vld [vmem:[%s4551_s25 + $0x714] sm:$0xf]  ;;  %v4049_v52 = vor.u32 %v4467_v41, %v4048_v40 }
  0x28   : > { %4160 = vmatmul.msk.bf16.vlgmr.msrb.gmra.mxu3 %vm1967_vm0, %v4572_v27  ;;  %v4435_v44 = vld [vmem:[%s4551_s25 + $0x78c] sm:$0xf0]  ;;  %v3922_v51 = vld [vmem:[%s4551_s25 + $0x790] sm:$0xf0]  ;;  %4491 = vset.pattern.permute.xlu0 %v4501_v53  ;;  %v3149_v57 = vor.u32 %v4226_v46, %v3146_v47  ;;  %v4194_v59 = vld [vmem:[%s4551_s25 + $0xc] sm:$0xf] }
  0x29   : > { %2001 = vmatpush.bf16.msrb.mxu2 %v3397_v6  ;;  %2052 = vmatpush.bf16.msra.mxu3 %v3533_v9  ;;  %v3921_v54 = vor.u32 %v4435_v44, %v3920_v43  ;;  %v3792_v56 = vld [vmem:[%s4551_s25 + $0x610] sm:$0xf]  ;;  %v3018_v60 = vld [vmem:[%s4551_s25 + $0x88] sm:$0xf0]  ;;  %v3925_v61 = vor.u32 %v4419_v50, %v3922_v51  ;;  %v4387_v62 = vld [vmem:[%s4551_s25 + $0x614] sm:$0xf] }
  0x2a   : > { %518 = vperm.xlu0 %4491, %v515_v49   ;;  %v4403_v58 = vld [vmem:[%s4551_s25 + $0x68c] sm:$0xf0]  ;;  %4492 = vset.pattern.permute.xlu1 %v4501_v53  ;;  %v3794_v63 = vld [vmem:[%s4551_s25 + $0x690] sm:$0xf0]  ;;  %v3928_v1 = vld [vmem:[%s4551_s25 + $0x718] sm:$0xf]  ;;  %v3021_v7 = vor.u32 %v4194_v59, %v3018_v60 }
  0x2b   : > { %1977 = vmatpush.bf16.msra.mxu0 %v3137_v24  ;;  %2029 = vmatpush.bf16.msra.mxu1 %v3145_v29  ;;  %v4436_v2 = vld [vmem:[%s4551_s25 + $0x794] sm:$0xf0]  ;;  %v4451_v3 = vld [vmem:[%s4551_s25 + $0x814] sm:$0xf]  ;;  %v3793_v5 = vor.u32 %v4403_v58, %v3792_v56  ;;  %v3664_v8 = vld [vmem:[%s4551_s25 + $0x510] sm:$0xf]  ;;  %v3797_v11 = vor.u32 %v4387_v62, %v3794_v63 }
  0x2c   : > { %v4050_v4 = vld [vmem:[%s4551_s25 + $0x890] sm:$0xf0]  ;;  %v4371_v9 = vld [vmem:[%s4551_s25 + $0x58c] sm:$0xf0]  ;;  %v2803_v10 = vld [vmem:[%s5398_s3] sm:$0xff]  ;;  %v3929_v12 = vor.u32 %v4436_v2, %v3928_v1 }
  0x2d   : > { %2002 = vmatpush.bf16.msrb.mxu2 %v3269_v18  ;;  %2053 = vmatpush.bf16.msra.mxu3 %v3405_v21  ;;  %v4053_v6 = vor.u32 %v4451_v3, %v4050_v4  ;;  %v4355_v13 = vld [vmem:[%s4551_s25 + $0x514] sm:$0xf]  ;;  %v2841_v14 = vld [vmem:[%s5399_s4] sm:$0xff]  ;;  %v3800_v16 = vld [vmem:[%s4551_s25 + $0x618] sm:$0xf]  ;;  %v3665_v18 = vor.u32 %v4371_v9, %v3664_v8 }
  0x2e   : > { %v3666_v15 = vld [vmem:[%s4551_s25 + $0x590] sm:$0xf0]  ;;  %v4404_v17 = vld [vmem:[%s4551_s25 + $0x694] sm:$0xf0]  ;;  %2844 = vperm.xlu1 %4492, %v2841_v14   ;;  %v3536_v19 = vld [vmem:[%s4551_s25 + $0x410] sm:$0xf] }
  0x2f   : > { %1978 = vmatpush.bf16.msra.mxu0 %v3009_v42  ;;  %2030 = vmatpush.bf16.msra.mxu1 %v3017_v45  ;;  %v4339_v20 = vld [vmem:[%s4551_s25 + $0x48c] sm:$0xf0]  ;;  %v3669_v21 = vor.u32 %v4355_v13, %v3666_v15  ;;  %v3801_v22 = vor.u32 %v4404_v17, %v3800_v16  ;;  %v4323_v23 = vld [vmem:[%s4551_s25 + $0x414] sm:$0xf]  ;;  %v3672_v25 = vld [vmem:[%s4551_s25 + $0x518] sm:$0xf] }
  0x30   : > { %v3538_v24 = vld [vmem:[%s4551_s25 + $0x490] sm:$0xf0]  ;;  %v4372_v26 = vld [vmem:[%s4551_s25 + $0x594] sm:$0xf0]  ;;  %v3537_v28 = vor.u32 %v4339_v20, %v3536_v19  ;;  %v3408_v29 = vld [vmem:[%s4551_s25 + $0x310] sm:$0xf] }
  0x31   : > { %2003 = vmatpush.bf16.msrb.mxu2 %v3141_v33  ;;  %2054 = vmatpush.bf16.msra.mxu3 %v3277_v37  ;;  %v4307_v30 = vld [vmem:[%s4551_s25 + $0x38c] sm:$0xf0]  ;;  %v3541_v31 = vor.u32 %v4323_v23, %v3538_v24  ;;  %v3673_v32 = vor.u32 %v4372_v26, %v3672_v25  ;;  %v4291_v33 = vld [vmem:[%s4551_s25 + $0x314] sm:$0xf]  ;;  %v3544_v35 = vld [vmem:[%s4551_s25 + $0x418] sm:$0xf] }
  0x32   : > { %1979 = vmatmul.bf16.vlgmr.msra.gmra.mxu0 %v4642_v55  ;;  %2031 = vmatmul.bf16.vlgmr.msra.gmra.mxu1 %v4642_v55  ;;  %v3410_v34 = vld [vmem:[%s4551_s25 + $0x390] sm:$0xf0]  ;;  %v4340_v36 = vld [vmem:[%s4551_s25 + $0x494] sm:$0xf0]  ;;  %v3409_v37 = vor.u32 %v4307_v30, %v3408_v29  ;;  %v4420_v38 = vld [vmem:[%s4551_s25 + $0x71c] sm:$0xf] }
  0x33   : > { %2069 = vmatpush.bf16.msrb.mxu0 %v4045_v48  ;;  %2095 = vmatpush.bf16.msrb.mxu1 %v4049_v52  ;;  %v3930_v39 = vld [vmem:[%s4551_s25 + $0x798] sm:$0xf0]  ;;  %v3280_v40 = vld [vmem:[%s4551_s25 + $0x210] sm:$0xf]  ;;  %v3413_v42 = vor.u32 %v4291_v33, %v3410_v34  ;;  %v3545_v43 = vor.u32 %v4340_v36, %v3544_v35  ;;  %v4259_v44 = vld [vmem:[%s4551_s25 + $0x214] sm:$0xf] }
  0x34   : > { %2806 = vperm.xlu0 %4491, %v2803_v10   ;;  %v4275_v41 = vld [vmem:[%s4551_s25 + $0x28c] sm:$0xf0]  ;;  %v3933_v45 = vor.u32 %v4420_v38, %v3930_v39  ;;  %v3282_v46 = vld [vmem:[%s4551_s25 + $0x290] sm:$0xf0]  ;;  %v3416_v47 = vld [vmem:[%s4551_s25 + $0x318] sm:$0xf] }
  0x35   : > { %2004 = vmatpush.bf16.msrb.mxu2 %v3013_v0  ;;  %2055 = vmatpush.bf16.msra.mxu3 %v3149_v57  ;;  %v4308_v48 = vld [vmem:[%s4551_s25 + $0x394] sm:$0xf0]  ;;  %v3281_v49 = vor.u32 %v4275_v41, %v3280_v40  ;;  %v4388_v0 = vld [vmem:[%s4551_s25 + $0x61c] sm:$0xf]  ;;  %v3152_v51 = vld [vmem:[%s4551_s25 + $0x110] sm:$0xf]  ;;  %v3285_v53 = vor.u32 %v4259_v44, %v3282_v46 }
  0x36   : > { %v3802_v50 = vld [vmem:[%s4551_s25 + $0x698] sm:$0xf0]  ;;  %v4243_v52 = vld [vmem:[%s4551_s25 + $0x18c] sm:$0xf0]  ;;  %v4227_v56 = vld [vmem:[%s4551_s25 + $0x114] sm:$0xf] }
  0x37   : > { %2101 = vmatpush.bf16.msra.mxu0 %v3925_v61  ;;  %2121 = vmatpush.bf16.msra.mxu1 %v4053_v6  ;;  %v3805_v57 = vor.u32 %v4388_v0, %v3802_v50  ;;  %v3154_v58 = vld [vmem:[%s4551_s25 + $0x190] sm:$0xf0]  ;;  %v3288_v59 = vld [vmem:[%s4551_s25 + $0x218] sm:$0xf]  ;;  %v3153_v61 = vor.u32 %v4243_v52, %v3152_v51  ;;  %v4356_v62 = vld [vmem:[%s4551_s25 + $0x51c] sm:$0xf] }
  0x38   : > { %2005 = vmatmul.bf16.vlgmr.msrb.gmra.mxu2 %v4642_v55  ;;  %v4276_v60 = vld [vmem:[%s4551_s25 + $0x294] sm:$0xf0]  ;;  %v3674_v63 = vld [vmem:[%s4551_s25 + $0x598] sm:$0xf0]  ;;  %v3024_v1 = vld [vmem:[%s4551_s25 + $0x10] sm:$0xf]  ;;  %v3157_v3 = vor.u32 %v4227_v56, %v3154_v58 }
  0x39   : > { %2075 = vmatpush.bf16.msra.mxu2 %v3921_v54  ;;  %2056 = vmatpush.bf16.msra.mxu3 %v3021_v7  ;;  %v3417_v54 = vor.u32 %v4308_v48, %v3416_v47  ;;  %v4211_v2 = vld [vmem:[%s4551_s25 + $0x8c] sm:$0xf0]  ;;  %v3289_v4 = vor.u32 %v4276_v60, %v3288_v59  ;;  %v4056_v6 = vld [vmem:[%s4551_s25 + $0x818] sm:$0xf]  ;;  %v3677_v8 = vor.u32 %v4356_v62, %v3674_v63  ;;  %v3026_v9 = vld [vmem:[%s4551_s25 + $0x90] sm:$0xf0] }
  0x3a   : > { %v4468_v7 = vld [vmem:[%s4551_s25 + $0x894] sm:$0xf0]  ;;  %v4324_v13 = vld [vmem:[%s4551_s25 + $0x41c] sm:$0xf]  ;;  %v3936_v15 = vld [vmem:[%s4551_s25 + $0x720] sm:$0xf] }
  0x3b   : > { %2102 = vmatpush.bf16.msra.mxu0 %v3797_v11  ;;  %v3160_v10 = vld [vmem:[%s4551_s25 + $0x118] sm:$0xf]  ;;  %v3546_v14 = vld [vmem:[%s4551_s25 + $0x498] sm:$0xf0]  ;;  %v4057_v16 = vor.u32 %v4468_v7, %v4056_v6  ;;  %v4437_v17 = vld [vmem:[%s4551_s25 + $0x79c] sm:$0xf0] }
  0x3c   : > { %2057 = vmatmul.bf16.vlgmr.msra.gmra.mxu3 %v4642_v55  ;;  %v4244_v11 = vld [vmem:[%s4551_s25 + $0x194] sm:$0xf0]  ;;  %v4058_v19 = vld [vmem:[%s4551_s25 + $0x898] sm:$0xf0]  ;;  %v3549_v24 = vor.u32 %v4324_v13, %v3546_v14  ;;  %v4421_v26 = vld [vmem:[%s4551_s25 + $0x724] sm:$0xf]  ;;  %v3937_v29 = vor.u32 %v4437_v17, %v3936_v15 }
  0x3d   : > { %2076 = vmatpush.bf16.msra.mxu2 %v3793_v5  ;;  %2127 = vmatpush.bf16.msrb.mxu3 %v3929_v12  ;;  %v4195_v5 = vld [vmem:[%s4551_s25 + $0x14] sm:$0xf]  ;;  %v3025_v12 = vor.u32 %v4211_v2, %v3024_v1  ;;  %v4212_v23 = vld [vmem:[%s4551_s25 + $0x94] sm:$0xf0]  ;;  %v4292_v25 = vld [vmem:[%s4551_s25 + $0x31c] sm:$0xf] }
  0x3e   : > { %v3029_v20 = vor.u32 %v4195_v5, %v3026_v9  ;;  %v4469_v33 = vld [vmem:[%s4551_s25 + $0x89c] sm:$0xf0]  ;;  %v4389_v38 = vld [vmem:[%s4551_s25 + $0x624] sm:$0xf]  ;;  %v3290_v46 = vld [vmem:[%s4551_s25 + $0x298] sm:$0xf0] }
  0x3f   : > { %2103 = vmatpush.bf16.msra.mxu0 %v3669_v21  ;;  %v3161_v21 = vor.u32 %v4244_v11, %v3160_v10  ;;  %v3808_v34 = vld [vmem:[%s4551_s25 + $0x620] sm:$0xf]  ;;  %v3810_v41 = vld [vmem:[%s4551_s25 + $0x6a0] sm:$0xf0]  ;;  %v3162_v58 = vld [vmem:[%s4551_s25 + $0x198] sm:$0xf0] }
  0x40   : > { %v4405_v35 = vld [vmem:[%s4551_s25 + $0x69c] sm:$0xf0]  ;;  %v4357_v50 = vld [vmem:[%s4551_s25 + $0x524] sm:$0xf]  ;;  %v4196_v6 = vld [vmem:[%s4551_s25 + $0x1c] sm:$0xf] }
  0x41   : > { %2077 = vmatpush.bf16.msra.mxu2 %v3665_v18  ;;  %2128 = vmatpush.bf16.msrb.mxu3 %v3801_v22  ;;  %v4452_v18 = vld [vmem:[%s4551_s25 + $0x81c] sm:$0xf]  ;;  %v3032_v22 = vld [vmem:[%s4551_s25 + $0x18] sm:$0xf]  ;;  %v3809_v44 = vor.u32 %v4405_v35, %v3808_v34  ;;  %v3680_v47 = vld [vmem:[%s4551_s25 + $0x520] sm:$0xf] }
  0x42   : > { %4161 = vmatmul.msk.bf16.vlgmr.msrb.gmra.mxu0 %vm1967_vm0, %v4572_v27  ;;  %4162 = vmatmul.msk.bf16.vlgmr.msrb.gmra.mxu1 %vm1967_vm0, %v4572_v27  ;;  %v4061_v30 = vor.u32 %v4452_v18, %v4058_v19  ;;  %v3033_v36 = vor.u32 %v4212_v23, %v3032_v22  ;;  %v4373_v48 = vld [vmem:[%s4551_s25 + $0x59c] sm:$0xf0]  ;;  %v3682_v52 = vld [vmem:[%s4551_s25 + $0x5a0] sm:$0xf0]  ;;  %v3034_v7 = vld [vmem:[%s4551_s25 + $0x98] sm:$0xf0] }
  0x43   : > { %2104 = vmatpush.bf16.msra.mxu0 %v3541_v31  ;;  %2153 = vmatpush.bf16.msrb.mxu1 %v3933_v45  ;;  %v3418_v31 = vld [vmem:[%s4551_s25 + $0x398] sm:$0xf0]  ;;  %v3681_v56 = vor.u32 %v4373_v48, %v3680_v47  ;;  %v3552_v59 = vld [vmem:[%s4551_s25 + $0x420] sm:$0xf]  ;;  %v4325_v63 = vld [vmem:[%s4551_s25 + $0x424] sm:$0xf]  ;;  %v3037_v14 = vor.u32 %v4196_v6, %v3034_v7 }
  0x44   : > { %v3421_v39 = vor.u32 %v4292_v25, %v3418_v31  ;;  %v4260_v45 = vld [vmem:[%s4551_s25 + $0x21c] sm:$0xf]  ;;  %v4341_v60 = vld [vmem:[%s4551_s25 + $0x49c] sm:$0xf0]  ;;  %v3554_v2 = vld [vmem:[%s4551_s25 + $0x4a0] sm:$0xf0] }
  0x45   : > { %2078 = vmatpush.bf16.msra.mxu2 %v3537_v28  ;;  %2129 = vmatpush.bf16.msrb.mxu3 %v3673_v32  ;;  %v3938_v28 = vld [vmem:[%s4551_s25 + $0x7a0] sm:$0xf0]  ;;  %v4064_v32 = vld [vmem:[%s4551_s25 + $0x820] sm:$0xf]  ;;  %v3293_v51 = vor.u32 %v4260_v45, %v3290_v46  ;;  %v3553_v5 = vor.u32 %v4341_v60, %v3552_v59  ;;  %v3560_v17 = vld [vmem:[%s4551_s25 + $0x428] sm:$0xf] }
  0x46   : > { %v4065_v40 = vor.u32 %v4469_v33, %v4064_v32  ;;  %v4309_v9 = vld [vmem:[%s4551_s25 + $0x39c] sm:$0xf0]  ;;  %v4453_v10 = vld [vmem:[%s4551_s25 + $0x824] sm:$0xf]  ;;  %v3946_v22 = vld [vmem:[%s4551_s25 + $0x7a8] sm:$0xf0] }
  0x47   : > { %2105 = vmatpush.bf16.msra.mxu0 %v3413_v42  ;;  %2154 = vmatpush.bf16.msrb.mxu1 %v3805_v57  ;;  %v3944_v42 = vld [vmem:[%s4551_s25 + $0x728] sm:$0xf]  ;;  %v4228_v57 = vld [vmem:[%s4551_s25 + $0x11c] sm:$0xf]  ;;  %v4066_v11 = vld [vmem:[%s4551_s25 + $0x8a0] sm:$0xf0] }
  0x48   : > { %v3165_v1 = vor.u32 %v4228_v57, %v3162_v58  ;;  %v4293_v15 = vld [vmem:[%s4551_s25 + $0x324] sm:$0xf]  ;;  %v4069_v19 = vor.u32 %v4453_v10, %v4066_v11  ;;  %v3296_v23 = vld [vmem:[%s4551_s25 + $0x220] sm:$0xf]  ;;  %v3432_v31 = vld [vmem:[%s4551_s25 + $0x328] sm:$0xf] }
  0x49   : > { %2079 = vmatpush.bf16.msra.mxu2 %v3409_v37  ;;  %2130 = vmatpush.bf16.msrb.mxu3 %v3545_v43  ;;  %v3941_v37 = vor.u32 %v4421_v26, %v3938_v28  ;;  %v4438_v43 = vld [vmem:[%s4551_s25 + $0x7a4] sm:$0xf0]  ;;  %v4390_v34 = vld [vmem:[%s4551_s25 + $0x62c] sm:$0xf]  ;;  %v3040_v48 = vld [vmem:[%s4551_s25 + $0x20] sm:$0xf] }
  0x4a   : > { %v3945_v0 = vor.u32 %v4438_v43, %v3944_v42  ;;  %v4310_v33 = vld [vmem:[%s4551_s25 + $0x3a4] sm:$0xf0]  ;;  %v3818_v35 = vld [vmem:[%s4551_s25 + $0x6a8] sm:$0xf0]  ;;  %v3170_v42 = vld [vmem:[%s4551_s25 + $0x1a0] sm:$0xf0] }
  0x4b   : > { %2106 = vmatpush.bf16.msra.mxu0 %v3285_v53  ;;  %2155 = vmatpush.bf16.msrb.mxu1 %v3677_v8  ;;  %v3816_v53 = vld [vmem:[%s4551_s25 + $0x628] sm:$0xf]  ;;  %v3424_v8 = vld [vmem:[%s4551_s25 + $0x320] sm:$0xf]  ;;  %v4358_v46 = vld [vmem:[%s4551_s25 + $0x52c] sm:$0xf] }
  0x4c   : > { %v3425_v18 = vor.u32 %v4309_v9, %v3424_v8  ;;  %v3304_v43 = vld [vmem:[%s4551_s25 + $0x228] sm:$0xf]  ;;  %v3690_v47 = vld [vmem:[%s4551_s25 + $0x5a8] sm:$0xf0]  ;;  %v4423_v8 = vld [vmem:[%s4551_s25 + $0x734] sm:$0xf] }
  0x4d   : > { %2080 = vmatpush.bf16.msra.mxu2 %v3281_v49  ;;  %2131 = vmatpush.bf16.msrb.mxu3 %v3417_v54  ;;  %v3813_v49 = vor.u32 %v4389_v38, %v3810_v41  ;;  %v4406_v54 = vld [vmem:[%s4551_s25 + $0x6a4] sm:$0xf0]  ;;  %v4229_v41 = vld [vmem:[%s4551_s25 + $0x124] sm:$0xf]  ;;  %v4326_v60 = vld [vmem:[%s4551_s25 + $0x42c] sm:$0xf] }
  0x4e   : > { %v3817_v62 = vor.u32 %v4406_v54, %v3816_v53  ;;  %v4278_v45 = vld [vmem:[%s4551_s25 + $0x2a4] sm:$0xf0]  ;;  %v3693_v53 = vor.u32 %v4358_v46, %v3690_v47  ;;  %v4197_v54 = vld [vmem:[%s4551_s25 + $0x24] sm:$0xf]  ;;  %v3954_v9 = vld [vmem:[%s4551_s25 + $0x7b0] sm:$0xf0] }
  0x4f   : > { %2107 = vmatpush.bf16.msra.mxu0 %v3157_v3  ;;  %2156 = vmatpush.bf16.msrb.mxu1 %v3549_v24  ;;  %v3688_v3 = vld [vmem:[%s4551_s25 + $0x528] sm:$0xf]  ;;  %v4277_v24 = vld [vmem:[%s4551_s25 + $0x29c] sm:$0xf0] }
  0x50   : > { %v3297_v32 = vor.u32 %v4277_v24, %v3296_v23  ;;  %v3176_v57 = vld [vmem:[%s4551_s25 + $0x128] sm:$0xf]  ;;  %v4391_v23 = vld [vmem:[%s4551_s25 + $0x634] sm:$0xf] }
  0x51   : > { %2081 = vmatpush.bf16.msra.mxu2 %v3153_v61  ;;  %2132 = vmatpush.bf16.msrb.mxu3 %v3289_v4  ;;  %v3685_v61 = vor.u32 %v4357_v50, %v3682_v52  ;;  %v4374_v4 = vld [vmem:[%s4551_s25 + $0x5a4] sm:$0xf0]  ;;  %v3305_v52 = vor.u32 %v4278_v45, %v3304_v43  ;;  %v3826_v24 = vld [vmem:[%s4551_s25 + $0x6b0] sm:$0xf0]  ;;  %v4343_v45 = vld [vmem:[%s4551_s25 + $0x4ac] sm:$0xf0] }
  0x52   : > { %4163 = vmatmul.msk.bf16.vlgmr.msra.gmra.mxu1 %vm1967_vm0, %v4572_v27  ;;  %v3689_v13 = vor.u32 %v4374_v4, %v3688_v3  ;;  %v4072_v50 = vld [vmem:[%s4551_s25 + $0x828] sm:$0xf]  ;;  %v3952_v3 = vld [vmem:[%s4551_s25 + $0x730] sm:$0xf] }
  0x53   : > { %2108 = vmatpush.bf16.msra.mxu0 %v3029_v20  ;;  %2157 = vmatpush.bf16.msrb.mxu1 %v3421_v39  ;;  %v4342_v20 = vld [vmem:[%s4551_s25 + $0x4a4] sm:$0xf0]  ;;  %v3433_v39 = vor.u32 %v4310_v33, %v3432_v31  ;;  %v4439_v4 = vld [vmem:[%s4551_s25 + $0x7ac] sm:$0xf0]  ;;  %v3829_v31 = vor.u32 %v4391_v23, %v3826_v24  ;;  %v4231_v24 = vld [vmem:[%s4551_s25 + $0x134] sm:$0xf] }
  0x54   : > { %v3561_v26 = vor.u32 %v4342_v20, %v3560_v17  ;;  %v4246_v59 = vld [vmem:[%s4551_s25 + $0x1a4] sm:$0xf0]  ;;  %v3957_v17 = vor.u32 %v4423_v8, %v3954_v9  ;;  %v4375_v33 = vld [vmem:[%s4551_s25 + $0x5ac] sm:$0xf0] }
  0x55   : > { %2082 = vmatpush.bf16.msra.mxu2 %v3025_v12  ;;  %2133 = vmatpush.bf16.msrb.mxu3 %v3161_v21  ;;  %v3557_v12 = vor.u32 %v4325_v63, %v3554_v2  ;;  %v4422_v21 = vld [vmem:[%s4551_s25 + $0x72c] sm:$0xf]  ;;  %v3048_v7 = vld [vmem:[%s4551_s25 + $0x28] sm:$0xf]  ;;  %v3312_v8 = vld [vmem:[%s4551_s25 + $0x230] sm:$0xf] }
  0x56   : > { %2109 = vmatmul.bf16.vlgmr.msra.gmra.mxu0 %v4642_v55  ;;  %v3949_v28 = vor.u32 %v4422_v21, %v3946_v22  ;;  %v4454_v63 = vld [vmem:[%s4551_s25 + $0x82c] sm:$0xf]  ;;  %v4214_v11 = vld [vmem:[%s4551_s25 + $0xa4] sm:$0xf0]  ;;  %v4279_v9 = vld [vmem:[%s4551_s25 + $0x2ac] sm:$0xf0] }
  0x57   : > { %2173 = vmatpush.bf16.msrb.mxu0 %v4061_v30  ;;  %2158 = vmatpush.bf16.msrb.mxu1 %v3293_v51  ;;  %v3298_v30 = vld [vmem:[%s4551_s25 + $0x2a0] sm:$0xf0]  ;;  %v4470_v51 = vld [vmem:[%s4551_s25 + $0x8a4] sm:$0xf0]  ;;  %v3049_v20 = vor.u32 %v4214_v11, %v3048_v7  ;;  %v4262_v22 = vld [vmem:[%s4551_s25 + $0x22c] sm:$0xf] }
  0x58   : > { %2083 = vmatmul.bf16.vlgmr.msra.gmra.mxu2 %v4642_v55 }
  0x59   : > { %2147 = vmatpush.bf16.msrb.mxu2 %v4057_v16  ;;  %2134 = vmatpush.bf16.msrb.mxu3 %v3033_v36  ;;  %v3426_v16 = vld [vmem:[%s4551_s25 + $0x3a0] sm:$0xf0]  ;;  %v3168_v36 = vld [vmem:[%s4551_s25 + $0x120] sm:$0xf] }
  0x5a   : > { %v3429_v25 = vor.u32 %v4293_v15, %v3426_v16  ;;  %v4080_v15 = vld [vmem:[%s4551_s25 + $0x830] sm:$0xf] }
  0x5b   : > { %2205 = vmatpush.bf16.msra.mxu0 %v3941_v37  ;;  %2159 = vmatpush.bf16.msrb.mxu1 %v3165_v1  ;;  %v4245_v37 = vld [vmem:[%s4551_s25 + $0x19c] sm:$0xf0]  ;;  %v4074_v1 = vld [vmem:[%s4551_s25 + $0x8a8] sm:$0xf0]  ;;  %v4471_v16 = vld [vmem:[%s4551_s25 + $0x8ac] sm:$0xf0] }
  0x5c   : > { %2135 = vmatmul.bf16.vlgmr.msrb.gmra.mxu3 %v4642_v55  ;;  %v4077_v10 = vor.u32 %v4454_v63, %v4074_v1  ;;  %v3442_v63 = vld [vmem:[%s4551_s25 + $0x3b0] sm:$0xf0]  ;;  %v3576_v1 = vld [vmem:[%s4551_s25 + $0x438] sm:$0xf] }
  0x5d   : > { %2179 = vmatpush.bf16.msra.mxu2 %v3937_v29  ;;  %2199 = vmatpush.bf16.msra.mxu3 %v4065_v40  ;;  %v4261_v29 = vld [vmem:[%s4551_s25 + $0x224] sm:$0xf]  ;;  %v3821_v40 = vor.u32 %v4390_v34, %v3818_v35 }
  0x5e   : > { %v3301_v38 = vor.u32 %v4261_v29, %v3298_v30  ;;  %v4440_v29 = vld [vmem:[%s4551_s25 + $0x7b4] sm:$0xf0] }
  0x5f   : > { %2206 = vmatpush.bf16.msra.mxu0 %v3813_v49  ;;  %2160 = vmatpush.bf16.msrb.mxu1 %v3037_v14  ;;  %v4213_v49 = vld [vmem:[%s4551_s25 + $0x9c] sm:$0xf0]  ;;  %v3953_v14 = vor.u32 %v4439_v4, %v3952_v3  ;;  %v4344_v3 = vld [vmem:[%s4551_s25 + $0x4b4] sm:$0xf0]  ;;  %v4424_v4 = vld [vmem:[%s4551_s25 + $0x73c] sm:$0xf] }
  0x60   : > { %v3041_v58 = vor.u32 %v4213_v49, %v3040_v48  ;;  %v4198_v48 = vld [vmem:[%s4551_s25 + $0x2c] sm:$0xf]  ;;  %v4327_v49 = vld [vmem:[%s4551_s25 + $0x434] sm:$0xf] }
  0x61   : > { %2180 = vmatpush.bf16.msra.mxu2 %v3809_v44  ;;  %2231 = vmatpush.bf16.msrb.mxu3 %v3945_v0  ;;  %v3169_v44 = vor.u32 %v4245_v37, %v3168_v36  ;;  %v3173_v0 = vor.u32 %v4229_v41, %v3170_v42  ;;  %v4230_v36 = vld [vmem:[%s4551_s25 + $0x12c] sm:$0xf]  ;;  %v4359_v37 = vld [vmem:[%s4551_s25 + $0x534] sm:$0xf]  ;;  %v4408_v41 = vld [vmem:[%s4551_s25 + $0x6b4] sm:$0xf0] }
  0x62   : > { %2161 = vmatmul.bf16.vlgmr.msrb.gmra.mxu1 %v4642_v55 }
  0x63   : > { %2207 = vmatpush.bf16.msra.mxu0 %v3685_v61  ;;  %2225 = vmatpush.bf16.msra.mxu1 %v4069_v19  ;;  %v3562_v61 = vld [vmem:[%s4551_s25 + $0x4a8] sm:$0xf0]  ;;  %v4407_v19 = vld [vmem:[%s4551_s25 + $0x6ac] sm:$0xf0] }
  0x64   : > { %v3565_v6 = vor.u32 %v4326_v60, %v3562_v61 }
  0x65   : > { %2181 = vmatpush.bf16.msra.mxu2 %v3681_v56  ;;  %2232 = vmatpush.bf16.msrb.mxu3 %v3817_v62  ;;  %v3042_v56 = vld [vmem:[%s4551_s25 + $0xa0] sm:$0xf0]  ;;  %v4073_v62 = vor.u32 %v4470_v51, %v4072_v50  ;;  %v3050_v50 = vld [vmem:[%s4551_s25 + $0xa8] sm:$0xf0]  ;;  %v3704_v51 = vld [vmem:[%s4551_s25 + $0x538] sm:$0xf] }
  0x66   : > { %4165 = vmatmul.msk.bf16.vlgmr.msrb.gmra.mxu0 %vm1967_vm0, %v4572_v27  ;;  %v3045_v2 = vor.u32 %v4197_v54, %v3042_v56  ;;  %v4455_v54 = vld [vmem:[%s4551_s25 + $0x834] sm:$0xf]  ;;  %v3053_v60 = vor.u32 %v4198_v48, %v3050_v50  ;;  %v4441_v50 = vld [vmem:[%s4551_s25 + $0x7bc] sm:$0xf0] }
  0x67   : > { %2208 = vmatpush.bf16.msra.mxu0 %v3557_v12  ;;  %2257 = vmatpush.bf16.msrb.mxu1 %v3949_v28  ;;  %v4294_v12 = vld [vmem:[%s4551_s25 + $0x32c] sm:$0xf]  ;;  %v3960_v28 = vld [vmem:[%s4551_s25 + $0x738] sm:$0xf]  ;;  %v4082_v56 = vld [vmem:[%s4551_s25 + $0x8b0] sm:$0xf0] }
  0x68   : > { %4164 = vmatmul.msk.bf16.vlgmr.msrb.gmra.mxu2 %vm1967_vm0, %v4572_v27  ;;  %v3961_v35 = vor.u32 %v4440_v29, %v3960_v28  ;;  %v4280_v28 = vld [vmem:[%s4551_s25 + $0x2b4] sm:$0xf0]  ;;  %v4360_v29 = vld [vmem:[%s4551_s25 + $0x53c] sm:$0xf] }
  0x69   : > { %2182 = vmatpush.bf16.msra.mxu2 %v3553_v5  ;;  %2233 = vmatpush.bf16.msrb.mxu3 %v3689_v13  ;;  %v3177_v5 = vor.u32 %v4246_v59, %v3176_v57  ;;  %v3434_v13 = vld [vmem:[%s4551_s25 + $0x3a8] sm:$0xf0]  ;;  %v4311_v59 = vld [vmem:[%s4551_s25 + $0x3ac] sm:$0xf0] }
  0x6a   : > { %v3437_v21 = vor.u32 %v4294_v12, %v3434_v13  ;;  %v4263_v12 = vld [vmem:[%s4551_s25 + $0x234] sm:$0xf] }
  0x6b   : > { %2209 = vmatpush.bf16.msra.mxu0 %v3429_v25  ;;  %2258 = vmatpush.bf16.msrb.mxu1 %v3821_v40  ;;  %v4081_v25 = vor.u32 %v4471_v16, %v4080_v15  ;;  %v3832_v40 = vld [vmem:[%s4551_s25 + $0x638] sm:$0xf]  ;;  %v3314_v13 = vld [vmem:[%s4551_s25 + $0x2b0] sm:$0xf0]  ;;  %v4392_v16 = vld [vmem:[%s4551_s25 + $0x63c] sm:$0xf] }
  0x6c   : > { %4166 = vmatmul.msk.bf16.vlgmr.msra.gmra.mxu3 %vm1967_vm0, %v4572_v27  ;;  %v3833_v47 = vor.u32 %v4408_v41, %v3832_v40  ;;  %v4312_v15 = vld [vmem:[%s4551_s25 + $0x3b4] sm:$0xf0] }
  0x6d   : > { %2183 = vmatpush.bf16.msra.mxu2 %v3425_v18  ;;  %2234 = vmatpush.bf16.msrb.mxu3 %v3561_v26  ;;  %v3824_v18 = vld [vmem:[%s4551_s25 + $0x630] sm:$0xf]  ;;  %v3306_v26 = vld [vmem:[%s4551_s25 + $0x2a8] sm:$0xf0]  ;;  %v4088_v40 = vld [vmem:[%s4551_s25 + $0x838] sm:$0xf] }
  0x6e   : > { %v3825_v30 = vor.u32 %v4407_v19, %v3824_v18  ;;  %v3309_v34 = vor.u32 %v4262_v22, %v3306_v26  ;;  %v3313_v18 = vor.u32 %v4279_v9, %v3312_v8  ;;  %v3317_v19 = vor.u32 %v4263_v12, %v3314_v13  ;;  %v3320_v26 = vld [vmem:[%s4551_s25 + $0x238] sm:$0xf]  ;;  %v3842_v8 = vld [vmem:[%s4551_s25 + $0x6c0] sm:$0xf0]  ;;  %v4442_v12 = vld [vmem:[%s4551_s25 + $0x7c4] sm:$0xf0] }
  0x6f   : > { %2210 = vmatpush.bf16.msra.mxu0 %v3301_v38  ;;  %2259 = vmatpush.bf16.msrb.mxu1 %v3693_v53  ;;  %v3698_v38 = vld [vmem:[%s4551_s25 + $0x5b0] sm:$0xf0]  ;;  %v4472_v41 = vld [vmem:[%s4551_s25 + $0x8b4] sm:$0xf0] }
  0x70   : > { %v3701_v43 = vor.u32 %v4359_v37, %v3698_v38  ;;  %v3321_v37 = vor.u32 %v4280_v28, %v3320_v26  ;;  %v3584_v28 = vld [vmem:[%s4551_s25 + $0x440] sm:$0xf] }
  0x71   : > { %2184 = vmatpush.bf16.msra.mxu2 %v3297_v32  ;;  %2235 = vmatpush.bf16.msrb.mxu3 %v3433_v39  ;;  %v3696_v32 = vld [vmem:[%s4551_s25 + $0x530] sm:$0xf]  ;;  %v3178_v39 = vld [vmem:[%s4551_s25 + $0x1a8] sm:$0xf0] }
  0x72   : > { %4167 = vmatmul.msk.bf16.vlgmr.msra.gmra.mxu1 %vm1967_vm0, %v4572_v27  ;;  %v3697_v42 = vor.u32 %v4375_v33, %v3696_v32  ;;  %v3181_v46 = vor.u32 %v4230_v36, %v3178_v39  ;;  %v3056_v32 = vld [vmem:[%s4551_s25 + $0x30] sm:$0xf]  ;;  %v3058_v36 = vld [vmem:[%s4551_s25 + $0xb0] sm:$0xf0]  ;;  %v3192_v39 = vld [vmem:[%s4551_s25 + $0x138] sm:$0xf] }
  0x73   : > { %2211 = vmatpush.bf16.msra.mxu0 %v3173_v0  ;;  %2260 = vmatpush.bf16.msrb.mxu1 %v3565_v6  ;;  %v3570_v0 = vld [vmem:[%s4551_s25 + $0x4b0] sm:$0xf0] }
  0x74   : > { %v3573_v57 = vor.u32 %v4327_v49, %v3570_v0  ;;  %v4089_v49 = vor.u32 %v4472_v41, %v4088_v40  ;;  %v3968_v0 = vld [vmem:[%s4551_s25 + $0x740] sm:$0xf]  ;;  %v4457_v40 = vld [vmem:[%s4551_s25 + $0x844] sm:$0xf] }
  0x75   : > { %2185 = vmatpush.bf16.msra.mxu2 %v3169_v44  ;;  %2236 = vmatpush.bf16.msrb.mxu3 %v3305_v52  ;;  %v3568_v44 = vld [vmem:[%s4551_s25 + $0x430] sm:$0xf]  ;;  %v4376_v52 = vld [vmem:[%s4551_s25 + $0x5b4] sm:$0xf0]  ;;  %v4098_v41 = vld [vmem:[%s4551_s25 + $0x8c0] sm:$0xf0] }
  0x76   : > { %v3569_v53 = vor.u32 %v4343_v45, %v3568_v44  ;;  %v3705_v61 = vor.u32 %v4376_v52, %v3704_v51  ;;  %v3578_v44 = vld [vmem:[%s4551_s25 + $0x4b8] sm:$0xf0] }
  0x77   : > { %2212 = vmatpush.bf16.msra.mxu0 %v3045_v2  ;;  %2261 = vmatpush.bf16.msrb.mxu1 %v3437_v21  ;;  %v4085_v2 = vor.u32 %v4455_v54, %v4082_v56  ;;  %v4247_v21 = vld [vmem:[%s4551_s25 + $0x1ac] sm:$0xf0]  ;;  %v4425_v54 = vld [vmem:[%s4551_s25 + $0x744] sm:$0xf] }
  0x78   : > { %v3970_v56 = vld [vmem:[%s4551_s25 + $0x7c0] sm:$0xf0] }
  0x79   : > { %2186 = vmatpush.bf16.msra.mxu2 %v3041_v58  ;;  %2237 = vmatpush.bf16.msrb.mxu3 %v3177_v5  ;;  %v3440_v58 = vld [vmem:[%s4551_s25 + $0x330] sm:$0xf]  ;;  %v3962_v5 = vld [vmem:[%s4551_s25 + $0x7b8] sm:$0xf0] }
  0x7a   : > { %2213 = vmatmul.bf16.vlgmr.msra.gmra.mxu0 %v4642_v55  ;;  %v3441_v6 = vor.u32 %v4311_v59, %v3440_v58  ;;  %v3965_v11 = vor.u32 %v4424_v4, %v3962_v5  ;;  %v4216_v58 = vld [vmem:[%s4551_s25 + $0xb4] sm:$0xf0]  ;;  %v4296_v59 = vld [vmem:[%s4551_s25 + $0x33c] sm:$0xf] }
  0x7b   : > { %2277 = vmatpush.bf16.msrb.mxu0 %v4077_v10  ;;  %2262 = vmatpush.bf16.msrb.mxu1 %v3309_v34  ;;  %v3577_v10 = vor.u32 %v4344_v3, %v3576_v1  ;;  %v4215_v34 = vld [vmem:[%s4551_s25 + $0xac] sm:$0xf0]  ;;  %v3973_v1 = vor.u32 %v4425_v54, %v3970_v56  ;;  %v4409_v3 = vld [vmem:[%s4551_s25 + $0x6bc] sm:$0xf0] }
  0x7c   : > { %2187 = vmatmul.bf16.vlgmr.msra.gmra.mxu2 %v4642_v55  ;;  %v3057_v45 = vor.u32 %v4215_v34, %v3056_v32  ;;  %v4200_v32 = vld [vmem:[%s4551_s25 + $0x3c] sm:$0xf]  ;;  %v3586_v34 = vld [vmem:[%s4551_s25 + $0x4c0] sm:$0xf0] }
  0x7d   : > { %2251 = vmatpush.bf16.msrb.mxu2 %v4073_v62  ;;  %2238 = vmatpush.bf16.msrb.mxu3 %v3049_v20  ;;  %v4295_v62 = vld [vmem:[%s4551_s25 + $0x334] sm:$0xf]  ;;  %v3184_v20 = vld [vmem:[%s4551_s25 + $0x130] sm:$0xf] }
  0x7e   : > { %v3445_v7 = vor.u32 %v4295_v62, %v3442_v63  ;;  %v4096_v62 = vld [vmem:[%s4551_s25 + $0x840] sm:$0xf] }
  0x7f   : > { %2309 = vmatpush.bf16.msra.mxu0 %v3957_v17  ;;  %2263 = vmatpush.bf16.msrb.mxu1 %v3181_v46  ;;  %v3834_v17 = vld [vmem:[%s4551_s25 + $0x6b8] sm:$0xf0]  ;;  %v4473_v63 = vld [vmem:[%s4551_s25 + $0x8bc] sm:$0xf0] }
  0x80   : > { %2239 = vmatmul.bf16.vlgmr.msrb.gmra.mxu3 %v4642_v55  ;;  %v3837_v23 = vor.u32 %v4392_v16, %v3834_v17  ;;  %v4456_v46 = vld [vmem:[%s4551_s25 + $0x83c] sm:$0xf]  ;;  %v4097_v9 = vor.u32 %v4473_v63, %v4096_v62  ;;  %v4377_v16 = vld [vmem:[%s4551_s25 + $0x5bc] sm:$0xf0]  ;;  %v3330_v62 = vld [vmem:[%s4551_s25 + $0x2c0] sm:$0xf0] }
  0x81   : > { %2283 = vmatpush.bf16.msra.mxu2 %v3953_v14  ;;  %2303 = vmatpush.bf16.msra.mxu3 %v4081_v25  ;;  %v3448_v14 = vld [vmem:[%s4551_s25 + $0x338] sm:$0xf]  ;;  %v3186_v25 = vld [vmem:[%s4551_s25 + $0x1b0] sm:$0xf0]  ;;  %v3464_v63 = vld [vmem:[%s4551_s25 + $0x348] sm:$0xf] }
  0x82   : > { %v3449_v22 = vor.u32 %v4312_v15, %v3448_v14  ;;  %v3189_v33 = vor.u32 %v4231_v24, %v3186_v25  ;;  %v3712_v15 = vld [vmem:[%s4551_s25 + $0x540] sm:$0xf]  ;;  %v4410_v24 = vld [vmem:[%s4551_s25 + $0x6c4] sm:$0xf0] }
  0x83   : > { %2310 = vmatpush.bf16.msra.mxu0 %v3829_v31  ;;  %2264 = vmatpush.bf16.msrb.mxu1 %v3053_v60  ;;  %v3185_v31 = vor.u32 %v4247_v21, %v3184_v20  ;;  %v3450_v60 = vld [vmem:[%s4551_s25 + $0x3b8] sm:$0xf0]  ;;  %v4361_v20 = vld [vmem:[%s4551_s25 + $0x544] sm:$0xf]  ;;  %v3713_v25 = vor.u32 %v4377_v16, %v3712_v15  ;;  %v4282_v15 = vld [vmem:[%s4551_s25 + $0x2c4] sm:$0xf0] }
  0x84   : > { %v3453_v5 = vor.u32 %v4296_v59, %v3450_v60  ;;  %v3714_v21 = vld [vmem:[%s4551_s25 + $0x5c0] sm:$0xf0]  ;;  %v4362_v16 = vld [vmem:[%s4551_s25 + $0x54c] sm:$0xf] }
  0x85   : > { %2284 = vmatpush.bf16.msra.mxu2 %v3825_v30  ;;  %2335 = vmatpush.bf16.msrb.mxu3 %v3961_v35  ;;  %v3706_v30 = vld [vmem:[%s4551_s25 + $0x5b8] sm:$0xf0]  ;;  %v4199_v35 = vld [vmem:[%s4551_s25 + $0x34] sm:$0xf]  ;;  %v3717_v26 = vor.u32 %v4361_v20, %v3714_v21  ;;  %v3072_v20 = vld [vmem:[%s4551_s25 + $0x40] sm:$0xf] }
  0x86   : > { %2265 = vmatmul.bf16.vlgmr.msrb.gmra.mxu1 %v4642_v55  ;;  %v3709_v38 = vor.u32 %v4360_v29, %v3706_v30  ;;  %v3061_v48 = vor.u32 %v4199_v35, %v3058_v36  ;;  %v4345_v29 = vld [vmem:[%s4551_s25 + $0x4bc] sm:$0xf0]  ;;  %v3066_v35 = vld [vmem:[%s4551_s25 + $0xb8] sm:$0xf0]  ;;  %v3720_v36 = vld [vmem:[%s4551_s25 + $0x548] sm:$0xf] }
  0x87   : > { %2311 = vmatpush.bf16.msra.mxu0 %v3701_v43  ;;  %2329 = vmatpush.bf16.msra.mxu1 %v4085_v2  ;;  %v4328_v43 = vld [vmem:[%s4551_s25 + $0x43c] sm:$0xf]  ;;  %v3840_v2 = vld [vmem:[%s4551_s25 + $0x640] sm:$0xf] }
  0x88   : > { %v3581_v52 = vor.u32 %v4328_v43, %v3578_v44  ;;  %v3841_v13 = vor.u32 %v4409_v3, %v3840_v2  ;;  %v3456_v44 = vld [vmem:[%s4551_s25 + $0x340] sm:$0xf]  ;;  %v4394_v2 = vld [vmem:[%s4551_s25 + $0x64c] sm:$0xf] }
  0x89   : > { %2285 = vmatpush.bf16.msra.mxu2 %v3697_v42  ;;  %2336 = vmatpush.bf16.msrb.mxu3 %v3833_v47  ;;  %v4248_v42 = vld [vmem:[%s4551_s25 + $0x1b4] sm:$0xf0]  ;;  %v4090_v47 = vld [vmem:[%s4551_s25 + $0x8b8] sm:$0xf0]  ;;  %v3850_v3 = vld [vmem:[%s4551_s25 + $0x6c8] sm:$0xf0] }
  0x8a   : > { %4169 = vmatmul.msk.bf16.vlgmr.msrb.gmra.mxu0 %vm1967_vm0, %v4572_v27  ;;  %v3193_v51 = vor.u32 %v4248_v42, %v3192_v39  ;;  %v3585_v39 = vor.u32 %v4345_v29, %v3584_v28  ;;  %v3208_v28 = vld [vmem:[%s4551_s25 + $0x148] sm:$0xf] }
  0x8b   : > { %2312 = vmatpush.bf16.msra.mxu0 %v3573_v57  ;;  %2361 = vmatpush.bf16.msrb.mxu1 %v3965_v11  ;;  %v4093_v57 = vor.u32 %v4456_v46, %v4090_v47  ;;  %v3976_v11 = vld [vmem:[%s4551_s25 + $0x748] sm:$0xf]  ;;  %v3069_v46 = vor.u32 %v4200_v32, %v3066_v35  ;;  %v4330_v32 = vld [vmem:[%s4551_s25 + $0x44c] sm:$0xf] }
  0x8c   : > { %4168 = vmatmul.msk.bf16.vlgmr.msrb.gmra.mxu2 %vm1967_vm0, %v4572_v27  ;;  %v4104_v29 = vld [vmem:[%s4551_s25 + $0x848] sm:$0xf]  ;;  %v4458_v35 = vld [vmem:[%s4551_s25 + $0x84c] sm:$0xf] }
  0x8d   : > { %2286 = vmatpush.bf16.msra.mxu2 %v3569_v53  ;;  %2337 = vmatpush.bf16.msrb.mxu3 %v3705_v61  ;;  %v3064_v53 = vld [vmem:[%s4551_s25 + $0x38] sm:$0xf]  ;;  %v3969_v61 = vor.u32 %v4441_v50, %v3968_v0  ;;  %v3592_v0 = vld [vmem:[%s4551_s25 + $0x448] sm:$0xf]  ;;  %v4101_v50 = vor.u32 %v4457_v40, %v4098_v41  ;;  %v3984_v41 = vld [vmem:[%s4551_s25 + $0x750] sm:$0xf] }
  0x8e   : > { %v3065_v4 = vor.u32 %v4216_v58, %v3064_v53  ;;  %v3978_v53 = vld [vmem:[%s4551_s25 + $0x7c8] sm:$0xf0]  ;;  %v4281_v58 = vld [vmem:[%s4551_s25 + $0x2bc] sm:$0xf0] }
  0x8f   : > { %2313 = vmatpush.bf16.msra.mxu0 %v3445_v7  ;;  %2362 = vmatpush.bf16.msrb.mxu1 %v3837_v23  ;;  %v4393_v7 = vld [vmem:[%s4551_s25 + $0x644] sm:$0xf]  ;;  %v3848_v23 = vld [vmem:[%s4551_s25 + $0x648] sm:$0xf] }
  0x90   : > { %4170 = vmatmul.msk.bf16.vlgmr.msra.gmra.mxu3 %vm1967_vm0, %v4572_v27  ;;  %v3845_v14 = vor.u32 %v4393_v7, %v3842_v8  ;;  %v3200_v8 = vld [vmem:[%s4551_s25 + $0x140] sm:$0xf] }
  0x91   : > { %2287 = vmatpush.bf16.msra.mxu2 %v3441_v6  ;;  %2338 = vmatpush.bf16.msrb.mxu3 %v3577_v10  ;;  %v4264_v6 = vld [vmem:[%s4551_s25 + $0x23c] sm:$0xf] }
  0x92   : > { %v3322_v10 = vld [vmem:[%s4551_s25 + $0x2b8] sm:$0xf0] }
  0x93   : > { %2314 = vmatpush.bf16.msra.mxu0 %v3317_v19  ;;  %2363 = vmatpush.bf16.msrb.mxu1 %v3709_v38  ;;  %v3325_v17 = vor.u32 %v4264_v6, %v3322_v10  ;;  %v4232_v19 = vld [vmem:[%s4551_s25 + $0x13c] sm:$0xf] }
  0x95   : > { %2288 = vmatpush.bf16.msra.mxu2 %v3313_v18  ;;  %2339 = vmatpush.bf16.msrb.mxu3 %v3449_v22  ;;  %v3977_v18 = vor.u32 %v4442_v12, %v3976_v11  ;;  %v3194_v22 = vld [vmem:[%s4551_s25 + $0x1b8] sm:$0xf0]  ;;  %v3853_v11 = vor.u32 %v4394_v2, %v3850_v3  ;;  %v4233_v12 = vld [vmem:[%s4551_s25 + $0x144] sm:$0xf]  ;;  %v4266_v3 = vld [vmem:[%s4551_s25 + $0x24c] sm:$0xf] }
  0x96   : > { %4171 = vmatmul.msk.bf16.vlgmr.msra.gmra.mxu1 %vm1967_vm0, %v4572_v27  ;;  %v3197_v30 = vor.u32 %v4232_v19, %v3194_v22  ;;  %v4217_v22 = vld [vmem:[%s4551_s25 + $0xbc] sm:$0xf0] }
  0x97   : > { %2315 = vmatpush.bf16.msra.mxu0 %v3189_v33  ;;  %2364 = vmatpush.bf16.msrb.mxu1 %v3581_v52  ;;  %v4329_v33 = vld [vmem:[%s4551_s25 + $0x444] sm:$0xf]  ;;  %v4426_v52 = vld [vmem:[%s4551_s25 + $0x74c] sm:$0xf] }
  0x98   : > { %v3589_v43 = vor.u32 %v4329_v33, %v3586_v34  ;;  %v3981_v60 = vor.u32 %v4426_v52, %v3978_v53  ;;  %v3594_v33 = vld [vmem:[%s4551_s25 + $0x4c8] sm:$0xf0]  ;;  %v3073_v34 = vor.u32 %v4217_v22, %v3072_v20 }
  0x99   : > { %2289 = vmatpush.bf16.msra.mxu2 %v3185_v31  ;;  %2340 = vmatpush.bf16.msrb.mxu3 %v3321_v37  ;;  %v3849_v31 = vor.u32 %v4410_v24, %v3848_v23  ;;  %v4378_v37 = vld [vmem:[%s4551_s25 + $0x5c4] sm:$0xf0]  ;;  %v4201_v23 = vld [vmem:[%s4551_s25 + $0x44] sm:$0xf]  ;;  %v4234_v22 = vld [vmem:[%s4551_s25 + $0x14c] sm:$0xf] }
  0x9a   : > { %v3721_v47 = vor.u32 %v4378_v37, %v3720_v36  ;;  %v3074_v24 = vld [vmem:[%s4551_s25 + $0xc0] sm:$0xf0]  ;;  %v4106_v36 = vld [vmem:[%s4551_s25 + $0x8c8] sm:$0xf0] }
  0x9b   : > { %2316 = vmatpush.bf16.msra.mxu0 %v3061_v48  ;;  %2365 = vmatpush.bf16.msrb.mxu1 %v3453_v5  ;;  %v4923_v38 = vpop.f32.mrf.mxu2  ;;  %v4927_v42 = vpop.f32.mrf.mxu3  ;;  %v4297_v48 = vld [vmem:[%s4551_s25 + $0x344] sm:$0xf]  ;;  %v3077_v37 = vor.u32 %v4201_v23, %v3074_v24  ;;  %v4363_v23 = vld [vmem:[%s4551_s25 + $0x554] sm:$0xf] }
  0x9c   : > { %v4958_v19 = vpop.permute.xlu0 %518  ;;  %v3730_v24 = vld [vmem:[%s4551_s25 + $0x5d0] sm:$0xf0] }
  0x9d   : > { %2290 = vmatpush.bf16.msra.mxu2 %v3057_v45  ;;  %2341 = vmatpush.bf16.msrb.mxu3 %v3193_v51  ;;  %v4313_v45 = vld [vmem:[%s4551_s25 + $0x3bc] sm:$0xf0]  ;;  %v4346_v51 = vld [vmem:[%s4551_s25 + $0x4c4] sm:$0xf0] }
  0x9e   : > { %2317 = vmatmul.bf16.vlgmr.msra.gmra.mxu0 %v4642_v55  ;;  %v3457_v54 = vor.u32 %v4313_v45, %v3456_v44  ;;  %v3593_v59 = vor.u32 %v4346_v51, %v3592_v0  ;;  %v3597_v45 = vor.u32 %v4330_v32, %v3594_v33  ;;  %v4218_v0 = vld [vmem:[%s4551_s25 + $0xc4] sm:$0xf0]  ;;  %v3466_v51 = vld [vmem:[%s4551_s25 + $0x3c8] sm:$0xf0] }
  0x9f   : > { %2381 = vmatpush.bf16.msrb.mxu0 %v4093_v57  ;;  %2366 = vmatpush.bf16.msrb.mxu1 %v3325_v17  ;;  %v3328_v57 = vld [vmem:[%s4551_s25 + $0x240] sm:$0xf]  ;;  %v3722_v17 = vld [vmem:[%s4551_s25 + $0x5c8] sm:$0xf0] }
  0xa0   : > { %2291 = vmatmul.bf16.vlgmr.msra.gmra.mxu2 %v4642_v55  ;;  %v3329_v5 = vor.u32 %v4281_v58, %v3328_v57 }
  0xa1   : > { %2355 = vmatpush.bf16.msrb.mxu2 %v4089_v49  ;;  %2342 = vmatpush.bf16.msrb.mxu3 %v3065_v4  ;;  %v3458_v49 = vld [vmem:[%s4551_s25 + $0x3c0] sm:$0xf0] }
  0xa2   : > { %v3461_v56 = vor.u32 %v4297_v48, %v3458_v49  ;;  %v3986_v48 = vld [vmem:[%s4551_s25 + $0x7d0] sm:$0xf0]  ;;  %v4109_v49 = vor.u32 %v4458_v35, %v4106_v36 }
  0xa3   : > { %2413 = vmatpush.bf16.msra.mxu0 %v3973_v1  ;;  %2367 = vmatpush.bf16.msrb.mxu1 %v3197_v30  ;;  %v4314_v1 = vld [vmem:[%s4551_s25 + $0x3c4] sm:$0xf0]  ;;  %v1995_v4 = vpop.f32.mrf.mxu2  ;;  %v2021_v6 = vpop.f32.mrf.mxu3 }
  0xa4   : > { %2343 = vmatmul.bf16.vlgmr.msrb.gmra.mxu3 %v4642_v55  ;;  %v3465_v10 = vor.u32 %v4314_v1, %v3464_v63  ;;  %v4474_v30 = vld [vmem:[%s4551_s25 + $0x8c4] sm:$0xf0]  ;;  %v4395_v4 = vld [vmem:[%s4551_s25 + $0x654] sm:$0xf] }
  0xa5   : > { %2387 = vmatpush.bf16.msra.mxu2 %v3969_v61  ;;  %2407 = vmatpush.bf16.msra.mxu3 %v4097_v9  ;;  %v4265_v61 = vld [vmem:[%s4551_s25 + $0x244] sm:$0xf]  ;;  %v4249_v9 = vld [vmem:[%s4551_s25 + $0x1bc] sm:$0xf0] }
  0xa6   : > { %v3333_v7 = vor.u32 %v4265_v61, %v3330_v62  ;;  %v4411_v61 = vld [vmem:[%s4551_s25 + $0x6cc] sm:$0xf0]  ;;  %v4988_v2 = vpop.permute.xlu0 %2806 }
  0xa7   : > { %2414 = vmatpush.bf16.msra.mxu0 %v3845_v14  ;;  %2368 = vmatpush.bf16.msrb.mxu1 %v3069_v46  ;;  %v3336_v14 = vld [vmem:[%s4551_s25 + $0x248] sm:$0xf] }
  0xa8   : > { %v3080_v46 = vld [vmem:[%s4551_s25 + $0x48] sm:$0xf] }
  0xa9   : > { %2388 = vmatpush.bf16.msra.mxu2 %v3841_v13  ;;  %2439 = vmatpush.bf16.msrb.mxu3 %v3977_v18  ;;  %v3202_v13 = vld [vmem:[%s4551_s25 + $0x1c0] sm:$0xf0]  ;;  %v3201_v18 = vor.u32 %v4249_v9, %v3200_v8  ;;  %v3081_v63 = vor.u32 %v4218_v0, %v3080_v46  ;;  %v3338_v8 = vld [vmem:[%s4551_s25 + $0x2c8] sm:$0xf0]  ;;  %v3992_v9 = vld [vmem:[%s4551_s25 + $0x758] sm:$0xf] }
  0xaa   : > { %2369 = vmatmul.bf16.vlgmr.msrb.gmra.mxu1 %v4642_v55  ;;  %v3205_v21 = vor.u32 %v4233_v12, %v3202_v13  ;;  %v4999_v13 = vpop.permute.xlu1 %2844  ;;  %v3341_v20 = vor.u32 %v4266_v3, %v3338_v8  ;;  %v4331_v46 = vld [vmem:[%s4551_s25 + $0x454] sm:$0xf]  ;;  %v3736_v0 = vld [vmem:[%s4551_s25 + $0x558] sm:$0xf] }
  0xab   : > { %2415 = vmatpush.bf16.msra.mxu0 %v3717_v26  ;;  %2433 = vmatpush.bf16.msra.mxu1 %v4101_v50  ;;  %v3725_v26 = vor.u32 %v4362_v16, %v3722_v17  ;;  %v2045_v40 = vpop.f32.mrf.mxu3  ;;  %v4298_v50 = vld [vmem:[%s4551_s25 + $0x34c] sm:$0xf]  ;;  %v3728_v16 = vld [vmem:[%s4551_s25 + $0x550] sm:$0xf] }
  0xac   : > { %v3469_v1 = vor.u32 %v4298_v50, %v3466_v51  ;;  %v4379_v17 = vld [vmem:[%s4551_s25 + $0x5cc] sm:$0xf0]  ;;  %v4380_v50 = vld [vmem:[%s4551_s25 + $0x5d4] sm:$0xf0] }
  0xad   : > { %2389 = vmatpush.bf16.msra.mxu2 %v3713_v25  ;;  %2440 = vmatpush.bf16.msrb.mxu3 %v3849_v31  ;;  %v3337_v25 = vor.u32 %v4282_v15, %v3336_v14  ;;  %v4250_v31 = vld [vmem:[%s4551_s25 + $0x1c4] sm:$0xf0]  ;;  %v3729_v33 = vor.u32 %v4379_v17, %v3728_v16  ;;  %v4283_v16 = vld [vmem:[%s4551_s25 + $0x2cc] sm:$0xf0]  ;;  %v4267_v17 = vld [vmem:[%s4551_s25 + $0x254] sm:$0xf] }
  0xae   : > { %4173 = vmatmul.msk.bf16.vlgmr.msrb.gmra.mxu0 %vm1967_vm0, %v4572_v27  ;;  %v3209_v44 = vor.u32 %v4250_v31, %v3208_v28  ;;  %v3864_v28 = vld [vmem:[%s4551_s25 + $0x658] sm:$0xf] }
  0xaf   : > { %2416 = vmatpush.bf16.msra.mxu0 %v3589_v43  ;;  %2465 = vmatpush.bf16.msrb.mxu1 %v3981_v60  ;;  %v4443_v43 = vld [vmem:[%s4551_s25 + $0x7cc] sm:$0xf0]  ;;  %v1980_v52 = vpop.f32.mrf.mxu0  ;;  %v2032_v58 = vpop.f32.mrf.mxu1 }
  0xb0   : > { %4172 = vmatmul.msk.bf16.vlgmr.msrb.gmra.mxu2 %vm1967_vm0, %v4572_v27  ;;  %v3985_v53 = vor.u32 %v4443_v43, %v3984_v41  ;;  %v1981_v57 = vadd.f32 %v1980_v52, %v4958_v19  ;;  %v3856_v60 = vld [vmem:[%s4551_s25 + $0x650] sm:$0xf]  ;;  %v2033_v62 = vadd.f32 %v2032_v58, %v4958_v19  ;;  %v4202_v41 = vld [vmem:[%s4551_s25 + $0x4c] sm:$0xf]  ;;  %v4459_v52 = vld [vmem:[%s4551_s25 + $0x854] sm:$0xf] }
  0xb1   : > { %2390 = vmatpush.bf16.msra.mxu2 %v3585_v39  ;;  %2441 = vmatpush.bf16.msrb.mxu3 %v3721_v47  ;;  %v4105_v39 = vor.u32 %v4474_v30, %v4104_v29  ;;  %v4427_v47 = vld [vmem:[%s4551_s25 + $0x754] sm:$0xf]  ;;  %v3857_v12 = vor.u32 %v4411_v61, %v3856_v60  ;;  %v4412_v29 = vld [vmem:[%s4551_s25 + $0x6d4] sm:$0xf0] }
  0xb2   : > { %v1994_v6 = vadd.f32 %v4923_v38, %v1981_v57  ;;  %v4315_v57 = vld [vmem:[%s4551_s25 + $0x3cc] sm:$0xf0]  ;;  %v4299_v61 = vld [vmem:[%s4551_s25 + $0x354] sm:$0xf] }
  0xb3   : > { %2417 = vmatpush.bf16.msra.mxu0 %v3461_v56  ;;  %2466 = vmatpush.bf16.msrb.mxu1 %v3853_v11  ;;  %v4475_v56 = vld [vmem:[%s4551_s25 + $0x8cc] sm:$0xf0]  ;;  %v2046_v11 = vadd.f32 %v2045_v40, %v2033_v62  ;;  %v2047_v15 = vpop.f32.mrf.mxu3  ;;  %v3474_v62 = vld [vmem:[%s4551_s25 + $0x3d0] sm:$0xf0] }
  0xb4   : > { %4174 = vmatmul.msk.bf16.vlgmr.msra.gmra.mxu3 %vm1967_vm0, %v4572_v27  ;;  %v2809_v38 = vmul.f32 %v4988_v2, %v1994_v6  ;;  %v4347_v40 = vld [vmem:[%s4551_s25 + $0x4cc] sm:$0xf0]  ;;  %v4428_v6 = vld [vmem:[%s4551_s25 + $0x75c] sm:$0xf]  ;;  %v3477_v15 = vor.u32 %v4299_v61, %v3474_v62 }
  0xb5   : > { %2391 = vmatpush.bf16.msra.mxu2 %v3457_v54  ;;  %2442 = vmatpush.bf16.msrb.mxu3 %v3593_v59  ;;  %v4112_v54 = vld [vmem:[%s4551_s25 + $0x850] sm:$0xf]  ;;  %v3989_v59 = vor.u32 %v4427_v47, %v3986_v48  ;;  %v3602_v47 = vld [vmem:[%s4551_s25 + $0x4d0] sm:$0xf0]  ;;  %v4460_v61 = vld [vmem:[%s4551_s25 + $0x85c] sm:$0xf] }
  0xb6   : > { %v4122_v62 = vld [vmem:[%s4551_s25 + $0x8d8] sm:$0xf0] }
  0xb7   : > { %2418 = vmatpush.bf16.msra.mxu0 %v3333_v7  ;;  %2467 = vmatpush.bf16.msrb.mxu1 %v3725_v26  ;;  %v4113_v7 = vor.u32 %v4475_v56, %v4112_v54  ;;  %v3210_v26 = vld [vmem:[%s4551_s25 + $0x1c8] sm:$0xf0]  ;;  %v1982_v32 = vpop.f32.mrf.mxu0  ;;  %v3605_v56 = vor.u32 %v4331_v46, %v3602_v47  ;;  %v3088_v47 = vld [vmem:[%s4551_s25 + $0x50] sm:$0xf] }
  0xb8   : > { %v4251_v32 = vld [vmem:[%s4551_s25 + $0x1cc] sm:$0xf0] }
  0xb9   : > { %2392 = vmatpush.bf16.msra.mxu2 %v3329_v5  ;;  %2443 = vmatpush.bf16.msrb.mxu3 %v3465_v10  ;;  %v3858_v5 = vld [vmem:[%s4551_s25 + $0x6d0] sm:$0xf0]  ;;  %v4444_v10 = vld [vmem:[%s4551_s25 + $0x7d4] sm:$0xf0] }
  0xba   : > { %4175 = vmatmul.msk.bf16.vlgmr.msra.gmra.mxu1 %vm1967_vm0, %v4572_v27  ;;  %v3861_v14 = vor.u32 %v4395_v4, %v3858_v5  ;;  %v4348_v5 = vld [vmem:[%s4551_s25 + $0x4d4] sm:$0xf0] }
  0xbb   : > { %2419 = vmatpush.bf16.msra.mxu0 %v3205_v21  ;;  %2468 = vmatpush.bf16.msrb.mxu1 %v3597_v45  ;;  %v3993_v21 = vor.u32 %v4444_v10, %v3992_v9  ;;  %v2006_v30 = vpop.f32.mrf.mxu2  ;;  %v3865_v45 = vor.u32 %v4412_v29, %v3864_v28 }
  0xbc   : > { %v2007_v35 = vadd.f32 %v2006_v30, %v4958_v19 }
  0xbd   : > { %2393 = vmatpush.bf16.msra.mxu2 %v3201_v18  ;;  %2444 = vmatpush.bf16.msrb.mxu3 %v3337_v25  ;;  %v2811_v18 = vmul.f32 %v4988_v2, %v2046_v11  ;;  %v2847_v25 = vadd.f32 %v4999_v13, %v2809_v38  ;;  %v3344_v11 = vld [vmem:[%s4551_s25 + $0x250] sm:$0xf] }
  0xbe   : > { %v2020_v48 = vadd.f32 %v4927_v42, %v2007_v35  ;;  %v3472_v42 = vld [vmem:[%s4551_s25 + $0x350] sm:$0xf]  ;;  %v3345_v28 = vor.u32 %v4283_v16, %v3344_v11  ;;  %v4220_v11 = vld [vmem:[%s4551_s25 + $0xd4] sm:$0xf0]  ;;  %v4128_v16 = vld [vmem:[%s4551_s25 + $0x860] sm:$0xf] }
  0xbf   : > { %2420 = vmatpush.bf16.msra.mxu0 %v3077_v37  ;;  %2469 = vmatpush.bf16.msrb.mxu1 %v3469_v1  ;;  %v2849_v31 = vadd.f32 %v4999_v13, %v2811_v18  ;;  %v2879_v36 = vmax.f32 %v2847_v25, 0.0  ;;  %v2034_v37 = vpop.f32.mrf.mxu1  ;;  %v2058_v60 = vpop.f32.mrf.mxu3  ;;  %v3473_v9 = vor.u32 %v4315_v57, %v3472_v42  ;;  %v4396_v25 = vld [vmem:[%s4551_s25 + $0x65c] sm:$0xf]  ;;  %v4476_v42 = vld [vmem:[%s4551_s25 + $0x8d4] sm:$0xf0] }
  0xc0   : > { %v2810_v54 = vmul.f32 %v4988_v2, %v2020_v48  ;;  %v2059_v3 = vadd.f32 %v2058_v60, %v4958_v19  ;;  %v2071_v8 = vpop.f32.mrf.mxu0  ;;  %v3352_v37 = vld [vmem:[%s4551_s25 + $0x258] sm:$0xf]  ;;  %v4219_v48 = vld [vmem:[%s4551_s25 + $0xcc] sm:$0xf0] }
  0xc1   : > { %2394 = vmatpush.bf16.msra.mxu2 %v3073_v34  ;;  %2445 = vmatpush.bf16.msrb.mxu3 %v3209_v44  ;;  %v3600_v34 = vld [vmem:[%s4551_s25 + $0x450] sm:$0xf]  ;;  %v2881_v43 = vmax.f32 %v2849_v31, 0.0  ;;  %v3213_v44 = vor.u32 %v4234_v22, %v3210_v26  ;;  %2911 = vst [vmem:[%s5018_s10] sm:$0xff] %v2879_v36  ;;  %v3480_v22 = vld [vmem:[%s4551_s25 + $0x358] sm:$0xf]  ;;  %v3089_v60 = vor.u32 %v4219_v48, %v3088_v47 }
  0xc2   : > { %2421 = vmatmul.bf16.vlgmr.msra.gmra.mxu0 %v4642_v55  ;;  %v3601_v51 = vor.u32 %v4347_v40, %v3600_v34  ;;  %v2848_v1 = vadd.f32 %v4999_v13, %v2810_v54  ;;  %v3866_v26 = vld [vmem:[%s4551_s25 + $0x6d8] sm:$0xf0]  ;;  %v3216_v31 = vld [vmem:[%s4551_s25 + $0x150] sm:$0xf]  ;;  %v3218_v36 = vld [vmem:[%s4551_s25 + $0x1d0] sm:$0xf0] }
  0xc3   : > { %2485 = vmatpush.bf16.msrb.mxu0 %v4109_v49  ;;  %2470 = vmatpush.bf16.msrb.mxu1 %v3341_v20  ;;  %v3082_v49 = vld [vmem:[%s4551_s25 + $0xc8] sm:$0xf0]  ;;  %2913 = vst [vmem:[%s5018_s10 + $0x10] sm:$0xff] %v2881_v43  ;;  %v2008_v10 = vpop.f32.mrf.mxu2  ;;  %v3869_v35 = vor.u32 %v4396_v25, %v3866_v26  ;;  %v4364_v43 = vld [vmem:[%s4551_s25 + $0x55c] sm:$0xf]  ;;  %v3217_v46 = vor.u32 %v4251_v32, %v3216_v31 }
  0xc4   : > { %2395 = vmatmul.bf16.vlgmr.msra.gmra.mxu2 %v4642_v55  ;;  %v3085_v58 = vor.u32 %v4202_v41, %v3082_v49  ;;  %v3224_v54 = vld [vmem:[%s4551_s25 + $0x158] sm:$0xf]  ;;  %v4125_v10 = vor.u32 %v4460_v61, %v4122_v62  ;;  %v3874_v31 = vld [vmem:[%s4551_s25 + $0x6e0] sm:$0xf0]  ;;  %v4236_v47 = vld [vmem:[%s4551_s25 + $0x15c] sm:$0xf] }
  0xc5   : > { %2459 = vmatpush.bf16.msrb.mxu2 %v4105_v39  ;;  %2446 = vmatpush.bf16.msrb.mxu3 %v3081_v63  ;;  %v3733_v39 = vor.u32 %v4363_v23, %v3730_v24  ;;  %v3608_v63 = vld [vmem:[%s4551_s25 + $0x458] sm:$0xf]  ;;  %v4365_v48 = vld [vmem:[%s4551_s25 + $0x564] sm:$0xf] }
  0xc6   : > { %v3609_v18 = vor.u32 %v4348_v5, %v3608_v63  ;;  %v4316_v23 = vld [vmem:[%s4551_s25 + $0x3d4] sm:$0xf0] }
  0xc7   : > { %2517 = vmatpush.bf16.msra.mxu0 %v3989_v59  ;;  %2471 = vmatpush.bf16.msrb.mxu1 %v3213_v44  ;;  %v3737_v59 = vor.u32 %v4380_v50, %v3736_v0  ;;  %v5048_v38 = vpop.f32.mrf.mxu1  ;;  %v3481_v34 = vor.u32 %v4316_v23, %v3480_v22  ;;  %v2060_v40 = vpop.f32.mrf.mxu3  ;;  %v3738_v44 = vld [vmem:[%s4551_s25 + $0x5d8] sm:$0xf0]  ;;  %v4203_v50 = vld [vmem:[%s4551_s25 + $0x54] sm:$0xf]  ;;  %v4252_v57 = vld [vmem:[%s4551_s25 + $0x1d4] sm:$0xf0] }
  0xc8   : > { %2447 = vmatmul.bf16.vlgmr.msrb.gmra.mxu3 %v4642_v55  ;;  %v3225_v5 = vor.u32 %v4252_v57, %v3224_v54  ;;  %v3872_v22 = vld [vmem:[%s4551_s25 + $0x660] sm:$0xf] }
  0xc9   : > { %2491 = vmatpush.bf16.msra.mxu2 %v3985_v53  ;;  %2511 = vmatpush.bf16.msra.mxu3 %v4113_v7  ;;  %v4114_v53 = vld [vmem:[%s4551_s25 + $0x8d0] sm:$0xf0]  ;;  %v3994_v7 = vld [vmem:[%s4551_s25 + $0x7d8] sm:$0xf0]  ;;  %v4413_v23 = vld [vmem:[%s4551_s25 + $0x6dc] sm:$0xf0] }
  0xca   : > { %v4117_v4 = vor.u32 %v4459_v52, %v4114_v53  ;;  %v3997_v20 = vor.u32 %v4428_v6, %v3994_v7  ;;  %v3741_v53 = vor.u32 %v4364_v43, %v3738_v44  ;;  %v3096_v7 = vld [vmem:[%s4551_s25 + $0x58] sm:$0xf]  ;;  %v4381_v43 = vld [vmem:[%s4551_s25 + $0x5dc] sm:$0xf0] }
  0xcb   : > { %2518 = vmatpush.bf16.msra.mxu0 %v3861_v14  ;;  %v2072_v14 = vadd.f32 %v2071_v8, %v2059_v3  ;;  %2472 = vmatpush.bf16.msrb.mxu1 %v3085_v58  ;;  %v4332_v58 = vld [vmem:[%s4551_s25 + $0x45c] sm:$0xf]  ;;  %v4000_v3 = vld [vmem:[%s4551_s25 + $0x760] sm:$0xf]  ;;  %v4429_v8 = vld [vmem:[%s4551_s25 + $0x764] sm:$0xf]  ;;  %v3097_v26 = vor.u32 %v4220_v11, %v3096_v7 }
  0xcc   : > { %v4382_v7 = vld [vmem:[%s4551_s25 + $0x5e4] sm:$0xf0]  ;;  %v4130_v11 = vld [vmem:[%s4551_s25 + $0x8e0] sm:$0xf0] }
  0xcd   : > { %2492 = vmatpush.bf16.msra.mxu2 %v3857_v12  ;;  %2543 = vmatpush.bf16.msrb.mxu3 %v3993_v21  ;;  %v2880_v12 = vmax.f32 %v2848_v1, 0.0  ;;  %v3346_v21 = vld [vmem:[%s4551_s25 + $0x2d0] sm:$0xf0]  ;;  %v2812_v24 = vmul.f32 %v4988_v2, %v2072_v14  ;;  %v3482_v14 = vld [vmem:[%s4551_s25 + $0x3d8] sm:$0xf0] }
  0xce   : > { %2473 = vmatmul.bf16.vlgmr.msrb.gmra.mxu1 %v4642_v55  ;;  %v3349_v30 = vor.u32 %v4267_v17, %v3346_v21  ;;  %v4477_v17 = vld [vmem:[%s4551_s25 + $0x8dc] sm:$0xf0] }
  0xcf   : > { %2519 = vmatpush.bf16.msra.mxu0 %v3733_v39  ;;  %2912 = vst [vmem:[%s5018_s10 + $0x8] sm:$0xff] %v2880_v12  ;;  %2537 = vmatpush.bf16.msra.mxu1 %v4117_v4  ;;  %v2850_v29 = vadd.f32 %v4999_v13, %v2812_v24  ;;  %v4284_v39 = vld [vmem:[%s4551_s25 + $0x2d4] sm:$0xf0]  ;;  %v2099_v49 = vpop.f32.mrf.mxu1  ;;  %v4445_v4 = vld [vmem:[%s4551_s25 + $0x7dc] sm:$0xf0]  ;;  %v4129_v32 = vor.u32 %v4477_v17, %v4128_v16 }
  0xd0   : > { %v3353_v52 = vor.u32 %v4284_v39, %v3352_v37  ;;  %v4300_v12 = vld [vmem:[%s4551_s25 + $0x35c] sm:$0xf]  ;;  %v3746_v49 = vld [vmem:[%s4551_s25 + $0x5e0] sm:$0xf0]  ;;  %v4317_v16 = vld [vmem:[%s4551_s25 + $0x3dc] sm:$0xf0] }
  0xd1   : > { %2493 = vmatpush.bf16.msra.mxu2 %v3729_v33  ;;  %2544 = vmatpush.bf16.msrb.mxu3 %v3865_v45  ;;  %v4235_v33 = vld [vmem:[%s4551_s25 + $0x154] sm:$0xf]  ;;  %v2882_v41 = vmax.f32 %v2850_v29, 0.0  ;;  %v2073_v45 = vpop.f32.mrf.mxu0  ;;  %v4268_v24 = vld [vmem:[%s4551_s25 + $0x25c] sm:$0xf]  ;;  %v3749_v57 = vor.u32 %v4365_v48, %v3746_v49 }
  0xd2   : > { %4177 = vmatmul.msk.bf16.vlgmr.msrb.gmra.mxu0 %vm1967_vm0, %v4572_v27  ;;  %v3221_v0 = vor.u32 %v4235_v33, %v3218_v36  ;;  %v3354_v29 = vld [vmem:[%s4551_s25 + $0x2d8] sm:$0xf0]  ;;  %v4008_v33 = vld [vmem:[%s4551_s25 + $0x768] sm:$0xf]  ;;  %v3873_v36 = vor.u32 %v4413_v23, %v3872_v22  ;;  %v4301_v17 = vld [vmem:[%s4551_s25 + $0x364] sm:$0xf] }
  0xd3   : > { %2520 = vmatpush.bf16.msra.mxu0 %v3605_v56  ;;  %2569 = vmatpush.bf16.msrb.mxu1 %v3997_v20  ;;  %2914 = vst [vmem:[%s5018_s10 + $0x18] sm:$0xff] %v2882_v41  ;;  %v4120_v56 = vld [vmem:[%s4551_s25 + $0x858] sm:$0xf]  ;;  %v3357_v39 = vor.u32 %v4268_v24, %v3354_v29  ;;  %v3744_v41 = vld [vmem:[%s4551_s25 + $0x560] sm:$0xf] }
  0xd4   : > { %4176 = vmatmul.msk.bf16.vlgmr.msrb.gmra.mxu2 %vm1967_vm0, %v4572_v27  ;;  %v4121_v1 = vor.u32 %v4476_v42, %v4120_v56  ;;  %v3745_v54 = vor.u32 %v4381_v43, %v3744_v41  ;;  %v3490_v22 = vld [vmem:[%s4551_s25 + $0x3e0] sm:$0xf0]  ;;  %v3624_v23 = vld [vmem:[%s4551_s25 + $0x468] sm:$0xf] }
  0xd5   : > { %2494 = vmatpush.bf16.msra.mxu2 %v3601_v51  ;;  %2545 = vmatpush.bf16.msrb.mxu3 %v3737_v59  ;;  %v3090_v51 = vld [vmem:[%s4551_s25 + $0xd0] sm:$0xf0]  ;;  %v3610_v59 = vld [vmem:[%s4551_s25 + $0x4d8] sm:$0xf0]  ;;  %v3496_v41 = vld [vmem:[%s4551_s25 + $0x368] sm:$0xf] }
  0xd6   : > { %v3093_v63 = vor.u32 %v4203_v50, %v3090_v51  ;;  %v3613_v6 = vor.u32 %v4332_v58, %v3610_v59  ;;  %v3880_v50 = vld [vmem:[%s4551_s25 + $0x668] sm:$0xf]  ;;  %v3616_v58 = vld [vmem:[%s4551_s25 + $0x460] sm:$0xf] }
  0xd7   : > { %2521 = vmatpush.bf16.msra.mxu0 %v3477_v15  ;;  %2570 = vmatpush.bf16.msrb.mxu1 %v3869_v35  ;;  %v4001_v15 = vor.u32 %v4445_v4, %v4000_v3  ;;  %v2123_v20 = vpop.f32.mrf.mxu1  ;;  %v4414_v51 = vld [vmem:[%s4551_s25 + $0x6e4] sm:$0xf0]  ;;  %v4349_v59 = vld [vmem:[%s4551_s25 + $0x4dc] sm:$0xf0]  ;;  %v3618_v3 = vld [vmem:[%s4551_s25 + $0x4e0] sm:$0xf0] }
  0xd8   : > { %4178 = vmatmul.msk.bf16.vlgmr.msra.gmra.mxu3 %vm1967_vm0, %v4572_v27 }
  0xd9   : > { %2495 = vmatpush.bf16.msra.mxu2 %v3473_v9  ;;  %2546 = vmatpush.bf16.msrb.mxu3 %v3609_v18  ;;  %v4002_v9 = vld [vmem:[%s4551_s25 + $0x7e0] sm:$0xf0]  ;;  %v2110_v18 = vpop.f32.mrf.mxu0 }
  0xda   : > { %v4005_v21 = vor.u32 %v4429_v8, %v4002_v9  ;;  %v2111_v25 = vadd.f32 %v2110_v18, %v4958_v19  ;;  %v3617_v9 = vor.u32 %v4349_v59, %v3616_v58  ;;  %v3368_v58 = vld [vmem:[%s4551_s25 + $0x268] sm:$0xf] }
  0xdb   : > { %2522 = vmatpush.bf16.msra.mxu0 %v3349_v30  ;;  %2571 = vmatpush.bf16.msrb.mxu1 %v3741_v53  ;;  %v4397_v30 = vld [vmem:[%s4551_s25 + $0x664] sm:$0xf]  ;;  %v2084_v37 = vpop.f32.mrf.mxu2 }
  0xdc   : > { %v2124_v35 = vadd.f32 %v2123_v20, %v2111_v25  ;;  %v3877_v40 = vor.u32 %v4397_v30, %v3874_v31  ;;  %v2085_v45 = vadd.f32 %v2084_v37, %v4958_v19  ;;  %v4350_v25 = vld [vmem:[%s4551_s25 + $0x4e4] sm:$0xf0]  ;;  %v3493_v31 = vor.u32 %v4301_v17, %v3490_v22  ;;  %v3626_v22 = vld [vmem:[%s4551_s25 + $0x4e8] sm:$0xf0] }
  0xdd   : > { %2496 = vmatpush.bf16.msra.mxu2 %v3345_v28  ;;  %2547 = vmatpush.bf16.msrb.mxu3 %v3481_v34  ;;  %v3485_v28 = vor.u32 %v4300_v12, %v3482_v14  ;;  %v4446_v34 = vld [vmem:[%s4551_s25 + $0x7e4] sm:$0xf0] }
  0xde   : > { %4179 = vmatmul.msk.bf16.vlgmr.msra.gmra.mxu1 %vm1967_vm0, %v4572_v27  ;;  %v2814_v44 = vmul.f32 %v4988_v2, %v2124_v35  ;;  %v2098_v53 = vadd.f32 %v5048_v38, %v2085_v45  ;;  %v4318_v45 = vld [vmem:[%s4551_s25 + $0x3e4] sm:$0xf0] }
  0xdf   : > { %2523 = vmatpush.bf16.msra.mxu0 %v3221_v0  ;;  %2572 = vmatpush.bf16.msrb.mxu1 %v3613_v6  ;;  %v3226_v0 = vld [vmem:[%s4551_s25 + $0x1d8] sm:$0xf0]  ;;  %v2125_v42 = vpop.f32.mrf.mxu1  ;;  %v2136_v4 = vpop.f32.mrf.mxu3  ;;  %v3752_v6 = vld [vmem:[%s4551_s25 + $0x568] sm:$0xf] }
  0xe0   : > { %v2813_v38 = vmul.f32 %v4988_v2, %v2098_v53  ;;  %v3229_v62 = vor.u32 %v4236_v47, %v3226_v0  ;;  %v3882_v47 = vld [vmem:[%s4551_s25 + $0x6e8] sm:$0xf0]  ;;  %v4237_v42 = vld [vmem:[%s4551_s25 + $0x164] sm:$0xf]  ;;  %v4136_v17 = vld [vmem:[%s4551_s25 + $0x868] sm:$0xf] }
  0xe1   : > { %2497 = vmatpush.bf16.msra.mxu2 %v3217_v46  ;;  %2548 = vmatpush.bf16.msrb.mxu3 %v3353_v52  ;;  %v4009_v46 = vor.u32 %v4446_v34, %v4008_v33  ;;  %v2852_v52 = vadd.f32 %v4999_v13, %v2814_v44  ;;  %v2112_v56 = vpop.f32.mrf.mxu0  ;;  %v4285_v33 = vld [vmem:[%s4551_s25 + $0x2dc] sm:$0xf0]  ;;  %v2137_v34 = vadd.f32 %v2136_v4, %v4958_v19  ;;  %v4205_v4 = vld [vmem:[%s4551_s25 + $0x64] sm:$0xf] }
  0xe2   : > { %v2851_v8 = vadd.f32 %v4999_v13, %v2813_v38  ;;  %v3754_v38 = vld [vmem:[%s4551_s25 + $0x5e8] sm:$0xf0] }
  0xe3   : > { %2524 = vmatpush.bf16.msra.mxu0 %v3093_v63  ;;  %2573 = vmatpush.bf16.msrb.mxu1 %v3485_v28  ;;  %v2884_v61 = vmax.f32 %v2852_v52, 0.0  ;;  %v3881_v63 = vor.u32 %v4414_v51, %v3880_v50  ;;  %v2086_v12 = vpop.f32.mrf.mxu2  ;;  %v4010_v28 = vld [vmem:[%s4551_s25 + $0x7e8] sm:$0xf0]  ;;  %v3232_v51 = vld [vmem:[%s4551_s25 + $0x160] sm:$0xf] }
  0xe4   : > { %v2883_v18 = vmax.f32 %v2851_v8, 0.0  ;;  %v4253_v52 = vld [vmem:[%s4551_s25 + $0x1dc] sm:$0xf0]  ;;  %v3106_v8 = vld [vmem:[%s4551_s25 + $0xe0] sm:$0xf0] }
  0xe5   : > { %2498 = vmatpush.bf16.msra.mxu2 %v3089_v60  ;;  %2549 = vmatpush.bf16.msrb.mxu3 %v3225_v5  ;;  %v4204_v60 = vld [vmem:[%s4551_s25 + $0x5c] sm:$0xf]  ;;  %2916 = vst [vmem:[%s5018_s10 + $0x28] sm:$0xff] %v2884_v61  ;;  %v4366_v61 = vld [vmem:[%s4551_s25 + $0x56c] sm:$0xf] }
  0xe6   : > { %2525 = vmatmul.bf16.vlgmr.msra.gmra.mxu0 %v4642_v55  ;;  %v3098_v5 = vld [vmem:[%s4551_s25 + $0xd8] sm:$0xf0]  ;;  %2915 = vst [vmem:[%s5018_s10 + $0x20] sm:$0xff] %v2883_v18  ;;  %v4478_v18 = vld [vmem:[%s4551_s25 + $0x8e4] sm:$0xf0] }
  0xe7   : > { %2589 = vmatpush.bf16.msrb.mxu0 %v4125_v10  ;;  %2574 = vmatpush.bf16.msrb.mxu1 %v3357_v39  ;;  %v4461_v10 = vld [vmem:[%s4551_s25 + $0x864] sm:$0xf]  ;;  %v3101_v20 = vor.u32 %v4204_v60, %v3098_v5  ;;  %v2162_v35 = vpop.f32.mrf.mxu1  ;;  %v2138_v44 = vpop.f32.mrf.mxu3  ;;  %v4286_v60 = vld [vmem:[%s4551_s25 + $0x2e4] sm:$0xf0] }
  0xe8   : > { %2499 = vmatmul.bf16.vlgmr.msra.gmra.mxu2 %v4642_v55  ;;  %v4133_v24 = vor.u32 %v4461_v10, %v4130_v11  ;;  %v4269_v39 = vld [vmem:[%s4551_s25 + $0x264] sm:$0xf]  ;;  %v2163_v43 = vadd.f32 %v2162_v35, %v4958_v19  ;;  %v4254_v10 = vld [vmem:[%s4551_s25 + $0x1e4] sm:$0xf0] }
  0xe9   : > { %2563 = vmatpush.bf16.msrb.mxu2 %v4121_v1  ;;  %2550 = vmatpush.bf16.msrb.mxu3 %v3097_v26  ;;  %v4333_v1 = vld [vmem:[%s4551_s25 + $0x464] sm:$0xf]  ;;  %v4430_v26 = vld [vmem:[%s4551_s25 + $0x76c] sm:$0xf]  ;;  %v2175_v30 = vpop.f32.mrf.mxu0 }
  0xea   : > { %v3621_v14 = vor.u32 %v4333_v1, %v3618_v3  ;;  %v4013_v37 = vor.u32 %v4430_v26, %v4010_v28  ;;  %v2176_v49 = vadd.f32 %v2175_v30, %v2163_v43  ;;  %v3104_v1 = vld [vmem:[%s4551_s25 + $0x60] sm:$0xf]  ;;  %v4462_v26 = vld [vmem:[%s4551_s25 + $0x86c] sm:$0xf]  ;;  %v3109_v30 = vor.u32 %v4205_v4, %v3106_v8 }
  0xeb   : > { %2621 = vmatpush.bf16.msra.mxu0 %v4005_v21  ;;  %2575 = vmatpush.bf16.msrb.mxu1 %v3229_v62  ;;  %v3753_v21 = vor.u32 %v4382_v7, %v3752_v6  ;;  %v2149_v0 = vpop.f32.mrf.mxu2  ;;  %v4221_v3 = vld [vmem:[%s4551_s25 + $0xdc] sm:$0xf0]  ;;  %v4138_v28 = vld [vmem:[%s4551_s25 + $0x8e8] sm:$0xf0] }
  0xec   : > { %2551 = vmatmul.bf16.vlgmr.msrb.gmra.mxu3 %v4642_v55  ;;  %v2150_v53 = vadd.f32 %v2149_v0, %v2137_v34  ;;  %v2816_v59 = vmul.f32 %v4988_v2, %v2176_v49  ;;  %v3498_v43 = vld [vmem:[%s4551_s25 + $0x3e8] sm:$0xf0]  ;;  %v3888_v49 = vld [vmem:[%s4551_s25 + $0x670] sm:$0xf] }
  0xed   : > { %2595 = vmatpush.bf16.msra.mxu2 %v4001_v15  ;;  %2615 = vmatpush.bf16.msra.mxu3 %v4129_v32  ;;  %v3488_v15 = vld [vmem:[%s4551_s25 + $0x360] sm:$0xf]  ;;  %v4415_v0 = vld [vmem:[%s4551_s25 + $0x6ec] sm:$0xf0]  ;;  %v4238_v8 = vld [vmem:[%s4551_s25 + $0x16c] sm:$0xf] }
  0xee   : > { %v3489_v29 = vor.u32 %v4317_v16, %v3488_v15  ;;  %v3360_v32 = vld [vmem:[%s4551_s25 + $0x260] sm:$0xf]  ;;  %v2815_v62 = vmul.f32 %v4988_v2, %v2150_v53  ;;  %v2854_v5 = vadd.f32 %v4999_v13, %v2816_v59  ;;  %v3757_v15 = vor.u32 %v4366_v61, %v3754_v38  ;;  %v4334_v16 = vld [vmem:[%s4551_s25 + $0x46c] sm:$0xf]  ;;  %v4448_v61 = vld [vmem:[%s4551_s25 + $0x7f4] sm:$0xf0] }
  0xef   : > { %2622 = vmatpush.bf16.msra.mxu0 %v3877_v40  ;;  %2576 = vmatpush.bf16.msrb.mxu1 %v3101_v20  ;;  %v3362_v40 = vld [vmem:[%s4551_s25 + $0x2e0] sm:$0xf0]  ;;  %v3361_v48 = vor.u32 %v4285_v33, %v3360_v32  ;;  %v2164_v12 = vpop.f32.mrf.mxu1  ;;  %v4447_v32 = vld [vmem:[%s4551_s25 + $0x7ec] sm:$0xf0]  ;;  %v3112_v33 = vld [vmem:[%s4551_s25 + $0x68] sm:$0xf]  ;;  %v3629_v35 = vor.u32 %v4334_v16, %v3626_v22 }
  0xf0   : > { %v3365_v50 = vor.u32 %v4269_v39, %v3362_v40  ;;  %v2853_v11 = vadd.f32 %v4999_v13, %v2815_v62  ;;  %v2886_v20 = vmax.f32 %v2854_v5, 0.0  ;;  %v4141_v39 = vor.u32 %v4462_v26, %v4138_v28  ;;  %v4222_v40 = vld [vmem:[%s4551_s25 + $0xe4] sm:$0xf0]  ;;  %v3370_v59 = vld [vmem:[%s4551_s25 + $0x2e8] sm:$0xf0] }
  0xf1   : > { %2596 = vmatpush.bf16.msra.mxu2 %v3873_v36  ;;  %2647 = vmatpush.bf16.msrb.mxu3 %v4009_v46  ;;  %v3625_v36 = vor.u32 %v4350_v25, %v3624_v23  ;;  %v4398_v46 = vld [vmem:[%s4551_s25 + $0x66c] sm:$0xf]  ;;  %v2177_v6 = vpop.f32.mrf.mxu0  ;;  %v4016_v23 = vld [vmem:[%s4551_s25 + $0x770] sm:$0xf]  ;;  %v3105_v25 = vor.u32 %v4221_v3, %v3104_v1  ;;  %v3889_v62 = vor.u32 %v4415_v0, %v3888_v49  ;;  %v3506_v0 = vld [vmem:[%s4551_s25 + $0x3f0] sm:$0xf0] }
  0xf2   : > { %2577 = vmatmul.bf16.vlgmr.msrb.gmra.mxu1 %v4642_v55  ;;  %v3885_v56 = vor.u32 %v4398_v46, %v3882_v47  ;;  %2918 = vst [vmem:[%s5018_s10 + $0x38] sm:$0xff] %v2886_v20  ;;  %v4017_v44 = vor.u32 %v4447_v32, %v4016_v23  ;;  %v4479_v46 = vld [vmem:[%s4551_s25 + $0x8ec] sm:$0xf0]  ;;  %v3242_v12 = vld [vmem:[%s4551_s25 + $0x1e8] sm:$0xf0] }
  0xf3   : > { %2623 = vmatpush.bf16.msra.mxu0 %v3749_v57  ;;  %2641 = vmatpush.bf16.msra.mxu1 %v4133_v24  ;;  %v3234_v57 = vld [vmem:[%s4551_s25 + $0x1e0] sm:$0xf0]  ;;  %v2885_v24 = vmax.f32 %v2853_v11, 0.0  ;;  %v3760_v1 = vld [vmem:[%s4551_s25 + $0x570] sm:$0xf] }
  0xf4   : > { %v3237_v7 = vor.u32 %v4237_v42, %v3234_v57  ;;  %v3890_v42 = vld [vmem:[%s4551_s25 + $0x6f0] sm:$0xf0]  ;;  %v4383_v3 = vld [vmem:[%s4551_s25 + $0x5ec] sm:$0xf0] }
  0xf5   : > { %2597 = vmatpush.bf16.msra.mxu2 %v3745_v54  ;;  %2648 = vmatpush.bf16.msrb.mxu3 %v3881_v63  ;;  %v3497_v54 = vor.u32 %v4318_v45, %v3496_v41  ;;  %v3233_v63 = vor.u32 %v4253_v52, %v3232_v51  ;;  %2917 = vst [vmem:[%s5018_s10 + $0x30] sm:$0xff] %v2885_v24  ;;  %v4302_v41 = vld [vmem:[%s4551_s25 + $0x36c] sm:$0xf]  ;;  %v4144_v45 = vld [vmem:[%s4551_s25 + $0x870] sm:$0xf] }
  0xf6   : > { %4181 = vmatmul.msk.bf16.vlgmr.msrb.gmra.mxu0 %vm1967_vm0, %v4572_v27  ;;  %v3113_v52 = vor.u32 %v4222_v40, %v3112_v33  ;;  %v3501_v53 = vor.u32 %v4302_v41, %v3498_v43  ;;  %v3632_v23 = vld [vmem:[%s4551_s25 + $0x470] sm:$0xf]  ;;  %v3114_v33 = vld [vmem:[%s4551_s25 + $0xe8] sm:$0xf0]  ;;  %v4146_v40 = vld [vmem:[%s4551_s25 + $0x8f0] sm:$0xf0] }
  0xf7   : > { %2624 = vmatpush.bf16.msra.mxu0 %v3621_v14  ;;  %2673 = vmatpush.bf16.msrb.mxu1 %v4013_v37  ;;  %v3369_v14 = vor.u32 %v4286_v60, %v3368_v58  ;;  %v4018_v37 = vld [vmem:[%s4551_s25 + $0x7f0] sm:$0xf0]  ;;  %v2227_v51 = vpop.f32.mrf.mxu1  ;;  %v4145_v58 = vor.u32 %v4479_v46, %v4144_v45  ;;  %v4024_v60 = vld [vmem:[%s4551_s25 + $0x778] sm:$0xf]  ;;  %v4351_v24 = vld [vmem:[%s4551_s25 + $0x4ec] sm:$0xf0] }
  0xf8   : > { %4180 = vmatmul.msk.bf16.vlgmr.msrb.gmra.mxu2 %vm1967_vm0, %v4572_v27  ;;  %v4319_v45 = vld [vmem:[%s4551_s25 + $0x3ec] sm:$0xf0]  ;;  %v4303_v46 = vld [vmem:[%s4551_s25 + $0x374] sm:$0xf] }
  0xf9   : > { %2598 = vmatpush.bf16.msra.mxu2 %v3617_v9  ;;  %2649 = vmatpush.bf16.msrb.mxu3 %v3753_v21  ;;  %v3240_v9 = vld [vmem:[%s4551_s25 + $0x168] sm:$0xf]  ;;  %v5184_v21 = vpop.f32.mrf.mxu3  ;;  %v2214_v47 = vpop.f32.mrf.mxu0 }
  0xfa   : > { %v3241_v34 = vor.u32 %v4254_v10, %v3240_v9  ;;  %v4367_v9 = vld [vmem:[%s4551_s25 + $0x574] sm:$0xf] }
  0xfb   : > { %2625 = vmatpush.bf16.msra.mxu0 %v3493_v31  ;;  %2674 = vmatpush.bf16.msrb.mxu1 %v3885_v56  ;;  %v4137_v31 = vor.u32 %v4478_v18, %v4136_v17  ;;  %v4399_v56 = vld [vmem:[%s4551_s25 + $0x674] sm:$0xf]  ;;  %v3761_v17 = vor.u32 %v4383_v3, %v3760_v1  ;;  %v3512_v3 = vld [vmem:[%s4551_s25 + $0x378] sm:$0xf] }
  0xfc   : > { %4182 = vmatmul.msk.bf16.vlgmr.msra.gmra.mxu3 %vm1967_vm0, %v4572_v27  ;;  %v3762_v10 = vld [vmem:[%s4551_s25 + $0x5f0] sm:$0xf0] }
  0xfd   : > { %2599 = vmatpush.bf16.msra.mxu2 %v3489_v29  ;;  %2650 = vmatpush.bf16.msrb.mxu3 %v3625_v36  ;;  %v2151_v29 = vpop.f32.mrf.mxu2  ;;  %v4431_v36 = vld [vmem:[%s4551_s25 + $0x774] sm:$0xf]  ;;  %v3765_v22 = vor.u32 %v4367_v9, %v3762_v10 }
  0xfe   : > { %v3245_v29 = vor.u32 %v4238_v8, %v3242_v12  ;;  %v3378_v1 = vld [vmem:[%s4551_s25 + $0x2f0] sm:$0xf0]  ;;  %v3898_v8 = vld [vmem:[%s4551_s25 + $0x6f8] sm:$0xf0] }
  0xff   : > { %2626 = vmatpush.bf16.msra.mxu0 %v3365_v50  ;;  %2675 = vmatpush.bf16.msrb.mxu1 %v3757_v15  ;;  %v2215_v50 = vadd.f32 %v2214_v47, %v4958_v19  ;;  %v4416_v15 = vld [vmem:[%s4551_s25 + $0x6f4] sm:$0xf0]  ;;  %v2229_v28 = vpop.f32.mrf.mxu1 }
 0x100   : > { %v4368_v28 = vld [vmem:[%s4551_s25 + $0x57c] sm:$0xf] }
 0x101   : > { %2600 = vmatpush.bf16.msra.mxu2 %v3361_v48  ;;  %2651 = vmatpush.bf16.msrb.mxu3 %v3497_v54  ;;  %v4021_v48 = vor.u32 %v4431_v36, %v4018_v37  ;;  %v4270_v54 = vld [vmem:[%s4551_s25 + $0x26c] sm:$0xf]  ;;  %v2203_v57 = vpop.f32.mrf.mxu3  ;;  %v2228_v38 = vadd.f32 %v2227_v51, %v2215_v50  ;;  %v2216_v20 = vpop.f32.mrf.mxu0  ;;  %v3633_v37 = vor.u32 %v4351_v24, %v3632_v23  ;;  %v3640_v50 = vld [vmem:[%s4551_s25 + $0x478] sm:$0xf] }
 0x102   : > { %4183 = vmatmul.msk.bf16.vlgmr.msra.gmra.mxu1 %vm1967_vm0, %v4572_v27  ;;  %v3373_v6 = vor.u32 %v4270_v54, %v3370_v59  ;;  %v4352_v51 = vld [vmem:[%s4551_s25 + $0x4f4] sm:$0xf0]  ;;  %v4432_v54 = vld [vmem:[%s4551_s25 + $0x77c] sm:$0xf]  ;;  %v3376_v59 = vld [vmem:[%s4551_s25 + $0x270] sm:$0xf] }
 0x103   : > { %2627 = vmatpush.bf16.msra.mxu0 %v3237_v7  ;;  %2676 = vmatpush.bf16.msrb.mxu1 %v3629_v35  ;;  %v2818_v4 = vmul.f32 %v4988_v2, %v2228_v38  ;;  %v4025_v7 = vor.u32 %v4448_v61, %v4024_v60  ;;  %v4384_v35 = vld [vmem:[%s4551_s25 + $0x5f4] sm:$0xf0]  ;;  %v4287_v60 = vld [vmem:[%s4551_s25 + $0x2ec] sm:$0xf0]  ;;  %v3641_v38 = vor.u32 %v4352_v51, %v3640_v50  ;;  %v4239_v20 = vld [vmem:[%s4551_s25 + $0x174] sm:$0xf] }
 0x104   : > { %v3377_v10 = vor.u32 %v4287_v60, %v3376_v59  ;;  %v3384_v23 = vld [vmem:[%s4551_s25 + $0x278] sm:$0xf] }
 0x105   : > { %2601 = vmatpush.bf16.msra.mxu2 %v3233_v63  ;;  %2652 = vmatpush.bf16.msrb.mxu3 %v3369_v14  ;;  %v3893_v63 = vor.u32 %v4399_v56, %v3890_v42  ;;  %v2188_v5 = vpop.f32.mrf.mxu2  ;;  %v3896_v14 = vld [vmem:[%s4551_s25 + $0x678] sm:$0xf]  ;;  %v2856_v16 = vadd.f32 %v4999_v13, %v2818_v4  ;;  %v4026_v56 = vld [vmem:[%s4551_s25 + $0x7f8] sm:$0xf0] }
 0x106   : > { %v2189_v11 = vadd.f32 %v2188_v5, %v4958_v19  ;;  %v3128_v60 = vld [vmem:[%s4551_s25 + $0x78] sm:$0xf] }
 0x107   : > { %2628 = vmatpush.bf16.msra.mxu0 %v3109_v30  ;;  %2677 = vmatpush.bf16.msrb.mxu1 %v3501_v53  ;;  %v2888_v26 = vmax.f32 %v2856_v16, 0.0  ;;  %v4335_v30 = vld [vmem:[%s4551_s25 + $0x474] sm:$0xf]  ;;  %v2266_v61 = vpop.f32.mrf.mxu1 }
 0x108   : > { %v2202_v18 = vadd.f32 %v5184_v21, %v2189_v11  ;;  %v3897_v21 = vor.u32 %v4416_v15, %v3896_v14  ;;  %v2267_v5 = vadd.f32 %v2266_v61, %v4958_v19  ;;  %v3248_v14 = vld [vmem:[%s4551_s25 + $0x170] sm:$0xf]  ;;  %v4224_v61 = vld [vmem:[%s4551_s25 + $0xf4] sm:$0xf0] }
 0x109   : > { %2602 = vmatpush.bf16.msra.mxu2 %v3105_v25  ;;  %2653 = vmatpush.bf16.msrb.mxu3 %v3241_v34  ;;  %v4206_v25 = vld [vmem:[%s4551_s25 + $0x6c] sm:$0xf]  ;;  %v3768_v34 = vld [vmem:[%s4551_s25 + $0x578] sm:$0xf]  ;;  %2920 = vst [vmem:[%s5018_s10 + $0x48] sm:$0xff] %v2888_v26  ;;  %v2240_v36 = vpop.f32.mrf.mxu3  ;;  %v2279_v57 = vpop.f32.mrf.mxu0 }
 0x10a   : > { %2629 = vmatmul.bf16.vlgmr.msra.gmra.mxu0 %v4642_v55  ;;  %v2817_v32 = vmul.f32 %v4988_v2, %v2202_v18  ;;  %v3769_v49 = vor.u32 %v4384_v35, %v3768_v34  ;;  %v2241_v4 = vadd.f32 %v2240_v36, %v4958_v19  ;;  %v2280_v11 = vadd.f32 %v2279_v57, %v2267_v5  ;;  %v4255_v15 = vld [vmem:[%s4551_s25 + $0x1ec] sm:$0xf0]  ;;  %v4288_v26 = vld [vmem:[%s4551_s25 + $0x2f4] sm:$0xf0]  ;;  %v4207_v36 = vld [vmem:[%s4551_s25 + $0x74] sm:$0xf] }
 0x10b   : > { %2693 = vmatpush.bf16.msrb.mxu0 %v4141_v39  ;;  %2678 = vmatpush.bf16.msrb.mxu1 %v3373_v6  ;;  %v4463_v39 = vld [vmem:[%s4551_s25 + $0x874] sm:$0xf]  ;;  %v4320_v6 = vld [vmem:[%s4551_s25 + $0x3f4] sm:$0xf0]  ;;  %v3129_v5 = vor.u32 %v4224_v61, %v3128_v60 }
 0x10c   : > { %2603 = vmatmul.bf16.vlgmr.msra.gmra.mxu2 %v4642_v55  ;;  %v2855_v41 = vadd.f32 %v4999_v13, %v2817_v32  ;;  %v4149_v53 = vor.u32 %v4463_v39, %v4146_v40  ;;  %v2820_v24 = vmul.f32 %v4988_v2, %v2280_v11  ;;  %v3256_v39 = vld [vmem:[%s4551_s25 + $0x178] sm:$0xf] }
 0x10d   : > { %2667 = vmatpush.bf16.msrb.mxu2 %v4137_v31  ;;  %2654 = vmatpush.bf16.msrb.mxu3 %v3113_v52  ;;  %v3634_v31 = vld [vmem:[%s4551_s25 + $0x4f0] sm:$0xf0]  ;;  %v2190_v47 = vpop.f32.mrf.mxu2 }
 0x10e   : > { %v3637_v43 = vor.u32 %v4335_v30, %v3634_v31  ;;  %v2887_v52 = vmax.f32 %v2855_v41, 0.0  ;;  %v3120_v30 = vld [vmem:[%s4551_s25 + $0x70] sm:$0xf]  ;;  %v2858_v32 = vadd.f32 %v4999_v13, %v2820_v24  ;;  %v3385_v41 = vor.u32 %v4288_v26, %v3384_v23 }
 0x10f   : > { %2725 = vmatpush.bf16.msra.mxu0 %v4021_v48  ;;  %2679 = vmatpush.bf16.msrb.mxu1 %v3245_v29  ;;  %v3117_v48 = vor.u32 %v4206_v25, %v3114_v33  ;;  %v3770_v29 = vld [vmem:[%s4551_s25 + $0x5f8] sm:$0xf0]  ;;  %v4223_v31 = vld [vmem:[%s4551_s25 + $0xec] sm:$0xf0]  ;;  %v2268_v40 = vpop.f32.mrf.mxu1 }
 0x110   : > { %2655 = vmatmul.bf16.vlgmr.msrb.gmra.mxu3 %v4642_v55  ;;  %2919 = vst [vmem:[%s5018_s10 + $0x40] sm:$0xff] %v2887_v52  ;;  %v2890_v47 = vmax.f32 %v2858_v32, 0.0  ;;  %v3121_v51 = vor.u32 %v4223_v31, %v3120_v30  ;;  %v4464_v52 = vld [vmem:[%s4551_s25 + $0x87c] sm:$0xf] }
 0x111   : > { %2699 = vmatpush.bf16.msra.mxu2 %v4017_v44  ;;  %2719 = vmatpush.bf16.msra.mxu3 %v4145_v58  ;;  %v3504_v44 = vld [vmem:[%s4551_s25 + $0x370] sm:$0xf]  ;;  %v3509_v58 = vor.u32 %v4303_v46, %v3506_v0  ;;  %v2242_v9 = vpop.f32.mrf.mxu3  ;;  %v2281_v34 = vpop.f32.mrf.mxu0  ;;  %v4480_v46 = vld [vmem:[%s4551_s25 + $0x8f4] sm:$0xf0]  ;;  %v3642_v0 = vld [vmem:[%s4551_s25 + $0x4f8] sm:$0xf0] }
 0x112   : > { %v3505_v42 = vor.u32 %v4319_v45, %v3504_v44  ;;  %v4256_v44 = vld [vmem:[%s4551_s25 + $0x1f4] sm:$0xf0]  ;;  %2922 = vst [vmem:[%s5018_s10 + $0x58] sm:$0xff] %v2890_v47 }
 0x113   : > { %2726 = vmatpush.bf16.msra.mxu0 %v3893_v63  ;;  %2680 = vmatpush.bf16.msrb.mxu1 %v3117_v48  ;;  %v4271_v63 = vld [vmem:[%s4551_s25 + $0x274] sm:$0xf]  ;;  %v4152_v45 = vld [vmem:[%s4551_s25 + $0x878] sm:$0xf] }
 0x114   : > { %v3381_v12 = vor.u32 %v4271_v63, %v3378_v1 }
 0x115   : > { %2700 = vmatpush.bf16.msra.mxu2 %v3889_v62  ;;  %2751 = vmatpush.bf16.msrb.mxu3 %v4025_v7  ;;  %v4029_v62 = vor.u32 %v4432_v54, %v4026_v56  ;;  %v4400_v7 = vld [vmem:[%s4551_s25 + $0x67c] sm:$0xf]  ;;  %v2253_v16 = vpop.f32.mrf.mxu2 }
 0x116   : > { %2681 = vmatmul.bf16.vlgmr.msrb.gmra.mxu1 %v4642_v55  ;;  %v3901_v18 = vor.u32 %v4400_v7, %v3898_v8  ;;  %v2254_v25 = vadd.f32 %v2253_v16, %v2241_v4  ;;  %v4272_v7 = vld [vmem:[%s4551_s25 + $0x27c] sm:$0xf] }
 0x117   : > { %2727 = vmatpush.bf16.msra.mxu0 %v3765_v22  ;;  %2745 = vmatpush.bf16.msra.mxu1 %v4149_v53  ;;  %v3250_v22 = vld [vmem:[%s4551_s25 + $0x1f0] sm:$0xf0]  ;;  %v4154_v53 = vld [vmem:[%s4551_s25 + $0x8f8] sm:$0xf0]  ;;  %v2331_v4 = vpop.f32.mrf.mxu1 }
 0x118   : > { %v2819_v33 = vmul.f32 %v4988_v2, %v2254_v25  ;;  %v3253_v35 = vor.u32 %v4239_v20, %v3250_v22  ;;  %v4157_v63 = vor.u32 %v4464_v52, %v4154_v53  ;;  %v3386_v8 = vld [vmem:[%s4551_s25 + $0x2f8] sm:$0xf0] }
 0x119   : > { %2701 = vmatpush.bf16.msra.mxu2 %v3761_v17  ;;  %2752 = vmatpush.bf16.msrb.mxu3 %v3897_v21  ;;  %v3513_v17 = vor.u32 %v4320_v6, %v3512_v3  ;;  %v3249_v21 = vor.u32 %v4255_v15, %v3248_v14  ;;  %v2305_v50 = vpop.f32.mrf.mxu3  ;;  %v3389_v14 = vor.u32 %v4272_v7, %v3386_v8  ;;  %v4240_v16 = vld [vmem:[%s4551_s25 + $0x17c] sm:$0xf] }
 0x11a   : > { %4185 = vmatmul.msk.bf16.vlgmr.msrb.gmra.mxu0 %vm1967_vm0, %v4572_v27  ;;  %v2857_v48 = vadd.f32 %v4999_v13, %v2819_v33 }
 0x11b   : > { %2728 = vmatpush.bf16.msra.mxu0 %v3637_v43  ;;  %2777 = vmatpush.bf16.msrb.mxu1 %v4029_v62  ;;  %v3773_v43 = vor.u32 %v4368_v28, %v3770_v29  ;;  %v3514_v62 = vld [vmem:[%s4551_s25 + $0x3f8] sm:$0xf0]  ;;  %v2318_v1 = vpop.f32.mrf.mxu0 }
 0x11c   : > { %4184 = vmatmul.msk.bf16.vlgmr.msrb.gmra.mxu2 %vm1967_vm0, %v4572_v27  ;;  %v2889_v54 = vmax.f32 %v2857_v48, 0.0  ;;  %v2319_v3 = vadd.f32 %v2318_v1, %v4958_v19  ;;  %v4208_v28 = vld [vmem:[%s4551_s25 + $0x7c] sm:$0xf] }
 0x11d   : > { %2702 = vmatpush.bf16.msra.mxu2 %v3633_v37  ;;  %2753 = vmatpush.bf16.msrb.mxu3 %v3769_v49  ;;  %v3122_v37 = vld [vmem:[%s4551_s25 + $0xf0] sm:$0xf0]  ;;  %v4336_v49 = vld [vmem:[%s4551_s25 + $0x47c] sm:$0xf]  ;;  %v2255_v57 = vpop.f32.mrf.mxu2 }
 0x11e   : > { %v3125_v56 = vor.u32 %v4207_v36, %v3122_v37  ;;  %v3645_v59 = vor.u32 %v4336_v49, %v3642_v0  ;;  %2921 = vst [vmem:[%s5018_s10 + $0x50] sm:$0xff] %v2889_v54  ;;  %v2332_v9 = vadd.f32 %v2331_v4, %v2319_v3  ;;  %v3130_v29 = vld [vmem:[%s4551_s25 + $0xf8] sm:$0xf0] }
 0x11f   : > { %2729 = vmatpush.bf16.msra.mxu0 %v3509_v58  ;;  %2778 = vmatpush.bf16.msrb.mxu1 %v3901_v18  ;;  %v3257_v58 = vor.u32 %v4256_v44, %v3256_v39  ;;  %v2333_v24 = vpop.f32.mrf.mxu1  ;;  %v3133_v32 = vor.u32 %v4208_v28, %v3130_v29 }
 0x120   : > { %4186 = vmatmul.msk.bf16.vlgmr.msra.gmra.mxu3 %vm1967_vm0, %v4572_v27  ;;  %v2822_v11 = vmul.f32 %v4988_v2, %v2332_v9 }
 0x121   : > { %2703 = vmatpush.bf16.msra.mxu2 %v3505_v42  ;;  %2754 = vmatpush.bf16.msrb.mxu3 %v3641_v38  ;;  %v4153_v42 = vor.u32 %v4480_v46, %v4152_v45  ;;  %v4304_v38 = vld [vmem:[%s4551_s25 + $0x37c] sm:$0xf] }
 0x122   : > { %v3517_v6 = vor.u32 %v4304_v38, %v3514_v62  ;;  %v2860_v18 = vadd.f32 %v4999_v13, %v2822_v11 }
 0x123   : > { %2730 = vmatpush.bf16.msra.mxu0 %v3381_v12  ;;  %2779 = vmatpush.bf16.msrb.mxu1 %v3773_v43  ;;  %v2320_v22 = vpop.f32.mrf.mxu0 }
 0x124   : > { %v2892_v23 = vmax.f32 %v2860_v18, 0.0 }
 0x125   : > { %2704 = vmatpush.bf16.msra.mxu2 %v3377_v10  ;;  %2755 = vmatpush.bf16.msrb.mxu3 %v3513_v17  ;;  %v2307_v10 = vpop.f32.mrf.mxu3  ;;  %v2292_v12 = vpop.f32.mrf.mxu2  ;;  %v3258_v17 = vld [vmem:[%s4551_s25 + $0x1f8] sm:$0xf0] }
 0x126   : > { %4187 = vmatmul.msk.bf16.vlgmr.msra.gmra.mxu1 %vm1967_vm0, %v4572_v27  ;;  %v2293_v15 = vadd.f32 %v2292_v12, %v4958_v19  ;;  %v3261_v25 = vor.u32 %v4240_v16, %v3258_v17  ;;  %2924 = vst [vmem:[%s5018_s10 + $0x68] sm:$0xff] %v2892_v23 }
 0x127   : > { %2731 = vmatpush.bf16.msra.mxu0 %v3253_v35  ;;  %2780 = vmatpush.bf16.msrb.mxu1 %v3645_v59  ;;  %v2370_v35 = vpop.f32.mrf.mxu1 }
 0x128   : > { %v2306_v20 = vadd.f32 %v2305_v50, %v2293_v15  ;;  %v2371_v37 = vadd.f32 %v2370_v35, %v4958_v19 }
 0x129   : > { %2705 = vmatpush.bf16.msra.mxu2 %v3249_v21  ;;  %2756 = vmatpush.bf16.msrb.mxu3 %v3385_v41 }
 0x12a   : > { %v2821_v26 = vmul.f32 %v4988_v2, %v2306_v20 }
 0x12b   : > { %2732 = vmatpush.bf16.msra.mxu0 %v3125_v56  ;;  %2781 = vmatpush.bf16.msrb.mxu1 %v3517_v6  ;;  %v2383_v34 = vpop.f32.mrf.mxu0 }
 0x12c   : > { %v2859_v30 = vadd.f32 %v4999_v13, %v2821_v26  ;;  %v2384_v40 = vadd.f32 %v2383_v34, %v2371_v37 }
 0x12d   : > { %2706 = vmatpush.bf16.msra.mxu2 %v3121_v51  ;;  %2757 = vmatpush.bf16.msrb.mxu3 %v3257_v58  ;;  %v2344_v21 = vpop.f32.mrf.mxu3  ;;  %v2294_v31 = vpop.f32.mrf.mxu2 }
 0x12e   : > { %2733 = vmatmul.bf16.vlgmr.msra.gmra.mxu0 %v4642_v55  ;;  %v2891_v33 = vmax.f32 %v2859_v30, 0.0  ;;  %v2345_v36 = vadd.f32 %v2344_v21, %v4958_v19  ;;  %v2824_v43 = vmul.f32 %v4988_v2, %v2384_v40 }
 0x12f   : > { %2797 = vmatpush.bf16.msrb.mxu0 %v4157_v63  ;;  %2782 = vmatpush.bf16.msrb.mxu1 %v3389_v14  ;;  %v2372_v48 = vpop.f32.mrf.mxu1 }
 0x130   : > { %2707 = vmatmul.bf16.vlgmr.msra.gmra.mxu2 %v4642_v55  ;;  %2923 = vst [vmem:[%s5018_s10 + $0x60] sm:$0xff] %v2891_v33  ;;  %v2862_v45 = vadd.f32 %v4999_v13, %v2824_v43 }
 0x131   : > { %2771 = vmatpush.bf16.msrb.mxu2 %v4153_v42  ;;  %2758 = vmatpush.bf16.msrb.mxu3 %v3129_v5 }
 0x132   : > { %v2894_v49 = vmax.f32 %v2862_v45, 0.0 }
 0x133   : > { %2783 = vmatpush.bf16.msrb.mxu1 %v3261_v25  ;;  %v2385_v47 = vpop.f32.mrf.mxu0 }
 0x134   : > { %2759 = vmatmul.bf16.vlgmr.msrb.gmra.mxu3 %v4642_v55  ;;  %2926 = vst [vmem:[%s5018_s10 + $0x78] sm:$0xff] %v2894_v49 }
 0x135   : > { %v2346_v39 = vpop.f32.mrf.mxu3  ;;  %v2357_v41 = vpop.f32.mrf.mxu2 }
 0x136   : > { %v2358_v44 = vadd.f32 %v2357_v41, %v2345_v36 }
 0x137   : > { %2784 = vmatpush.bf16.msrb.mxu1 %v3133_v32  ;;  %v2435_v53 = vpop.f32.mrf.mxu1 }
 0x138   : > { %v2823_v46 = vmul.f32 %v4988_v2, %v2358_v44 }
 0x13a   : > { %2785 = vmatmul.bf16.vlgmr.msrb.gmra.mxu1 %v4642_v55  ;;  %v2861_v0 = vadd.f32 %v4999_v13, %v2823_v46 }
 0x13d   : > { %v2409_v50 = vpop.f32.mrf.mxu3  ;;  %v2359_v51 = vpop.f32.mrf.mxu2 }
 0x13e   : > { %4189 = vmatmul.msk.bf16.vlgmr.msrb.gmra.mxu0 %vm1967_vm0, %v4572_v27 }
 0x13f   : > { %v2422_v55 = vpop.f32.mrf.mxu0  ;;  %v2437_v62 = vpop.f32.mrf.mxu1 }
 0x140   : > { %4188 = vmatmul.msk.bf16.vlgmr.msrb.gmra.mxu2 %vm1967_vm0, %v4572_v27  ;;  %v2893_v27 = vmax.f32 %v2861_v0, 0.0  ;;  %v2423_v52 = vadd.f32 %v2422_v55, %v4958_v19 }
 0x142   : > { %2925 = vst [vmem:[%s5018_s10 + $0x70] sm:$0xff] %v2893_v27  ;;  %v2436_v54 = vadd.f32 %v2435_v53, %v2423_v52 }
 0x144   : > { %v2826_v42 = vmul.f32 %v4988_v2, %v2436_v54 }
 0x145   : > { %v2411_v56 = vpop.f32.mrf.mxu3 }
 0x146   : > { %v2864_v59 = vadd.f32 %v4999_v13, %v2826_v42 }
 0x147   : > { %v2396_v57 = vpop.f32.mrf.mxu2  ;;  %v2424_v61 = vpop.f32.mrf.mxu0 }
 0x148   : > { %v2397_v58 = vadd.f32 %v2396_v57, %v4958_v19  ;;  %v2896_v38 = vmax.f32 %v2864_v59, 0.0 }
 0x14a   : > { %v2410_v60 = vadd.f32 %v2409_v50, %v2397_v58  ;;  %2928 = vst [vmem:[%s5018_s10 + $0x88] sm:$0xff] %v2896_v38 }
 0x14b   : > { %v2474_v7 = vpop.f32.mrf.mxu1 }
 0x14c   : > { %v2825_v63 = vmul.f32 %v4988_v2, %v2410_v60  ;;  %v2475_v9 = vadd.f32 %v2474_v7, %v4958_v19 }
 0x14d   : > { %v2448_v1 = vpop.f32.mrf.mxu3 }
 0x14e   : > { %v2863_v3 = vadd.f32 %v4999_v13, %v2825_v63  ;;  %v2449_v8 = vadd.f32 %v2448_v1, %v4958_v19 }
 0x14f   : > { %v2398_v4 = vpop.f32.mrf.mxu2  ;;  %v2487_v6 = vpop.f32.mrf.mxu0 }
 0x150   : > { %v2895_v5 = vmax.f32 %v2863_v3, 0.0  ;;  %v2488_v11 = vadd.f32 %v2487_v6, %v2475_v9 }
 0x152   : > { %2927 = vst [vmem:[%s5018_s10 + $0x80] sm:$0xff] %v2895_v5  ;;  %v2828_v14 = vmul.f32 %v4988_v2, %v2488_v11 }
 0x153   : > { %v2476_v20 = vpop.f32.mrf.mxu1 }
 0x154   : > { %v2866_v16 = vadd.f32 %v4999_v13, %v2828_v14 }
 0x155   : > { %v2450_v10 = vpop.f32.mrf.mxu3 }
 0x156   : > { %v2898_v22 = vmax.f32 %v2866_v16, 0.0 }
 0x157   : > { %v2461_v12 = vpop.f32.mrf.mxu2  ;;  %v2489_v18 = vpop.f32.mrf.mxu0 }
 0x158   : > { %v2462_v15 = vadd.f32 %v2461_v12, %v2449_v8  ;;  %2930 = vst [vmem:[%s5018_s10 + $0x98] sm:$0xff] %v2898_v22 }
 0x15a   : > { %v2827_v17 = vmul.f32 %v4988_v2, %v2462_v15 }
 0x15b   : > { %v2539_v21 = vpop.f32.mrf.mxu1 }
 0x15c   : > { %v2865_v23 = vadd.f32 %v4999_v13, %v2827_v17 }
 0x15d   : > { %v2513_v24 = vpop.f32.mrf.mxu3 }
 0x15e   : > { %v2897_v25 = vmax.f32 %v2865_v23, 0.0 }
 0x15f   : > { %v2463_v26 = vpop.f32.mrf.mxu2 }
 0x160   : > { %2929 = vst [vmem:[%s5018_s10 + $0x90] sm:$0xff] %v2897_v25 }
 0x163   : > { %v2526_v28 = vpop.f32.mrf.mxu0  ;;  %v2541_v40 = vpop.f32.mrf.mxu1 }
 0x164   : > { %v2527_v29 = vadd.f32 %v2526_v28, %v4958_v19 }
 0x165   : > { %v2515_v31 = vpop.f32.mrf.mxu3 }
 0x166   : > { %v2540_v30 = vadd.f32 %v2539_v21, %v2527_v29 }
 0x168   : > { %v2830_v32 = vmul.f32 %v4988_v2, %v2540_v30 }
 0x16a   : > { %v2868_v35 = vadd.f32 %v4999_v13, %v2830_v32 }
 0x16b   : > { %v2500_v33 = vpop.f32.mrf.mxu2  ;;  %v2528_v37 = vpop.f32.mrf.mxu0 }
 0x16c   : > { %v2501_v34 = vadd.f32 %v2500_v33, %v4958_v19  ;;  %v2900_v39 = vmax.f32 %v2868_v35, 0.0 }
 0x16e   : > { %v2514_v36 = vadd.f32 %v2513_v24, %v2501_v34  ;;  %2932 = vst [vmem:[%s5018_s10 + $0xa8] sm:$0xff] %v2900_v39 }
 0x16f   : > { %v2552_v43 = vpop.f32.mrf.mxu3  ;;  %v2578_v48 = vpop.f32.mrf.mxu1 }
 0x170   : > { %v2829_v41 = vmul.f32 %v4988_v2, %v2514_v36  ;;  %v2553_v49 = vadd.f32 %v2552_v43, %v4958_v19  ;;  %v2579_v0 = vadd.f32 %v2578_v48, %v4958_v19 }
 0x172   : > { %v2867_v44 = vadd.f32 %v4999_v13, %v2829_v41 }
 0x173   : > { %v2502_v45 = vpop.f32.mrf.mxu2  ;;  %v2591_v47 = vpop.f32.mrf.mxu0 }
 0x174   : > { %v2899_v46 = vmax.f32 %v2867_v44, 0.0  ;;  %v2592_v27 = vadd.f32 %v2591_v47, %v2579_v0 }
 0x176   : > { %2931 = vst [vmem:[%s5018_s10 + $0xa0] sm:$0xff] %v2899_v46  ;;  %v2832_v55 = vmul.f32 %v4988_v2, %v2592_v27 }
 0x177   : > { %v2554_v50 = vpop.f32.mrf.mxu3  ;;  %v2580_v42 = vpop.f32.mrf.mxu1 }
 0x178   : > { %v2870_v53 = vadd.f32 %v4999_v13, %v2832_v55 }
 0x17a   : > { %v2902_v57 = vmax.f32 %v2870_v53, 0.0 }
 0x17b   : > { %v2565_v51 = vpop.f32.mrf.mxu2  ;;  %v2593_v56 = vpop.f32.mrf.mxu0 }
 0x17c   : > { %v2566_v52 = vadd.f32 %v2565_v51, %v2553_v49  ;;  %2934 = vst [vmem:[%s5018_s10 + $0xb8] sm:$0xff] %v2902_v57 }
 0x17e   : > { %v2831_v54 = vmul.f32 %v4988_v2, %v2566_v52 }
 0x17f   : > { %v2617_v59 = vpop.f32.mrf.mxu3  ;;  %v2643_v63 = vpop.f32.mrf.mxu1 }
 0x180   : > { %v2869_v58 = vadd.f32 %v4999_v13, %v2831_v54 }
 0x182   : > { %v2901_v60 = vmax.f32 %v2869_v58, 0.0 }
 0x183   : > { %v2567_v61 = vpop.f32.mrf.mxu2 }
 0x184   : > { %2933 = vst [vmem:[%s5018_s10 + $0xb0] sm:$0xff] %v2901_v60 }
 0x187   : > { %v2630_v38 = vpop.f32.mrf.mxu0  ;;  %v2619_v3 = vpop.f32.mrf.mxu3 }
 0x188   : > { %v2631_v62 = vadd.f32 %v2630_v38, %v4958_v19  ;;  %v2645_v11 = vpop.f32.mrf.mxu1 }
 0x18a   : > { %v2644_v1 = vadd.f32 %v2643_v63, %v2631_v62 }
 0x18c   : > { %v2834_v4 = vmul.f32 %v4988_v2, %v2644_v1 }
 0x18e   : > { %v2872_v7 = vadd.f32 %v4999_v13, %v2834_v4 }
 0x18f   : > { %v2604_v5 = vpop.f32.mrf.mxu2  ;;  %v2632_v9 = vpop.f32.mrf.mxu0 }
 0x190   : > { %v2605_v6 = vadd.f32 %v2604_v5, %v4958_v19  ;;  %v2904_v10 = vmax.f32 %v2872_v7, 0.0 }
 0x192   : > { %v2618_v8 = vadd.f32 %v2617_v59, %v2605_v6  ;;  %2936 = vst [vmem:[%s5018_s10 + $0xc8] sm:$0xff] %v2904_v10 }
 0x193   : > { %v2656_v14 = vpop.f32.mrf.mxu3  ;;  %v2682_v20 = vpop.f32.mrf.mxu1 }
 0x194   : > { %v2833_v12 = vmul.f32 %v4988_v2, %v2618_v8  ;;  %v2657_v22 = vadd.f32 %v2656_v14, %v4958_v19  ;;  %v2683_v23 = vadd.f32 %v2682_v20, %v4958_v19 }
 0x196   : > { %v2871_v15 = vadd.f32 %v4999_v13, %v2833_v12 }
 0x197   : > { %v2606_v16 = vpop.f32.mrf.mxu2  ;;  %v2695_v18 = vpop.f32.mrf.mxu0 }
 0x198   : > { %v2903_v17 = vmax.f32 %v2871_v15, 0.0  ;;  %v2696_v25 = vadd.f32 %v2695_v18, %v2683_v23 }
 0x19a   : > { %2935 = vst [vmem:[%s5018_s10 + $0xc0] sm:$0xff] %v2903_v17  ;;  %v2836_v28 = vmul.f32 %v4988_v2, %v2696_v25 }
 0x19b   : > { %v2658_v24 = vpop.f32.mrf.mxu3  ;;  %v2684_v32 = vpop.f32.mrf.mxu1 }
 0x19c   : > { %v2874_v21 = vadd.f32 %v4999_v13, %v2836_v28 }
 0x19e   : > { %v2906_v33 = vmax.f32 %v2874_v21, 0.0 }
 0x19f   : > { %v2669_v26 = vpop.f32.mrf.mxu2  ;;  %v2697_v31 = vpop.f32.mrf.mxu0 }
 0x1a0   : > { %v2670_v29 = vadd.f32 %v2669_v26, %v2657_v22  ;;  %2938 = vst [vmem:[%s5018_s10 + $0xd8] sm:$0xff] %v2906_v33 }
 0x1a2   : > { %v2835_v30 = vmul.f32 %v4988_v2, %v2670_v29 }
 0x1a3   : > { %v2721_v35 = vpop.f32.mrf.mxu3  ;;  %v2747_v41 = vpop.f32.mrf.mxu1 }
 0x1a4   : > { %v2873_v34 = vadd.f32 %v4999_v13, %v2835_v30 }
 0x1a6   : > { %v2905_v36 = vmax.f32 %v2873_v34, 0.0 }
 0x1a7   : > { %v2671_v37 = vpop.f32.mrf.mxu2 }
 0x1a8   : > { %2937 = vst [vmem:[%s5018_s10 + $0xd0] sm:$0xff] %v2905_v36 }
 0x1ab   : > { %v2734_v39 = vpop.f32.mrf.mxu0  ;;  %v2723_v44 = vpop.f32.mrf.mxu3 }
 0x1ac   : > { %v2735_v40 = vadd.f32 %v2734_v39, %v4958_v19  ;;  %v2749_v27 = vpop.f32.mrf.mxu1 }
 0x1ae   : > { %v2748_v43 = vadd.f32 %v2747_v41, %v2735_v40 }
 0x1b0   : > { %v2838_v45 = vmul.f32 %v4988_v2, %v2748_v43 }
 0x1b2   : > { %v2876_v48 = vadd.f32 %v4999_v13, %v2838_v45 }
 0x1b3   : > { %v2708_v46 = vpop.f32.mrf.mxu2  ;;  %v2736_v0 = vpop.f32.mrf.mxu0 }
 0x1b4   : > { %v2709_v47 = vadd.f32 %v2708_v46, %v4958_v19  ;;  %v2908_v50 = vmax.f32 %v2876_v48, 0.0 }
 0x1b6   : > { %v2722_v49 = vadd.f32 %v2721_v35, %v2709_v47  ;;  %2940 = vst [vmem:[%s5018_s10 + $0xe8] sm:$0xff] %v2908_v50 }
 0x1b7   : > { %v2760_v55 = vpop.f32.mrf.mxu3  ;;  %v2786_v42 = vpop.f32.mrf.mxu1 }
 0x1b8   : > { %v2837_v51 = vmul.f32 %v4988_v2, %v2722_v49  ;;  %v2787_v57 = vadd.f32 %v2786_v42, %v4958_v19  ;;  %v2761_v59 = vadd.f32 %v2760_v55, %v4958_v19 }
 0x1ba   : > { %v2875_v52 = vadd.f32 %v4999_v13, %v2837_v51 }
 0x1bb   : > { %v2710_v53 = vpop.f32.mrf.mxu2  ;;  %v2799_v56 = vpop.f32.mrf.mxu0 }
 0x1bc   : > { %v2907_v54 = vmax.f32 %v2875_v52, 0.0  ;;  %v2800_v60 = vadd.f32 %v2799_v56, %v2787_v57 }
 0x1be   : > { %2939 = vst [vmem:[%s5018_s10 + $0xe0] sm:$0xff] %v2907_v54  ;;  %v2840_v38 = vmul.f32 %v4988_v2, %v2800_v60 }
 0x1bf   : > { %v2762_v58 = vpop.f32.mrf.mxu3  ;;  %v2788_v4 = vpop.f32.mrf.mxu1 }
 0x1c0   : > { %v2878_v63 = vadd.f32 %v4999_v13, %v2840_v38 }
 0x1c2   : > { %v2910_v5 = vmax.f32 %v2878_v63, 0.0 }
 0x1c3   : > { %v2773_v61 = vpop.f32.mrf.mxu2  ;;  %v2801_v3 = vpop.f32.mrf.mxu0 }
 0x1c4   : > { %v2774_v62 = vadd.f32 %v2773_v61, %v2761_v59  ;;  %2942 = vst [vmem:[%s5018_s10 + $0xf8] sm:$0xff] %v2910_v5 }
 0x1c6   : > { %v2839_v1 = vmul.f32 %v4988_v2, %v2774_v62 }
 0x1c8   : > { %v2877_v6 = vadd.f32 %v4999_v13, %v2839_v1 }
 0x1ca   : > { %v2909_v7 = vmax.f32 %v2877_v6, 0.0 }
 0x1cb   : > { %v2775_v8 = vpop.f32.mrf.mxu2 }
 0x1cc   : > { %2941 = vst [vmem:[%s5018_s10 + $0xf0] sm:$0xff] %v2909_v7 }
 0x1cd PF: > { %s15_s18 = sadd.s32 1, %s4499_s18  }
 0x1ce   : > { %p12_p4 = scmp.ge.s32.totalorder %s15_s18, 4  }
 0x1d0   :  { %14 = sbr.rel (!%p12_p4) target bundleno = 1 (0x1), region = 70 }

// kernel: _lambda_.21
= control target key start
LH: loop header
LB: loop body
LE: loop exit
PB: predicated region body
PF: predicated region fallthrough
CT: control target
= control target key end

     0   :  { %s9165_s12 = smov 0   ;;  %s10961_s0 = inlined_call_operand.vmem [shape: bf16[2,392,3364], index: 0, kind: input, shape index: {}]   ;;  %s10962_s1 = inlined_call_operand.vmem [shape: bf16[3,392], index: 1, kind: input, shape index: {}]   ;;  %s10963_s2 = inlined_call_operand.vmem [shape: f32[3,1], index: 2, kind: input, shape index: {}]   ;;  %s10964_s3 = inlined_call_operand.vmem [shape: f32[2,3,3364], index: 3, kind: output, shape index: {}]  }
   0x1 LB: > { %s5830_s13 = sadd.s32 4294967295, %s9142_s12   ;;  %p5834_p0 = scmp.ge.s32.totalorder %s9142_s12, 1  ;;  %s9142_s12 = sphi %s9165_s12, %s13_s12  }
   0x2   : > { %p137_p1 = scmp.lt.s32.totalorder %s9142_s12, 3 }
   0x4   : > { %p138_p2 = pnand %p5834_p0, %p137_p1 }
   0x5   : > { %p161_p3 = scmp.lt.s32.totalorder (!%p138_p2), %s5830_s13, 1 }
   0x6   : > { %141 = sbr.rel (%p138_p2) target bundleno = 858 (0x35a), region = 32 }
   0xb   : > { %v172_v0 = vld [vmem:[%s10962_s1] sm:$0xff]  ;;  %s10966_s13 = smov (!%p161_p3, %s5830_s13), 1  ;;  %vm4209_vm0 = vcmask 1043456   ;;  %vm4206_vm1 = vcmask 64512   ;;  %vm5773_vm2 = vcmask 288768  }
   0xc   : > { %866 = vst [vmem:[#allocation1] ss:$4 sm:$0xff] %v172_v0  ;;  %s9106_s16 = smul.u32 5292, %s10966_s13 }
   0xd   : > { %s9107_s22 = smul.u32 108, %s10966_s13 }
   0xe   : > { %s9182_s19 = scalar_lea.vmem %s10961_s0, %s9106_s16 }
   0xf   : > { %v6595_v1 = vld [vmem:[%s9182_s19 + $0x5e8] sm:$0xf]  ;;  %v8660_v2 = vld [vmem:[%s9182_s19 + $0x650] sm:$0xf0]  ;;  %v9191_v10 = vld [vmem:[%s9182_s19 + $0x1440] sm:$0xff]  ;;  %s9714_s25 = scalar_lea.vmem %s10964_s3, %s9107_s22 }
  0x10   : > { %v8323_v3 = vld [vmem:[%s9182_s19 + $0x1368] sm:$0xf]  ;;  %v6596_v4 = vor.u32 %v8660_v2, %v6595_v1  ;;  %v9092_v5 = vld [vmem:[%s9182_s19 + $0x13d0] sm:$0xf0]  ;;  %v6487_v11 = vld [vmem:[%s9182_s19 + $0x510] sm:$0xf]  ;;  %v2856_v13 = vunpack.c.l.b16 %v9191_v10 }
  0x11   : > { %v7459_v6 = vld [vmem:[%s9182_s19 + $0xca8] sm:$0xf]  ;;  %v8876_v7 = vld [vmem:[%s9182_s19 + $0xd10] sm:$0xf0]  ;;  %v8324_v8 = vor.u32 %v9092_v5, %v8323_v3  ;;  %v8633_v12 = vld [vmem:[%s9182_s19 + $0x578] sm:$0xf0] }
  0x12   : > { %v7460_v9 = vor.u32 %v8876_v7, %v7459_v6  ;;  %4291 = vmatpush.bf16.msra.mxu0 %v6596_v4  ;;  %v6488_v14 = vor.u32 %v8633_v12, %v6487_v11  ;;  %v8215_v15 = vld [vmem:[%s9182_s19 + $0x1290] sm:$0xf]  ;;  %v9065_v16 = vld [vmem:[%s9182_s19 + $0x12f8] sm:$0xf0]  ;;  %v8647_v17 = vld [vmem:[%s9182_s19 + $0x5ec] sm:$0xf]  ;;  %v3531_v22 = vpack.c.b16 %v2856_v13, %v2856_v13 }
  0x13   : > { %4317 = vmatpush.bf16.msra.mxu2 %v8324_v8  ;;  %v8216_v18 = vor.u32 %v9065_v16, %v8215_v15  ;;  %v6597_v19 = vld [vmem:[%s9182_s19 + $0x654] sm:$0xf0]  ;;  %v7351_v20 = vld [vmem:[%s9182_s19 + $0xbd0] sm:$0xf]  ;;  %v8849_v21 = vld [vmem:[%s9182_s19 + $0xc38] sm:$0xf0] }
  0x14   : > { %4304 = vmatpush.bf16.msra.mxu1 %v7460_v9  ;;  %v6600_v23 = vor.u32 %v8647_v17, %v6597_v19  ;;  %v7352_v24 = vor.u32 %v8849_v21, %v7351_v20  ;;  %v6379_v25 = vld [vmem:[%s9182_s19 + $0x438] sm:$0xf]  ;;  %v8606_v26 = vld [vmem:[%s9182_s19 + $0x4a0] sm:$0xf0]  ;;  %v8620_v29 = vld [vmem:[%s9182_s19 + $0x514] sm:$0xf] }
  0x15   : > { %v8107_v27 = vld [vmem:[%s9182_s19 + $0x11b8] sm:$0xf]  ;;  %v9038_v28 = vld [vmem:[%s9182_s19 + $0x1220] sm:$0xf0]  ;;  %v6489_v30 = vld [vmem:[%s9182_s19 + $0x57c] sm:$0xf0]  ;;  %v6380_v32 = vor.u32 %v8606_v26, %v6379_v25 }
  0x16   : > { %v4211_v31 = vsel %vm4209_vm0, %v3531_v22, 0  ;;  %4292 = vmatpush.bf16.msra.mxu0 %v6488_v14  ;;  %v7243_v33 = vld [vmem:[%s9182_s19 + $0xaf8] sm:$0xf]  ;;  %v8822_v34 = vld [vmem:[%s9182_s19 + $0xb60] sm:$0xf0]  ;;  %v8108_v35 = vor.u32 %v9038_v28, %v8107_v27  ;;  %v6492_v38 = vor.u32 %v8620_v29, %v6489_v30  ;;  %v9144_v26 = vmov 0  }
  0x17   : > { %4337 = vmatpush.bf16.msra.mxu3 %v4211_v31  ;;  %4318 = vmatpush.bf16.msra.mxu2 %v8216_v18  ;;  %v6271_v36 = vld [vmem:[%s9182_s19 + $0x360] sm:$0xf]  ;;  %v8579_v37 = vld [vmem:[%s9182_s19 + $0x3c8] sm:$0xf0]  ;;  %v7244_v39 = vor.u32 %v8822_v34, %v7243_v33  ;;  %v8593_v42 = vld [vmem:[%s9182_s19 + $0x43c] sm:$0xf] }
  0x18   : > { %4305 = vmatpush.bf16.msra.mxu1 %v7352_v24  ;;  %v7999_v40 = vld [vmem:[%s9182_s19 + $0x10e0] sm:$0xf]  ;;  %v9011_v41 = vld [vmem:[%s9182_s19 + $0x1148] sm:$0xf0]  ;;  %v6381_v43 = vld [vmem:[%s9182_s19 + $0x4a4] sm:$0xf0]  ;;  %v6272_v46 = vor.u32 %v8579_v37, %v6271_v36  ;;  %9117 = vset.pattern.permute.xlu0 %v9144_v26 }
  0x19   : > { %v7135_v44 = vld [vmem:[%s9182_s19 + $0xa20] sm:$0xf]  ;;  %v8795_v45 = vld [vmem:[%s9182_s19 + $0xa88] sm:$0xf0]  ;;  %v8000_v47 = vor.u32 %v9011_v41, %v7999_v40  ;;  %v6163_v48 = vld [vmem:[%s9182_s19 + $0x288] sm:$0xf]  ;;  %v6384_v50 = vor.u32 %v8593_v42, %v6381_v43 }
  0x1a   : > { %4293 = vmatpush.bf16.msra.mxu0 %v6380_v32  ;;  %v8552_v49 = vld [vmem:[%s9182_s19 + $0x2f0] sm:$0xf0]  ;;  %v7136_v51 = vor.u32 %v8795_v45, %v7135_v44  ;;  %v7891_v52 = vld [vmem:[%s9182_s19 + $0x1008] sm:$0xf]  ;;  %v8566_v54 = vld [vmem:[%s9182_s19 + $0x364] sm:$0xf] }
  0x1b   : > { %4343 = vmatpush.bf16.msrb.mxu3 %v6600_v23  ;;  %4319 = vmatpush.bf16.msra.mxu2 %v8108_v35  ;;  %v8984_v53 = vld [vmem:[%s9182_s19 + $0x1070] sm:$0xf0]  ;;  %v6273_v55 = vld [vmem:[%s9182_s19 + $0x3cc] sm:$0xf0]  ;;  %v7027_v56 = vld [vmem:[%s9182_s19 + $0x948] sm:$0xf]  ;;  %v6164_v58 = vor.u32 %v8552_v49, %v6163_v48  ;;  %v2857_v35 = vunpack.c.h.b16 %v9191_v10 }
  0x1c   : > { %4306 = vmatpush.bf16.msra.mxu1 %v7244_v39  ;;  %v8768_v57 = vld [vmem:[%s9182_s19 + $0x9b0] sm:$0xf0]  ;;  %v6055_v59 = vld [vmem:[%s9182_s19 + $0x1b0] sm:$0xf]  ;;  %v7892_v60 = vor.u32 %v8984_v53, %v7891_v52  ;;  %v8525_v61 = vld [vmem:[%s9182_s19 + $0x218] sm:$0xf0]  ;;  %v6276_v0 = vor.u32 %v8566_v54, %v6273_v55 }
  0x1d   : > { %v7783_v62 = vld [vmem:[%s9182_s19 + $0xf30] sm:$0xf]  ;;  %v8957_v63 = vld [vmem:[%s9182_s19 + $0xf98] sm:$0xf0]  ;;  %v7028_v1 = vor.u32 %v8768_v57, %v7027_v56  ;;  %v8539_v2 = vld [vmem:[%s9182_s19 + $0x28c] sm:$0xf]  ;;  %v6056_v7 = vor.u32 %v8525_v61, %v6055_v59  ;;  %v3532_v52 = vpack.c.b16 %v2857_v35, %v2857_v35 }
  0x1e   : > { %4294 = vmatpush.bf16.msra.mxu0 %v6272_v46  ;;  %v6165_v3 = vld [vmem:[%s9182_s19 + $0x2f4] sm:$0xf0]  ;;  %v6919_v4 = vld [vmem:[%s9182_s19 + $0x870] sm:$0xf]  ;;  %v8741_v5 = vld [vmem:[%s9182_s19 + $0x8d8] sm:$0xf0]  ;;  %v7784_v8 = vor.u32 %v8957_v63, %v7783_v62 }
  0x1f   : > { %4344 = vmatpush.bf16.msrb.mxu3 %v6492_v38  ;;  %4320 = vmatpush.bf16.msra.mxu2 %v8000_v47  ;;  %v9235_v6 = vld.sshfl [vmem:[#allocation1 + $0x18] sm:$0xff pattern:$0x73625140]  ;;  %v8498_v11 = vld [vmem:[%s9182_s19 + $0x140] sm:$0xf0]  ;;  %v6168_v12 = vor.u32 %v8539_v2, %v6165_v3  ;;  %v6920_v13 = vor.u32 %v8741_v5, %v6919_v4 }
  0x20   : > { %4307 = vmatpush.bf16.msra.mxu1 %v7136_v51  ;;  %8429 = vmatmul.msk.bf16.vlgmr.msra.gmra.mxu3 %vm4206_vm1, %v9235_v6  ;;  %v5947_v9 = vld [vmem:[%s9182_s19 + $0xd8] sm:$0xf]  ;;  %v8930_v15 = vld [vmem:[%s9182_s19 + $0xec0] sm:$0xf0]  ;;  %v8512_v16 = vld [vmem:[%s9182_s19 + $0x1b4] sm:$0xf] }
  0x21   : > { %v7675_v14 = vld [vmem:[%s9182_s19 + $0xe58] sm:$0xf]  ;;  %v6057_v17 = vld [vmem:[%s9182_s19 + $0x21c] sm:$0xf0]  ;;  %v8714_v19 = vld [vmem:[%s9182_s19 + $0x800] sm:$0xf0]  ;;  %v5948_v20 = vor.u32 %v8498_v11, %v5947_v9 }
  0x22   : > { %4295 = vmatpush.bf16.msra.mxu0 %v6164_v58  ;;  %v6811_v18 = vld [vmem:[%s9182_s19 + $0x798] sm:$0xf]  ;;  %v5839_v21 = vld [vmem:[%s9182_s19] sm:$0xf]  ;;  %v7676_v22 = vor.u32 %v8930_v15, %v7675_v14  ;;  %v8471_v23 = vld [vmem:[%s9182_s19 + $0x68] sm:$0xf0]  ;;  %v6060_v27 = vor.u32 %v8512_v16, %v6057_v17 }
  0x23   : > { %4345 = vmatpush.bf16.msrb.mxu3 %v6384_v50  ;;  %4321 = vmatpush.bf16.msra.mxu2 %v7892_v60  ;;  %v7567_v24 = vld [vmem:[%s9182_s19 + $0xd80] sm:$0xf]  ;;  %v8903_v25 = vld [vmem:[%s9182_s19 + $0xde8] sm:$0xf0]  ;;  %v6812_v28 = vor.u32 %v8714_v19, %v6811_v18  ;;  %v8485_v29 = vld [vmem:[%s9182_s19 + $0xdc] sm:$0xf]  ;;  %v5840_v36 = vor.u32 %v8471_v23, %v5839_v21 }
  0x24   : > { %4308 = vmatpush.bf16.msra.mxu1 %v7028_v1  ;;  %v8863_v30 = vld [vmem:[%s9182_s19 + $0xcac] sm:$0xf]  ;;  %v7461_v31 = vld [vmem:[%s9182_s19 + $0xd14] sm:$0xf0]  ;;  %v5949_v32 = vld [vmem:[%s9182_s19 + $0x144] sm:$0xf0]  ;;  %v7568_v39 = vor.u32 %v8903_v25, %v7567_v24 }
  0x25   : > { %v6703_v33 = vld [vmem:[%s9182_s19 + $0x6c0] sm:$0xf]  ;;  %v8687_v34 = vld [vmem:[%s9182_s19 + $0x728] sm:$0xf0]  ;;  %v8325_v38 = vld [vmem:[%s9182_s19 + $0x13d4] sm:$0xf0]  ;;  %v7464_v40 = vor.u32 %v8863_v30, %v7461_v31  ;;  %v5952_v44 = vor.u32 %v8485_v29, %v5949_v32 }
  0x26   : > { %4296 = vmatpush.bf16.msra.mxu0 %v6056_v7  ;;  %v9079_v37 = vld [vmem:[%s9182_s19 + $0x136c] sm:$0xf]  ;;  %v8458_v41 = vld [vmem:[%s9182_s19 + $0x4] sm:$0xf]  ;;  %v5841_v42 = vld [vmem:[%s9182_s19 + $0x6c] sm:$0xf0]  ;;  %v6704_v10 = vor.u32 %v8687_v34, %v6703_v33 }
  0x27   : > { %4346 = vmatpush.bf16.msrb.mxu3 %v6276_v0  ;;  %4322 = vmatpush.bf16.msra.mxu2 %v7784_v8  ;;  %v8836_v43 = vld [vmem:[%s9182_s19 + $0xbd4] sm:$0xf]  ;;  %v9263_v45 = vld.sshfl [vmem:[#allocation1] sm:$0xff pattern:$0x73625140]  ;;  %v8328_v48 = vor.u32 %v9079_v37, %v8325_v38  ;;  %v5844_v58 = vor.u32 %v8458_v41, %v5841_v42  ;;  %v4214_v0 = vsel %vm4209_vm0, %v3532_v52, 0 }
  0x28   : > { %4309 = vmatpush.bf16.msra.mxu1 %v6920_v13  ;;  %v7353_v46 = vld [vmem:[%s9182_s19 + $0xc3c] sm:$0xf0]  ;;  %v9266_v47 = vld.sshfl [vmem:[#allocation1 + $0x10] sm:$0xff pattern:$0x73625140] }
  0x29   : > { %v6603_v49 = vld [vmem:[%s9182_s19 + $0x5f0] sm:$0xf]  ;;  %v8661_v50 = vld [vmem:[%s9182_s19 + $0x658] sm:$0xf0]  ;;  %v9052_v51 = vld [vmem:[%s9182_s19 + $0x1294] sm:$0xf]  ;;  %v7356_v55 = vor.u32 %v8836_v43, %v7353_v46 }
  0x2a   : > { %4297 = vmatpush.bf16.msra.mxu0 %v5948_v20  ;;  %v9271_v53 = vld.sshfl [vmem:[#allocation1 + $0x8] sm:$0xff pattern:$0x73625140]  ;;  %v8217_v54 = vld [vmem:[%s9182_s19 + $0x12fc] sm:$0xf0]  ;;  %v6604_v62 = vor.u32 %v8661_v50, %v6603_v49 }
  0x2b   : > { %4347 = vmatpush.bf16.msrb.mxu3 %v6168_v12  ;;  %4323 = vmatpush.bf16.msra.mxu2 %v7676_v22  ;;  %v7467_v56 = vld [vmem:[%s9182_s19 + $0xcb0] sm:$0xf]  ;;  %v8877_v57 = vld [vmem:[%s9182_s19 + $0xd18] sm:$0xf0]  ;;  %v7245_v60 = vld [vmem:[%s9182_s19 + $0xb64] sm:$0xf0]  ;;  %v8220_v63 = vor.u32 %v9052_v51, %v8217_v54 }
  0x2c   : > { %4310 = vmatpush.bf16.msra.mxu1 %v6812_v28  ;;  %v8809_v59 = vld [vmem:[%s9182_s19 + $0xafc] sm:$0xf]  ;;  %v859_v61 = vld [vmem:[%s10963_s2] sm:$0x7]  ;;  %v6495_v1 = vld [vmem:[%s9182_s19 + $0x518] sm:$0xf]  ;;  %v7468_v3 = vor.u32 %v8877_v57, %v7467_v56 }
  0x2d   : > { %v8634_v2 = vld [vmem:[%s9182_s19 + $0x580] sm:$0xf0]  ;;  %v9025_v4 = vld [vmem:[%s9182_s19 + $0x11bc] sm:$0xf]  ;;  %v8109_v5 = vld [vmem:[%s9182_s19 + $0x1224] sm:$0xf0]  ;;  %862 = vperm.xlu0 %9117, %v859_v61   ;;  %v7248_v7 = vor.u32 %v8809_v59, %v7245_v60 }
  0x2e   : > { %4298 = vmatpush.bf16.msra.mxu0 %v5840_v36  ;;  %v7359_v8 = vld [vmem:[%s9182_s19 + $0xbd8] sm:$0xf]  ;;  %v8850_v9 = vld [vmem:[%s9182_s19 + $0xc40] sm:$0xf0]  ;;  %v7137_v12 = vld [vmem:[%s9182_s19 + $0xa8c] sm:$0xf0]  ;;  %v6496_v13 = vor.u32 %v8634_v2, %v6495_v1  ;;  %v8112_v14 = vor.u32 %v9025_v4, %v8109_v5 }
  0x2f   : > { %4348 = vmatpush.bf16.msrb.mxu3 %v6060_v27  ;;  %4324 = vmatpush.bf16.msra.mxu2 %v7568_v39  ;;  %v8782_v11 = vld [vmem:[%s9182_s19 + $0xa24] sm:$0xf]  ;;  %v6387_v15 = vld [vmem:[%s9182_s19 + $0x440] sm:$0xf]  ;;  %v8607_v16 = vld [vmem:[%s9182_s19 + $0x4a8] sm:$0xf0]  ;;  %v7360_v17 = vor.u32 %v8850_v9, %v7359_v8 }
  0x30   : > { %4311 = vmatpush.bf16.msra.mxu1 %v6704_v10  ;;  %v8998_v18 = vld [vmem:[%s9182_s19 + $0x10e4] sm:$0xf]  ;;  %v8001_v19 = vld [vmem:[%s9182_s19 + $0x114c] sm:$0xf0]  ;;  %v7140_v20 = vor.u32 %v8782_v11, %v7137_v12  ;;  %v7251_v21 = vld [vmem:[%s9182_s19 + $0xb00] sm:$0xf]  ;;  %v6388_v25 = vor.u32 %v8607_v16, %v6387_v15 }
  0x31   : > { %4299 = vmatmul.bf16.vlgmr.msra.gmra.mxu0 %v9263_v45  ;;  %v8823_v22 = vld [vmem:[%s9182_s19 + $0xb68] sm:$0xf0]  ;;  %v7029_v24 = vld [vmem:[%s9182_s19 + $0x9b4] sm:$0xf0]  ;;  %v8004_v26 = vor.u32 %v8998_v18, %v8001_v19  ;;  %v6279_v27 = vld [vmem:[%s9182_s19 + $0x368] sm:$0xf] }
  0x32   : > { %4356 = vmatpush.bf16.msrb.mxu0 %v7464_v40  ;;  %4325 = vmatmul.bf16.vlgmr.msra.gmra.mxu2 %v9266_v47  ;;  %v8755_v23 = vld [vmem:[%s9182_s19 + $0x94c] sm:$0xf]  ;;  %v8580_v28 = vld [vmem:[%s9182_s19 + $0x3d0] sm:$0xf0]  ;;  %v7252_v29 = vor.u32 %v8823_v22, %v7251_v21  ;;  %v7893_v31 = vld [vmem:[%s9182_s19 + $0x1074] sm:$0xf0] }
  0x33   : > { %4349 = vmatpush.bf16.msrb.mxu3 %v5952_v44  ;;  %4312 = vmatmul.bf16.vlgmr.msra.gmra.mxu1 %v9271_v53  ;;  %v8971_v30 = vld [vmem:[%s9182_s19 + $0x100c] sm:$0xf]  ;;  %v7032_v32 = vor.u32 %v8755_v23, %v7029_v24  ;;  %v7143_v33 = vld [vmem:[%s9182_s19 + $0xa28] sm:$0xf]  ;;  %v8796_v34 = vld [vmem:[%s9182_s19 + $0xa90] sm:$0xf0]  ;;  %v6280_v37 = vor.u32 %v8580_v28, %v6279_v27 }
  0x34   : > { %4369 = vmatpush.bf16.msrb.mxu1 %v8328_v48  ;;  %4389 = vmatpush.bf16.msrb.mxu2 %v4214_v0  ;;  %v8728_v35 = vld [vmem:[%s9182_s19 + $0x874] sm:$0xf]  ;;  %v6921_v36 = vld [vmem:[%s9182_s19 + $0x8dc] sm:$0xf0]  ;;  %v7896_v38 = vor.u32 %v8971_v30, %v7893_v31  ;;  %v6171_v39 = vld [vmem:[%s9182_s19 + $0x290] sm:$0xf]  ;;  %v7144_v41 = vor.u32 %v8796_v34, %v7143_v33 }
  0x35   : > { %v8553_v40 = vld [vmem:[%s9182_s19 + $0x2f8] sm:$0xf0]  ;;  %v8944_v42 = vld [vmem:[%s9182_s19 + $0xf34] sm:$0xf]  ;;  %v7785_v43 = vld [vmem:[%s9182_s19 + $0xf9c] sm:$0xf0]  ;;  %v6924_v44 = vor.u32 %v8728_v35, %v6921_v36 }
  0x36   : > { %4357 = vmatpush.bf16.msrb.mxu0 %v7356_v55  ;;  %v7035_v10 = vld [vmem:[%s9182_s19 + $0x950] sm:$0xf]  ;;  %v8769_v46 = vld [vmem:[%s9182_s19 + $0x9b8] sm:$0xf0]  ;;  %v6813_v49 = vld [vmem:[%s9182_s19 + $0x804] sm:$0xf0]  ;;  %v6172_v50 = vor.u32 %v8553_v40, %v6171_v39  ;;  %v7788_v51 = vor.u32 %v8944_v42, %v7785_v43 }
  0x37   : > { %4350 = vmatpush.bf16.msrb.mxu3 %v5844_v58  ;;  %v8701_v48 = vld [vmem:[%s9182_s19 + $0x79c] sm:$0xf]  ;;  %v6063_v52 = vld [vmem:[%s9182_s19 + $0x1b8] sm:$0xf]  ;;  %v9320_v54 = vld [vmem:[%s9182_s19 + $0x1448] sm:$0xff]  ;;  %v7036_v56 = vor.u32 %v8769_v46, %v7035_v10 }
  0x38   : > { %4370 = vmatpush.bf16.msrb.mxu1 %v8220_v63  ;;  %4408 = vmatpush.bf16.msra.mxu2 %v7468_v3  ;;  %v8526_v55 = vld [vmem:[%s9182_s19 + $0x220] sm:$0xf0]  ;;  %v8917_v57 = vld [vmem:[%s9182_s19 + $0xe5c] sm:$0xf]  ;;  %v7677_v58 = vld [vmem:[%s9182_s19 + $0xec4] sm:$0xf0]  ;;  %v6816_v59 = vor.u32 %v8701_v48, %v6813_v49  ;;  %v2858_v0 = vunpack.c.l.b16 %v9320_v54 }
  0x39   : > { %v6927_v60 = vld [vmem:[%s9182_s19 + $0x878] sm:$0xf]  ;;  %v8742_v61 = vld [vmem:[%s9182_s19 + $0x8e0] sm:$0xf0]  ;;  %v6705_v63 = vld [vmem:[%s9182_s19 + $0x72c] sm:$0xf0]  ;;  %v6064_v1 = vor.u32 %v8526_v55, %v6063_v52  ;;  %v7680_v2 = vor.u32 %v8917_v57, %v7677_v58 }
  0x3a   : > { %4358 = vmatpush.bf16.msrb.mxu0 %v7248_v7  ;;  %4351 = vmatmul.bf16.vlgmr.msrb.gmra.mxu3 %v9263_v45  ;;  %v5955_v3 = vld [vmem:[%s9182_s19 + $0xe0] sm:$0xf]  ;;  %v8331_v4 = vld [vmem:[%s9182_s19 + $0x1370] sm:$0xf]  ;;  %v9093_v5 = vld [vmem:[%s9182_s19 + $0x13d8] sm:$0xf0]  ;;  %v6928_v8 = vor.u32 %v8742_v61, %v6927_v60 }
  0x3b   : > { %4395 = vmatpush.bf16.msra.mxu3 %v6604_v62  ;;  %v8674_v62 = vld [vmem:[%s9182_s19 + $0x6c4] sm:$0xf]  ;;  %v8499_v7 = vld [vmem:[%s9182_s19 + $0x148] sm:$0xf0]  ;;  %v7569_v11 = vld [vmem:[%s9182_s19 + $0xdec] sm:$0xf0]  ;;  %v8332_v15 = vor.u32 %v9093_v5, %v8331_v4 }
  0x3c   : > { %4371 = vmatpush.bf16.msrb.mxu1 %v8112_v14  ;;  %4409 = vmatpush.bf16.msra.mxu2 %v7360_v17  ;;  %v8890_v9 = vld [vmem:[%s9182_s19 + $0xd84] sm:$0xf]  ;;  %v6708_v12 = vor.u32 %v8674_v62, %v6705_v63  ;;  %v8715_v14 = vld [vmem:[%s9182_s19 + $0x808] sm:$0xf0]  ;;  %v5847_v16 = vld [vmem:[%s9182_s19 + $0x8] sm:$0xf]  ;;  %v3533_v17 = vpack.c.b16 %v2858_v0, %v2858_v0  ;;  %v5956_v18 = vor.u32 %v8499_v7, %v5955_v3 }
  0x3d   : > { %v7572_v19 = vor.u32 %v8890_v9, %v7569_v11  ;;  %v8223_v21 = vld [vmem:[%s9182_s19 + $0x1298] sm:$0xf]  ;;  %v9066_v22 = vld [vmem:[%s9182_s19 + $0x1300] sm:$0xf0]  ;;  %v8648_v24 = vld [vmem:[%s9182_s19 + $0x5f4] sm:$0xf] }
  0x3e   : > { %4359 = vmatpush.bf16.msrb.mxu0 %v7140_v20  ;;  %v8472_v20 = vld [vmem:[%s9182_s19 + $0x70] sm:$0xf0]  ;;  %v6605_v27 = vld [vmem:[%s9182_s19 + $0x65c] sm:$0xf0]  ;;  %v6711_v28 = vld [vmem:[%s9182_s19 + $0x6c8] sm:$0xf]  ;;  %v8224_v30 = vor.u32 %v9066_v22, %v8223_v21 }
  0x3f   : > { %4396 = vmatpush.bf16.msra.mxu3 %v6496_v13  ;;  %v6819_v13 = vld [vmem:[%s9182_s19 + $0x7a0] sm:$0xf]  ;;  %v9080_v31 = vld [vmem:[%s9182_s19 + $0x1374] sm:$0xf]  ;;  %v4217_v33 = vsel %vm4209_vm0, %v3533_v17, 0  ;;  %v5848_v34 = vor.u32 %v8472_v20, %v5847_v16 }
  0x40   : > { %4372 = vmatpush.bf16.msrb.mxu1 %v8004_v26  ;;  %4410 = vmatpush.bf16.msra.mxu2 %v7252_v29  ;;  %v6820_v23 = vor.u32 %v8715_v14, %v6819_v13  ;;  %v7469_v26 = vld [vmem:[%s9182_s19 + $0xd1c] sm:$0xf0]  ;;  %v8688_v29 = vld [vmem:[%s9182_s19 + $0x730] sm:$0xf0]  ;;  %v9039_v36 = vld [vmem:[%s9182_s19 + $0x1228] sm:$0xf0] }
  0x41   : > { %v8115_v35 = vld [vmem:[%s9182_s19 + $0x11c0] sm:$0xf]  ;;  %v6712_v39 = vor.u32 %v8688_v29, %v6711_v28  ;;  %v8837_v40 = vld [vmem:[%s9182_s19 + $0xbdc] sm:$0xf]  ;;  %v6497_v43 = vld [vmem:[%s9182_s19 + $0x584] sm:$0xf0] }
  0x42   : > { %4360 = vmatpush.bf16.msrb.mxu0 %v7032_v32  ;;  %8430 = vmatmul.msk.bf16.vlgmr.msrb.gmra.mxu2 %vm4206_vm1, %v9235_v6  ;;  %v8333_v32 = vld [vmem:[%s9182_s19 + $0x13dc] sm:$0xf0]  ;;  %v8621_v42 = vld [vmem:[%s9182_s19 + $0x51c] sm:$0xf]  ;;  %v8116_v10 = vor.u32 %v9039_v36, %v8115_v35  ;;  %v8225_v48 = vld [vmem:[%s9182_s19 + $0x1304] sm:$0xf0] }
  0x43   : > { %4397 = vmatpush.bf16.msra.mxu3 %v6388_v25  ;;  %v8864_v25 = vld [vmem:[%s9182_s19 + $0xcb4] sm:$0xf]  ;;  %v9053_v46 = vld [vmem:[%s9182_s19 + $0x129c] sm:$0xf]  ;;  %v8007_v49 = vld [vmem:[%s9182_s19 + $0x10e8] sm:$0xf]  ;;  %v6500_v52 = vor.u32 %v8621_v42, %v6497_v43 }
  0x44   : > { %4373 = vmatpush.bf16.msrb.mxu1 %v7896_v38  ;;  %4411 = vmatpush.bf16.msra.mxu2 %v7144_v41  ;;  %v6608_v38 = vor.u32 %v8648_v24, %v6605_v27  ;;  %v7361_v41 = vld [vmem:[%s9182_s19 + $0xc44] sm:$0xf0]  ;;  %v8810_v55 = vld [vmem:[%s9182_s19 + $0xb04] sm:$0xf]  ;;  %v6389_v58 = vld [vmem:[%s9182_s19 + $0x4ac] sm:$0xf0] }
  0x45   : > { %v8594_v57 = vld [vmem:[%s9182_s19 + $0x444] sm:$0xf]  ;;  %v8117_v62 = vld [vmem:[%s9182_s19 + $0x122c] sm:$0xf0]  ;;  %v8985_v0 = vld [vmem:[%s9182_s19 + $0x1078] sm:$0xf0] }
  0x46   : > { %4361 = vmatpush.bf16.msrb.mxu0 %v6924_v44  ;;  %v8336_v44 = vor.u32 %v9080_v31, %v8333_v32  ;;  %v9026_v61 = vld [vmem:[%s9182_s19 + $0x11c4] sm:$0xf]  ;;  %v7899_v63 = vld [vmem:[%s9182_s19 + $0x1010] sm:$0xf]  ;;  %v8783_v3 = vld [vmem:[%s9182_s19 + $0xa2c] sm:$0xf]  ;;  %v2859_v31 = vunpack.c.h.b16 %v9320_v54 }
  0x47   : > { %4398 = vmatpush.bf16.msra.mxu3 %v6280_v37  ;;  %v7472_v37 = vor.u32 %v8864_v25, %v7469_v26  ;;  %v7145_v4 = vld [vmem:[%s9182_s19 + $0xa94] sm:$0xf0]  ;;  %v8567_v5 = vld [vmem:[%s9182_s19 + $0x36c] sm:$0xf]  ;;  %v7900_v9 = vor.u32 %v8985_v0, %v7899_v63  ;;  %v8958_v14 = vld [vmem:[%s9182_s19 + $0xfa0] sm:$0xf0] }
  0x48   : > { %4374 = vmatpush.bf16.msrb.mxu1 %v7788_v51  ;;  %4412 = vmatpush.bf16.msra.mxu2 %v7036_v56  ;;  %v7364_v51 = vor.u32 %v8837_v40, %v7361_v41  ;;  %v7253_v56 = vld [vmem:[%s9182_s19 + $0xb6c] sm:$0xf0]  ;;  %v6281_v7 = vld [vmem:[%s9182_s19 + $0x3d4] sm:$0xf0]  ;;  %v8999_v11 = vld [vmem:[%s9182_s19 + $0x10ec] sm:$0xf]  ;;  %v3534_v43 = vpack.c.b16 %v2859_v31, %v2859_v31 }
  0x49   : > { %v7791_v13 = vld [vmem:[%s9182_s19 + $0xf38] sm:$0xf]  ;;  %v6284_v16 = vor.u32 %v8567_v5, %v6281_v7  ;;  %v8756_v17 = vld [vmem:[%s9182_s19 + $0x954] sm:$0xf]  ;;  %v6173_v20 = vld [vmem:[%s9182_s19 + $0x2fc] sm:$0xf0] }
  0x4a   : > { %4362 = vmatpush.bf16.msrb.mxu0 %v6816_v59  ;;  %v8228_v59 = vor.u32 %v9053_v46, %v8225_v48  ;;  %v7792_v22 = vor.u32 %v8958_v14, %v7791_v13  ;;  %v7901_v24 = vld [vmem:[%s9182_s19 + $0x107c] sm:$0xf0]  ;;  %v8931_v26 = vld [vmem:[%s9182_s19 + $0xec8] sm:$0xf0]  ;;  %v8729_v29 = vld [vmem:[%s9182_s19 + $0x87c] sm:$0xf] }
  0x4b   : > { %4399 = vmatpush.bf16.msra.mxu3 %v6172_v50  ;;  %v9012_v50 = vld [vmem:[%s9182_s19 + $0x1150] sm:$0xf0]  ;;  %v7683_v25 = vld [vmem:[%s9182_s19 + $0xe60] sm:$0xf]  ;;  %v8513_v32 = vld [vmem:[%s9182_s19 + $0x1bc] sm:$0xf] }
  0x4c   : > { %4375 = vmatpush.bf16.msrb.mxu1 %v7680_v2  ;;  %4413 = vmatpush.bf16.msra.mxu2 %v6928_v8  ;;  %v8008_v60 = vor.u32 %v9012_v50, %v8007_v49  ;;  %v6392_v2 = vor.u32 %v8594_v57, %v6389_v58  ;;  %v8120_v8 = vor.u32 %v9026_v61, %v8117_v62  ;;  %v8945_v36 = vld [vmem:[%s9182_s19 + $0xf3c] sm:$0xf]  ;;  %v8702_v41 = vld [vmem:[%s9182_s19 + $0x7a4] sm:$0xf]  ;;  %v6821_v42 = vld [vmem:[%s9182_s19 + $0x80c] sm:$0xf0] }
  0x4d   : > { %v7684_v35 = vor.u32 %v8931_v26, %v7683_v25  ;;  %v9407_v48 = vld [vmem:[%s9182_s19 + $0x1450] sm:$0xff]  ;;  %v8918_v50 = vld [vmem:[%s9182_s19 + $0xe64] sm:$0xf]  ;;  %v7475_v57 = vld [vmem:[%s9182_s19 + $0xcb8] sm:$0xf]  ;;  %v4220_v62 = vsel %vm4209_vm0, %v3534_v43, 0 }
  0x4e   : > { %4363 = vmatpush.bf16.msrb.mxu0 %v6708_v12  ;;  %v8009_v12 = vld [vmem:[%s9182_s19 + $0x1154] sm:$0xf0]  ;;  %v8878_v58 = vld [vmem:[%s9182_s19 + $0xd20] sm:$0xf0]  ;;  %v2860_v63 = vunpack.c.l.b16 %v9407_v48  ;;  %v8891_v5 = vld [vmem:[%s9182_s19 + $0xd8c] sm:$0xf] }
  0x4f   : > { %4400 = vmatpush.bf16.msra.mxu3 %v6064_v1  ;;  %v7256_v1 = vor.u32 %v8810_v55, %v7253_v56  ;;  %v8012_v21 = vor.u32 %v8999_v11, %v8009_v12  ;;  %v5849_v55 = vld [vmem:[%s9182_s19 + $0x74] sm:$0xf0]  ;;  %v6824_v56 = vor.u32 %v8702_v41, %v6821_v42  ;;  %v7367_v11 = vld [vmem:[%s9182_s19 + $0xbe0] sm:$0xf]  ;;  %v8851_v12 = vld [vmem:[%s9182_s19 + $0xc48] sm:$0xf0] }
  0x50   : > { %4376 = vmatpush.bf16.msrb.mxu1 %v7572_v19  ;;  %4414 = vmatpush.bf16.msra.mxu2 %v6820_v23  ;;  %v8540_v19 = vld [vmem:[%s9182_s19 + $0x294] sm:$0xf]  ;;  %v6713_v61 = vld [vmem:[%s9182_s19 + $0x734] sm:$0xf0]  ;;  %v3535_v14 = vpack.c.b16 %v2860_v63, %v2860_v63  ;;  %v7259_v25 = vld [vmem:[%s9182_s19 + $0xb08] sm:$0xf] }
  0x51   : > { %4364 = vmatmul.bf16.vlgmr.msrb.gmra.mxu0 %v9271_v53  ;;  %v8972_v23 = vld [vmem:[%s9182_s19 + $0x1014] sm:$0xf]  ;;  %v6176_v28 = vor.u32 %v8540_v19, %v6173_v20  ;;  %v7577_v7 = vld [vmem:[%s9182_s19 + $0xdf4] sm:$0xf0]  ;;  %v8231_v19 = vld [vmem:[%s9182_s19 + $0x12a0] sm:$0xf] }
  0x52   : > { %4421 = vmatpush.bf16.msra.mxu0 %v8332_v15  ;;  %v7148_v15 = vor.u32 %v8783_v3, %v7145_v4  ;;  %v9094_v3 = vld [vmem:[%s9182_s19 + $0x13e0] sm:$0xf0]  ;;  %v9067_v20 = vld [vmem:[%s9182_s19 + $0x1308] sm:$0xf0]  ;;  %v8824_v26 = vld [vmem:[%s9182_s19 + $0xb70] sm:$0xf0] }
  0x53   : > { %4401 = vmatpush.bf16.msra.mxu3 %v5956_v18  ;;  %4377 = vmatmul.bf16.vlgmr.msrb.gmra.mxu1 %v9266_v47  ;;  %v7037_v18 = vld [vmem:[%s9182_s19 + $0x9bc] sm:$0xf0]  ;;  %v8662_v4 = vld [vmem:[%s9182_s19 + $0x660] sm:$0xf0]  ;;  %v8015_v42 = vld [vmem:[%s9182_s19 + $0x10f0] sm:$0xf] }
  0x54   : > { %4441 = vmatpush.bf16.msra.mxu1 %v4217_v33  ;;  %4415 = vmatpush.bf16.msra.mxu2 %v6712_v39  ;;  %v7040_v27 = vor.u32 %v8756_v17, %v7037_v18  ;;  %v6065_v33 = vld [vmem:[%s9182_s19 + $0x224] sm:$0xf0]  ;;  %v8904_v39 = vld [vmem:[%s9182_s19 + $0xdf0] sm:$0xf0]  ;;  %v7580_v17 = vor.u32 %v8891_v5, %v7577_v7  ;;  %v6503_v18 = vld [vmem:[%s9182_s19 + $0x520] sm:$0xf] }
  0x55   : > { %v6068_v40 = vor.u32 %v8513_v32, %v6065_v33  ;;  %v8123_v32 = vld [vmem:[%s9182_s19 + $0x11c8] sm:$0xf]  ;;  %v9040_v33 = vld [vmem:[%s9182_s19 + $0x1230] sm:$0xf0]  ;;  %v9013_v43 = vld [vmem:[%s9182_s19 + $0x1158] sm:$0xf0] }
  0x56   : > { %4422 = vmatpush.bf16.msra.mxu0 %v8224_v30  ;;  %v6929_v30 = vld [vmem:[%s9182_s19 + $0x8e4] sm:$0xf0]  ;;  %v8568_v63 = vld [vmem:[%s9182_s19 + $0x374] sm:$0xf]  ;;  %v7799_v5 = vld [vmem:[%s9182_s19 + $0xf40] sm:$0xf] }
  0x57   : > { %4402 = vmatpush.bf16.msra.mxu3 %v5848_v34  ;;  %4416 = vmatmul.bf16.vlgmr.msra.gmra.mxu2 %v9271_v53  ;;  %v7904_v34 = vor.u32 %v8972_v23, %v7901_v24  ;;  %v6932_v54 = vor.u32 %v8729_v29, %v6929_v30  ;;  %v8649_v23 = vld [vmem:[%s9182_s19 + $0x5fc] sm:$0xf]  ;;  %v6613_v24 = vld [vmem:[%s9182_s19 + $0x664] sm:$0xf0]  ;;  %v8959_v7 = vld [vmem:[%s9182_s19 + $0xfa8] sm:$0xf0] }
  0x58   : > { %4460 = vmatpush.bf16.msrb.mxu1 %v7472_v37  ;;  %4473 = vmatpush.bf16.msrb.mxu2 %v8336_v44  ;;  %v7793_v37 = vld [vmem:[%s9182_s19 + $0xfa4] sm:$0xf0]  ;;  %v8486_v44 = vld [vmem:[%s9182_s19 + $0xe4] sm:$0xf]  ;;  %v6616_v31 = vor.u32 %v8649_v23, %v6613_v24 }
  0x59   : > { %v7796_v46 = vor.u32 %v8945_v36, %v7793_v37  ;;  %v6395_v30 = vld [vmem:[%s9182_s19 + $0x448] sm:$0xf]  ;;  %v8622_v36 = vld [vmem:[%s9182_s19 + $0x524] sm:$0xf]  ;;  %v6505_v37 = vld [vmem:[%s9182_s19 + $0x58c] sm:$0xf0] }
  0x5a   : > { %4423 = vmatpush.bf16.msra.mxu0 %v8116_v10  ;;  %4403 = vmatmul.bf16.vlgmr.msra.gmra.mxu3 %v9263_v45  ;;  %v5957_v10 = vld [vmem:[%s9182_s19 + $0x14c] sm:$0xf0]  ;;  %v6508_v41 = vor.u32 %v8622_v36, %v6505_v37  ;;  %v8473_v36 = vld [vmem:[%s9182_s19 + $0x78] sm:$0xf0] }
  0x5b   : > { %4447 = vmatpush.bf16.msrb.mxu3 %v6608_v38  ;;  %v7575_v38 = vld [vmem:[%s9182_s19 + $0xd88] sm:$0xf]  ;;  %v8865_v37 = vld [vmem:[%s9182_s19 + $0xcbc] sm:$0xf] }
  0x5c   : > { %4461 = vmatpush.bf16.msrb.mxu1 %v7364_v51  ;;  %4474 = vmatpush.bf16.msrb.mxu2 %v8228_v59  ;;  %v7576_v49 = vor.u32 %v8904_v39, %v7575_v38  ;;  %v7685_v51 = vld [vmem:[%s9182_s19 + $0xecc] sm:$0xf0]  ;;  %v5960_v59 = vor.u32 %v8486_v44, %v5957_v10  ;;  %v8797_v39 = vld [vmem:[%s9182_s19 + $0xa98] sm:$0xf0] }
  0x5d   : > { %v7688_v0 = vor.u32 %v8918_v50, %v7685_v51  ;;  %v7151_v38 = vld [vmem:[%s9182_s19 + $0xa30] sm:$0xf]  ;;  %v8581_v10 = vld [vmem:[%s9182_s19 + $0x3d8] sm:$0xf0]  ;;  %v6397_v50 = vld [vmem:[%s9182_s19 + $0x4b4] sm:$0xf0] }
  0x5e   : > { %4424 = vmatpush.bf16.msra.mxu0 %v8008_v60  ;;  %v8675_v60 = vld [vmem:[%s9182_s19 + $0x6cc] sm:$0xf]  ;;  %v6287_v44 = vld [vmem:[%s9182_s19 + $0x370] sm:$0xf]  ;;  %v7043_v51 = vld [vmem:[%s9182_s19 + $0x958] sm:$0xf] }
  0x5f   : > { %4448 = vmatpush.bf16.msrb.mxu3 %v6500_v52  ;;  %v8459_v52 = vld [vmem:[%s9182_s19 + $0xc] sm:$0xf] }
  0x60   : > { %4462 = vmatpush.bf16.msrb.mxu1 %v7256_v1  ;;  %4475 = vmatpush.bf16.msrb.mxu2 %v8120_v8  ;;  %v6611_v1 = vld [vmem:[%s9182_s19 + $0x5f8] sm:$0xf]  ;;  %v7476_v8 = vor.u32 %v8878_v58, %v7475_v57  ;;  %v5852_v13 = vor.u32 %v8459_v52, %v5849_v55  ;;  %v8770_v52 = vld [vmem:[%s9182_s19 + $0x9c0] sm:$0xf0]  ;;  %v8016_v55 = vor.u32 %v9013_v43, %v8015_v42 }
  0x61   : > { %v7907_v57 = vld [vmem:[%s9182_s19 + $0x1018] sm:$0xf]  ;;  %v8986_v58 = vld [vmem:[%s9182_s19 + $0x1080] sm:$0xf0] }
  0x62   : > { %4425 = vmatpush.bf16.msra.mxu0 %v7900_v9  ;;  %v6716_v9 = vor.u32 %v8675_v60, %v6713_v61  ;;  %v8554_v60 = vld [vmem:[%s9182_s19 + $0x300] sm:$0xf0]  ;;  %v5965_v42 = vld [vmem:[%s9182_s19 + $0x154] sm:$0xf0] }
  0x63   : > { %4449 = vmatpush.bf16.msrb.mxu3 %v6392_v2  ;;  %8431 = vmatmul.msk.bf16.vlgmr.msra.gmra.mxu1 %vm4206_vm1, %v9235_v6  ;;  %v8339_v2 = vld [vmem:[%s9182_s19 + $0x1378] sm:$0xf]  ;;  %v9054_v43 = vld [vmem:[%s9182_s19 + $0x12a4] sm:$0xf] }
  0x64   : > { %4463 = vmatpush.bf16.msrb.mxu1 %v7148_v15  ;;  %4476 = vmatpush.bf16.msrb.mxu2 %v8012_v21  ;;  %v8340_v15 = vor.u32 %v9094_v3, %v8339_v2  ;;  %v8635_v21 = vld [vmem:[%s9182_s19 + $0x588] sm:$0xf0]  ;;  %v7908_v3 = vor.u32 %v8986_v58, %v7907_v57 }
  0x65   : > { %v6504_v29 = vor.u32 %v8635_v21, %v6503_v18  ;;  %v8743_v2 = vld [vmem:[%s9182_s19 + $0x8e8] sm:$0xf0]  ;;  %v5963_v21 = vld [vmem:[%s9182_s19 + $0xe8] sm:$0xf] }
  0x66   : > { %4426 = vmatpush.bf16.msra.mxu0 %v7792_v22  ;;  %v7368_v22 = vor.u32 %v8851_v12, %v7367_v11 }
  0x67   : > { %4450 = vmatpush.bf16.msrb.mxu3 %v6284_v16  ;;  %v6612_v16 = vor.u32 %v8662_v4, %v6611_v1  ;;  %v6935_v1 = vld [vmem:[%s9182_s19 + $0x880] sm:$0xf] }
  0x68   : > { %4464 = vmatpush.bf16.msrb.mxu1 %v7040_v27  ;;  %4477 = vmatpush.bf16.msrb.mxu2 %v7904_v34  ;;  %v4223_v27 = vsel %vm4209_vm0, %v3535_v14, 0  ;;  %v8608_v34 = vld [vmem:[%s9182_s19 + $0x4b0] sm:$0xf0]  ;;  %v6936_v12 = vor.u32 %v8743_v2, %v6935_v1  ;;  %v6181_v14 = vld [vmem:[%s9182_s19 + $0x304] sm:$0xf0] }
  0x69   : > { %v6511_v2 = vld [vmem:[%s9182_s19 + $0x528] sm:$0xf] }
  0x6a   : > { %4427 = vmatpush.bf16.msra.mxu0 %v7684_v35  ;;  %v7260_v35 = vor.u32 %v8824_v26, %v7259_v25  ;;  %v8514_v25 = vld [vmem:[%s9182_s19 + $0x1c4] sm:$0xf]  ;;  %v2861_v26 = vunpack.c.h.b16 %v9407_v48  ;;  %v5855_v48 = vld [vmem:[%s9182_s19 + $0x10] sm:$0xf] }
  0x6b   : > { %4451 = vmatpush.bf16.msrb.mxu3 %v6176_v28  ;;  %v8232_v28 = vor.u32 %v9067_v20, %v8231_v19  ;;  %v7691_v19 = vld [vmem:[%s9182_s19 + $0xe68] sm:$0xf]  ;;  %v8932_v20 = vld [vmem:[%s9182_s19 + $0xed0] sm:$0xf0] }
  0x6c   : > { %4465 = vmatpush.bf16.msrb.mxu1 %v6932_v54  ;;  %4478 = vmatpush.bf16.msrb.mxu2 %v7796_v46  ;;  %v8124_v54 = vor.u32 %v9040_v33, %v8123_v32  ;;  %v7152_v46 = vor.u32 %v8797_v39, %v7151_v38  ;;  %v7692_v32 = vor.u32 %v8932_v20, %v7691_v19  ;;  %v7153_v20 = vld [vmem:[%s9182_s19 + $0xa9c] sm:$0xf0] }
  0x6e   : > { %4428 = vmatpush.bf16.msra.mxu0 %v7576_v49  ;;  %v8595_v49 = vld [vmem:[%s9182_s19 + $0x44c] sm:$0xf] }
  0x6f   : > { %4452 = vmatpush.bf16.msrb.mxu3 %v6068_v40  ;;  %v6396_v40 = vor.u32 %v8608_v34, %v6395_v30  ;;  %v6400_v61 = vor.u32 %v8595_v49, %v6397_v50  ;;  %v9081_v30 = vld [vmem:[%s9182_s19 + $0x137c] sm:$0xf]  ;;  %v7583_v34 = vld [vmem:[%s9182_s19 + $0xd90] sm:$0xf]  ;;  %v6619_v49 = vld [vmem:[%s9182_s19 + $0x600] sm:$0xf] }
  0x70   : > { %4466 = vmatpush.bf16.msrb.mxu1 %v6824_v56  ;;  %4479 = vmatpush.bf16.msrb.mxu2 %v7688_v0  ;;  %v6288_v56 = vor.u32 %v8581_v10, %v6287_v44  ;;  %v6289_v0 = vld [vmem:[%s9182_s19 + $0x3dc] sm:$0xf0]  ;;  %v8233_v44 = vld [vmem:[%s9182_s19 + $0x130c] sm:$0xf0]  ;;  %v8663_v50 = vld [vmem:[%s9182_s19 + $0x668] sm:$0xf0] }
  0x71   : > { %4429 = vmatmul.bf16.vlgmr.msra.gmra.mxu0 %v9266_v47  ;;  %v6292_v11 = vor.u32 %v8568_v63, %v6289_v0  ;;  %v8236_v58 = vor.u32 %v9054_v43, %v8233_v44  ;;  %v9027_v63 = vld [vmem:[%s9182_s19 + $0x11cc] sm:$0xf]  ;;  %v8125_v0 = vld [vmem:[%s9182_s19 + $0x1234] sm:$0xf0]  ;;  %v6620_v1 = vor.u32 %v8663_v50, %v6619_v49  ;;  %v7051_v43 = vld [vmem:[%s9182_s19 + $0x960] sm:$0xf] }
  0x72   : > { %4493 = vmatpush.bf16.msrb.mxu0 %v4220_v62  ;;  %v7044_v62 = vor.u32 %v8770_v52, %v7043_v51  ;;  %v8838_v52 = vld [vmem:[%s9182_s19 + $0xbe4] sm:$0xf]  ;;  %v8771_v44 = vld [vmem:[%s9182_s19 + $0x9c8] sm:$0xf0]  ;;  %v6079_v50 = vld [vmem:[%s9182_s19 + $0x1c8] sm:$0xf] }
  0x73   : > { %4453 = vmatpush.bf16.msrb.mxu3 %v5960_v59  ;;  %v6179_v59 = vld [vmem:[%s9182_s19 + $0x298] sm:$0xf] }
  0x74   : > { %4467 = vmatpush.bf16.msrb.mxu1 %v6716_v9  ;;  %4480 = vmatpush.bf16.msrb.mxu2 %v7580_v17  ;;  %v6180_v4 = vor.u32 %v8554_v60, %v6179_v59  ;;  %v8527_v9 = vld [vmem:[%s9182_s19 + $0x228] sm:$0xf0]  ;;  %v7800_v17 = vor.u32 %v8959_v7, %v7799_v5  ;;  %v8460_v59 = vld [vmem:[%s9182_s19 + $0x14] sm:$0xf]  ;;  %v5857_v60 = vld [vmem:[%s9182_s19 + $0x7c] sm:$0xf0] }
  0x75   : > { %v5860_v5 = vor.u32 %v8460_v59, %v5857_v60  ;;  %v8811_v7 = vld [vmem:[%s9182_s19 + $0xb0c] sm:$0xf]  ;;  %v6943_v60 = vld [vmem:[%s9182_s19 + $0x888] sm:$0xf] }
  0x76   : > { %4512 = vmatpush.bf16.msra.mxu0 %v7476_v8  ;;  %v6071_v8 = vld [vmem:[%s9182_s19 + $0x1c0] sm:$0xf] }
  0x77   : > { %4454 = vmatpush.bf16.msrb.mxu3 %v5852_v13  ;;  %4468 = vmatmul.bf16.vlgmr.msrb.gmra.mxu1 %v9271_v53  ;;  %v8541_v13 = vld [vmem:[%s9182_s19 + $0x29c] sm:$0xf]  ;;  %v6072_v18 = vor.u32 %v8527_v9, %v6071_v8  ;;  %v7261_v8 = vld [vmem:[%s9182_s19 + $0xb74] sm:$0xf0] }
  0x78   : > { %4525 = vmatpush.bf16.msra.mxu1 %v8340_v15  ;;  %4545 = vmatpush.bf16.msra.mxu2 %v4223_v27  ;;  %v6827_v15 = vld [vmem:[%s9182_s19 + $0x7a8] sm:$0xf]  ;;  %v6184_v23 = vor.u32 %v8541_v13, %v6181_v14  ;;  %v6073_v27 = vld [vmem:[%s9182_s19 + $0x22c] sm:$0xf0]  ;;  %v8852_v13 = vld [vmem:[%s9182_s19 + $0xc50] sm:$0xf0]  ;;  %v7264_v19 = vor.u32 %v8811_v7, %v7261_v8 }
  0x79   : > { %4481 = vmatmul.bf16.vlgmr.msrb.gmra.mxu2 %v9266_v47  ;;  %v6076_v38 = vor.u32 %v8514_v25, %v6073_v27  ;;  %v9000_v14 = vld [vmem:[%s9182_s19 + $0x10f4] sm:$0xf]  ;;  %v7909_v25 = vld [vmem:[%s9182_s19 + $0x1084] sm:$0xf0]  ;;  %v6295_v27 = vld [vmem:[%s9182_s19 + $0x378] sm:$0xf] }
  0x7a   : > { %4513 = vmatpush.bf16.msra.mxu0 %v7368_v22  ;;  %4455 = vmatmul.bf16.vlgmr.msrb.gmra.mxu3 %v9263_v45  ;;  %v8500_v22 = vld [vmem:[%s9182_s19 + $0x150] sm:$0xf0]  ;;  %v6721_v8 = vld [vmem:[%s9182_s19 + $0x73c] sm:$0xf0] }
  0x7b   : > { %4499 = vmatpush.bf16.msra.mxu3 %v6612_v16  ;;  %v8716_v16 = vld [vmem:[%s9182_s19 + $0x810] sm:$0xf0]  ;;  %v5964_v33 = vor.u32 %v8500_v22, %v5963_v21 }
  0x7c   : > { %4526 = vmatpush.bf16.msra.mxu1 %v8232_v28  ;;  %4551 = vmatpush.bf16.msrb.mxu2 %v6616_v31  ;;  %v6828_v24 = vor.u32 %v8716_v16, %v6827_v15  ;;  %v6719_v28 = vld [vmem:[%s9182_s19 + $0x6d0] sm:$0xf]  ;;  %v8341_v31 = vld [vmem:[%s9182_s19 + $0x13e4] sm:$0xf0]  ;;  %v8017_v15 = vld [vmem:[%s9182_s19 + $0x115c] sm:$0xf0] }
  0x7d   : > { %v8020_v22 = vor.u32 %v9000_v14, %v8017_v15  ;;  %v8676_v7 = vld [vmem:[%s9182_s19 + $0x6d4] sm:$0xf]  ;;  %v6835_v14 = vld [vmem:[%s9182_s19 + $0x7b0] sm:$0xf]  ;;  %v8717_v15 = vld [vmem:[%s9182_s19 + $0x818] sm:$0xf0] }
  0x7e   : > { %4514 = vmatpush.bf16.msra.mxu0 %v7260_v35  ;;  %v8905_v35 = vld [vmem:[%s9182_s19 + $0xdf8] sm:$0xf0] }
  0x7f   : > { %4500 = vmatpush.bf16.msra.mxu3 %v6504_v29  ;;  %v8689_v29 = vld [vmem:[%s9182_s19 + $0x738] sm:$0xf0]  ;;  %v7584_v10 = vor.u32 %v8905_v35, %v7583_v34  ;;  %v7159_v34 = vld [vmem:[%s9182_s19 + $0xa38] sm:$0xf]  ;;  %v8798_v35 = vld [vmem:[%s9182_s19 + $0xaa0] sm:$0xf0] }
  0x80   : > { %4527 = vmatpush.bf16.msra.mxu1 %v8124_v54  ;;  %4552 = vmatpush.bf16.msrb.mxu2 %v6508_v41  ;;  %v6720_v39 = vor.u32 %v8689_v29, %v6719_v28  ;;  %v3536_v54 = vpack.c.b16 %v2861_v26, %v2861_v26  ;;  %v8487_v41 = vld [vmem:[%s9182_s19 + $0xec] sm:$0xf]  ;;  %v8582_v28 = vld [vmem:[%s9182_s19 + $0x3e0] sm:$0xf0] }
  0x81   : > { %8432 = vmatmul.msk.bf16.vlgmr.msrb.gmra.mxu0 %vm4206_vm1, %v9235_v6 }
  0x82   : > { %4515 = vmatpush.bf16.msra.mxu0 %v7152_v46  ;;  %v5856_v46 = vor.u32 %v8473_v36, %v5855_v48  ;;  %v4226_v57 = vsel %vm4209_vm0, %v3536_v54, 0  ;;  %v7801_v48 = vld [vmem:[%s9182_s19 + $0xfac] sm:$0xf0]  ;;  %v6296_v36 = vor.u32 %v8582_v28, %v6295_v27  ;;  %v9539_v54 = vld [vmem:[%s9182_s19 + $0x1458] sm:$0xff]  ;;  %v6836_v27 = vor.u32 %v8717_v15, %v6835_v14 }
  0x83   : > { %4501 = vmatpush.bf16.msra.mxu3 %v6396_v40  ;;  %v8344_v40 = vor.u32 %v9081_v30, %v8341_v31  ;;  %v8757_v30 = vld [vmem:[%s9182_s19 + $0x95c] sm:$0xf]  ;;  %v7045_v31 = vld [vmem:[%s9182_s19 + $0x9c4] sm:$0xf0] }
  0x84   : > { %4528 = vmatpush.bf16.msra.mxu1 %v8016_v55  ;;  %4553 = vmatpush.bf16.msrb.mxu2 %v6400_v61  ;;  %v7369_v55 = vld [vmem:[%s9182_s19 + $0xc4c] sm:$0xf0]  ;;  %v7483_v61 = vld [vmem:[%s9182_s19 + $0xcc0] sm:$0xf]  ;;  %v9001_v15 = vld [vmem:[%s9182_s19 + $0x10fc] sm:$0xf] }
  0x86   : > { %4516 = vmatpush.bf16.msra.mxu0 %v7044_v62  ;;  %v8879_v62 = vld [vmem:[%s9182_s19 + $0xd28] sm:$0xf0] }
  0x87   : > { %4502 = vmatpush.bf16.msra.mxu3 %v6288_v56  ;;  %v5968_v56 = vor.u32 %v8487_v41, %v5965_v42  ;;  %v7484_v9 = vor.u32 %v8879_v62, %v7483_v61  ;;  %v7160_v41 = vor.u32 %v8798_v35, %v7159_v34  ;;  %v8744_v61 = vld [vmem:[%s9182_s19 + $0x8f0] sm:$0xf0]  ;;  %v8623_v34 = vld [vmem:[%s9182_s19 + $0x52c] sm:$0xf]  ;;  %v6513_v35 = vld [vmem:[%s9182_s19 + $0x594] sm:$0xf0] }
  0x88   : > { %4529 = vmatpush.bf16.msra.mxu1 %v7908_v3  ;;  %4554 = vmatpush.bf16.msrb.mxu2 %v6292_v11  ;;  %v8636_v3 = vld [vmem:[%s9182_s19 + $0x590] sm:$0xf0]  ;;  %v8128_v11 = vor.u32 %v9027_v63, %v8125_v0  ;;  %v7585_v63 = vld [vmem:[%s9182_s19 + $0xdfc] sm:$0xf0] }
  0x89   : > { %8433 = vmatmul.msk.bf16.vlgmr.msra.gmra.mxu2 %vm4206_vm1, %v9235_v6  ;;  %v7477_v6 = vld [vmem:[%s9182_s19 + $0xd24] sm:$0xf0]  ;;  %v6512_v16 = vor.u32 %v8636_v3, %v6511_v2  ;;  %v8892_v62 = vld [vmem:[%s9182_s19 + $0xd94] sm:$0xf]  ;;  %v5971_v3 = vld [vmem:[%s9182_s19 + $0xf0] sm:$0xf] }
  0x8a   : > { %4517 = vmatpush.bf16.msra.mxu0 %v6936_v12  ;;  %v7480_v51 = vor.u32 %v8865_v37, %v7477_v6  ;;  %v7375_v12 = vld [vmem:[%s9182_s19 + $0xbe8] sm:$0xf]  ;;  %v6187_v37 = vld [vmem:[%s9182_s19 + $0x2a0] sm:$0xf]  ;;  %v8730_v6 = vld [vmem:[%s9182_s19 + $0x884] sm:$0xf] }
  0x8b   : > { %4503 = vmatpush.bf16.msra.mxu3 %v6180_v4  ;;  %v7372_v4 = vor.u32 %v8838_v52, %v7369_v55  ;;  %v7376_v21 = vor.u32 %v8852_v13, %v7375_v12  ;;  %v2862_v52 = vunpack.c.l.b16 %v9539_v54  ;;  %v9556_v2 = vld.sshfl [vmem:[#allocation1 + $0x18] sm:$0xff pattern:$0x73625140]  ;;  %v6944_v12 = vor.u32 %v8744_v61, %v6943_v60 }
  0x8c   : > { %4530 = vmatpush.bf16.msra.mxu1 %v7800_v17  ;;  %4555 = vmatpush.bf16.msrb.mxu2 %v6184_v23  ;;  %v6403_v17 = vld [vmem:[%s9182_s19 + $0x450] sm:$0xf]  ;;  %v7588_v13 = vor.u32 %v8892_v62, %v7585_v63  ;;  %v9028_v62 = vld [vmem:[%s9182_s19 + $0x11d4] sm:$0xf]  ;;  %v8133_v63 = vld [vmem:[%s9182_s19 + $0x123c] sm:$0xf0] }
  0x8d   : > { %v7267_v23 = vld [vmem:[%s9182_s19 + $0xb10] sm:$0xf] }
  0x8e   : > { %4518 = vmatpush.bf16.msra.mxu0 %v6828_v24  ;;  %v8973_v24 = vld [vmem:[%s9182_s19 + $0x101c] sm:$0xf] }
  0x8f   : > { %4504 = vmatpush.bf16.msra.mxu3 %v6072_v18  ;;  %v8609_v18 = vld [vmem:[%s9182_s19 + $0x4b8] sm:$0xf0] }
  0x90   : > { %4531 = vmatpush.bf16.msra.mxu1 %v7692_v32  ;;  %4556 = vmatpush.bf16.msrb.mxu2 %v6076_v38  ;;  %v6404_v26 = vor.u32 %v8609_v18, %v6403_v17  ;;  %v8555_v38 = vld [vmem:[%s9182_s19 + $0x308] sm:$0xf0]  ;;  %v6621_v17 = vld [vmem:[%s9182_s19 + $0x66c] sm:$0xf0] }
  0x91   : > { %v6188_v49 = vor.u32 %v8555_v38, %v6187_v37  ;;  %v7377_v37 = vld [vmem:[%s9182_s19 + $0xc54] sm:$0xf0] }
  0x92   : > { %4519 = vmatpush.bf16.msra.mxu0 %v6720_v39  ;;  %v7048_v39 = vor.u32 %v8757_v30, %v7045_v31  ;;  %v8690_v30 = vld [vmem:[%s9182_s19 + $0x740] sm:$0xf0] }
  0x93   : > { %4505 = vmatpush.bf16.msra.mxu3 %v5964_v33  ;;  %v7912_v33 = vor.u32 %v8973_v24, %v7909_v25  ;;  %v8239_v24 = vld [vmem:[%s9182_s19 + $0x12a8] sm:$0xf]  ;;  %v9068_v25 = vld [vmem:[%s9182_s19 + $0x1310] sm:$0xf0]  ;;  %v9082_v31 = vld [vmem:[%s9182_s19 + $0x1384] sm:$0xf] }
  0x94   : > { %4532 = vmatpush.bf16.msra.mxu1 %v7584_v10  ;;  %4557 = vmatpush.bf16.msrb.mxu2 %v5968_v56  ;;  %v8919_v10 = vld [vmem:[%s9182_s19 + $0xe6c] sm:$0xf]  ;;  %v8240_v38 = vor.u32 %v9068_v25, %v8239_v24 }
  0x95   : > { %4520 = vmatmul.bf16.vlgmr.msra.gmra.mxu0 %v9271_v53  ;;  %v8825_v53 = vld [vmem:[%s9182_s19 + $0xb78] sm:$0xf0]  ;;  %v8703_v56 = vld [vmem:[%s9182_s19 + $0x7ac] sm:$0xf] }
  0x96   : > { %4577 = vmatpush.bf16.msrb.mxu0 %v8344_v40  ;;  %v7268_v32 = vor.u32 %v8825_v53, %v7267_v23  ;;  %v6937_v40 = vld [vmem:[%s9182_s19 + $0x8ec] sm:$0xf0] }
  0x97   : > { %4506 = vmatpush.bf16.msra.mxu3 %v5856_v46  ;;  %4533 = vmatmul.bf16.vlgmr.msra.gmra.mxu1 %v9266_v47  ;;  %v8784_v47 = vld [vmem:[%s9182_s19 + $0xa34] sm:$0xf]  ;;  %v7693_v46 = vld [vmem:[%s9182_s19 + $0xed4] sm:$0xf0]  ;;  %v6940_v55 = vor.u32 %v8730_v6, %v6937_v40  ;;  %v7485_v23 = vld [vmem:[%s9182_s19 + $0xd2c] sm:$0xf0] }
  0x98   : > { %4597 = vmatpush.bf16.msrb.mxu1 %v4226_v57  ;;  %4558 = vmatpush.bf16.msrb.mxu2 %v5860_v5  ;;  %v7156_v29 = vor.u32 %v8784_v47, %v7153_v20  ;;  %v6829_v57 = vld [vmem:[%s9182_s19 + $0x814] sm:$0xf0]  ;;  %v7696_v59 = vor.u32 %v8919_v10, %v7693_v46  ;;  %v8474_v20 = vld [vmem:[%s9182_s19 + $0x80] sm:$0xf0]  ;;  %v8131_v6 = vld [vmem:[%s9182_s19 + $0x11d0] sm:$0xf] }
  0x99   : > { %v6832_v5 = vor.u32 %v8703_v56, %v6829_v57  ;;  %v5863_v47 = vld [vmem:[%s9182_s19 + $0x18] sm:$0xf]  ;;  %v9041_v40 = vld [vmem:[%s9182_s19 + $0x1238] sm:$0xf0]  ;;  %v8596_v46 = vld [vmem:[%s9182_s19 + $0x454] sm:$0xf] }
  0x9a   : > { %4578 = vmatpush.bf16.msrb.mxu0 %v8236_v58  ;;  %4507 = vmatmul.bf16.vlgmr.msra.gmra.mxu3 %v9263_v45  ;;  %v7052_v58 = vor.u32 %v8771_v44, %v7051_v43  ;;  %v9055_v43 = vld [vmem:[%s9182_s19 + $0x12ac] sm:$0xf]  ;;  %v8241_v10 = vld [vmem:[%s9182_s19 + $0x1314] sm:$0xf0] }
  0x9b   : > { %4564 = vmatpush.bf16.msrb.mxu3 %v7480_v51  ;;  %4559 = vmatmul.bf16.vlgmr.msrb.gmra.mxu2 %v9263_v45  ;;  %v8946_v45 = vld [vmem:[%s9182_s19 + $0xf44] sm:$0xf]  ;;  %v8528_v51 = vld [vmem:[%s9182_s19 + $0x230] sm:$0xf0]  ;;  %v8244_v60 = vor.u32 %v9055_v43, %v8241_v10  ;;  %v5973_v10 = vld [vmem:[%s9182_s19 + $0x15c] sm:$0xf0] }
  0x9c   : > { %4603 = vmatpush.bf16.msra.mxu1 %v6620_v1  ;;  %4616 = vmatpush.bf16.msra.mxu2 %v7484_v9  ;;  %v7804_v42 = vor.u32 %v8946_v45, %v7801_v48  ;;  %v6080_v0 = vor.u32 %v8528_v51, %v6079_v50  ;;  %v3537_v1 = vpack.c.b16 %v2862_v52, %v2862_v52  ;;  %v8347_v9 = vld [vmem:[%s9182_s19 + $0x1380] sm:$0xf]  ;;  %v9585_v48 = vld.sshfl [vmem:[#allocation1 + $0x10] sm:$0xff pattern:$0x73625140] }
  0x9d   : > { %v9593_v44 = vld.sshfl [vmem:[#allocation1 + $0x8] sm:$0xff pattern:$0x73625140]  ;;  %v8812_v51 = vld [vmem:[%s9182_s19 + $0xb14] sm:$0xf] }
  0x9e   : > { %4579 = vmatpush.bf16.msrb.mxu0 %v8128_v11  ;;  %v9095_v11 = vld [vmem:[%s9182_s19 + $0x13e8] sm:$0xf0]  ;;  %v7269_v52 = vld [vmem:[%s9182_s19 + $0xb7c] sm:$0xf0]  ;;  %v8488_v43 = vld [vmem:[%s9182_s19 + $0xf4] sm:$0xf] }
  0x9f   : > { %4565 = vmatpush.bf16.msrb.mxu3 %v7372_v4  ;;  %v8501_v4 = vld [vmem:[%s9182_s19 + $0x158] sm:$0xf0]  ;;  %v8348_v53 = vor.u32 %v9095_v11, %v8347_v9  ;;  %v7915_v11 = vld [vmem:[%s9182_s19 + $0x1020] sm:$0xf] }
  0xa0   : > { %4604 = vmatpush.bf16.msra.mxu1 %v6512_v16  ;;  %4617 = vmatpush.bf16.msra.mxu2 %v7376_v21  ;;  %v8650_v16 = vld [vmem:[%s9182_s19 + $0x604] sm:$0xf]  ;;  %v5972_v18 = vor.u32 %v8501_v4, %v5971_v3  ;;  %v6724_v21 = vor.u32 %v8676_v7, %v6721_v8  ;;  %v7272_v3 = vor.u32 %v8812_v51, %v7269_v52  ;;  %v7161_v7 = vld [vmem:[%s9182_s19 + $0xaa4] sm:$0xf0] }
  0xa1   : > { %v6624_v28 = vor.u32 %v8650_v16, %v6621_v17  ;;  %v9614_v8 = vld.sshfl [vmem:[#allocation1] sm:$0xff pattern:$0x73625140]  ;;  %v8025_v16 = vld [vmem:[%s9182_s19 + $0x1164] sm:$0xf0] }
  0xa2   : > { %4580 = vmatpush.bf16.msrb.mxu0 %v8020_v22  ;;  %v8866_v22 = vld [vmem:[%s9182_s19 + $0xcc4] sm:$0xf]  ;;  %v8028_v24 = vor.u32 %v9001_v15, %v8025_v16  ;;  %v8664_v15 = vld [vmem:[%s9182_s19 + $0x670] sm:$0xf0] }
  0xa3   : > { %4566 = vmatpush.bf16.msrb.mxu3 %v7264_v19  ;;  %v4229_v19 = vsel %vm4209_vm0, %v3537_v1, 0  ;;  %v7488_v45 = vor.u32 %v8866_v22, %v7485_v23  ;;  %v6297_v1 = vld [vmem:[%s9182_s19 + $0x3e4] sm:$0xf0]  ;;  %v8542_v17 = vld [vmem:[%s9182_s19 + $0x2a4] sm:$0xf] }
  0xa4   : > { %4605 = vmatpush.bf16.msra.mxu1 %v6404_v26  ;;  %4618 = vmatpush.bf16.msra.mxu2 %v7268_v32  ;;  %v9577_v26 = vpop.f32.mrf.mxu3  ;;  %v5864_v32 = vor.u32 %v8474_v20, %v5863_v47  ;;  %v8758_v47 = vld [vmem:[%s9182_s19 + $0x964] sm:$0xf]  ;;  %v7053_v20 = vld [vmem:[%s9182_s19 + $0x9cc] sm:$0xf0]  ;;  %v7807_v23 = vld [vmem:[%s9182_s19 + $0xf48] sm:$0xf] }
  0xa6   : > { %4581 = vmatpush.bf16.msrb.mxu0 %v7912_v33  ;;  %v8349_v33 = vld [vmem:[%s9182_s19 + $0x13ec] sm:$0xf0] }
  0xa7   : > { %4567 = vmatpush.bf16.msrb.mxu3 %v7156_v29  ;;  %8434 = vmatmul.msk.bf16.vlgmr.msrb.gmra.mxu1 %vm4206_vm1, %v9556_v2  ;;  %v6727_v29 = vld [vmem:[%s9182_s19 + $0x6d8] sm:$0xf] }
  0xa8   : > { %4606 = vmatpush.bf16.msra.mxu1 %v6296_v36  ;;  %4619 = vmatpush.bf16.msra.mxu2 %v7160_v41  ;;  %v8839_v36 = vld [vmem:[%s9182_s19 + $0xbec] sm:$0xf]  ;;  %v8352_v41 = vor.u32 %v9082_v31, %v8349_v33  ;;  %v6081_v31 = vld [vmem:[%s9182_s19 + $0x234] sm:$0xf0] }
  0xa9   : > { %v7380_v50 = vor.u32 %v8839_v36, %v7377_v37  ;;  %v7699_v36 = vld [vmem:[%s9182_s19 + $0xe70] sm:$0xf]  ;;  %v8933_v37 = vld [vmem:[%s9182_s19 + $0xed8] sm:$0xf0] }
  0xaa   : > { %4582 = vmatpush.bf16.msrb.mxu0 %v7804_v42  ;;  %v6516_v42 = vor.u32 %v8623_v34, %v6513_v35  ;;  %v8731_v34 = vld [vmem:[%s9182_s19 + $0x88c] sm:$0xf]  ;;  %v6945_v35 = vld [vmem:[%s9182_s19 + $0x8f4] sm:$0xf0]  ;;  %v7700_v51 = vor.u32 %v8933_v37, %v7699_v36  ;;  %v8247_v36 = vld [vmem:[%s9182_s19 + $0x12b0] sm:$0xf] }
  0xab   : > { %4568 = vmatpush.bf16.msrb.mxu3 %v7048_v39  ;;  %v6728_v39 = vor.u32 %v8690_v30, %v6727_v29  ;;  %v7917_v29 = vld [vmem:[%s9182_s19 + $0x108c] sm:$0xf0]  ;;  %v8515_v30 = vld [vmem:[%s9182_s19 + $0x1cc] sm:$0xf]  ;;  %v9069_v37 = vld [vmem:[%s9182_s19 + $0x1318] sm:$0xf0] }
  0xac   : > { %4607 = vmatpush.bf16.msra.mxu1 %v6188_v49  ;;  %4620 = vmatpush.bf16.msra.mxu2 %v7052_v58  ;;  %v6405_v49 = vld [vmem:[%s9182_s19 + $0x4bc] sm:$0xf0]  ;;  %v4341_v56 = vpop.f32.mrf.mxu3  ;;  %v8023_v58 = vld [vmem:[%s9182_s19 + $0x10f8] sm:$0xf] }
  0xad   : > { %v6408_v61 = vor.u32 %v8596_v46, %v6405_v49  ;;  %v6948_v46 = vor.u32 %v8731_v34, %v6945_v35  ;;  %v8704_v49 = vld [vmem:[%s9182_s19 + $0x7b4] sm:$0xf]  ;;  %v7591_v56 = vld [vmem:[%s9182_s19 + $0xd98] sm:$0xf] }
  0xae   : > { %4583 = vmatpush.bf16.msrb.mxu0 %v7696_v59  ;;  %v9601_v57 = vpop.f32.mrf.mxu0  ;;  %v9014_v59 = vld [vmem:[%s9182_s19 + $0x1160] sm:$0xf0] }
  0xaf   : > { %4569 = vmatpush.bf16.msrb.mxu3 %v6940_v55  ;;  %v8132_v55 = vor.u32 %v9041_v40, %v8131_v6  ;;  %v8024_v9 = vor.u32 %v9014_v59, %v8023_v58  ;;  %v8947_v40 = vld [vmem:[%s9182_s19 + $0xf4c] sm:$0xf]  ;;  %v5976_v59 = vor.u32 %v8488_v43, %v5973_v10  ;;  %v7275_v43 = vld [vmem:[%s9182_s19 + $0xb18] sm:$0xf]  ;;  %v8826_v10 = vld [vmem:[%s9182_s19 + $0xb80] sm:$0xf0] }
  0xb0   : > { %4608 = vmatpush.bf16.msra.mxu1 %v6080_v0  ;;  %4621 = vmatpush.bf16.msra.mxu2 %v6944_v12  ;;  %v8569_v0 = vld [vmem:[%s9182_s19 + $0x37c] sm:$0xf]  ;;  %v9609_v4 = vpop.f32.mrf.mxu1  ;;  %v8987_v12 = vld [vmem:[%s9182_s19 + $0x1088] sm:$0xf0] }
  0xb1   : > { %v6300_v14 = vor.u32 %v8569_v0, %v6297_v1  ;;  %v7916_v22 = vor.u32 %v8987_v12, %v7915_v11  ;;  %v5865_v1 = vld [vmem:[%s9182_s19 + $0x84] sm:$0xf0] }
  0xb2   : > { %4584 = vmatpush.bf16.msrb.mxu0 %v7588_v13  ;;  %v8136_v13 = vor.u32 %v9028_v62, %v8133_v63  ;;  %v7701_v62 = vld [vmem:[%s9182_s19 + $0xedc] sm:$0xf0]  ;;  %v8461_v63 = vld [vmem:[%s9182_s19 + $0x1c] sm:$0xf]  ;;  %v6627_v11 = vld [vmem:[%s9182_s19 + $0x608] sm:$0xf] }
  0xb3   : > { %4570 = vmatpush.bf16.msrb.mxu3 %v6832_v5  ;;  %v8785_v5 = vld [vmem:[%s9182_s19 + $0xa3c] sm:$0xf]  ;;  %v7491_v12 = vld [vmem:[%s9182_s19 + $0xcc8] sm:$0xf] }
  0xb4   : > { %4609 = vmatpush.bf16.msra.mxu1 %v5972_v18  ;;  %4622 = vmatpush.bf16.msra.mxu2 %v6836_v27  ;;  %v6189_v18 = vld [vmem:[%s9182_s19 + $0x30c] sm:$0xf0] }
  0xb5   : > { %4585 = vmatmul.bf16.vlgmr.msrb.gmra.mxu0 %v9585_v48  ;;  %v6192_v25 = vor.u32 %v8542_v17, %v6189_v18  ;;  %v8355_v18 = vld [vmem:[%s9182_s19 + $0x1388] sm:$0xf] }
  0xb6   : > { %4649 = vmatpush.bf16.msra.mxu0 %v4229_v19  ;;  %v7164_v19 = vor.u32 %v8785_v5, %v7161_v7  ;;  %v4302_v27 = vpop.f32.mrf.mxu0  ;;  %v8677_v5 = vld [vmem:[%s9182_s19 + $0x6dc] sm:$0xf]  ;;  %v6729_v7 = vld [vmem:[%s9182_s19 + $0x744] sm:$0xf0] }
  0xb7   : > { %4571 = vmatpush.bf16.msrb.mxu3 %v6724_v21  ;;  %v9625_v21 = vpop.f32.mrf.mxu2 }
  0xb8   : > { %4610 = vmatpush.bf16.msra.mxu1 %v5864_v32  ;;  %4623 = vmatpush.bf16.msra.mxu2 %v6728_v39  ;;  %v7056_v32 = vor.u32 %v8758_v47, %v7053_v20  ;;  %v4315_v33 = vpop.f32.mrf.mxu1  ;;  %v6084_v39 = vor.u32 %v8515_v30, %v6081_v31  ;;  %v5868_v20 = vor.u32 %v8461_v63, %v5865_v1  ;;  %v8853_v30 = vld [vmem:[%s9182_s19 + $0xc58] sm:$0xf0]  ;;  %v7167_v63 = vld [vmem:[%s9182_s19 + $0xa40] sm:$0xf] }
  0xb9   : > { %v8637_v33 = vld [vmem:[%s9182_s19 + $0x598] sm:$0xf0] }
  0xba   : > { %4655 = vmatpush.bf16.msrb.mxu0 %v6624_v28  ;;  %4572 = vmatmul.bf16.vlgmr.msrb.gmra.mxu3 %v9593_v44  ;;  %v8974_v28 = vld [vmem:[%s9182_s19 + $0x1024] sm:$0xf] }
  0xbb   : > { %4629 = vmatpush.bf16.msra.mxu3 %v8348_v53  ;;  %4624 = vmatmul.bf16.vlgmr.msra.gmra.mxu2 %v9593_v44  ;;  %v8960_v53 = vld [vmem:[%s9182_s19 + $0xfb0] sm:$0xf0] }
  0xbc   : > { %4668 = vmatpush.bf16.msrb.mxu1 %v7488_v45  ;;  %4681 = vmatpush.bf16.msrb.mxu2 %v8352_v41  ;;  %v7808_v45 = vor.u32 %v8960_v53, %v7807_v23  ;;  %v2863_v41 = vunpack.c.h.b16 %v9539_v54  ;;  %v8906_v54 = vld [vmem:[%s9182_s19 + $0xe00] sm:$0xf0]  ;;  %v7593_v23 = vld [vmem:[%s9182_s19 + $0xe04] sm:$0xf0]  ;;  %v6732_v53 = vor.u32 %v8677_v5, %v6729_v7  ;;  %v8583_v5 = vld [vmem:[%s9182_s19 + $0x3e8] sm:$0xf0] }
  0xbd   : > { %4611 = vmatmul.bf16.vlgmr.msra.gmra.mxu1 %v9614_v8  ;;  %v9639_v6 = vpop.f32.mrf.mxu3 }
  0xbe   : > { %4656 = vmatpush.bf16.msrb.mxu0 %v6516_v42  ;;  %v7809_v42 = vld [vmem:[%s9182_s19 + $0xfb4] sm:$0xf0] }
  0xbf   : > { %4630 = vmatpush.bf16.msra.mxu3 %v8240_v38  ;;  %v7920_v38 = vor.u32 %v8974_v28, %v7917_v29  ;;  %v4328_v52 = vpop.f32.mrf.mxu2  ;;  %v7812_v58 = vor.u32 %v8947_v40, %v7809_v42  ;;  %v6628_v28 = vor.u32 %v8664_v15, %v6627_v11  ;;  %v7383_v29 = vld [vmem:[%s9182_s19 + $0xbf0] sm:$0xf]  ;;  %v9015_v15 = vld [vmem:[%s9182_s19 + $0x1168] sm:$0xf0] }
  0xc0   : > { %4669 = vmatpush.bf16.msrb.mxu1 %v7380_v50  ;;  %4682 = vmatpush.bf16.msrb.mxu2 %v8244_v60  ;;  %v6837_v50 = vld [vmem:[%s9182_s19 + $0x81c] sm:$0xf0]  ;;  %v3538_v60 = vpack.c.b16 %v2863_v41, %v2863_v41 }
  0xc1   : > { %v6840_v0 = vor.u32 %v8704_v49, %v6837_v50  ;;  %v8610_v49 = vld [vmem:[%s9182_s19 + $0x4c0] sm:$0xf0] }
  0xc2   : > { %4657 = vmatpush.bf16.msrb.mxu0 %v6408_v61  ;;  %v8920_v61 = vld [vmem:[%s9182_s19 + $0xe74] sm:$0xf]  ;;  %v4232_v47 = vsel %vm4209_vm0, %v3538_v60, 0 }
  0xc3   : > { %4631 = vmatpush.bf16.msra.mxu3 %v8132_v55  ;;  %v9649_v55 = vld [vmem:[%s9182_s19 + $0x1460] sm:$0xff]  ;;  %v7704_v16 = vor.u32 %v8920_v61, %v7701_v62 }
  0xc4   : > { %4670 = vmatpush.bf16.msrb.mxu1 %v7272_v3  ;;  %4683 = vmatpush.bf16.msrb.mxu2 %v8136_v13  ;;  %v2864_v3 = vunpack.c.l.b16 %v9649_v55  ;;  %v8880_v13 = vld [vmem:[%s9182_s19 + $0xd30] sm:$0xf0] }
  0xc5   : > { %8435 = vmatmul.msk.bf16.vlgmr.msra.gmra.mxu0 %vm4206_vm1, %v9556_v2  ;;  %v4354_v17 = vpop.f32.mrf.mxu3 }
  0xc6   : > { %4658 = vmatpush.bf16.msrb.mxu0 %v6300_v14  ;;  %v9663_v14 = vpop.permute.xlu0 %862 }
  0xc7   : > { %4632 = vmatpush.bf16.msra.mxu3 %v8024_v9  ;;  %v7592_v9 = vor.u32 %v8906_v54, %v7591_v56  ;;  %v4301_v27 = vadd.f32 %v9601_v57, %v9663_v14  ;;  %v4391_v34 = vpop.f32.mrf.mxu2  ;;  %v6629_v57 = vld [vmem:[%s9182_s19 + $0x674] sm:$0xf0]  ;;  %v9042_v54 = vld [vmem:[%s9182_s19 + $0x1240] sm:$0xf0] }
  0xc8   : > { %4671 = vmatpush.bf16.msrb.mxu1 %v7164_v19  ;;  %4684 = vmatpush.bf16.msrb.mxu2 %v8028_v24  ;;  %v9096_v19 = vld [vmem:[%s9182_s19 + $0x13f0] sm:$0xf0]  ;;  %v7492_v24 = vor.u32 %v8880_v13, %v7491_v12  ;;  %v8139_v56 = vld [vmem:[%s9182_s19 + $0x11d8] sm:$0xf]  ;;  %v6413_v12 = vld [vmem:[%s9182_s19 + $0x4c4] sm:$0xf0] }
  0xc9   : > { %v8356_v31 = vor.u32 %v9096_v19, %v8355_v18  ;;  %v4314_v41 = vadd.f32 %v9609_v4, %v4301_v27  ;;  %v6521_v4 = vld [vmem:[%s9182_s19 + $0x59c] sm:$0xf0]  ;;  %v8140_v11 = vor.u32 %v9042_v54, %v8139_v56  ;;  %v6195_v19 = vld [vmem:[%s9182_s19 + $0x2a8] sm:$0xf]  ;;  %v8516_v56 = vld [vmem:[%s9182_s19 + $0x1d4] sm:$0xf] }
  0xca   : > { %4659 = vmatpush.bf16.msrb.mxu0 %v6192_v25  ;;  %v3539_v25 = vpack.c.b16 %v2864_v3, %v2864_v3  ;;  %v6303_v3 = vld [vmem:[%s9182_s19 + $0x380] sm:$0xf] }
  0xcb   : > { %4633 = vmatpush.bf16.msra.mxu3 %v7916_v22  ;;  %v8893_v22 = vld [vmem:[%s9182_s19 + $0xd9c] sm:$0xf]  ;;  %v4327_v60 = vadd.f32 %v9625_v21, %v4314_v41  ;;  %v8031_v13 = vld [vmem:[%s9182_s19 + $0x1100] sm:$0xf]  ;;  %v6304_v18 = vor.u32 %v8583_v5, %v6303_v3  ;;  %v6197_v41 = vld [vmem:[%s9182_s19 + $0x314] sm:$0xf0] }
  0xcc   : > { %4672 = vmatpush.bf16.msrb.mxu1 %v7056_v32  ;;  %4685 = vmatpush.bf16.msrb.mxu2 %v7920_v38  ;;  %v6519_v32 = vld [vmem:[%s9182_s19 + $0x530] sm:$0xf]  ;;  %v7596_v35 = vor.u32 %v8893_v22, %v7593_v23  ;;  %v4353_v38 = vadd.f32 %v9639_v6, %v9663_v14  ;;  %v4235_v40 = vsel %vm4209_vm0, %v3539_v25, 0  ;;  %v8624_v6 = vld [vmem:[%s9182_s19 + $0x534] sm:$0xf]  ;;  %v8032_v27 = vor.u32 %v9015_v15, %v8031_v13 }
  0xcd   : > { %v6520_v42 = vor.u32 %v8637_v33, %v6519_v32  ;;  %v6524_v7 = vor.u32 %v8624_v6, %v6521_v4  ;;  %v8597_v21 = vld [vmem:[%s9182_s19 + $0x45c] sm:$0xf]  ;;  %v4340_v22 = vadd.f32 %v9577_v26, %v4327_v60  ;;  %v8570_v25 = vld [vmem:[%s9182_s19 + $0x384] sm:$0xf]  ;;  %v7923_v26 = vld [vmem:[%s9182_s19 + $0x1028] sm:$0xf] }
  0xce   : > { %4660 = vmatpush.bf16.msrb.mxu0 %v6084_v39  ;;  %v7384_v39 = vor.u32 %v8853_v30, %v7383_v29  ;;  %v4365_v52 = vpop.f32.mrf.mxu0  ;;  %v6305_v29 = vld [vmem:[%s9182_s19 + $0x3ec] sm:$0xf0]  ;;  %v8988_v30 = vld [vmem:[%s9182_s19 + $0x1090] sm:$0xf0]  ;;  %v8718_v6 = vld [vmem:[%s9182_s19 + $0x820] sm:$0xf0] }
  0xcf   : > { %4634 = vmatpush.bf16.msra.mxu3 %v7808_v45  ;;  %v8651_v45 = vld [vmem:[%s9182_s19 + $0x60c] sm:$0xf]  ;;  %v8934_v60 = vld [vmem:[%s9182_s19 + $0xee0] sm:$0xf0]  ;;  %v6735_v3 = vld [vmem:[%s9182_s19 + $0x6e0] sm:$0xf] }
  0xd0   : > { %4673 = vmatpush.bf16.msrb.mxu1 %v6948_v46  ;;  %4686 = vmatpush.bf16.msrb.mxu2 %v7812_v58  ;;  %v6411_v46 = vld [vmem:[%s9182_s19 + $0x458] sm:$0xf]  ;;  %v6632_v50 = vor.u32 %v8651_v45, %v6629_v57  ;;  %v4366_v58 = vadd.f32 %v4365_v52, %v4353_v38  ;;  %v4378_v61 = vpop.f32.mrf.mxu1  ;;  %v8745_v45 = vld [vmem:[%s9182_s19 + $0x8f8] sm:$0xf0]  ;;  %v6087_v57 = vld [vmem:[%s9182_s19 + $0x1d0] sm:$0xf] }
  0xd1   : > { %v6412_v62 = vor.u32 %v8610_v49, %v6411_v46  ;;  %v8543_v38 = vld [vmem:[%s9182_s19 + $0x2ac] sm:$0xf]  ;;  %v8502_v52 = vld [vmem:[%s9182_s19 + $0x160] sm:$0xf0]  ;;  %v7493_v15 = vld [vmem:[%s9182_s19 + $0xd34] sm:$0xf0] }
  0xd2   : > { %4661 = vmatpush.bf16.msrb.mxu0 %v5976_v59  ;;  %v7276_v59 = vor.u32 %v8826_v10, %v7275_v43  ;;  %v4379_v1 = vadd.f32 %v4378_v61, %v4366_v58  ;;  %v8961_v43 = vld [vmem:[%s9182_s19 + $0xfb8] sm:$0xf0]  ;;  %v6200_v4 = vor.u32 %v8543_v38, %v6197_v41  ;;  %v6089_v58 = vld [vmem:[%s9182_s19 + $0x23c] sm:$0xf0]  ;;  %v8691_v5 = vld [vmem:[%s9182_s19 + $0x748] sm:$0xf0] }
  0xd3   : > { %4635 = vmatpush.bf16.msra.mxu3 %v7700_v51  ;;  %v8248_v51 = vor.u32 %v9069_v37, %v8247_v36  ;;  %v8529_v36 = vld [vmem:[%s9182_s19 + $0x238] sm:$0xf0]  ;;  %v6308_v37 = vor.u32 %v8570_v25, %v6305_v29  ;;  %v5871_v61 = vld [vmem:[%s9182_s19 + $0x20] sm:$0xf]  ;;  %v8840_v25 = vld [vmem:[%s9182_s19 + $0xbf4] sm:$0xf] }
  0xd4   : > { %4674 = vmatpush.bf16.msrb.mxu1 %v6840_v0  ;;  %4687 = vmatpush.bf16.msrb.mxu2 %v7704_v16  ;;  %v8799_v0 = vld [vmem:[%s9182_s19 + $0xaa8] sm:$0xf0]  ;;  %v4392_v16 = vadd.f32 %v4391_v34, %v4379_v1  ;;  %v6088_v49 = vor.u32 %v8529_v36, %v6087_v57  ;;  %v8249_v29 = vld [vmem:[%s9182_s19 + $0x131c] sm:$0xf0]  ;;  %v6635_v36 = vld [vmem:[%s9182_s19 + $0x610] sm:$0xf] }
  0xd5   : > { %v7168_v17 = vor.u32 %v8799_v0, %v7167_v63  ;;  %v8475_v0 = vld [vmem:[%s9182_s19 + $0x88] sm:$0xf0]  ;;  %v9029_v41 = vld [vmem:[%s9182_s19 + $0x11dc] sm:$0xf] }
  0xd6   : > { %4662 = vmatpush.bf16.msrb.mxu0 %v5868_v20  ;;  %v8772_v20 = vld [vmem:[%s9182_s19 + $0x9d0] sm:$0xf0]  ;;  %v5721_v23 = vrot.slane %v4392_v16, 4 }
  0xd7   : > { %4636 = vmatpush.bf16.msra.mxu3 %v7592_v9  ;;  %v4393_v9 = vpop.f32.mrf.mxu2 }
  0xd8   : > { %4675 = vmatpush.bf16.msrb.mxu1 %v6732_v53  ;;  %4688 = vmatpush.bf16.msrb.mxu2 %v7596_v35  ;;  %v8556_v53 = vld [vmem:[%s9182_s19 + $0x310] sm:$0xf0]  ;;  %v4380_v34 = vpop.f32.mrf.mxu1  ;;  %v6951_v35 = vld [vmem:[%s9182_s19 + $0x890] sm:$0xf]  ;;  %v6092_v9 = vor.u32 %v8516_v56, %v6089_v58  ;;  %v6527_v56 = vld [vmem:[%s9182_s19 + $0x538] sm:$0xf] }
  0xd9   : > { %4663 = vmatmul.bf16.vlgmr.msrb.gmra.mxu0 %v9614_v8  ;;  %v6196_v33 = vor.u32 %v8556_v53, %v6195_v19  ;;  %v6952_v10 = vor.u32 %v8745_v45, %v6951_v35  ;;  %v6736_v19 = vor.u32 %v8691_v5, %v6735_v3  ;;  %v8881_v34 = vld [vmem:[%s9182_s19 + $0xd38] sm:$0xf0]  ;;  %v7283_v3 = vld [vmem:[%s9182_s19 + $0xb20] sm:$0xf]  ;;  %v8827_v5 = vld [vmem:[%s9182_s19 + $0xb88] sm:$0xf0] }
  0xda   : > { %4637 = vmatmul.bf16.vlgmr.msra.gmra.mxu3 %v9585_v48  ;;  %4720 = vmatpush.bf16.msra.mxu0 %v7492_v24  ;;  %v6416_v24 = vor.u32 %v8597_v21, %v6413_v12  ;;  %v8867_v21 = vld [vmem:[%s9182_s19 + $0xccc] sm:$0xf]  ;;  %v8357_v12 = vld [vmem:[%s9182_s19 + $0x13f4] sm:$0xf0] }
  0xdb   : > { %4701 = vmatpush.bf16.msrb.mxu3 %v4232_v47  ;;  %4676 = vmatmul.bf16.vlgmr.msrb.gmra.mxu1 %v9593_v44  ;;  %v7059_v47 = vld [vmem:[%s9182_s19 + $0x968] sm:$0xf] }
  0xdc   : > { %4733 = vmatpush.bf16.msra.mxu1 %v8356_v31  ;;  %4753 = vmatpush.bf16.msra.mxu2 %v4235_v40  ;;  %v5734_v31 = vsel %vm4209_vm0, %v4340_v22, %v5721_v23  ;;  %v7060_v32 = vor.u32 %v8772_v20, %v7059_v47  ;;  %v7599_v47 = vld [vmem:[%s9182_s19 + $0xda0] sm:$0xf]  ;;  %v8907_v20 = vld [vmem:[%s9182_s19 + $0xe08] sm:$0xf0]  ;;  %v5872_v22 = vor.u32 %v8475_v0, %v5871_v61  ;;  %v8786_v61 = vld [vmem:[%s9182_s19 + $0xa44] sm:$0xf] }
  0xdd   : > { %4689 = vmatmul.bf16.vlgmr.msrb.gmra.mxu2 %v9585_v48  ;;  %5760 = vst [vmem:[%s9714_s25] sm:$0x77] %v5734_v31  ;;  %v9728_v40 = vpop.f32.mrf.mxu3  ;;  %v5873_v31 = vld [vmem:[%s9182_s19 + $0x8c] sm:$0xf0] }
  0xde   : > { %4721 = vmatpush.bf16.msra.mxu0 %v7384_v39  ;;  %v7924_v39 = vor.u32 %v8988_v30, %v7923_v26  ;;  %v7385_v26 = vld [vmem:[%s9182_s19 + $0xc5c] sm:$0xf0]  ;;  %v8462_v30 = vld [vmem:[%s9182_s19 + $0x24] sm:$0xf] }
  0xdf   : > { %4707 = vmatpush.bf16.msra.mxu3 %v6628_v28  ;;  %v4367_v28 = vpop.f32.mrf.mxu0  ;;  %v9735_v46 = vpop.f32.mrf.mxu2  ;;  %v7388_v38 = vor.u32 %v8840_v25, %v7385_v26  ;;  %v6953_v26 = vld [vmem:[%s9182_s19 + $0x8fc] sm:$0xf0] }
  0xe0   : > { %4759 = vmatpush.bf16.msrb.mxu2 %v6632_v50  ;;  %4734 = vmatpush.bf16.msra.mxu1 %v8248_v51  ;;  %v6843_v50 = vld [vmem:[%s9182_s19 + $0x7b8] sm:$0xf]  ;;  %v9747_v1 = vpop.f32.mrf.mxu1  ;;  %v9056_v28 = vld [vmem:[%s9182_s19 + $0x12b4] sm:$0xf] }
  0xe1   : > { %v5979_v51 = vld [vmem:[%s9182_s19 + $0xf8] sm:$0xf]  ;;  %v8252_v45 = vor.u32 %v9056_v28, %v8249_v29  ;;  %v7817_v28 = vld [vmem:[%s9182_s19 + $0xfbc] sm:$0xf0]  ;;  %v8732_v29 = vld [vmem:[%s9182_s19 + $0x894] sm:$0xf] }
  0xe2   : > { %4722 = vmatpush.bf16.msra.mxu0 %v7276_v59  ;;  %v7707_v59 = vld [vmem:[%s9182_s19 + $0xe78] sm:$0xf]  ;;  %v5980_v63 = vor.u32 %v8502_v52, %v5979_v51  ;;  %v8854_v52 = vld [vmem:[%s9182_s19 + $0xc60] sm:$0xf0] }
  0xe3   : > { %4708 = vmatpush.bf16.msra.mxu3 %v6520_v42  ;;  %v7815_v42 = vld [vmem:[%s9182_s19 + $0xf50] sm:$0xf]  ;;  %v7708_v13 = vor.u32 %v8934_v60, %v7707_v59  ;;  %v7391_v51 = vld [vmem:[%s9182_s19 + $0xbf8] sm:$0xf]  ;;  %v9002_v59 = vld [vmem:[%s9182_s19 + $0x1104] sm:$0xf] }
  0xe4   : > { %4760 = vmatpush.bf16.msrb.mxu2 %v6524_v7  ;;  %4735 = vmatpush.bf16.msra.mxu1 %v8140_v11  ;;  %v7816_v54 = vor.u32 %v8961_v43, %v7815_v42  ;;  %v2865_v7 = vunpack.c.h.b16 %v9649_v55  ;;  %v9083_v11 = vld [vmem:[%s9182_s19 + $0x138c] sm:$0xf]  ;;  %v8141_v42 = vld [vmem:[%s9182_s19 + $0x1244] sm:$0xf0]  ;;  %v8813_v43 = vld [vmem:[%s9182_s19 + $0xb1c] sm:$0xf] }
  0xe5   : > { %v4406_v16 = vpop.f32.mrf.mxu3  ;;  %v8360_v23 = vor.u32 %v9083_v11, %v8357_v12  ;;  %v8033_v60 = vld [vmem:[%s9182_s19 + $0x116c] sm:$0xf0]  ;;  %v8611_v11 = vld [vmem:[%s9182_s19 + $0x4c8] sm:$0xf0] }
  0xe6   : > { %4723 = vmatpush.bf16.msra.mxu0 %v7168_v17  ;;  %v8489_v17 = vld [vmem:[%s9182_s19 + $0xfc] sm:$0xf]  ;;  %v3540_v53 = vpack.c.b16 %v2865_v7, %v2865_v7  ;;  %v8759_v16 = vld [vmem:[%s9182_s19 + $0x96c] sm:$0xf] }
  0xe7   : > { %4709 = vmatpush.bf16.msra.mxu3 %v6412_v62  ;;  %v6844_v62 = vor.u32 %v8718_v6, %v6843_v50  ;;  %v4419_v55 = vpop.f32.mrf.mxu2 }
  0xe8   : > { %4761 = vmatpush.bf16.msrb.mxu2 %v6416_v24  ;;  %4736 = vmatpush.bf16.msra.mxu1 %v8032_v27  ;;  %v7496_v24 = vor.u32 %v8867_v21, %v7493_v15  ;;  %v4445_v35 = vpop.f32.mrf.mxu1  ;;  %v4238_v57 = vsel %vm4209_vm0, %v3540_v53, 0  ;;  %v8036_v21 = vor.u32 %v9002_v59, %v8033_v60  ;;  %v7925_v15 = vld [vmem:[%s9182_s19 + $0x1094] sm:$0xf0]  ;;  %v6311_v53 = vld [vmem:[%s9182_s19 + $0x388] sm:$0xf] }
  0xea   : > { %8436 = vmatmul.msk.bf16.vlgmr.msrb.gmra.mxu3 %vm4206_vm1, %v9556_v2  ;;  %4724 = vmatpush.bf16.msra.mxu0 %v7060_v32  ;;  %v7600_v32 = vor.u32 %v8907_v20, %v7599_v47  ;;  %v7175_v47 = vld [vmem:[%s9182_s19 + $0xa48] sm:$0xf]  ;;  %v8800_v20 = vld [vmem:[%s9182_s19 + $0xab0] sm:$0xf0] }
  0xeb   : > { %4710 = vmatpush.bf16.msra.mxu3 %v6304_v18  ;;  %v5981_v18 = vld [vmem:[%s9182_s19 + $0x164] sm:$0xf0] }
  0xec   : > { %4762 = vmatpush.bf16.msrb.mxu2 %v6308_v37  ;;  %4737 = vmatpush.bf16.msra.mxu1 %v7924_v39  ;;  %v5984_v27 = vor.u32 %v8489_v17, %v5981_v18  ;;  %v8665_v37 = vld [vmem:[%s9182_s19 + $0x678] sm:$0xf0]  ;;  %v5876_v39 = vor.u32 %v8462_v30, %v5873_v31  ;;  %v7061_v17 = vld [vmem:[%s9182_s19 + $0x9d4] sm:$0xf0]  ;;  %v7284_v18 = vor.u32 %v8827_v5, %v7283_v3  ;;  %v7601_v3 = vld [vmem:[%s9182_s19 + $0xe0c] sm:$0xf0] }
  0xed   : > { %8437 = vmatmul.msk.bf16.vlgmr.msra.gmra.mxu2 %vm4206_vm1, %v9556_v2  ;;  %v6636_v6 = vor.u32 %v8665_v37, %v6635_v36  ;;  %v7064_v25 = vor.u32 %v8759_v16, %v7061_v17  ;;  %v7176_v30 = vor.u32 %v8800_v20, %v7175_v47  ;;  %v6203_v37 = vld [vmem:[%s9182_s19 + $0x2b0] sm:$0xf]  ;;  %v8719_v16 = vld [vmem:[%s9182_s19 + $0x828] sm:$0xf0] }
  0xee   : > { %4725 = vmatpush.bf16.msra.mxu0 %v6952_v10  ;;  %v7277_v10 = vld [vmem:[%s9182_s19 + $0xb84] sm:$0xf0]  ;;  %v9778_v50 = vpop.f32.mrf.mxu0  ;;  %v8503_v20 = vld [vmem:[%s9182_s19 + $0x168] sm:$0xf0] }
  0xef   : > { %4711 = vmatpush.bf16.msra.mxu3 %v6196_v33  ;;  %v7499_v33 = vld [vmem:[%s9182_s19 + $0xcd0] sm:$0xf]  ;;  %v7280_v58 = vor.u32 %v8813_v43, %v7277_v10  ;;  %v7709_v43 = vld [vmem:[%s9182_s19 + $0xee4] sm:$0xf0] }
  0xf0   : > { %4763 = vmatpush.bf16.msrb.mxu2 %v6200_v4  ;;  %4738 = vmatpush.bf16.msra.mxu1 %v7816_v54  ;;  %v8144_v4 = vor.u32 %v9029_v41, %v8141_v42  ;;  %v8638_v54 = vld [vmem:[%s9182_s19 + $0x5a0] sm:$0xf0]  ;;  %v6956_v41 = vor.u32 %v8732_v29, %v6953_v26  ;;  %v8921_v42 = vld [vmem:[%s9182_s19 + $0xe7c] sm:$0xf]  ;;  %v6743_v26 = vld [vmem:[%s9182_s19 + $0x6e8] sm:$0xf] }
  0xf1   : > { %v6528_v0 = vor.u32 %v8638_v54, %v6527_v56  ;;  %v6959_v56 = vld [vmem:[%s9182_s19 + $0x898] sm:$0xf]  ;;  %v8746_v54 = vld [vmem:[%s9182_s19 + $0x900] sm:$0xf0]  ;;  %v7712_v60 = vor.u32 %v8921_v42, %v7709_v43  ;;  %v8147_v43 = vld [vmem:[%s9182_s19 + $0x11e0] sm:$0xf] }
  0xf2   : > { %4726 = vmatpush.bf16.msra.mxu0 %v6844_v62  ;;  %v7169_v62 = vld [vmem:[%s9182_s19 + $0xaac] sm:$0xf0] }
  0xf3   : > { %4712 = vmatpush.bf16.msra.mxu3 %v6088_v49  ;;  %v7500_v49 = vor.u32 %v8881_v34, %v7499_v33  ;;  %v7172_v12 = vor.u32 %v8786_v61, %v7169_v62  ;;  %v8773_v33 = vld [vmem:[%s9182_s19 + $0x9d8] sm:$0xf0]  ;;  %v9812_v34 = vld [vmem:[%s9182_s19 + $0x1468] sm:$0xff]  ;;  %v6095_v61 = vld [vmem:[%s9182_s19 + $0x1d8] sm:$0xf] }
  0xf4   : > { %4764 = vmatpush.bf16.msrb.mxu2 %v6092_v9  ;;  %4739 = vmatpush.bf16.msra.mxu1 %v7708_v13  ;;  %v4469_v7 = vpop.f32.mrf.mxu1  ;;  %v6419_v9 = vld [vmem:[%s9182_s19 + $0x460] sm:$0xf]  ;;  %v8975_v13 = vld [vmem:[%s9182_s19 + $0x102c] sm:$0xf]  ;;  %v8530_v62 = vld [vmem:[%s9182_s19 + $0x240] sm:$0xf0] }
  0xf5   : > { %v6420_v55 = vor.u32 %v8611_v11, %v6419_v9  ;;  %v8363_v9 = vld [vmem:[%s9182_s19 + $0x1390] sm:$0xf] }
  0xf6   : > { %4727 = vmatpush.bf16.msra.mxu0 %v6736_v19  ;;  %v4432_v19 = vpop.f32.mrf.mxu0 }
  0xf7   : > { %4713 = vmatpush.bf16.msra.mxu3 %v5980_v63  ;;  %v7392_v63 = vor.u32 %v8854_v52, %v7391_v51  ;;  %v2866_v51 = vunpack.c.l.b16 %v9812_v34 }
  0xf8   : > { %4765 = vmatpush.bf16.msrb.mxu2 %v5984_v27  ;;  %4740 = vmatpush.bf16.msra.mxu1 %v7600_v32  ;;  %v8948_v27 = vld [vmem:[%s9182_s19 + $0xf54] sm:$0xf]  ;;  %v7067_v32 = vld [vmem:[%s9182_s19 + $0x970] sm:$0xf] }
  0xf9   : > { %4728 = vmatmul.bf16.vlgmr.msra.gmra.mxu0 %v9593_v44  ;;  %v7820_v36 = vor.u32 %v8948_v27, %v7817_v28  ;;  %v3541_v11 = vpack.c.b16 %v2866_v51, %v2866_v51 }
  0xfa   : > { %4785 = vmatpush.bf16.msrb.mxu0 %v8360_v23  ;;  %v7928_v23 = vor.u32 %v8975_v13, %v7925_v15  ;;  %v6096_v13 = vor.u32 %v8530_v62, %v6095_v61  ;;  %v6851_v15 = vld [vmem:[%s9182_s19 + $0x7c0] sm:$0xf]  ;;  %v8039_v61 = vld [vmem:[%s9182_s19 + $0x1108] sm:$0xf]  ;;  %v9016_v62 = vld [vmem:[%s9182_s19 + $0x1170] sm:$0xf0] }
  0xfb   : > { %4714 = vmatpush.bf16.msra.mxu3 %v5872_v22  ;;  %4741 = vmatmul.bf16.vlgmr.msra.gmra.mxu1 %v9585_v48  ;;  %v4405_v22 = vadd.f32 %v9728_v40, %v9663_v14  ;;  %v6852_v28 = vor.u32 %v8719_v16, %v6851_v15  ;;  %v4241_v29 = vsel %vm4209_vm0, %v3541_v11, 0  ;;  %v7285_v11 = vld [vmem:[%s9182_s19 + $0xb8c] sm:$0xf0]  ;;  %v8989_v16 = vld [vmem:[%s9182_s19 + $0x1098] sm:$0xf0] }
  0xfc   : > { %4805 = vmatpush.bf16.msrb.mxu1 %v4238_v57  ;;  %4766 = vmatpush.bf16.msrb.mxu2 %v5876_v39  ;;  %v4482_v57 = vpop.f32.mrf.mxu2  ;;  %v4471_v39 = vpop.f32.mrf.mxu1  ;;  %v7931_v15 = vld [vmem:[%s9182_s19 + $0x1030] sm:$0xf] }
  0xfd   : > { %v4456_v31 = vpop.f32.mrf.mxu3  ;;  %v4418_v35 = vadd.f32 %v9735_v46, %v4405_v22  ;;  %v7068_v46 = vor.u32 %v8773_v33, %v7067_v32  ;;  %v8365_v32 = vld [vmem:[%s9182_s19 + $0x13fc] sm:$0xf0] }
  0xfe   : > { %4715 = vmatmul.bf16.vlgmr.msra.gmra.mxu3 %v9614_v8  ;;  %4786 = vmatpush.bf16.msrb.mxu0 %v8252_v45  ;;  %v4457_v45 = vadd.f32 %v4456_v31, %v9663_v14  ;;  %v4495_v52 = vpop.f32.mrf.mxu0  ;;  %v7501_v39 = vld [vmem:[%s9182_s19 + $0xd3c] sm:$0xf0] }
  0xff   : > { %4772 = vmatpush.bf16.msrb.mxu3 %v7496_v24  ;;  %4767 = vmatmul.bf16.vlgmr.msrb.gmra.mxu2 %v9614_v8  ;;  %v8584_v24 = vld [vmem:[%s9182_s19 + $0x3f0] sm:$0xf0] }
 0x100   : > { %4824 = vmatpush.bf16.msra.mxu2 %v7500_v49  ;;  %4811 = vmatpush.bf16.msra.mxu1 %v6636_v6  ;;  %v6312_v40 = vor.u32 %v8584_v24, %v6311_v53  ;;  %v4470_v10 = vadd.f32 %v4469_v7, %v4457_v45  ;;  %v8705_v49 = vld [vmem:[%s9182_s19 + $0x7bc] sm:$0xf]  ;;  %v6845_v6 = vld [vmem:[%s9182_s19 + $0x824] sm:$0xf0]  ;;  %v8678_v7 = vld [vmem:[%s9182_s19 + $0x6e4] sm:$0xf] }
 0x101   : > { %v9070_v53 = vld [vmem:[%s9182_s19 + $0x1320] sm:$0xf0]  ;;  %v8652_v24 = vld [vmem:[%s9182_s19 + $0x614] sm:$0xf]  ;;  %v8625_v45 = vld [vmem:[%s9182_s19 + $0x53c] sm:$0xf] }
 0x102   : > { %4787 = vmatpush.bf16.msrb.mxu0 %v8144_v4  ;;  %v4483_v59 = vadd.f32 %v4482_v57, %v4470_v10  ;;  %v5879_v57 = vld [vmem:[%s9182_s19 + $0x28] sm:$0xf]  ;;  %v9043_v10 = vld [vmem:[%s9182_s19 + $0x1248] sm:$0xf0] }
 0x103   : > { %4773 = vmatpush.bf16.msrb.mxu3 %v7388_v38  ;;  %v8557_v38 = vld [vmem:[%s9182_s19 + $0x318] sm:$0xf0] }
 0x104   : > { %4825 = vmatpush.bf16.msra.mxu2 %v7392_v63  ;;  %4812 = vmatpush.bf16.msra.mxu1 %v6528_v0  ;;  %v6204_v4 = vor.u32 %v8557_v38, %v6203_v37  ;;  %v6848_v63 = vor.u32 %v8705_v49, %v6845_v6  ;;  %v8894_v0 = vld [vmem:[%s9182_s19 + $0xda4] sm:$0xf]  ;;  %v4496_v5 = vadd.f32 %v4495_v52, %v4483_v59  ;;  %v4484_v47 = vpop.f32.mrf.mxu2  ;;  %v6529_v37 = vld [vmem:[%s9182_s19 + $0x5a4] sm:$0xf0]  ;;  %v8868_v38 = vld [vmem:[%s9182_s19 + $0xcd4] sm:$0xf] }
 0x105   : > { %v4458_v17 = vpop.f32.mrf.mxu3  ;;  %v7504_v51 = vor.u32 %v8868_v38, %v7501_v39  ;;  %v9057_v52 = vld [vmem:[%s9182_s19 + $0x12bc] sm:$0xf]  ;;  %v8041_v47 = vld [vmem:[%s9182_s19 + $0x1174] sm:$0xf0] }
 0x106   : > { %4788 = vmatpush.bf16.msrb.mxu0 %v8036_v21  ;;  %v6737_v21 = vld [vmem:[%s9182_s19 + $0x74c] sm:$0xf0]  ;;  %v5722_v19 = vrot.slane %v4496_v5, 4  ;;  %v4497_v33 = vpop.f32.mrf.mxu0  ;;  %v8841_v59 = vld [vmem:[%s9182_s19 + $0xbfc] sm:$0xf] }
 0x107   : > { %4774 = vmatpush.bf16.msrb.mxu3 %v7280_v58  ;;  %v4431_v58 = vadd.f32 %v9778_v50, %v4418_v35  ;;  %v6960_v50 = vor.u32 %v8746_v54, %v6959_v56  ;;  %v6740_v22 = vor.u32 %v8678_v7, %v6737_v21  ;;  %v8598_v56 = vld [vmem:[%s9182_s19 + $0x464] sm:$0xf]  ;;  %v8149_v7 = vld [vmem:[%s9182_s19 + $0x124c] sm:$0xf0]  ;;  %v8571_v21 = vld [vmem:[%s9182_s19 + $0x38c] sm:$0xf] }
 0x108   : > { %4826 = vmatpush.bf16.msra.mxu2 %v7284_v18  ;;  %4813 = vmatpush.bf16.msra.mxu1 %v6420_v55  ;;  %v7604_v55 = vor.u32 %v8894_v0, %v7601_v3  ;;  %v9030_v5 = vld [vmem:[%s9182_s19 + $0x11e4] sm:$0xf]  ;;  %v7069_v33 = vld [vmem:[%s9182_s19 + $0x9dc] sm:$0xf0] }
 0x109   : > { %v4444_v18 = vadd.f32 %v9747_v1, %v4431_v58  ;;  %v6421_v58 = vld [vmem:[%s9182_s19 + $0x4cc] sm:$0xf0]  ;;  %v8152_v17 = vor.u32 %v9030_v5, %v8149_v7  ;;  %v9904_v38 = vld.sshfl [vmem:[#allocation1 + $0x18] sm:$0xff pattern:$0x73625140] }
 0x10a   : > { %4789 = vmatpush.bf16.msrb.mxu0 %v7928_v23  ;;  %v8255_v23 = vld [vmem:[%s9182_s19 + $0x12b8] sm:$0xf]  ;;  %v6424_v0 = vor.u32 %v8598_v56, %v6421_v58  ;;  %v9918_v58 = vld [vmem:[%s9182_s19 + $0x1470] sm:$0xff]  ;;  %v8463_v5 = vld [vmem:[%s9182_s19 + $0x2c] sm:$0xf] }
 0x10b   : > { %4775 = vmatpush.bf16.msrb.mxu3 %v7172_v12  ;;  %8438 = vmatmul.msk.bf16.vlgmr.msrb.gmra.mxu1 %vm4206_vm1, %v9556_v2  ;;  %v9097_v12 = vld [vmem:[%s9182_s19 + $0x13f8] sm:$0xf0]  ;;  %v5987_v2 = vld [vmem:[%s9182_s19 + $0x100] sm:$0xf]  ;;  %v5735_v1 = vsel %vm4209_vm0, %v4444_v18, %v5722_v19  ;;  %v5881_v7 = vld [vmem:[%s9182_s19 + $0x94] sm:$0xf0] }
 0x10c   : > { %4827 = vmatpush.bf16.msra.mxu2 %v7176_v30  ;;  %4814 = vmatpush.bf16.msra.mxu1 %v6312_v40  ;;  %v8364_v27 = vor.u32 %v9097_v12, %v8363_v9  ;;  %v8692_v30 = vld [vmem:[%s9182_s19 + $0x750] sm:$0xf0]  ;;  %5761 = vst [vmem:[%s9714_s25 + $0x8] sm:$0x77] %v5735_v1  ;;  %v5988_v31 = vor.u32 %v8503_v20, %v5987_v2  ;;  %v9865_v54 = vpop.f32.mrf.mxu2  ;;  %v6313_v9 = vld [vmem:[%s9182_s19 + $0x3f4] sm:$0xf0] }
 0x10d   : > { %v9084_v40 = vld [vmem:[%s9182_s19 + $0x1394] sm:$0xf]  ;;  %v6744_v42 = vor.u32 %v8692_v30, %v6743_v26  ;;  %v7933_v30 = vld [vmem:[%s9182_s19 + $0x109c] sm:$0xf0] }
 0x10e   : > { %4790 = vmatpush.bf16.msrb.mxu0 %v7820_v36  ;;  %v8476_v36 = vld [vmem:[%s9182_s19 + $0x90] sm:$0xf0]  ;;  %v8368_v49 = vor.u32 %v9084_v40, %v8365_v32  ;;  %v6097_v40 = vld [vmem:[%s9182_s19 + $0x244] sm:$0xf0] }
 0x10f   : > { %4776 = vmatpush.bf16.msrb.mxu3 %v7064_v25  ;;  %v6637_v25 = vld [vmem:[%s9182_s19 + $0x67c] sm:$0xf0]  ;;  %v5880_v6 = vor.u32 %v8476_v36, %v5879_v57  ;;  %v8544_v2 = vld [vmem:[%s9182_s19 + $0x2b4] sm:$0xf]  ;;  %v8935_v36 = vld [vmem:[%s9182_s19 + $0xee8] sm:$0xf0] }
 0x110   : > { %4828 = vmatpush.bf16.msra.mxu2 %v7068_v46  ;;  %4815 = vmatpush.bf16.msra.mxu1 %v6204_v4  ;;  %v6640_v35 = vor.u32 %v8652_v24, %v6637_v25  ;;  %v6532_v46 = vor.u32 %v8625_v45, %v6529_v37  ;;  %v8257_v4 = vld [vmem:[%s9182_s19 + $0x1324] sm:$0xf0]  ;;  %v7823_v24 = vld [vmem:[%s9182_s19 + $0xf58] sm:$0xf]  ;;  %v8962_v25 = vld [vmem:[%s9182_s19 + $0xfc0] sm:$0xf0] }
 0x111   : > { %v8976_v26 = vld [vmem:[%s9182_s19 + $0x1034] sm:$0xf]  ;;  %v7824_v45 = vor.u32 %v8962_v25, %v7823_v24  ;;  %v7715_v57 = vld [vmem:[%s9182_s19 + $0xe80] sm:$0xf]  ;;  %v8679_v24 = vld [vmem:[%s9182_s19 + $0x6ec] sm:$0xf] }
 0x112   : > { %4791 = vmatpush.bf16.msrb.mxu0 %v7712_v60  ;;  %v8148_v60 = vor.u32 %v9043_v10, %v8147_v43  ;;  %v9884_v18 = vpop.f32.mrf.mxu0  ;;  %v8760_v32 = vld [vmem:[%s9182_s19 + $0x974] sm:$0xf]  ;;  %v7936_v37 = vor.u32 %v8976_v26, %v7933_v30  ;;  %v8949_v10 = vld [vmem:[%s9182_s19 + $0xf5c] sm:$0xf]  ;;  %v7716_v56 = vor.u32 %v8935_v36, %v7715_v57  ;;  %v6745_v25 = vld [vmem:[%s9182_s19 + $0x754] sm:$0xf0] }
 0x113   : > { %4777 = vmatpush.bf16.msrb.mxu3 %v6956_v41  ;;  %v8256_v41 = vor.u32 %v9070_v53, %v8255_v23  ;;  %v7177_v23 = vld [vmem:[%s9182_s19 + $0xab4] sm:$0xf0]  ;;  %v7932_v53 = vor.u32 %v8989_v16, %v7931_v15  ;;  %v7072_v43 = vor.u32 %v8760_v32, %v7069_v33  ;;  %v8882_v15 = vld [vmem:[%s9182_s19 + $0xd40] sm:$0xf0]  ;;  %v6748_v33 = vor.u32 %v8679_v24, %v6745_v25  ;;  %v8572_v25 = vld [vmem:[%s9182_s19 + $0x394] sm:$0xf] }
 0x114   : > { %4829 = vmatpush.bf16.msra.mxu2 %v6960_v50  ;;  %4816 = vmatpush.bf16.msra.mxu1 %v6096_v13  ;;  %v8814_v50 = vld [vmem:[%s9182_s19 + $0xb24] sm:$0xf]  ;;  %v9879_v12 = vpop.f32.mrf.mxu1  ;;  %v8040_v13 = vor.u32 %v9016_v62, %v8039_v61  ;;  %v4549_v20 = vpop.f32.mrf.mxu2  ;;  %v6643_v16 = vld [vmem:[%s9182_s19 + $0x618] sm:$0xf] }
 0x115   : > { %v7288_v19 = vor.u32 %v8814_v50, %v7285_v11  ;;  %v2868_v50 = vunpack.c.l.b16 %v9918_v58  ;;  %v8895_v20 = vld [vmem:[%s9182_s19 + $0xdac] sm:$0xf]  ;;  %v8371_v26 = vld [vmem:[%s9182_s19 + $0x1398] sm:$0xf]  ;;  %v9098_v30 = vld [vmem:[%s9182_s19 + $0x1400] sm:$0xf0] }
 0x116   : > { %4792 = vmatpush.bf16.msrb.mxu0 %v7604_v55  ;;  %v9003_v55 = vld [vmem:[%s9182_s19 + $0x110c] sm:$0xf]  ;;  %v9948_v57 = vld.sshfl [vmem:[#allocation1 + $0x10] sm:$0xff pattern:$0x73625140] }
 0x117   : > { %4778 = vmatpush.bf16.msrb.mxu3 %v6848_v63  ;;  %v8260_v63 = vor.u32 %v9057_v52, %v8257_v4  ;;  %v8044_v1 = vor.u32 %v9003_v55, %v8041_v47  ;;  %v6961_v52 = vld [vmem:[%s9182_s19 + $0x904] sm:$0xf0]  ;;  %v5884_v47 = vor.u32 %v8463_v5, %v5881_v7  ;;  %v9044_v5 = vld [vmem:[%s9182_s19 + $0x1250] sm:$0xf0]  ;;  %v6319_v7 = vld [vmem:[%s9182_s19 + $0x390] sm:$0xf] }
 0x118   : > { %4830 = vmatpush.bf16.msra.mxu2 %v6852_v28  ;;  %4817 = vmatpush.bf16.msra.mxu1 %v5988_v31  ;;  %v8517_v31 = vld [vmem:[%s9182_s19 + $0x1dc] sm:$0xf] }
 0x119   : > { %4793 = vmatmul.bf16.vlgmr.msrb.gmra.mxu0 %v9585_v48  ;;  %v7393_v48 = vld [vmem:[%s9182_s19 + $0xc64] sm:$0xf0] }
 0x11a   : > { %4857 = vmatpush.bf16.msra.mxu0 %v4241_v29  ;;  %v7396_v3 = vor.u32 %v8841_v59, %v7393_v48  ;;  %v4523_v39 = vpop.f32.mrf.mxu0  ;;  %v8908_v59 = vld [vmem:[%s9182_s19 + $0xe10] sm:$0xf0] }
 0x11b   : > { %4779 = vmatpush.bf16.msrb.mxu3 %v6740_v22  ;;  %v8787_v22 = vld [vmem:[%s9182_s19 + $0xa4c] sm:$0xf]  ;;  %v8372_v39 = vor.u32 %v9098_v30, %v8371_v26 }
 0x11c   : > { %4831 = vmatpush.bf16.msra.mxu2 %v6744_v42  ;;  %4818 = vmatpush.bf16.msra.mxu1 %v5880_v6  ;;  %v7180_v29 = vor.u32 %v8787_v22, %v7177_v23  ;;  %v2867_v42 = vunpack.c.h.b16 %v9812_v34  ;;  %v8490_v6 = vld [vmem:[%s9182_s19 + $0x104] sm:$0xf]  ;;  %v7607_v34 = vld [vmem:[%s9182_s19 + $0xda8] sm:$0xf]  ;;  %v7399_v23 = vld [vmem:[%s9182_s19 + $0xc00] sm:$0xf] }
 0x11d   : > { %v7608_v11 = vor.u32 %v8908_v59, %v7607_v34  ;;  %v8626_v59 = vld [vmem:[%s9182_s19 + $0x544] sm:$0xf] }
 0x11e   : > { %4780 = vmatmul.bf16.vlgmr.msrb.gmra.mxu3 %v9593_v44  ;;  %4863 = vmatpush.bf16.msrb.mxu0 %v6640_v35  ;;  %v4536_v35 = vpop.f32.mrf.mxu1  ;;  %v9915_v4 = vpop.f32.mrf.mxu2 }
 0x11f   : > { %4837 = vmatpush.bf16.msra.mxu3 %v8364_v27  ;;  %4832 = vmatmul.bf16.vlgmr.msra.gmra.mxu2 %v9593_v44  ;;  %v6316_v44 = vor.u32 %v8571_v21, %v6313_v9  ;;  %v9894_v27 = vpop.f32.mrf.mxu3  ;;  %v8706_v21 = vld [vmem:[%s9182_s19 + $0x7c4] sm:$0xf]  ;;  %v6853_v9 = vld [vmem:[%s9182_s19 + $0x82c] sm:$0xf0]  ;;  %v8653_v35 = vld [vmem:[%s9182_s19 + $0x61c] sm:$0xf] }
 0x120   : > { %4889 = vmatpush.bf16.msrb.mxu2 %v8368_v49  ;;  %4876 = vmatpush.bf16.msrb.mxu1 %v7504_v51  ;;  %v7825_v49 = vld [vmem:[%s9182_s19 + $0xfc4] sm:$0xf0]  ;;  %v8733_v51 = vld [vmem:[%s9182_s19 + $0x89c] sm:$0xf] }
 0x121   : > { %4819 = vmatmul.bf16.vlgmr.msra.gmra.mxu1 %v9614_v8  ;;  %v6205_v8 = vld [vmem:[%s9182_s19 + $0x31c] sm:$0xf0]  ;;  %v7828_v48 = vor.u32 %v8949_v10, %v7825_v49  ;;  %v9071_v49 = vld [vmem:[%s9182_s19 + $0x1328] sm:$0xf0] }
 0x122   : > { %4864 = vmatpush.bf16.msrb.mxu0 %v6532_v46  ;;  %v6208_v28 = vor.u32 %v8544_v2, %v6205_v8  ;;  %v5989_v46 = vld [vmem:[%s9182_s19 + $0x16c] sm:$0xf0]  ;;  %v6856_v2 = vor.u32 %v8706_v21, %v6853_v9  ;;  %v7609_v8 = vld [vmem:[%s9182_s19 + $0xe14] sm:$0xf0]  ;;  %v8263_v10 = vld [vmem:[%s9182_s19 + $0x12c0] sm:$0xf] }
 0x123   : > { %4838 = vmatpush.bf16.msra.mxu3 %v8256_v41  ;;  %v6100_v41 = vor.u32 %v8517_v31, %v6097_v40  ;;  %v5992_v62 = vor.u32 %v8490_v6, %v5989_v46  ;;  %v6535_v31 = vld [vmem:[%s9182_s19 + $0x540] sm:$0xf]  ;;  %v8639_v40 = vld [vmem:[%s9182_s19 + $0x5a8] sm:$0xf0]  ;;  %v7612_v32 = vor.u32 %v8895_v20, %v7609_v8  ;;  %v6427_v6 = vld [vmem:[%s9182_s19 + $0x468] sm:$0xf] }
 0x124   : > { %4890 = vmatpush.bf16.msrb.mxu2 %v8260_v63  ;;  %4877 = vmatpush.bf16.msrb.mxu1 %v7396_v3  ;;  %v6964_v63 = vor.u32 %v8733_v51, %v6961_v52  ;;  %v7717_v3 = vld [vmem:[%s9182_s19 + $0xeec] sm:$0xf0]  ;;  %v8612_v46 = vld [vmem:[%s9182_s19 + $0x4d0] sm:$0xf0]  ;;  %v8585_v21 = vld [vmem:[%s9182_s19 + $0x3f8] sm:$0xf0] }
 0x125   : > { %v9958_v52 = vld.sshfl [vmem:[#allocation1] sm:$0xff pattern:$0x73625140]  ;;  %v9970_v9 = vld.sshfl [vmem:[#allocation1 + $0x8] sm:$0xff pattern:$0x73625140] }
 0x126   : > { %4865 = vmatpush.bf16.msrb.mxu0 %v6424_v0  ;;  %v8922_v0 = vld [vmem:[%s9182_s19 + $0xe84] sm:$0xf] }
 0x127   : > { %4839 = vmatpush.bf16.msra.mxu3 %v8148_v60  ;;  %v3542_v60 = vpack.c.b16 %v2867_v42, %v2867_v42  ;;  %v4510_v61 = vpop.f32.mrf.mxu3  ;;  %v6536_v42 = vor.u32 %v8639_v40, %v6535_v31  ;;  %v8774_v20 = vld [vmem:[%s9182_s19 + $0x9e0] sm:$0xf0]  ;;  %v6103_v31 = vld [vmem:[%s9182_s19 + $0x1e0] sm:$0xf] }
 0x128   : > { %4891 = vmatpush.bf16.msrb.mxu2 %v8152_v17  ;;  %4878 = vmatpush.bf16.msrb.mxu1 %v7288_v19  ;;  %v8666_v17 = vld [vmem:[%s9182_s19 + $0x680] sm:$0xf0]  ;;  %v9933_v19 = vpop.f32.mrf.mxu1  ;;  %v8264_v61 = vor.u32 %v9071_v49, %v8263_v10 }
 0x129   : > { %8439 = vmatmul.msk.bf16.vlgmr.msra.gmra.mxu0 %vm4206_vm1, %v9904_v38  ;;  %v4244_v55 = vsel %vm4209_vm0, %v3542_v60, 0  ;;  %v8558_v8 = vld [vmem:[%s9182_s19 + $0x320] sm:$0xf0] }
 0x12a   : > { %4866 = vmatpush.bf16.msrb.mxu0 %v6316_v44  ;;  %v7720_v44 = vor.u32 %v8922_v0, %v7717_v3  ;;  %v8801_v0 = vld [vmem:[%s9182_s19 + $0xab8] sm:$0xf0]  ;;  %v8155_v3 = vld [vmem:[%s9182_s19 + $0x11e8] sm:$0xf] }
 0x12b   : > { %4840 = vmatpush.bf16.msra.mxu3 %v8040_v13  ;;  %v7507_v13 = vld [vmem:[%s9182_s19 + $0xcd8] sm:$0xf] }
 0x12c   : > { %4892 = vmatpush.bf16.msrb.mxu2 %v8044_v1  ;;  %4879 = vmatpush.bf16.msrb.mxu1 %v7180_v29  ;;  %v7508_v22 = vor.u32 %v8882_v15, %v7507_v13  ;;  %v4562_v1 = vpop.f32.mrf.mxu2  ;;  %v8855_v29 = vld [vmem:[%s9182_s19 + $0xc68] sm:$0xf0]  ;;  %v6429_v15 = vld [vmem:[%s9182_s19 + $0x4d4] sm:$0xf0] }
 0x12d   : > { %v7400_v36 = vor.u32 %v8855_v29, %v7399_v23  ;;  %v8599_v13 = vld [vmem:[%s9182_s19 + $0x46c] sm:$0xf]  ;;  %v9017_v23 = vld [vmem:[%s9182_s19 + $0x1178] sm:$0xf0]  ;;  %v6321_v1 = vld [vmem:[%s9182_s19 + $0x3fc] sm:$0xf0] }
 0x12e   : > { %4867 = vmatpush.bf16.msrb.mxu0 %v6208_v28  ;;  %v6644_v28 = vor.u32 %v8666_v17, %v6643_v16  ;;  %v8156_v17 = vor.u32 %v9044_v5, %v8155_v3 }
 0x12f   : > { %4841 = vmatpush.bf16.msra.mxu3 %v7932_v53  ;;  %v3543_v53 = vpack.c.b16 %v2868_v50, %v2868_v50 }
 0x130   : > { %4893 = vmatpush.bf16.msrb.mxu2 %v7936_v37  ;;  %4880 = vmatpush.bf16.msrb.mxu1 %v7072_v43  ;;  %v8828_v43 = vld [vmem:[%s9182_s19 + $0xb90] sm:$0xf0] }
 0x131   : > { %v4247_v37 = vsel %vm4209_vm0, %v3543_v53, 0 }
 0x132   : > { %4868 = vmatpush.bf16.msrb.mxu0 %v6100_v41  ;;  %v7291_v41 = vld [vmem:[%s9182_s19 + $0xb28] sm:$0xf]  ;;  %v4586_v34 = vpop.f32.mrf.mxu0 }
 0x133   : > { %4842 = vmatpush.bf16.msra.mxu3 %v7824_v45  ;;  %v6645_v45 = vld [vmem:[%s9182_s19 + $0x684] sm:$0xf0]  ;;  %v7292_v60 = vor.u32 %v8828_v43, %v7291_v41  ;;  %v8545_v41 = vld [vmem:[%s9182_s19 + $0x2bc] sm:$0xf] }
 0x134   : > { %4894 = vmatpush.bf16.msrb.mxu2 %v7828_v48  ;;  %4881 = vmatpush.bf16.msrb.mxu1 %v6964_v63  ;;  %v6648_v51 = vor.u32 %v8653_v35, %v6645_v45  ;;  %v6537_v48 = vld [vmem:[%s9182_s19 + $0x5ac] sm:$0xf0]  ;;  %v6428_v63 = vor.u32 %v8612_v46, %v6427_v6  ;;  %v6324_v35 = vor.u32 %v8572_v25, %v6321_v1  ;;  %v7939_v45 = vld [vmem:[%s9182_s19 + $0x1038] sm:$0xf]  ;;  %v5995_v6 = vld [vmem:[%s9182_s19 + $0x108] sm:$0xf] }
 0x135   : > { %v6540_v50 = vor.u32 %v8626_v59, %v6537_v48  ;;  %v6859_v46 = vld [vmem:[%s9182_s19 + $0x7c8] sm:$0xf]  ;;  %v7831_v48 = vld [vmem:[%s9182_s19 + $0xf60] sm:$0xf] }
 0x136   : > { %4869 = vmatpush.bf16.msrb.mxu0 %v5992_v62  ;;  %v7183_v62 = vld [vmem:[%s9182_s19 + $0xa50] sm:$0xf] }
 0x137   : > { %4843 = vmatpush.bf16.msra.mxu3 %v7716_v56  ;;  %v4601_v56 = vpop.f32.mrf.mxu1  ;;  %v7184_v16 = vor.u32 %v8801_v0, %v7183_v62  ;;  %v6105_v0 = vld [vmem:[%s9182_s19 + $0x24c] sm:$0xf0] }
 0x138   : > { %4895 = vmatpush.bf16.msrb.mxu2 %v7720_v44  ;;  %4882 = vmatpush.bf16.msrb.mxu1 %v6856_v2  ;;  %v4561_v44 = vadd.f32 %v9915_v4, %v9663_v14  ;;  %v7075_v2 = vld [vmem:[%s9182_s19 + $0x978] sm:$0xf] }
 0x139   : > { %v7076_v29 = vor.u32 %v8774_v20, %v7075_v2  ;;  %v7509_v2 = vld [vmem:[%s9182_s19 + $0xd44] sm:$0xf0]  ;;  %v8491_v20 = vld [vmem:[%s9182_s19 + $0x10c] sm:$0xf] }
 0x13a   : > { %4870 = vmatpush.bf16.msrb.mxu0 %v5884_v47  ;;  %v6211_v47 = vld [vmem:[%s9182_s19 + $0x2b8] sm:$0xf]  ;;  %v4588_v24 = vpop.f32.mrf.mxu0 }
 0x13b   : > { %4844 = vmatpush.bf16.msra.mxu3 %v7608_v11  ;;  %v4509_v11 = vadd.f32 %v9894_v27, %v9663_v14  ;;  %v6432_v27 = vor.u32 %v8599_v13, %v6429_v15  ;;  %v6212_v30 = vor.u32 %v8558_v8, %v6211_v47  ;;  %v8869_v13 = vld [vmem:[%s9182_s19 + $0xcdc] sm:$0xf]  ;;  %v8373_v47 = vld [vmem:[%s9182_s19 + $0x1404] sm:$0xf0]  ;;  %v5997_v8 = vld [vmem:[%s9182_s19 + $0x174] sm:$0xf0] }
 0x13c   : > { %4896 = vmatpush.bf16.msrb.mxu2 %v7612_v32  ;;  %4883 = vmatpush.bf16.msrb.mxu1 %v6748_v33  ;;  %v8747_v32 = vld [vmem:[%s9182_s19 + $0x908] sm:$0xf0]  ;;  %v8842_v24 = vld [vmem:[%s9182_s19 + $0xc04] sm:$0xf] }
 0x13d   : > { %4871 = vmatmul.bf16.vlgmr.msrb.gmra.mxu0 %v9958_v52  ;;  %v4522_v53 = vadd.f32 %v9884_v18, %v4509_v11  ;;  %v6967_v18 = vld [vmem:[%s9182_s19 + $0x8a0] sm:$0xf]  ;;  %v8531_v33 = vld [vmem:[%s9182_s19 + $0x248] sm:$0xf0] }
 0x13e   : > { %4845 = vmatmul.bf16.vlgmr.msra.gmra.mxu3 %v9948_v57  ;;  %4928 = vmatpush.bf16.msra.mxu0 %v7508_v22  ;;  %v8047_v22 = vld [vmem:[%s9182_s19 + $0x1110] sm:$0xf]  ;;  %v6968_v43 = vor.u32 %v8747_v32, %v6967_v18  ;;  %v6104_v49 = vor.u32 %v8531_v33, %v6103_v31  ;;  %v10005_v56 = vpop.f32.mrf.mxu2  ;;  %v9058_v31 = vld [vmem:[%s9182_s19 + $0x12c4] sm:$0xf]  ;;  %v8464_v33 = vld [vmem:[%s9182_s19 + $0x34] sm:$0xf] }
 0x13f   : > { %4909 = vmatpush.bf16.msrb.mxu3 %v4244_v55  ;;  %4897 = vmatmul.bf16.vlgmr.msrb.gmra.mxu2 %v9948_v57  ;;  %v6320_v55 = vor.u32 %v8585_v21, %v6319_v7  ;;  %v9988_v4 = vpop.f32.mrf.mxu1  ;;  %v8048_v40 = vor.u32 %v9017_v23, %v8047_v22  ;;  %v5887_v7 = vld [vmem:[%s9182_s19 + $0x30] sm:$0xf]  ;;  %v8477_v21 = vld [vmem:[%s9182_s19 + $0x98] sm:$0xf0]  ;;  %v7723_v22 = vld [vmem:[%s9182_s19 + $0xe88] sm:$0xf] }
 0x140   : > { %4961 = vmatpush.bf16.msra.mxu2 %v4247_v37  ;;  %4941 = vmatpush.bf16.msra.mxu1 %v8372_v39  ;;  %v4535_v37 = vadd.f32 %v9879_v12, %v4522_v53  ;;  %v8936_v23 = vld [vmem:[%s9182_s19 + $0xef0] sm:$0xf0]  ;;  %v5888_v53 = vor.u32 %v8477_v21, %v5887_v7  ;;  %v7185_v7 = vld [vmem:[%s9182_s19 + $0xabc] sm:$0xf0] }
 0x141   : > { %4884 = vmatmul.bf16.vlgmr.msrb.gmra.mxu1 %v9970_v9  ;;  %v7724_v18 = vor.u32 %v8936_v23, %v7723_v22  ;;  %v6435_v23 = vld [vmem:[%s9182_s19 + $0x470] sm:$0xf] }
 0x142   : > { %4929 = vmatpush.bf16.msra.mxu0 %v7400_v36  ;;  %v8990_v36 = vld [vmem:[%s9182_s19 + $0x10a0] sm:$0xf0]  ;;  %v10011_v62 = vpop.f32.mrf.mxu0 }
 0x143   : > { %4915 = vmatpush.bf16.msra.mxu3 %v6644_v28  ;;  %v4573_v28 = vpop.f32.mrf.mxu3  ;;  %v7940_v12 = vor.u32 %v8990_v36, %v7939_v45  ;;  %v7615_v45 = vld [vmem:[%s9182_s19 + $0xdb0] sm:$0xf]  ;;  %v8909_v36 = vld [vmem:[%s9182_s19 + $0xe18] sm:$0xf0] }
 0x144   : > { %4967 = vmatpush.bf16.msrb.mxu2 %v6648_v51  ;;  %4942 = vmatpush.bf16.msra.mxu1 %v8264_v61  ;;  %v4574_v26 = vadd.f32 %v4573_v28, %v4561_v44  ;;  %v8720_v51 = vld [vmem:[%s9182_s19 + $0x830] sm:$0xf0]  ;;  %v2869_v28 = vunpack.c.h.b16 %v9918_v58 }
 0x146   : > { %4930 = vmatpush.bf16.msra.mxu0 %v7292_v60  ;;  %v4587_v39 = vadd.f32 %v4586_v34, %v4574_v26  ;;  %v8504_v34 = vld [vmem:[%s9182_s19 + $0x170] sm:$0xf0]  ;;  %v8963_v60 = vld [vmem:[%s9182_s19 + $0xfc8] sm:$0xf0]  ;;  %v4627_v1 = vpop.f32.mrf.mxu2  ;;  %v7401_v26 = vld [vmem:[%s9182_s19 + $0xc6c] sm:$0xf0] }
 0x147   : > { %4916 = vmatpush.bf16.msra.mxu3 %v6536_v42  ;;  %v6213_v42 = vld [vmem:[%s9182_s19 + $0x324] sm:$0xf0]  ;;  %v4614_v3 = vpop.f32.mrf.mxu1  ;;  %v5996_v11 = vor.u32 %v8504_v34, %v5995_v6  ;;  %v7832_v15 = vor.u32 %v8963_v60, %v7831_v48  ;;  %v8815_v6 = vld [vmem:[%s9182_s19 + $0xb2c] sm:$0xf]  ;;  %v6651_v34 = vld [vmem:[%s9182_s19 + $0x620] sm:$0xf] }
 0x148   : > { %4968 = vmatpush.bf16.msrb.mxu2 %v6540_v50  ;;  %4943 = vmatpush.bf16.msra.mxu1 %v8156_v17  ;;  %v4600_v10 = vadd.f32 %v9933_v19, %v4587_v39  ;;  %v6216_v59 = vor.u32 %v8545_v41, %v6213_v42  ;;  %v4548_v19 = vadd.f32 %v9865_v54, %v4535_v37  ;;  %v8693_v17 = vld [vmem:[%s9182_s19 + $0x758] sm:$0xf0]  ;;  %v7515_v37 = vld [vmem:[%s9182_s19 + $0xce0] sm:$0xf]  ;;  %v8883_v39 = vld [vmem:[%s9182_s19 + $0xd48] sm:$0xf0] }
 0x149   : > { %v6860_v50 = vor.u32 %v8720_v51, %v6859_v46  ;;  %v3544_v41 = vpack.c.b16 %v2869_v28, %v2869_v28  ;;  %v7404_v42 = vor.u32 %v8842_v24, %v7401_v26  ;;  %v7616_v46 = vor.u32 %v8909_v36, %v7615_v45  ;;  %v7407_v48 = vld [vmem:[%s9182_s19 + $0xc08] sm:$0xf]  ;;  %v8856_v60 = vld [vmem:[%s9182_s19 + $0xc70] sm:$0xf0]  ;;  %v8049_v3 = vld [vmem:[%s9182_s19 + $0x117c] sm:$0xf0] }
 0x14a   : > { %4931 = vmatpush.bf16.msra.mxu0 %v7184_v16  ;;  %v5723_v61 = vrot.slane %v4600_v10, 4  ;;  %v6751_v16 = vld [vmem:[%s9182_s19 + $0x6f0] sm:$0xf]  ;;  %v4653_v32 = vpop.f32.mrf.mxu0  ;;  %v9031_v10 = vld [vmem:[%s9182_s19 + $0x11ec] sm:$0xf]  ;;  %v7516_v51 = vor.u32 %v8883_v39, %v7515_v37  ;;  %v10082_v37 = vld [vmem:[%s9182_s19 + $0x1478] sm:$0xff] }
 0x14b   : > { %4917 = vmatpush.bf16.msra.mxu3 %v6428_v63  ;;  %v8518_v63 = vld [vmem:[%s9182_s19 + $0x1e4] sm:$0xf]  ;;  %v4575_v5 = vpop.f32.mrf.mxu3  ;;  %v7191_v24 = vld [vmem:[%s9182_s19 + $0xa58] sm:$0xf]  ;;  %v7083_v45 = vld [vmem:[%s9182_s19 + $0x980] sm:$0xf] }
 0x14c   : > { %4969 = vmatpush.bf16.msrb.mxu2 %v6432_v27  ;;  %4944 = vmatpush.bf16.msra.mxu1 %v8048_v40  ;;  %v5736_v54 = vsel %vm4209_vm0, %v4548_v19, %v5723_v61  ;;  %v6108_v44 = vor.u32 %v8518_v63, %v6105_v0  ;;  %v6752_v27 = vor.u32 %v8693_v17, %v6751_v16  ;;  %v8265_v40 = vld [vmem:[%s9182_s19 + $0x132c] sm:$0xf0]  ;;  %v4250_v61 = vsel %vm4209_vm0, %v3544_v41, 0  ;;  %v9004_v0 = vld [vmem:[%s9182_s19 + $0x1114] sm:$0xf] }
 0x14d   : > { %5762 = vst [vmem:[%s9714_s25 + $0x10] sm:$0x77] %v5736_v54  ;;  %v8268_v58 = vor.u32 %v9058_v31, %v8265_v40  ;;  %v8788_v5 = vld [vmem:[%s9182_s19 + $0xa54] sm:$0xf]  ;;  %v6543_v54 = vld [vmem:[%s9182_s19 + $0x548] sm:$0xf]  ;;  %v8052_v16 = vor.u32 %v9004_v0, %v8049_v3 }
 0x14e   : > { %8440 = vmatmul.msk.bf16.vlgmr.msrb.gmra.mxu3 %vm4206_vm1, %v9904_v38  ;;  %4932 = vmatpush.bf16.msra.mxu0 %v7076_v29  ;;  %v7512_v29 = vor.u32 %v8869_v13, %v7509_v2  ;;  %v7299_v13 = vld [vmem:[%s9182_s19 + $0xb30] sm:$0xf]  ;;  %v7941_v2 = vld [vmem:[%s9182_s19 + $0x10a4] sm:$0xf0]  ;;  %v8734_v26 = vld [vmem:[%s9182_s19 + $0x8a4] sm:$0xf] }
 0x14f   : > { %4918 = vmatpush.bf16.msra.mxu3 %v6320_v55  ;;  %v9085_v55 = vld [vmem:[%s9182_s19 + $0x139c] sm:$0xf]  ;;  %8441 = vmatmul.msk.bf16.vlgmr.msra.gmra.mxu2 %vm4206_vm1, %v9904_v38  ;;  %v7833_v31 = vld [vmem:[%s9182_s19 + $0xfcc] sm:$0xf0]  ;;  %v8775_v36 = vld [vmem:[%s9182_s19 + $0x9e8] sm:$0xf0] }
 0x150   : > { %4970 = vmatpush.bf16.msrb.mxu2 %v6324_v35  ;;  %4945 = vmatpush.bf16.msra.mxu1 %v7940_v12  ;;  %v8376_v25 = vor.u32 %v9085_v55, %v8373_v47  ;;  %v5889_v35 = vld [vmem:[%s9182_s19 + $0x9c] sm:$0xf0]  ;;  %v7293_v12 = vld [vmem:[%s9182_s19 + $0xb94] sm:$0xf0]  ;;  %v8977_v47 = vld [vmem:[%s9182_s19 + $0x103c] sm:$0xf] }
 0x151   : > { %v7296_v63 = vor.u32 %v8815_v6, %v7293_v12  ;;  %v7944_v28 = vor.u32 %v8977_v47, %v7941_v2  ;;  %v6969_v40 = vld [vmem:[%s9182_s19 + $0x90c] sm:$0xf0]  ;;  %v8707_v12 = vld [vmem:[%s9182_s19 + $0x7cc] sm:$0xf]  ;;  %v8532_v47 = vld [vmem:[%s9182_s19 + $0x250] sm:$0xf0] }
 0x152   : > { %4933 = vmatpush.bf16.msra.mxu0 %v6968_v43  ;;  %v5892_v43 = vor.u32 %v8464_v33, %v5889_v35  ;;  %v6327_v33 = vld [vmem:[%s9182_s19 + $0x398] sm:$0xf]  ;;  %v8586_v35 = vld [vmem:[%s9182_s19 + $0x400] sm:$0xf0]  ;;  %v6972_v41 = vor.u32 %v8734_v26, %v6969_v40  ;;  %v6003_v40 = vld [vmem:[%s9182_s19 + $0x110] sm:$0xf] }
 0x153   : > { %4919 = vmatpush.bf16.msra.mxu3 %v6212_v30  ;;  %v6000_v30 = vor.u32 %v8491_v20, %v5997_v8  ;;  %v8761_v20 = vld [vmem:[%s9182_s19 + $0x97c] sm:$0xf]  ;;  %v7077_v8 = vld [vmem:[%s9182_s19 + $0x9e4] sm:$0xf0] }
 0x154   : > { %4971 = vmatpush.bf16.msrb.mxu2 %v6216_v59  ;;  %4946 = vmatpush.bf16.msra.mxu1 %v7832_v15  ;;  %v8667_v59 = vld [vmem:[%s9182_s19 + $0x688] sm:$0xf0]  ;;  %v8829_v15 = vld [vmem:[%s9182_s19 + $0xb98] sm:$0xf0] }
 0x155   : > { %v6652_v21 = vor.u32 %v8667_v59, %v6651_v34  ;;  %v7300_v22 = vor.u32 %v8829_v15, %v7299_v13  ;;  %v7084_v34 = vor.u32 %v8775_v36, %v7083_v45  ;;  %v6219_v59 = vld [vmem:[%s9182_s19 + $0x2c0] sm:$0xf]  ;;  %v8694_v45 = vld [vmem:[%s9182_s19 + $0x760] sm:$0xf0] }
 0x156   : > { %4934 = vmatpush.bf16.msra.mxu0 %v6860_v50  ;;  %v7408_v50 = vor.u32 %v8856_v60, %v7407_v48  ;;  %v4664_v17 = vpop.f32.mrf.mxu0  ;;  %v2870_v48 = vunpack.c.l.b16 %v10082_v37  ;;  %v4613_v60 = vadd.f32 %v9988_v4, %v9663_v14  ;;  %v8379_v13 = vld [vmem:[%s9182_s19 + $0x13a0] sm:$0xf]  ;;  %v9086_v36 = vld [vmem:[%s9182_s19 + $0x13a4] sm:$0xf] }
 0x157   : > { %4920 = vmatpush.bf16.msra.mxu3 %v6104_v49  ;;  %v8157_v49 = vld [vmem:[%s9182_s19 + $0x1254] sm:$0xf0] }
 0x158   : > { %4972 = vmatpush.bf16.msrb.mxu2 %v6108_v44  ;;  %4947 = vmatpush.bf16.msra.mxu1 %v7724_v18  ;;  %v8160_v19 = vor.u32 %v9031_v10, %v8157_v49  ;;  %v7188_v44 = vor.u32 %v8788_v5, %v7185_v7  ;;  %v4677_v55 = vpop.f32.mrf.mxu1  ;;  %v8923_v10 = vld [vmem:[%s9182_s19 + $0xe8c] sm:$0xf]  ;;  %v7725_v49 = vld [vmem:[%s9182_s19 + $0xef4] sm:$0xf0] }
 0x159   : > { %v7728_v3 = vor.u32 %v8923_v10, %v7725_v49  ;;  %v9045_v10 = vld [vmem:[%s9182_s19 + $0x1258] sm:$0xf0] }
 0x15a   : > { %4935 = vmatpush.bf16.msra.mxu0 %v6752_v27 }
 0x15b   : > { %4921 = vmatpush.bf16.msra.mxu3 %v5996_v11  ;;  %v8640_v11 = vld [vmem:[%s9182_s19 + $0x5b0] sm:$0xf0] }
 0x15c   : > { %4973 = vmatpush.bf16.msrb.mxu2 %v6000_v30  ;;  %4948 = vmatpush.bf16.msra.mxu1 %v7616_v46  ;;  %v6544_v27 = vor.u32 %v8640_v11, %v6543_v54  ;;  %v8950_v30 = vld [vmem:[%s9182_s19 + $0xf64] sm:$0xf]  ;;  %v6861_v46 = vld [vmem:[%s9182_s19 + $0x834] sm:$0xf0]  ;;  %v8680_v54 = vld [vmem:[%s9182_s19 + $0x6f4] sm:$0xf] }
 0x15d   : > { %4936 = vmatmul.bf16.vlgmr.msra.gmra.mxu0 %v9970_v9  ;;  %v10071_v1 = vpop.f32.mrf.mxu3  ;;  %v7836_v39 = vor.u32 %v8950_v30, %v7833_v31  ;;  %v6864_v7 = vor.u32 %v8707_v12, %v6861_v46  ;;  %v6753_v11 = vld [vmem:[%s9182_s19 + $0x75c] sm:$0xf0]  ;;  %v9072_v30 = vld [vmem:[%s9182_s19 + $0x1330] sm:$0xf0] }
 0x15e   : > { %4993 = vmatpush.bf16.msrb.mxu0 %v8376_v25  ;;  %v8802_v25 = vld [vmem:[%s9182_s19 + $0xac0] sm:$0xf0] }
 0x15f   : > { %4922 = vmatpush.bf16.msra.mxu3 %v5888_v53  ;;  %4949 = vmatmul.bf16.vlgmr.msra.gmra.mxu1 %v9948_v57  ;;  %v8613_v53 = vld [vmem:[%s9182_s19 + $0x4d8] sm:$0xf0]  ;;  %v7192_v32 = vor.u32 %v8802_v25, %v7191_v24  ;;  %v8271_v25 = vld [vmem:[%s9182_s19 + $0x12c8] sm:$0xf] }
 0x160   : > { %4974 = vmatpush.bf16.msrb.mxu2 %v5892_v43  ;;  %5013 = vmatpush.bf16.msrb.mxu1 %v4250_v61  ;;  %v6436_v18 = vor.u32 %v8613_v53, %v6435_v23  ;;  %v4690_v43 = vpop.f32.mrf.mxu2  ;;  %v4679_v6 = vpop.f32.mrf.mxu1  ;;  %v6975_v61 = vld [vmem:[%s9182_s19 + $0x8a8] sm:$0xf]  ;;  %v8654_v23 = vld [vmem:[%s9182_s19 + $0x624] sm:$0xf]  ;;  %v6653_v53 = vld [vmem:[%s9182_s19 + $0x68c] sm:$0xf0] }
 0x162   : > { %4923 = vmatmul.bf16.vlgmr.msra.gmra.mxu3 %v9958_v52  ;;  %4994 = vmatpush.bf16.msrb.mxu0 %v8268_v58  ;;  %v4666_v58 = vpop.f32.mrf.mxu0 }
 0x163   : > { %4980 = vmatpush.bf16.msrb.mxu3 %v7512_v29  ;;  %4975 = vmatmul.bf16.vlgmr.msrb.gmra.mxu2 %v9958_v52  ;;  %v7080_v29 = vor.u32 %v8761_v20, %v7077_v8  ;;  %v6867_v20 = vld [vmem:[%s9182_s19 + $0x7d0] sm:$0xf]  ;;  %v8721_v8 = vld [vmem:[%s9182_s19 + $0x838] sm:$0xf0] }
 0x164   : > { %5032 = vmatpush.bf16.msra.mxu2 %v7516_v51  ;;  %5019 = vmatpush.bf16.msra.mxu1 %v6652_v21  ;;  %v6328_v51 = vor.u32 %v8586_v35, %v6327_v33  ;;  %v8896_v21 = vld [vmem:[%s9182_s19 + $0xdb4] sm:$0xf]  ;;  %v6868_v31 = vor.u32 %v8721_v8, %v6867_v20  ;;  %v6656_v33 = vor.u32 %v8654_v23, %v6653_v53  ;;  %v6759_v35 = vld [vmem:[%s9182_s19 + $0x6f8] sm:$0xf]  ;;  %v8381_v58 = vld [vmem:[%s9182_s19 + $0x140c] sm:$0xf0] }
 0x165   : > { %v4640_v0 = vpop.f32.mrf.mxu3  ;;  %v6760_v46 = vor.u32 %v8694_v45, %v6759_v35 }
 0x166   : > { %4995 = vmatpush.bf16.msrb.mxu0 %v8160_v19  ;;  %v8559_v19 = vld [vmem:[%s9182_s19 + $0x328] sm:$0xf0]  ;;  %v8600_v0 = vld [vmem:[%s9182_s19 + $0x474] sm:$0xf] }
 0x167   : > { %4981 = vmatpush.bf16.msrb.mxu3 %v7404_v42  ;;  %v4665_v42 = vadd.f32 %v4664_v17, %v9663_v14  ;;  %v6220_v4 = vor.u32 %v8559_v19, %v6219_v59  ;;  %v4626_v17 = vadd.f32 %v10005_v56, %v4613_v60  ;;  %v8384_v59 = vor.u32 %v9086_v36, %v8381_v58  ;;  %v8870_v60 = vld [vmem:[%s9182_s19 + $0xce4] sm:$0xf]  ;;  %v7517_v19 = vld [vmem:[%s9182_s19 + $0xd4c] sm:$0xf0]  ;;  %v8789_v58 = vld [vmem:[%s9182_s19 + $0xa5c] sm:$0xf] }
 0x168   : > { %5033 = vmatpush.bf16.msra.mxu2 %v7408_v50  ;;  %5020 = vmatpush.bf16.msra.mxu1 %v6544_v27  ;;  %v7617_v50 = vld [vmem:[%s9182_s19 + $0xe1c] sm:$0xf0]  ;;  %v4692_v24 = vpop.f32.mrf.mxu2 }
 0x169   : > { %v4678_v5 = vadd.f32 %v4677_v55, %v4665_v42  ;;  %v6111_v55 = vld [vmem:[%s9182_s19 + $0x1e8] sm:$0xf]  ;;  %v7620_v2 = vor.u32 %v8896_v21, %v7617_v50  ;;  %v4639_v26 = vadd.f32 %v10071_v1, %v4626_v17  ;;  %v8627_v1 = vld [vmem:[%s9182_s19 + $0x54c] sm:$0xf]  ;;  %v8272_v42 = vor.u32 %v9072_v30, %v8271_v25  ;;  %v8055_v50 = vld [vmem:[%s9182_s19 + $0x1118] sm:$0xf] }
 0x16a   : > { %4996 = vmatpush.bf16.msrb.mxu0 %v8052_v16  ;;  %v3545_v16 = vpack.c.b16 %v2870_v48, %v2870_v48  ;;  %v7409_v17 = vld [vmem:[%s9182_s19 + $0xc74] sm:$0xf0]  ;;  %v7301_v25 = vld [vmem:[%s9182_s19 + $0xb9c] sm:$0xf0]  ;;  %v6221_v30 = vld [vmem:[%s9182_s19 + $0x32c] sm:$0xf0] }
 0x16b   : > { %4982 = vmatpush.bf16.msrb.mxu3 %v7296_v63  ;;  %v8748_v63 = vld [vmem:[%s9182_s19 + $0x910] sm:$0xf0]  ;;  %v4691_v27 = vadd.f32 %v4690_v43, %v4678_v5  ;;  %v8163_v43 = vld [vmem:[%s9182_s19 + $0x11f0] sm:$0xf]  ;;  %v4652_v6 = vadd.f32 %v10011_v62, %v4639_v26  ;;  %v9059_v62 = vld [vmem:[%s9182_s19 + $0x12cc] sm:$0xf] }
 0x16c   : > { %5034 = vmatpush.bf16.msra.mxu2 %v7300_v22  ;;  %5021 = vmatpush.bf16.msra.mxu1 %v6436_v18  ;;  %v6976_v15 = vor.u32 %v8748_v63, %v6975_v61  ;;  %v6756_v22 = vor.u32 %v8680_v54, %v6753_v11  ;;  %v8505_v18 = vld [vmem:[%s9182_s19 + $0x178] sm:$0xf0]  ;;  %v8273_v63 = vld [vmem:[%s9182_s19 + $0x1334] sm:$0xf0]  ;;  %v9018_v54 = vld [vmem:[%s9182_s19 + $0x1180] sm:$0xf0]  ;;  %v7520_v11 = vor.u32 %v8870_v60, %v7517_v19 }
 0x16d   : > { %v6004_v49 = vor.u32 %v8505_v18, %v6003_v40  ;;  %v8056_v8 = vor.u32 %v9018_v54, %v8055_v50  ;;  %v8546_v26 = vld [vmem:[%s9182_s19 + $0x2c4] sm:$0xf]  ;;  %v7085_v19 = vld [vmem:[%s9182_s19 + $0x9ec] sm:$0xf0] }
 0x16e   : > { %4997 = vmatpush.bf16.msrb.mxu0 %v7944_v28  ;;  %v6112_v28 = vor.u32 %v8532_v47, %v6111_v55  ;;  %v8165_v55 = vld [vmem:[%s9182_s19 + $0x125c] sm:$0xf0]  ;;  %v8573_v47 = vld [vmem:[%s9182_s19 + $0x39c] sm:$0xf]  ;;  %v8762_v60 = vld [vmem:[%s9182_s19 + $0x984] sm:$0xf] }
 0x16f   : > { %4983 = vmatpush.bf16.msrb.mxu3 %v7188_v44  ;;  %v9099_v44 = vld [vmem:[%s9182_s19 + $0x1408] sm:$0xf0]  ;;  %8442 = vmatmul.msk.bf16.vlgmr.msrb.gmra.mxu1 %vm4206_vm1, %v9904_v38  ;;  %v8910_v50 = vld [vmem:[%s9182_s19 + $0xe20] sm:$0xf0] }
 0x170   : > { %5035 = vmatpush.bf16.msra.mxu2 %v7192_v32  ;;  %5022 = vmatpush.bf16.msra.mxu1 %v6328_v51  ;;  %v8380_v56 = vor.u32 %v9099_v44, %v8379_v13  ;;  %v4703_v32 = vpop.f32.mrf.mxu3  ;;  %v5895_v51 = vld [vmem:[%s9182_s19 + $0x38] sm:$0xf]  ;;  %v10137_v5 = vpop.f32.mrf.mxu2  ;;  %v9032_v44 = vld [vmem:[%s9182_s19 + $0x11f4] sm:$0xf]  ;;  %v10188_v54 = vld [vmem:[%s9182_s19 + $0x1480] sm:$0xff] }
 0x171   : > { %v8168_v53 = vor.u32 %v9032_v44, %v8165_v55  ;;  %v8924_v44 = vld [vmem:[%s9182_s19 + $0xe94] sm:$0xf]  ;;  %v7733_v55 = vld [vmem:[%s9182_s19 + $0xefc] sm:$0xf0] }
 0x172   : > { %4998 = vmatpush.bf16.msrb.mxu0 %v7836_v39  ;;  %v4704_v39 = vadd.f32 %v4703_v32, %v4691_v27  ;;  %v7947_v27 = vld [vmem:[%s9182_s19 + $0x1040] sm:$0xf]  ;;  %v7839_v32 = vld [vmem:[%s9182_s19 + $0xf68] sm:$0xf] }
 0x173   : > { %4984 = vmatpush.bf16.msrb.mxu3 %v7080_v29  ;;  %v4253_v29 = vsel %vm4209_vm0, %v3545_v16, 0  ;;  %v8843_v16 = vld [vmem:[%s9182_s19 + $0xc0c] sm:$0xf] }
 0x174   : > { %5036 = vmatpush.bf16.msra.mxu2 %v7084_v34  ;;  %5023 = vmatpush.bf16.msra.mxu1 %v6220_v4  ;;  %v5724_v12 = vrot.slane %v4704_v39, 4  ;;  %v8478_v34 = vld [vmem:[%s9182_s19 + $0xa0] sm:$0xf0]  ;;  %v8276_v4 = vor.u32 %v9059_v62, %v8273_v63  ;;  %v7412_v23 = vor.u32 %v8843_v16, %v7409_v17  ;;  %v6224_v39 = vor.u32 %v8546_v26, %v6221_v30  ;;  %v8951_v62 = vld [vmem:[%s9182_s19 + $0xf6c] sm:$0xf] }
 0x175   : > { %v5896_v21 = vor.u32 %v8478_v34, %v5895_v51  ;;  %v8492_v63 = vld [vmem:[%s9182_s19 + $0x114] sm:$0xf]  ;;  %v8735_v16 = vld [vmem:[%s9182_s19 + $0x8ac] sm:$0xf]  ;;  %v6977_v17 = vld [vmem:[%s9182_s19 + $0x914] sm:$0xf0] }
 0x176   : > { %4999 = vmatpush.bf16.msrb.mxu0 %v7728_v3  ;;  %v5737_v61 = vsel %vm4209_vm0, %v4652_v6, %v5724_v12  ;;  %v6437_v3 = vld [vmem:[%s9182_s19 + $0x4dc] sm:$0xf0]  ;;  %v10148_v20 = vpop.f32.mrf.mxu0  ;;  %v7731_v12 = vld [vmem:[%s9182_s19 + $0xe90] sm:$0xf]  ;;  %v8708_v26 = vld [vmem:[%s9182_s19 + $0x7d4] sm:$0xf] }
 0x177   : > { %4985 = vmatpush.bf16.msrb.mxu3 %v6972_v41  ;;  %v6545_v41 = vld [vmem:[%s9182_s19 + $0x5b4] sm:$0xf0]  ;;  %5763 = vst [vmem:[%s9714_s25 + $0x18] sm:$0x77] %v5737_v61  ;;  %v6869_v30 = vld [vmem:[%s9182_s19 + $0x83c] sm:$0xf0] }
 0x178   : > { %5037 = vmatpush.bf16.msra.mxu2 %v6976_v15  ;;  %5024 = vmatpush.bf16.msra.mxu1 %v6112_v28  ;;  %v6548_v48 = vor.u32 %v8627_v1, %v6545_v41  ;;  %v4705_v13 = vpop.f32.mrf.mxu3  ;;  %v6440_v15 = vor.u32 %v8600_v0, %v6437_v3  ;;  %v9005_v28 = vld [vmem:[%s9182_s19 + $0x111c] sm:$0xf]  ;;  %v4757_v40 = vpop.f32.mrf.mxu2  ;;  %v7193_v1 = vld [vmem:[%s9182_s19 + $0xac4] sm:$0xf0]  ;;  %v8978_v41 = vld [vmem:[%s9182_s19 + $0x1044] sm:$0xf] }
 0x179   : > { %v7196_v51 = vor.u32 %v8789_v58, %v7193_v1  ;;  %v7841_v61 = vld [vmem:[%s9182_s19 + $0xfd4] sm:$0xf0]  ;;  %v6005_v0 = vld [vmem:[%s9182_s19 + $0x17c] sm:$0xf0]  ;;  %v8857_v58 = vld [vmem:[%s9182_s19 + $0xc78] sm:$0xf0] }
 0x17a   : > { %5000 = vmatpush.bf16.msrb.mxu0 %v7620_v2  ;;  %v6329_v2 = vld [vmem:[%s9182_s19 + $0x404] sm:$0xf0]  ;;  %v7844_v13 = vor.u32 %v8951_v62, %v7841_v61  ;;  %v8830_v62 = vld [vmem:[%s9182_s19 + $0xba0] sm:$0xf0]  ;;  %v6443_v61 = vld [vmem:[%s9182_s19 + $0x478] sm:$0xf] }
 0x17b   : > { %4986 = vmatpush.bf16.msrb.mxu3 %v6864_v7  ;;  %v8164_v7 = vor.u32 %v9045_v10, %v8163_v43  ;;  %v6332_v24 = vor.u32 %v8573_v47, %v6329_v2  ;;  %v8519_v43 = vld [vmem:[%s9182_s19 + $0x1ec] sm:$0xf]  ;;  %v6113_v10 = vld [vmem:[%s9182_s19 + $0x254] sm:$0xf0]  ;;  %v8465_v47 = vld [vmem:[%s9182_s19 + $0x3c] sm:$0xf] }
 0x17c   : > { %5038 = vmatpush.bf16.msra.mxu2 %v6868_v31  ;;  %5025 = vmatpush.bf16.msra.mxu1 %v6004_v49  ;;  %v10159_v31 = vpop.f32.mrf.mxu1  ;;  %v5897_v2 = vld [vmem:[%s9182_s19 + $0xa4] sm:$0xf0] }
 0x17d   : > { %5001 = vmatmul.bf16.vlgmr.msrb.gmra.mxu0 %v9948_v57 }
 0x17e   : > { %5065 = vmatpush.bf16.msra.mxu0 %v4253_v29  ;;  %v8057_v29 = vld [vmem:[%s9182_s19 + $0x1184] sm:$0xf0]  ;;  %v4731_v49 = vpop.f32.mrf.mxu0 }
 0x17f   : > { %4987 = vmatpush.bf16.msrb.mxu3 %v6756_v22  ;;  %v8991_v22 = vld [vmem:[%s9182_s19 + $0x10a8] sm:$0xf0]  ;;  %v8060_v45 = vor.u32 %v9005_v28, %v8057_v29  ;;  %v7736_v28 = vor.u32 %v8924_v44, %v7733_v55  ;;  %v5900_v29 = vor.u32 %v8465_v47, %v5897_v2  ;;  %v8681_v49 = vld [vmem:[%s9182_s19 + $0x6fc] sm:$0xf]  ;;  %v6335_v55 = vld [vmem:[%s9182_s19 + $0x3a0] sm:$0xf] }
 0x180   : > { %5039 = vmatpush.bf16.msra.mxu2 %v6760_v46  ;;  %5026 = vmatpush.bf16.msra.mxu1 %v5896_v21  ;;  %v7948_v18 = vor.u32 %v8991_v22, %v7947_v27  ;;  %v8937_v46 = vld [vmem:[%s9182_s19 + $0xef8] sm:$0xf0]  ;;  %v7623_v21 = vld [vmem:[%s9182_s19 + $0xdb8] sm:$0xf]  ;;  %v7523_v27 = vld [vmem:[%s9182_s19 + $0xce8] sm:$0xf] }
 0x181   : > { %v10164_v36 = vpop.f32.mrf.mxu3  ;;  %v8884_v22 = vld [vmem:[%s9182_s19 + $0xd50] sm:$0xf0]  ;;  %v8587_v47 = vld [vmem:[%s9182_s19 + $0x408] sm:$0xf0] }
 0x182   : > { %4988 = vmatmul.bf16.vlgmr.msrb.gmra.mxu3 %v9970_v9  ;;  %5071 = vmatpush.bf16.msrb.mxu0 %v6656_v33  ;;  %v8964_v33 = vld [vmem:[%s9182_s19 + $0xfd0] sm:$0xf0]  ;;  %v7524_v40 = vor.u32 %v8884_v22, %v7523_v27  ;;  %v4717_v44 = vadd.f32 %v10164_v36, %v9663_v14  ;;  %v8601_v27 = vld [vmem:[%s9182_s19 + $0x47c] sm:$0xf]  ;;  %v9046_v36 = vld [vmem:[%s9182_s19 + $0x1260] sm:$0xf0] }
 0x183   : > { %5045 = vmatpush.bf16.msra.mxu3 %v8380_v56  ;;  %5040 = vmatmul.bf16.vlgmr.msra.gmra.mxu2 %v9970_v9  ;;  %v8816_v56 = vld [vmem:[%s9182_s19 + $0xb34] sm:$0xf]  ;;  %v7840_v6 = vor.u32 %v8964_v33, %v7839_v32  ;;  %v7625_v32 = vld [vmem:[%s9182_s19 + $0xe24] sm:$0xf0] }
 0x184   : > { %5097 = vmatpush.bf16.msrb.mxu2 %v8384_v59  ;;  %5084 = vmatpush.bf16.msrb.mxu1 %v7520_v11  ;;  %v7304_v35 = vor.u32 %v8816_v56, %v7301_v25  ;;  %v6116_v59 = vor.u32 %v8519_v43, %v6113_v10  ;;  %v4744_v3 = vpop.f32.mrf.mxu1  ;;  %v6980_v56 = vor.u32 %v8735_v16, %v6977_v17  ;;  %v8803_v17 = vld [vmem:[%s9182_s19 + $0xac8] sm:$0xf0] }
 0x185   : > { %5027 = vmatmul.bf16.vlgmr.msra.gmra.mxu1 %v9958_v52  ;;  %v6872_v43 = vor.u32 %v8708_v26, %v6869_v30  ;;  %v8560_v26 = vld [vmem:[%s9182_s19 + $0x330] sm:$0xf0] }
 0x186   : > { %5072 = vmatpush.bf16.msrb.mxu0 %v6548_v48  ;;  %v2871_v48 = vunpack.c.h.b16 %v10082_v37  ;;  %v7088_v37 = vor.u32 %v8762_v60, %v7085_v19  ;;  %v7307_v19 = vld [vmem:[%s9182_s19 + $0xb38] sm:$0xf] }
 0x187   : > { %5046 = vmatpush.bf16.msra.mxu3 %v8272_v42  ;;  %v7949_v42 = vld [vmem:[%s9182_s19 + $0x10ac] sm:$0xf0] }
 0x188   : > { %5098 = vmatpush.bf16.msrb.mxu2 %v8276_v4  ;;  %5085 = vmatpush.bf16.msrb.mxu1 %v7412_v23  ;;  %v7952_v34 = vor.u32 %v8978_v41, %v7949_v42  ;;  %v3546_v11 = vpack.c.b16 %v2871_v48, %v2871_v48  ;;  %v2872_v23 = vunpack.c.l.b16 %v10188_v54  ;;  %v6551_v41 = vld [vmem:[%s9182_s19 + $0x550] sm:$0xf]  ;;  %v8641_v42 = vld [vmem:[%s9182_s19 + $0x5b8] sm:$0xf0] }
 0x189   : > { %v4718_v4 = vpop.f32.mrf.mxu3  ;;  %v6552_v48 = vor.u32 %v8641_v42, %v6551_v41  ;;  %v6983_v41 = vld [vmem:[%s9182_s19 + $0x8b0] sm:$0xf]  ;;  %v8749_v42 = vld [vmem:[%s9182_s19 + $0x918] sm:$0xf0] }
 0x18a   : > { %5073 = vmatpush.bf16.msrb.mxu0 %v6440_v15  ;;  %v6008_v15 = vor.u32 %v8492_v63, %v6005_v0  ;;  %v4256_v25 = vsel %vm4209_vm0, %v3546_v11, 0  ;;  %v3547_v1 = vpack.c.b16 %v2872_v23, %v2872_v23  ;;  %v8614_v63 = vld [vmem:[%s9182_s19 + $0x4e0] sm:$0xf0]  ;;  %v8279_v11 = vld [vmem:[%s9182_s19 + $0x12d0] sm:$0xf] }
 0x18b   : > { %5047 = vmatpush.bf16.msra.mxu3 %v8164_v7  ;;  %v10183_v7 = vpop.f32.mrf.mxu2  ;;  %v6445_v23 = vld [vmem:[%s9182_s19 + $0x4e4] sm:$0xf0] }
 0x18c   : > { %5099 = vmatpush.bf16.msrb.mxu2 %v8168_v53  ;;  %5086 = vmatpush.bf16.msrb.mxu1 %v7304_v35  ;;  %v6659_v53 = vld [vmem:[%s9182_s19 + $0x628] sm:$0xf]  ;;  %v10206_v33 = vpop.f32.mrf.mxu1  ;;  %v4259_v60 = vsel %vm4209_vm0, %v3547_v1, 0  ;;  %v6448_v30 = vor.u32 %v8601_v27, %v6445_v23  ;;  %v8695_v27 = vld [vmem:[%s9182_s19 + $0x768] sm:$0xf0] }
 0x18d   : > { %8443 = vmatmul.msk.bf16.vlgmr.msra.gmra.mxu0 %vm4206_vm1, %v9904_v38  ;;  %v7732_v38 = vor.u32 %v8937_v46, %v7731_v12  ;;  %v8655_v12 = vld [vmem:[%s9182_s19 + $0x62c] sm:$0xf]  ;;  %v8389_v23 = vld [vmem:[%s9182_s19 + $0x1414] sm:$0xf0] }
 0x18e   : > { %5074 = vmatpush.bf16.msrb.mxu0 %v6332_v24  ;;  %v8668_v24 = vld [vmem:[%s9182_s19 + $0x690] sm:$0xf0] }
 0x18f   : > { %5048 = vmatpush.bf16.msra.mxu3 %v8056_v8  ;;  %v7624_v8 = vor.u32 %v8910_v50, %v7623_v21  ;;  %v8628_v21 = vld [vmem:[%s9182_s19 + $0x554] sm:$0xf]  ;;  %v7308_v50 = vor.u32 %v8830_v62, %v7307_v19 }
 0x190   : > { %5100 = vmatpush.bf16.msrb.mxu2 %v8060_v45  ;;  %5087 = vmatpush.bf16.msrb.mxu1 %v7196_v51  ;;  %v6660_v45 = vor.u32 %v8668_v24, %v6659_v53  ;;  %v6661_v51 = vld [vmem:[%s9182_s19 + $0x694] sm:$0xf0]  ;;  %v6336_v24 = vor.u32 %v8587_v47, %v6335_v55  ;;  %v8479_v47 = vld [vmem:[%s9182_s19 + $0xa8] sm:$0xf0] }
 0x191   : > { %v6664_v3 = vor.u32 %v8655_v12, %v6661_v51  ;;  %v8171_v53 = vld [vmem:[%s9182_s19 + $0x11f8] sm:$0xf]  ;;  %v8547_v51 = vld [vmem:[%s9182_s19 + $0x2cc] sm:$0xf] }
 0x192   : > { %5075 = vmatpush.bf16.msrb.mxu0 %v6224_v39  ;;  %v7415_v39 = vld [vmem:[%s9182_s19 + $0xc10] sm:$0xf] }
 0x193   : > { %5049 = vmatpush.bf16.msra.mxu3 %v7948_v18  ;;  %v8897_v18 = vld [vmem:[%s9182_s19 + $0xdbc] sm:$0xf]  ;;  %v4770_v35 = vpop.f32.mrf.mxu2  ;;  %v7416_v46 = vor.u32 %v8857_v58, %v7415_v39 }
 0x194   : > { %5101 = vmatpush.bf16.msrb.mxu2 %v7952_v34  ;;  %5088 = vmatpush.bf16.msrb.mxu1 %v7088_v37  ;;  %v7628_v10 = vor.u32 %v8897_v18, %v7625_v32  ;;  %v8387_v34 = vld [vmem:[%s9182_s19 + $0x13a8] sm:$0xf]  ;;  %v6553_v37 = vld [vmem:[%s9182_s19 + $0x5bc] sm:$0xf0]  ;;  %v4809_v4 = vpop.f32.mrf.mxu1 }
 0x195   : > { %v6556_v2 = vor.u32 %v8628_v21, %v6553_v37  ;;  %v8063_v35 = vld [vmem:[%s9182_s19 + $0x1120] sm:$0xf] }
 0x196   : > { %5076 = vmatpush.bf16.msrb.mxu0 %v6116_v59  ;;  %v9100_v59 = vld [vmem:[%s9182_s19 + $0x1410] sm:$0xf0]  ;;  %v4794_v16 = vpop.f32.mrf.mxu0  ;;  %v5903_v4 = vld [vmem:[%s9182_s19 + $0x40] sm:$0xf] }
 0x197   : > { %5050 = vmatpush.bf16.msra.mxu3 %v7840_v6  ;;  %v6761_v6 = vld [vmem:[%s9182_s19 + $0x764] sm:$0xf0] }
 0x198   : > { %5102 = vmatpush.bf16.msrb.mxu2 %v7844_v13  ;;  %5089 = vmatpush.bf16.msrb.mxu1 %v6980_v56  ;;  %v6764_v0 = vor.u32 %v8681_v49, %v6761_v6  ;;  %v9073_v13 = vld [vmem:[%s9182_s19 + $0x1338] sm:$0xf0]  ;;  %v7091_v56 = vld [vmem:[%s9182_s19 + $0x988] sm:$0xf] }
 0x199   : > { %v8533_v49 = vld [vmem:[%s9182_s19 + $0x258] sm:$0xf0] }
 0x19a   : > { %5077 = vmatpush.bf16.msrb.mxu0 %v6008_v15  ;;  %v6444_v15 = vor.u32 %v8614_v63, %v6443_v61  ;;  %v6875_v61 = vld [vmem:[%s9182_s19 + $0x7d8] sm:$0xf]  ;;  %v8722_v63 = vld [vmem:[%s9182_s19 + $0x840] sm:$0xf0] }
 0x19b   : > { %5051 = vmatpush.bf16.msra.mxu3 %v7732_v38  ;;  %v8388_v38 = vor.u32 %v9100_v59, %v8387_v34  ;;  %v10260_v34 = vld.sshfl [vmem:[#allocation1 + $0x18] sm:$0xff pattern:$0x73625140]  ;;  %v6984_v59 = vor.u32 %v8749_v42, %v6983_v41  ;;  %v8466_v41 = vld [vmem:[%s9182_s19 + $0x44] sm:$0xf] }
 0x19c   : > { %5103 = vmatpush.bf16.msrb.mxu2 %v7736_v28  ;;  %5090 = vmatpush.bf16.msrb.mxu1 %v6872_v43  ;;  %v4730_v28 = vadd.f32 %v10148_v20, %v4717_v44  ;;  %v5905_v42 = vld [vmem:[%s9182_s19 + $0xac] sm:$0xf0] }
 0x19e   : > { %5078 = vmatpush.bf16.msrb.mxu0 %v5900_v29  ;;  %v6227_v29 = vld [vmem:[%s9182_s19 + $0x2c8] sm:$0xf]  ;;  %v10252_v39 = vpop.f32.mrf.mxu1  ;;  %v4796_v1 = vpop.f32.mrf.mxu0  ;;  %v4743_v43 = vadd.f32 %v10159_v31, %v4730_v28  ;;  %v6229_v31 = vld [vmem:[%s9182_s19 + $0x334] sm:$0xf0] }
 0x19f   : > { %5052 = vmatpush.bf16.msra.mxu3 %v7624_v8  ;;  %v8280_v8 = vor.u32 %v9073_v13, %v8279_v11  ;;  %v6228_v58 = vor.u32 %v8560_v26, %v6227_v29  ;;  %v6232_v37 = vor.u32 %v8547_v51, %v6229_v31  ;;  %v8520_v11 = vld [vmem:[%s9182_s19 + $0x1f4] sm:$0xf]  ;;  %v6013_v28 = vld [vmem:[%s9182_s19 + $0x184] sm:$0xf0]  ;;  %v7739_v29 = vld [vmem:[%s9182_s19 + $0xe98] sm:$0xf] }
 0x1a0   : > { %5104 = vmatpush.bf16.msrb.mxu2 %v7628_v10  ;;  %5091 = vmatpush.bf16.msrb.mxu1 %v6764_v0  ;;  %v6119_v10 = vld [vmem:[%s9182_s19 + $0x1f0] sm:$0xf]  ;;  %v4756_v21 = vadd.f32 %v10137_v5, %v4743_v43  ;;  %v8938_v26 = vld [vmem:[%s9182_s19 + $0xf00] sm:$0xf0]  ;;  %v7631_v43 = vld [vmem:[%s9182_s19 + $0xdc0] sm:$0xf] }
 0x1a1   : > { %5079 = vmatmul.bf16.vlgmr.msrb.gmra.mxu0 %v9958_v52  ;;  %v7199_v52 = vld [vmem:[%s9182_s19 + $0xa60] sm:$0xf]  ;;  %v4781_v18 = vpop.f32.mrf.mxu3  ;;  %v6120_v62 = vor.u32 %v8533_v49, %v6119_v10  ;;  %v7847_v5 = vld [vmem:[%s9182_s19 + $0xf70] sm:$0xf]  ;;  %v7740_v1 = vor.u32 %v8938_v26, %v7739_v29  ;;  %v8173_v31 = vld [vmem:[%s9182_s19 + $0x1264] sm:$0xf0] }
 0x1a2   : > { %5053 = vmatmul.bf16.vlgmr.msra.gmra.mxu3 %v9948_v57  ;;  %5136 = vmatpush.bf16.msra.mxu0 %v7524_v40  ;;  %v7200_v22 = vor.u32 %v8803_v17, %v7199_v52  ;;  %v8172_v40 = vor.u32 %v9046_v36, %v8171_v53  ;;  %v10270_v0 = vpop.f32.mrf.mxu2  ;;  %v8965_v52 = vld [vmem:[%s9182_s19 + $0xfd8] sm:$0xf0]  ;;  %v8871_v53 = vld [vmem:[%s9182_s19 + $0xcec] sm:$0xf]  ;;  %v7525_v36 = vld [vmem:[%s9182_s19 + $0xd54] sm:$0xf0] }
 0x1a3   : > { %5117 = vmatpush.bf16.msrb.mxu3 %v4256_v25  ;;  %5105 = vmatmul.bf16.vlgmr.msrb.gmra.mxu2 %v9948_v57  ;;  %v4769_v57 = vadd.f32 %v10183_v7, %v9663_v14  ;;  %v8776_v25 = vld [vmem:[%s9182_s19 + $0x9f0] sm:$0xf0]  ;;  %v8574_v7 = vld [vmem:[%s9182_s19 + $0x3a4] sm:$0xf]  ;;  %v6451_v29 = vld [vmem:[%s9182_s19 + $0x480] sm:$0xf] }
 0x1a4   : > { %5169 = vmatpush.bf16.msra.mxu2 %v4259_v60  ;;  %5149 = vmatpush.bf16.msra.mxu1 %v8388_v38  ;;  %v7092_v32 = vor.u32 %v8776_v25, %v7091_v56  ;;  %v8992_v60 = vld [vmem:[%s9182_s19 + $0x10b0] sm:$0xf0]  ;;  %v8506_v38 = vld [vmem:[%s9182_s19 + $0x180] sm:$0xf0]  ;;  %v8493_v56 = vld [vmem:[%s9182_s19 + $0x11c] sm:$0xf] }
 0x1a5   : > { %5092 = vmatmul.bf16.vlgmr.msrb.gmra.mxu1 %v9970_v9  ;;  %v6337_v9 = vld [vmem:[%s9182_s19 + $0x40c] sm:$0xf0]  ;;  %v4782_v20 = vadd.f32 %v4781_v18, %v4769_v57  ;;  %v2873_v18 = vunpack.c.h.b16 %v10188_v54  ;;  %v8911_v54 = vld [vmem:[%s9182_s19 + $0xe28] sm:$0xf0] }
 0x1a6   : > { %5137 = vmatpush.bf16.msra.mxu0 %v7416_v46  ;;  %v6340_v12 = vor.u32 %v8574_v7, %v6337_v9  ;;  %v4822_v17 = vpop.f32.mrf.mxu1  ;;  %v9060_v9 = vld [vmem:[%s9182_s19 + $0x12d4] sm:$0xf]  ;;  %v8615_v26 = vld [vmem:[%s9182_s19 + $0x4e8] sm:$0xf0] }
 0x1a7   : > { %5123 = vmatpush.bf16.msra.mxu3 %v6660_v45  ;;  %v9019_v45 = vld [vmem:[%s9182_s19 + $0x1188] sm:$0xf0]  ;;  %v4795_v6 = vadd.f32 %v4794_v16, %v4782_v20  ;;  %v6121_v16 = vld [vmem:[%s9182_s19 + $0x25c] sm:$0xf0] }
 0x1a8   : > { %5175 = vmatpush.bf16.msrb.mxu2 %v6664_v3  ;;  %5150 = vmatpush.bf16.msra.mxu1 %v8280_v8  ;;  %v8064_v46 = vor.u32 %v9019_v45, %v8063_v35  ;;  %v6011_v3 = vld [vmem:[%s9182_s19 + $0x118] sm:$0xf]  ;;  %v6767_v8 = vld [vmem:[%s9182_s19 + $0x700] sm:$0xf]  ;;  %v6124_v57 = vor.u32 %v8520_v11, %v6121_v16  ;;  %v8844_v45 = vld [vmem:[%s9182_s19 + $0xc14] sm:$0xf] }
 0x1a9   : > { %v4808_v19 = vadd.f32 %v10206_v33, %v4795_v6  ;;  %v4783_v13 = vpop.f32.mrf.mxu3  ;;  %v6012_v55 = vor.u32 %v8506_v38, %v6011_v3  ;;  %v6768_v25 = vor.u32 %v8695_v27, %v6767_v8  ;;  %v8281_v35 = vld [vmem:[%s9182_s19 + $0x133c] sm:$0xf0]  ;;  %v7531_v6 = vld [vmem:[%s9182_s19 + $0xcf0] sm:$0xf]  ;;  %v8669_v38 = vld [vmem:[%s9182_s19 + $0x698] sm:$0xf0] }
 0x1aa   : > { %5138 = vmatpush.bf16.msra.mxu0 %v7308_v50  ;;  %v4835_v7 = vpop.f32.mrf.mxu2  ;;  %v7417_v20 = vld [vmem:[%s9182_s19 + $0xc7c] sm:$0xf0]  ;;  %v8284_v10 = vor.u32 %v9060_v9, %v8281_v35  ;;  %v6667_v3 = vld [vmem:[%s9182_s19 + $0x630] sm:$0xf]  ;;  %v8858_v11 = vld [vmem:[%s9182_s19 + $0xc80] sm:$0xf0] }
 0x1ab   : > { %5124 = vmatpush.bf16.msra.mxu3 %v6552_v48  ;;  %v7955_v48 = vld [vmem:[%s9182_s19 + $0x1048] sm:$0xf]  ;;  %v5725_v50 = vrot.slane %v4808_v19, 4  ;;  %v7420_v51 = vor.u32 %v8844_v45, %v7417_v20  ;;  %v5908_v19 = vor.u32 %v8466_v41, %v5905_v42  ;;  %v8790_v16 = vld [vmem:[%s9182_s19 + $0xa64] sm:$0xf] }
 0x1ac   : > { %5176 = vmatpush.bf16.msrb.mxu2 %v6556_v2  ;;  %5151 = vmatpush.bf16.msra.mxu1 %v8172_v40  ;;  %v7956_v33 = vor.u32 %v8992_v60, %v7955_v48  ;;  %v10282_v2 = vpop.f32.mrf.mxu0  ;;  %v8817_v48 = vld [vmem:[%s9182_s19 + $0xb3c] sm:$0xf]  ;;  %v7309_v60 = vld [vmem:[%s9182_s19 + $0xba4] sm:$0xf0]  ;;  %v7315_v27 = vld [vmem:[%s9182_s19 + $0xb40] sm:$0xf] }
 0x1ad   : > { %v5738_v44 = vsel %vm4209_vm0, %v4756_v21, %v5725_v50  ;;  %v10317_v21 = vld.sshfl [vmem:[#allocation1 + $0x8] sm:$0xff pattern:$0x73625140]  ;;  %v7312_v13 = vor.u32 %v8817_v48, %v7309_v60  ;;  %v8952_v35 = vld [vmem:[%s9182_s19 + $0xf74] sm:$0xf] }
 0x1ae   : > { %5139 = vmatpush.bf16.msra.mxu0 %v7200_v22  ;;  %5764 = vst [vmem:[%s9714_s25 + $0x20] sm:$0x77] %v5738_v44  ;;  %v9087_v22 = vld [vmem:[%s9182_s19 + $0x13ac] sm:$0xf]  ;;  %v6559_v44 = vld [vmem:[%s9182_s19 + $0x558] sm:$0xf] }
 0x1af   : > { %5125 = vmatpush.bf16.msra.mxu3 %v6444_v15  ;;  %v6876_v15 = vor.u32 %v8722_v63, %v6875_v61  ;;  %v8392_v40 = vor.u32 %v9087_v22, %v8389_v23  ;;  %v10312_v63 = vld.sshfl [vmem:[#allocation1] sm:$0xff pattern:$0x73625140]  ;;  %v8831_v22 = vld [vmem:[%s9182_s19 + $0xba8] sm:$0xf0] }
 0x1b0   : > { %5177 = vmatpush.bf16.msrb.mxu2 %v6448_v30  ;;  %5152 = vmatpush.bf16.msra.mxu1 %v8064_v46  ;;  %v5904_v30 = vor.u32 %v8479_v47, %v5903_v4  ;;  %v3548_v46 = vpack.c.b16 %v2873_v18, %v2873_v18  ;;  %v9006_v4 = vld [vmem:[%s9182_s19 + $0x1124] sm:$0xf]  ;;  %v7207_v18 = vld [vmem:[%s9182_s19 + $0xa68] sm:$0xf]  ;;  %v7849_v45 = vld [vmem:[%s9182_s19 + $0xfdc] sm:$0xf0] }
 0x1b1   : > { %v8736_v20 = vld [vmem:[%s9182_s19 + $0x8b4] sm:$0xf]  ;;  %v6343_v42 = vld [vmem:[%s9182_s19 + $0x3a8] sm:$0xf]  ;;  %v8709_v60 = vld [vmem:[%s9182_s19 + $0x7dc] sm:$0xf] }
 0x1b2   : > { %8444 = vmatmul.msk.bf16.vlgmr.msrb.gmra.mxu3 %vm4206_vm1, %v10260_v34  ;;  %5140 = vmatpush.bf16.msra.mxu0 %v7092_v32  ;;  %v7528_v32 = vor.u32 %v8871_v53, %v7525_v36  ;;  %v10331_v53 = vld.sshfl [vmem:[#allocation1 + $0x10] sm:$0xff pattern:$0x73625140]  ;;  %v8979_v36 = vld [vmem:[%s9182_s19 + $0x104c] sm:$0xf] }
 0x1b3   : > { %5126 = vmatpush.bf16.msra.mxu3 %v6336_v24  ;;  %8445 = vmatmul.msk.bf16.vlgmr.msra.gmra.mxu2 %vm4206_vm1, %v10260_v34  ;;  %v7848_v24 = vor.u32 %v8965_v52, %v7847_v5  ;;  %v7201_v5 = vld [vmem:[%s9182_s19 + $0xacc] sm:$0xf0]  ;;  %v6668_v52 = vor.u32 %v8669_v38, %v6667_v3  ;;  %v7741_v48 = vld [vmem:[%s9182_s19 + $0xf04] sm:$0xf0]  ;;  %v4821_v3 = vadd.f32 %v10252_v39, %v9663_v14  ;;  %v8898_v39 = vld [vmem:[%s9182_s19 + $0xdc4] sm:$0xf] }
 0x1b4   : > { %5178 = vmatpush.bf16.msrb.mxu2 %v6340_v12  ;;  %5153 = vmatpush.bf16.msra.mxu1 %v7956_v33  ;;  %v4861_v49 = vpop.f32.mrf.mxu0  ;;  %v8885_v12 = vld [vmem:[%s9182_s19 + $0xd58] sm:$0xf0]  ;;  %v7423_v33 = vld [vmem:[%s9182_s19 + $0xc18] sm:$0xf]  ;;  %v7204_v23 = vor.u32 %v8790_v16, %v7201_v5 }
 0x1b5   : > { %v7532_v61 = vor.u32 %v8885_v12, %v7531_v6  ;;  %v7424_v17 = vor.u32 %v8858_v11, %v7423_v33  ;;  %v7099_v49 = vld [vmem:[%s9182_s19 + $0x990] sm:$0xf]  ;;  %v8777_v6 = vld [vmem:[%s9182_s19 + $0x9f8] sm:$0xf0] }
 0x1b6   : > { %5141 = vmatpush.bf16.msra.mxu0 %v6984_v59  ;;  %v9033_v59 = vld [vmem:[%s9182_s19 + $0x11fc] sm:$0xf]  ;;  %v7100_v38 = vor.u32 %v8777_v6, %v7099_v49  ;;  %v9088_v49 = vld [vmem:[%s9182_s19 + $0x13b4] sm:$0xf] }
 0x1b7   : > { %5127 = vmatpush.bf16.msra.mxu3 %v6228_v58  ;;  %v6016_v58 = vor.u32 %v8493_v56, %v6013_v28  ;;  %v8176_v50 = vor.u32 %v9033_v59, %v8173_v31  ;;  %v7093_v56 = vld [vmem:[%s9182_s19 + $0x9f4] sm:$0xf0]  ;;  %v7316_v28 = vor.u32 %v8831_v22, %v7315_v27  ;;  %v8925_v31 = vld [vmem:[%s9182_s19 + $0xe9c] sm:$0xf]  ;;  %v4834_v27 = vadd.f32 %v10270_v0, %v4821_v3  ;;  %v8480_v3 = vld [vmem:[%s9182_s19 + $0xb0] sm:$0xf0] }
 0x1b8   : > { %5179 = vmatpush.bf16.msrb.mxu2 %v6232_v37  ;;  %5154 = vmatpush.bf16.msra.mxu1 %v7848_v24  ;;  %v4262_v37 = vsel %vm4209_vm0, %v3548_v46, 0  ;;  %v8763_v24 = vld [vmem:[%s9182_s19 + $0x98c] sm:$0xf]  ;;  %v7744_v11 = vor.u32 %v8925_v31, %v7741_v48  ;;  %v9101_v22 = vld [vmem:[%s9182_s19 + $0x1418] sm:$0xf0] }
 0x1b9   : > { %v7096_v9 = vor.u32 %v8763_v24, %v7093_v56  ;;  %v6883_v56 = vld [vmem:[%s9182_s19 + $0x7e0] sm:$0xf]  ;;  %v9047_v31 = vld [vmem:[%s9182_s19 + $0x1268] sm:$0xf0] }
 0x1ba   : > { %5142 = vmatpush.bf16.msra.mxu0 %v6876_v15  ;;  %v8065_v15 = vld [vmem:[%s9182_s19 + $0x118c] sm:$0xf0] }
 0x1bb   : > { %5128 = vmatpush.bf16.msra.mxu3 %v6120_v62  ;;  %v7632_v62 = vor.u32 %v8911_v54, %v7631_v43  ;;  %v8068_v47 = vor.u32 %v9006_v4, %v8065_v15  ;;  %v8588_v43 = vld [vmem:[%s9182_s19 + $0x410] sm:$0xf0]  ;;  %v10352_v54 = vld [vmem:[%s9182_s19 + $0x1488] sm:$0xff]  ;;  %v8750_v4 = vld [vmem:[%s9182_s19 + $0x920] sm:$0xf0] }
 0x1bc   : > { %5180 = vmatpush.bf16.msrb.mxu2 %v6124_v57  ;;  %5155 = vmatpush.bf16.msra.mxu1 %v7740_v1  ;;  %v4872_v8 = vpop.f32.mrf.mxu0  ;;  %v7957_v57 = vld [vmem:[%s9182_s19 + $0x10b4] sm:$0xf0]  ;;  %v6452_v1 = vor.u32 %v8615_v26, %v6451_v29  ;;  %v8656_v26 = vld [vmem:[%s9182_s19 + $0x634] sm:$0xf] }
 0x1bd   : > { %v7960_v7 = vor.u32 %v8979_v36, %v7957_v57  ;;  %v6127_v36 = vld [vmem:[%s9182_s19 + $0x1f8] sm:$0xf]  ;;  %v8534_v57 = vld [vmem:[%s9182_s19 + $0x260] sm:$0xf0] }
 0x1be   : > { %5143 = vmatpush.bf16.msra.mxu0 %v6768_v25 }
 0x1bf   : > { %5129 = vmatpush.bf16.msra.mxu3 %v6012_v55  ;;  %v8642_v55 = vld [vmem:[%s9182_s19 + $0x5c0] sm:$0xf0] }
 0x1c0   : > { %5181 = vmatpush.bf16.msrb.mxu2 %v6016_v58  ;;  %5156 = vmatpush.bf16.msra.mxu1 %v7632_v62  ;;  %v6560_v25 = vor.u32 %v8642_v55, %v6559_v44  ;;  %v6985_v58 = vld [vmem:[%s9182_s19 + $0x91c] sm:$0xf0]  ;;  %v6344_v62 = vor.u32 %v8588_v43, %v6343_v42  ;;  %v6769_v44 = vld [vmem:[%s9182_s19 + $0x76c] sm:$0xf0]  ;;  %v6775_v43 = vld [vmem:[%s9182_s19 + $0x708] sm:$0xf] }
 0x1c1   : > { %5144 = vmatmul.bf16.vlgmr.msra.gmra.mxu0 %v10317_v21  ;;  %v6988_v46 = vor.u32 %v8736_v20, %v6985_v58  ;;  %v8395_v55 = vld [vmem:[%s9182_s19 + $0x13b0] sm:$0xf]  ;;  %v6019_v58 = vld [vmem:[%s9182_s19 + $0x120] sm:$0xf] }
 0x1c2   : > { %5201 = vmatpush.bf16.msrb.mxu0 %v8392_v40  ;;  %v4885_v40 = vpop.f32.mrf.mxu1  ;;  %v4898_v59 = vpop.f32.mrf.mxu2  ;;  %v8396_v0 = vor.u32 %v9101_v22, %v8395_v55  ;;  %v7425_v22 = vld [vmem:[%s9182_s19 + $0xc84] sm:$0xf0] }
 0x1c3   : > { %5130 = vmatpush.bf16.msra.mxu3 %v5904_v30  ;;  %5157 = vmatmul.bf16.vlgmr.msra.gmra.mxu1 %v10331_v53  ;;  %v10341_v30 = vpop.f32.mrf.mxu3 }
 0x1c4   : > { %5182 = vmatpush.bf16.msrb.mxu2 %v5908_v19  ;;  %5221 = vmatpush.bf16.msrb.mxu1 %v4262_v37  ;;  %v4874_v12 = vpop.f32.mrf.mxu0  ;;  %v6877_v19 = vld [vmem:[%s9182_s19 + $0x844] sm:$0xf0]  ;;  %v8561_v37 = vld [vmem:[%s9182_s19 + $0x338] sm:$0xf0] }
 0x1c5   : > { %v6880_v5 = vor.u32 %v8709_v60, %v6877_v19  ;;  %v8629_v12 = vld [vmem:[%s9182_s19 + $0x55c] sm:$0xf] }
 0x1c6   : > { %5131 = vmatmul.bf16.vlgmr.msra.gmra.mxu3 %v10312_v63  ;;  %5202 = vmatpush.bf16.msrb.mxu0 %v8284_v10  ;;  %v7852_v10 = vor.u32 %v8952_v35, %v7849_v45  ;;  %v4847_v35 = vadd.f32 %v10341_v30, %v4834_v27  ;;  %v9074_v45 = vld [vmem:[%s9182_s19 + $0x1340] sm:$0xf0]  ;;  %v8397_v30 = vld [vmem:[%s9182_s19 + $0x141c] sm:$0xf0]  ;;  %v8845_v27 = vld [vmem:[%s9182_s19 + $0xc1c] sm:$0xf] }
 0x1c7   : > { %5188 = vmatpush.bf16.msrb.mxu3 %v7528_v32  ;;  %5183 = vmatmul.bf16.vlgmr.msrb.gmra.mxu2 %v10312_v63  ;;  %v8804_v32 = vld [vmem:[%s9182_s19 + $0xad0] sm:$0xf0] }
 0x1c8   : > { %5240 = vmatpush.bf16.msra.mxu2 %v7532_v61  ;;  %5227 = vmatpush.bf16.msra.mxu1 %v6668_v52  ;;  %v7208_v41 = vor.u32 %v8804_v32, %v7207_v18  ;;  %v2874_v61 = vunpack.c.l.b16 %v10352_v54  ;;  %v7633_v52 = vld [vmem:[%s9182_s19 + $0xe2c] sm:$0xf0]  ;;  %v8287_v18 = vld [vmem:[%s9182_s19 + $0x12d8] sm:$0xf]  ;;  %v6128_v32 = vor.u32 %v8534_v57, %v6127_v36  ;;  %v4860_v60 = vadd.f32 %v10282_v2, %v4847_v35  ;;  %v9061_v2 = vld [vmem:[%s9182_s19 + $0x12dc] sm:$0xf] }
 0x1c9   : > { %v7636_v24 = vor.u32 %v8898_v39, %v7633_v52  ;;  %v8071_v39 = vld [vmem:[%s9182_s19 + $0x1128] sm:$0xf]  ;;  %v9020_v52 = vld [vmem:[%s9182_s19 + $0x1190] sm:$0xf0]  ;;  %v8181_v36 = vld [vmem:[%s9182_s19 + $0x126c] sm:$0xf0] }
 0x1ca   : > { %5203 = vmatpush.bf16.msrb.mxu0 %v8176_v50  ;;  %v6235_v50 = vld [vmem:[%s9182_s19 + $0x2d0] sm:$0xf]  ;;  %v4887_v15 = vpop.f32.mrf.mxu1  ;;  %v8575_v57 = vld [vmem:[%s9182_s19 + $0x3ac] sm:$0xf]  ;;  %v8548_v35 = vld [vmem:[%s9182_s19 + $0x2d4] sm:$0xf] }
 0x1cb   : > { %5189 = vmatpush.bf16.msrb.mxu3 %v7420_v51  ;;  %v4873_v51 = vadd.f32 %v4872_v8, %v9663_v14  ;;  %v4848_v33 = vpop.f32.mrf.mxu3  ;;  %v3549_v8 = vpack.c.b16 %v2874_v61, %v2874_v61  ;;  %v5911_v61 = vld [vmem:[%s9182_s19 + $0x48] sm:$0xf]  ;;  %v6453_v15 = vld [vmem:[%s9182_s19 + $0x4ec] sm:$0xf0] }
 0x1cc   : > { %5241 = vmatpush.bf16.msra.mxu2 %v7424_v17  ;;  %5228 = vmatpush.bf16.msra.mxu1 %v6560_v25  ;;  %v8682_v17 = vld [vmem:[%s9182_s19 + $0x704] sm:$0xf]  ;;  %v8723_v25 = vld [vmem:[%s9182_s19 + $0x848] sm:$0xf0]  ;;  %v7533_v33 = vld [vmem:[%s9182_s19 + $0xd5c] sm:$0xf0] }
 0x1cd   : > { %v4886_v16 = vadd.f32 %v4885_v40, %v4873_v51  ;;  %v6772_v29 = vor.u32 %v8682_v17, %v6769_v44  ;;  %v6669_v40 = vld [vmem:[%s9182_s19 + $0x69c] sm:$0xf0]  ;;  %v6884_v20 = vor.u32 %v8723_v25, %v6883_v56  ;;  %v8288_v51 = vor.u32 %v9074_v45, %v8287_v18  ;;  %v7317_v18 = vld [vmem:[%s9182_s19 + $0xbac] sm:$0xf0] }
 0x1ce   : > { %5204 = vmatpush.bf16.msrb.mxu0 %v8068_v47  ;;  %v6236_v47 = vor.u32 %v8561_v37, %v6235_v50  ;;  %v6672_v42 = vor.u32 %v8656_v26, %v6669_v40  ;;  %v8872_v37 = vld [vmem:[%s9182_s19 + $0xcf4] sm:$0xf]  ;;  %v8072_v25 = vor.u32 %v9020_v52, %v8071_v39  ;;  %v7428_v26 = vor.u32 %v8845_v27, %v7425_v22  ;;  %v6237_v45 = vld [vmem:[%s9182_s19 + $0x33c] sm:$0xf0]  ;;  %v6993_v27 = vld [vmem:[%s9182_s19 + $0x924] sm:$0xf0] }
 0x1cf   : > { %5190 = vmatpush.bf16.msrb.mxu3 %v7312_v13  ;;  %v6991_v13 = vld [vmem:[%s9182_s19 + $0x8b8] sm:$0xf]  ;;  %v7536_v17 = vor.u32 %v8872_v37, %v7533_v33  ;;  %v8764_v37 = vld [vmem:[%s9182_s19 + $0x994] sm:$0xf]  ;;  %v7101_v33 = vld [vmem:[%s9182_s19 + $0x9fc] sm:$0xf0] }
 0x1d0   : > { %5242 = vmatpush.bf16.msra.mxu2 %v7316_v28  ;;  %5229 = vmatpush.bf16.msra.mxu1 %v6452_v1  ;;  %v4899_v28 = vadd.f32 %v4898_v59, %v4886_v16  ;;  %v8507_v1 = vld [vmem:[%s9182_s19 + $0x188] sm:$0xf0]  ;;  %v8179_v59 = vld [vmem:[%s9182_s19 + $0x1200] sm:$0xf]  ;;  %v7104_v39 = vor.u32 %v8764_v37, %v7101_v33  ;;  %v10458_v52 = vld [vmem:[%s9182_s19 + $0x1490] sm:$0xff] }
 0x1d1   : > { %v6020_v48 = vor.u32 %v8507_v1, %v6019_v58  ;;  %v8180_v16 = vor.u32 %v9047_v31, %v8179_v59  ;;  %v7855_v58 = vld [vmem:[%s9182_s19 + $0xf78] sm:$0xf]  ;;  %v8966_v1 = vld [vmem:[%s9182_s19 + $0xfe0] sm:$0xf0]  ;;  %v8521_v59 = vld [vmem:[%s9182_s19 + $0x1fc] sm:$0xf] }
 0x1d2   : > { %5205 = vmatpush.bf16.msrb.mxu0 %v7960_v7  ;;  %v4900_v7 = vpop.f32.mrf.mxu2  ;;  %v6129_v31 = vld [vmem:[%s9182_s19 + $0x264] sm:$0xf0]  ;;  %v8926_v22 = vld [vmem:[%s9182_s19 + $0xea4] sm:$0xf] }
 0x1d3   : > { %5191 = vmatpush.bf16.msrb.mxu3 %v7204_v23  ;;  %v6992_v23 = vor.u32 %v8750_v4, %v6991_v13  ;;  %8446 = vmatmul.msk.bf16.vlgmr.msrb.gmra.mxu1 %vm4206_vm1, %v10260_v34  ;;  %v8289_v13 = vld [vmem:[%s9182_s19 + $0x1344] sm:$0xf0]  ;;  %v8602_v4 = vld [vmem:[%s9182_s19 + $0x484] sm:$0xf] }
 0x1d4   : > { %5243 = vmatpush.bf16.msra.mxu2 %v7208_v41  ;;  %5230 = vmatpush.bf16.msra.mxu1 %v6344_v62  ;;  %v4911_v41 = vpop.f32.mrf.mxu3 }
 0x1d5   : > { %v4912_v6 = vadd.f32 %v4911_v41, %v4899_v28  ;;  %v7963_v28 = vld [vmem:[%s9182_s19 + $0x1050] sm:$0xf] }
 0x1d6   : > { %5206 = vmatpush.bf16.msrb.mxu0 %v7852_v10  ;;  %v8696_v10 = vld [vmem:[%s9182_s19 + $0x770] sm:$0xf0] }
 0x1d7   : > { %5192 = vmatpush.bf16.msrb.mxu3 %v7096_v9  ;;  %v4265_v9 = vsel %vm4209_vm0, %v3549_v8, 0  ;;  %v5726_v19 = vrot.slane %v4912_v6, 4  ;;  %v6776_v62 = vor.u32 %v8696_v10, %v6775_v43  ;;  %v6456_v8 = vor.u32 %v8602_v4, %v6453_v15  ;;  %v8791_v6 = vld [vmem:[%s9182_s19 + $0xa6c] sm:$0xf]  ;;  %v6021_v4 = vld [vmem:[%s9182_s19 + $0x18c] sm:$0xf0] }
 0x1d8   : > { %5244 = vmatpush.bf16.msra.mxu2 %v7100_v38  ;;  %5231 = vmatpush.bf16.msra.mxu1 %v6236_v47  ;;  %v8400_v38 = vor.u32 %v9088_v49, %v8397_v30  ;;  %v8292_v47 = vor.u32 %v9061_v2, %v8289_v13  ;;  %v6240_v49 = vor.u32 %v8548_v35, %v6237_v45  ;;  %v7209_v30 = vld [vmem:[%s9182_s19 + $0xad4] sm:$0xf0]  ;;  %v8953_v2 = vld [vmem:[%s9182_s19 + $0xf7c] sm:$0xf]  ;;  %v8494_v13 = vld [vmem:[%s9182_s19 + $0x124] sm:$0xf] }
 0x1d9   : > { %v8710_v45 = vld [vmem:[%s9182_s19 + $0x7e4] sm:$0xf] }
 0x1da   : > { %5207 = vmatpush.bf16.msrb.mxu0 %v7744_v11  ;;  %v5739_v11 = vsel %vm4209_vm0, %v4860_v60, %v5726_v19  ;;  %v10412_v44 = vpop.f32.mrf.mxu2  ;;  %v10420_v56 = vpop.f32.mrf.mxu0  ;;  %v7856_v60 = vor.u32 %v8966_v1, %v7855_v58  ;;  %v7747_v19 = vld [vmem:[%s9182_s19 + $0xea0] sm:$0xf]  ;;  %v8899_v1 = vld [vmem:[%s9182_s19 + $0xdcc] sm:$0xf] }
 0x1db   : > { %5193 = vmatpush.bf16.msrb.mxu3 %v6988_v46  ;;  %v6561_v46 = vld [vmem:[%s9182_s19 + $0x5c4] sm:$0xf0]  ;;  %5765 = vst [vmem:[%s9714_s25 + $0x28] sm:$0x77] %v5739_v11 }
 0x1dc   : > { %5245 = vmatpush.bf16.msra.mxu2 %v6992_v23  ;;  %5232 = vmatpush.bf16.msra.mxu1 %v6128_v32  ;;  %v6564_v50 = vor.u32 %v8629_v12, %v6561_v46  ;;  %v4913_v55 = vpop.f32.mrf.mxu3  ;;  %v9034_v23 = vld [vmem:[%s9182_s19 + $0x1204] sm:$0xf]  ;;  %v9007_v32 = vld [vmem:[%s9182_s19 + $0x112c] sm:$0xf]  ;;  %v8980_v12 = vld [vmem:[%s9182_s19 + $0x1054] sm:$0xf]  ;;  %v10439_v46 = vpop.f32.mrf.mxu1 }
 0x1dd   : > { %v8184_v40 = vor.u32 %v9034_v23, %v8181_v36  ;;  %v7857_v11 = vld [vmem:[%s9182_s19 + $0xfe4] sm:$0xf0]  ;;  %v7749_v36 = vld [vmem:[%s9182_s19 + $0xf0c] sm:$0xf0] }
 0x1de   : > { %5208 = vmatpush.bf16.msrb.mxu0 %v7636_v24  ;;  %v6345_v24 = vld [vmem:[%s9182_s19 + $0x414] sm:$0xf0] }
 0x1df   : > { %5194 = vmatpush.bf16.msrb.mxu3 %v6880_v5  ;;  %v5912_v5 = vor.u32 %v8480_v3, %v5911_v61  ;;  %v6348_v7 = vor.u32 %v8575_v57, %v6345_v24  ;;  %v7212_v61 = vor.u32 %v8791_v6, %v7209_v30  ;;  %v8467_v57 = vld [vmem:[%s9182_s19 + $0x4c] sm:$0xf]  ;;  %v5913_v24 = vld [vmem:[%s9182_s19 + $0xb4] sm:$0xf0]  ;;  %v6567_v30 = vld [vmem:[%s9182_s19 + $0x560] sm:$0xf] }
 0x1e0   : > { %5246 = vmatpush.bf16.msra.mxu2 %v6884_v20  ;;  %5233 = vmatpush.bf16.msra.mxu1 %v6020_v48  ;;  %v5916_v35 = vor.u32 %v8467_v57, %v5913_v24  ;;  %v6351_v57 = vld [vmem:[%s9182_s19 + $0x3b0] sm:$0xf]  ;;  %v8589_v24 = vld [vmem:[%s9182_s19 + $0x418] sm:$0xf0] }
 0x1e1   : > { %5209 = vmatmul.bf16.vlgmr.msrb.gmra.mxu0 %v10331_v53 }
 0x1e2   : > { %5273 = vmatpush.bf16.msra.mxu0 %v4265_v9  ;;  %v8073_v9 = vld [vmem:[%s9182_s19 + $0x1194] sm:$0xf0]  ;;  %v4939_v48 = vpop.f32.mrf.mxu0 }
 0x1e3   : > { %5195 = vmatpush.bf16.msrb.mxu3 %v6772_v29  ;;  %v8993_v29 = vld [vmem:[%s9182_s19 + $0x10b8] sm:$0xf0]  ;;  %v8076_v43 = vor.u32 %v9007_v32, %v8073_v9  ;;  %v7752_v9 = vor.u32 %v8926_v22, %v7749_v36  ;;  %v6777_v48 = vld [vmem:[%s9182_s19 + $0x774] sm:$0xf0]  ;;  %v7215_v22 = vld [vmem:[%s9182_s19 + $0xa70] sm:$0xf] }
 0x1e4   : > { %5247 = vmatpush.bf16.msra.mxu2 %v6776_v62  ;;  %5234 = vmatpush.bf16.msra.mxu1 %v5912_v5  ;;  %v7964_v20 = vor.u32 %v8993_v29, %v7963_v28  ;;  %v8939_v62 = vld [vmem:[%s9182_s19 + $0xf08] sm:$0xf0]  ;;  %v8912_v5 = vld [vmem:[%s9182_s19 + $0xe30] sm:$0xf0]  ;;  %v4952_v23 = vpop.f32.mrf.mxu1  ;;  %v7539_v29 = vld [vmem:[%s9182_s19 + $0xcf8] sm:$0xf] }
 0x1e5   : > { %v10434_v10 = vpop.f32.mrf.mxu3  ;;  %v7748_v15 = vor.u32 %v8939_v62, %v7747_v19  ;;  %v8805_v23 = vld [vmem:[%s9182_s19 + $0xad8] sm:$0xf0] }
 0x1e6   : > { %5196 = vmatmul.bf16.vlgmr.msrb.gmra.mxu3 %v10317_v21  ;;  %5279 = vmatpush.bf16.msrb.mxu0 %v6672_v42  ;;  %v4965_v42 = vpop.f32.mrf.mxu2  ;;  %v4925_v36 = vadd.f32 %v10434_v10, %v9663_v14  ;;  %v8187_v10 = vld [vmem:[%s9182_s19 + $0x1208] sm:$0xf] }
 0x1e7   : > { %5253 = vmatpush.bf16.msra.mxu3 %v8396_v0  ;;  %5248 = vmatmul.bf16.vlgmr.msra.gmra.mxu2 %v10317_v21  ;;  %v8818_v0 = vld [vmem:[%s9182_s19 + $0xb44] sm:$0xf] }
 0x1e8   : > { %5305 = vmatpush.bf16.msrb.mxu2 %v8400_v38  ;;  %5292 = vmatpush.bf16.msrb.mxu1 %v7536_v17  ;;  %v7320_v41 = vor.u32 %v8818_v0, %v7317_v18  ;;  %v6132_v38 = vor.u32 %v8521_v59, %v6129_v31  ;;  %v7860_v17 = vor.u32 %v8953_v2, %v7857_v11  ;;  %v8670_v0 = vld [vmem:[%s9182_s19 + $0x6a0] sm:$0xf0]  ;;  %v8683_v31 = vld [vmem:[%s9182_s19 + $0x70c] sm:$0xf]  ;;  %v7323_v2 = vld [vmem:[%s9182_s19 + $0xb48] sm:$0xf] }
 0x1e9   : > { %5235 = vmatmul.bf16.vlgmr.msra.gmra.mxu1 %v10312_v63  ;;  %v8832_v11 = vld [vmem:[%s9182_s19 + $0xbb0] sm:$0xf0] }
 0x1ea   : > { %5280 = vmatpush.bf16.msrb.mxu0 %v6564_v50  ;;  %v2875_v50 = vunpack.c.h.b16 %v10352_v54 }
 0x1eb   : > { %5254 = vmatpush.bf16.msra.mxu3 %v8288_v51  ;;  %v7965_v51 = vld [vmem:[%s9182_s19 + $0x10bc] sm:$0xf0] }
 0x1ec   : > { %5306 = vmatpush.bf16.msrb.mxu2 %v8292_v47  ;;  %5293 = vmatpush.bf16.msrb.mxu1 %v7428_v26  ;;  %v7968_v3 = vor.u32 %v8980_v12, %v7965_v51  ;;  %v3550_v54 = vpack.c.b16 %v2875_v50, %v2875_v50  ;;  %v6024_v47 = vor.u32 %v8494_v13, %v6021_v4  ;;  %v8886_v26 = vld [vmem:[%s9182_s19 + $0xd60] sm:$0xf0]  ;;  %v8643_v12 = vld [vmem:[%s9182_s19 + $0x5c8] sm:$0xf0]  ;;  %v10485_v19 = vpop.f32.mrf.mxu1  ;;  %v6459_v13 = vld [vmem:[%s9182_s19 + $0x488] sm:$0xf] }
 0x1ed   : > { %v4926_v55 = vpop.f32.mrf.mxu3  ;;  %v7540_v58 = vor.u32 %v8886_v26, %v7539_v29  ;;  %v6568_v37 = vor.u32 %v8643_v12, %v6567_v30  ;;  %v8616_v4 = vld [vmem:[%s9182_s19 + $0x4f0] sm:$0xf0]  ;;  %v8603_v26 = vld [vmem:[%s9182_s19 + $0x48c] sm:$0xf]  ;;  %v8079_v30 = vld [vmem:[%s9182_s19 + $0x1130] sm:$0xf] }
 0x1ee   : > { %5281 = vmatpush.bf16.msrb.mxu0 %v6456_v8  ;;  %v8737_v8 = vld [vmem:[%s9182_s19 + $0x8bc] sm:$0xf]  ;;  %v4268_v32 = vsel %vm4209_vm0, %v3550_v54, 0  ;;  %v7324_v54 = vor.u32 %v8832_v11, %v7323_v2  ;;  %v8295_v55 = vld [vmem:[%s9182_s19 + $0x12e0] sm:$0xf] }
 0x1ef   : > { %5255 = vmatpush.bf16.msra.mxu3 %v8180_v16  ;;  %v7639_v16 = vld [vmem:[%s9182_s19 + $0xdc8] sm:$0xf]  ;;  %v6996_v18 = vor.u32 %v8737_v8, %v6993_v27  ;;  %v6460_v8 = vor.u32 %v8616_v4, %v6459_v13  ;;  %v9021_v12 = vld [vmem:[%s9182_s19 + $0x1198] sm:$0xf0]  ;;  %v7971_v11 = vld [vmem:[%s9182_s19 + $0x1058] sm:$0xf] }
 0x1f0   : > { %5307 = vmatpush.bf16.msrb.mxu2 %v8184_v40  ;;  %5294 = vmatpush.bf16.msrb.mxu1 %v7320_v41  ;;  %v7640_v28 = vor.u32 %v8912_v5, %v7639_v16  ;;  %v2876_v40 = vunpack.c.l.b16 %v10458_v52  ;;  %v7641_v41 = vld [vmem:[%s9182_s19 + $0xe34] sm:$0xf0]  ;;  %v8994_v13 = vld [vmem:[%s9182_s19 + $0x10c0] sm:$0xf0] }
 0x1f1   : > { %8447 = vmatmul.msk.bf16.vlgmr.msra.gmra.mxu0 %vm4206_vm1, %v10260_v34  ;;  %v7644_v59 = vor.u32 %v8899_v1, %v7641_v41  ;;  %v8562_v1 = vld [vmem:[%s9182_s19 + $0x340] sm:$0xf0] }
 0x1f2   : > { %5282 = vmatpush.bf16.msrb.mxu0 %v6348_v7  ;;  %v6675_v7 = vld [vmem:[%s9182_s19 + $0x638] sm:$0xf]  ;;  %v3551_v6 = vpack.c.b16 %v2876_v40, %v2876_v40 }
 0x1f3   : > { %5256 = vmatpush.bf16.msra.mxu3 %v8072_v25  ;;  %v10466_v25 = vpop.f32.mrf.mxu2  ;;  %v6676_v42 = vor.u32 %v8670_v0, %v6675_v7  ;;  %v7216_v7 = vor.u32 %v8805_v23, %v7215_v22  ;;  %v6461_v0 = vld [vmem:[%s9182_s19 + $0x4f4] sm:$0xf0]  ;;  %v5919_v23 = vld [vmem:[%s9182_s19 + $0x50] sm:$0xf] }
 0x1f4   : > { %5308 = vmatpush.bf16.msrb.mxu2 %v8076_v43  ;;  %5295 = vmatpush.bf16.msrb.mxu1 %v7212_v61  ;;  %v7431_v43 = vld [vmem:[%s9182_s19 + $0xc20] sm:$0xf]  ;;  %v6677_v61 = vld [vmem:[%s9182_s19 + $0x6a4] sm:$0xf0]  ;;  %v4271_v33 = vsel %vm4209_vm0, %v3551_v6, 0  ;;  %v5017_v40 = vpop.f32.mrf.mxu1  ;;  %v6464_v41 = vor.u32 %v8603_v26, %v6461_v0 }
 0x1f5   : > { %v6353_v6 = vld [vmem:[%s9182_s19 + $0x41c] sm:$0xf0]  ;;  %v8481_v26 = vld [vmem:[%s9182_s19 + $0xb8] sm:$0xf0] }
 0x1f6   : > { %5283 = vmatpush.bf16.msrb.mxu0 %v6240_v49  ;;  %v8859_v49 = vld [vmem:[%s9182_s19 + $0xc88] sm:$0xf0]  ;;  %v8697_v0 = vld [vmem:[%s9182_s19 + $0x778] sm:$0xf0] }
 0x1f7   : > { %5257 = vmatpush.bf16.msra.mxu3 %v7964_v20  ;;  %v6885_v20 = vld [vmem:[%s9182_s19 + $0x84c] sm:$0xf0]  ;;  %v7432_v62 = vor.u32 %v8859_v49, %v7431_v43 }
 0x1f8   : > { %5309 = vmatpush.bf16.msrb.mxu2 %v7968_v3  ;;  %5296 = vmatpush.bf16.msrb.mxu1 %v7104_v39  ;;  %v6888_v51 = vor.u32 %v8710_v45, %v6885_v20  ;;  %v8403_v3 = vld [vmem:[%s9182_s19 + $0x13b8] sm:$0xf]  ;;  %v8630_v39 = vld [vmem:[%s9182_s19 + $0x564] sm:$0xf]  ;;  %v4938_v20 = vadd.f32 %v10420_v56, %v4925_v36 }
 0x1f9   : > { %v8778_v45 = vld [vmem:[%s9182_s19 + $0xa00] sm:$0xf0] }
 0x1fa   : > { %5284 = vmatpush.bf16.msrb.mxu0 %v6132_v38  ;;  %v9102_v38 = vld [vmem:[%s9182_s19 + $0x1420] sm:$0xf0]  ;;  %v5002_v27 = vpop.f32.mrf.mxu0 }
 0x1fb   : > { %5258 = vmatpush.bf16.msra.mxu3 %v7856_v60  ;;  %v8657_v60 = vld [vmem:[%s9182_s19 + $0x63c] sm:$0xf]  ;;  %v4978_v50 = vpop.f32.mrf.mxu2  ;;  %v8404_v5 = vor.u32 %v9102_v38, %v8403_v3 }
 0x1fc   : > { %5310 = vmatpush.bf16.msrb.mxu2 %v7860_v17  ;;  %5297 = vmatpush.bf16.msrb.mxu1 %v6996_v18  ;;  %v6680_v16 = vor.u32 %v8657_v60, %v6677_v61  ;;  %v6569_v17 = vld [vmem:[%s9182_s19 + $0x5cc] sm:$0xf0]  ;;  %v9048_v18 = vld [vmem:[%s9182_s19 + $0x1270] sm:$0xf0]  ;;  %v4951_v60 = vadd.f32 %v10439_v46, %v4938_v20  ;;  %v8535_v61 = vld [vmem:[%s9182_s19 + $0x268] sm:$0xf0]  ;;  %v8080_v50 = vor.u32 %v9021_v12, %v8079_v30 }
 0x1fd   : > { %v6245_v46 = vld [vmem:[%s9182_s19 + $0x344] sm:$0xf0]  ;;  %v8495_v20 = vld [vmem:[%s9182_s19 + $0x12c] sm:$0xf]  ;;  %v9062_v30 = vld [vmem:[%s9182_s19 + $0x12e4] sm:$0xf] }
 0x1fe   : > { %5285 = vmatpush.bf16.msrb.mxu0 %v6024_v47  ;;  %v9075_v47 = vld [vmem:[%s9182_s19 + $0x1348] sm:$0xf0]  ;;  %v8297_v12 = vld [vmem:[%s9182_s19 + $0x134c] sm:$0xf0] }
 0x1ff   : > { %5259 = vmatpush.bf16.msra.mxu3 %v7748_v15  ;;  %v6780_v15 = vor.u32 %v8683_v31, %v6777_v48  ;;  %v8296_v29 = vor.u32 %v9075_v47, %v8295_v55  ;;  %v6999_v31 = vld [vmem:[%s9182_s19 + $0x8c0] sm:$0xf]  ;;  %v8751_v48 = vld [vmem:[%s9182_s19 + $0x928] sm:$0xf0] }
 0x200   : > { %5311 = vmatpush.bf16.msrb.mxu2 %v7752_v9  ;;  %5298 = vmatpush.bf16.msrb.mxu1 %v6888_v51  ;;  %v6352_v9 = vor.u32 %v8589_v24, %v6351_v57  ;;  %v7000_v2 = vor.u32 %v8751_v48, %v6999_v31  ;;  %v7863_v57 = vld [vmem:[%s9182_s19 + $0xf80] sm:$0xf]  ;;  %v8967_v24 = vld [vmem:[%s9182_s19 + $0xfe8] sm:$0xf0]  ;;  %v8468_v48 = vld [vmem:[%s9182_s19 + $0x54] sm:$0xf] }
 0x202   : > { %5286 = vmatpush.bf16.msrb.mxu0 %v5916_v35  ;;  %v7107_v35 = vld [vmem:[%s9182_s19 + $0x998] sm:$0xf] }
 0x203   : > { %5260 = vmatpush.bf16.msra.mxu3 %v7640_v28  ;;  %v6572_v28 = vor.u32 %v8630_v39, %v6569_v17  ;;  %v7108_v49 = vor.u32 %v8778_v45, %v7107_v35  ;;  %v6027_v39 = vld [vmem:[%s9182_s19 + $0x128] sm:$0xf]  ;;  %v4964_v17 = vadd.f32 %v10412_v44, %v4951_v60  ;;  %v6137_v44 = vld [vmem:[%s9182_s19 + $0x26c] sm:$0xf0]  ;;  %v7864_v45 = vor.u32 %v8967_v24, %v7863_v57  ;;  %v7217_v57 = vld [vmem:[%s9182_s19 + $0xadc] sm:$0xf0] }
 0x204   : > { %5312 = vmatpush.bf16.msrb.mxu2 %v7644_v59  ;;  %5299 = vmatpush.bf16.msrb.mxu1 %v6780_v15  ;;  %v5004_v59 = vpop.f32.mrf.mxu0 }
 0x205   : > { %5287 = vmatmul.bf16.vlgmr.msrb.gmra.mxu0 %v10312_v63  ;;  %v4989_v43 = vpop.f32.mrf.mxu3 }
 0x206   : > { %5261 = vmatmul.bf16.vlgmr.msra.gmra.mxu3 %v10331_v53  ;;  %5344 = vmatpush.bf16.msra.mxu0 %v7540_v58  ;;  %v6243_v58 = vld [vmem:[%s9182_s19 + $0x2d8] sm:$0xf] }
 0x207   : > { %5325 = vmatpush.bf16.msrb.mxu3 %v4268_v32  ;;  %5313 = vmatmul.bf16.vlgmr.msrb.gmra.mxu2 %v10331_v53  ;;  %v4977_v32 = vadd.f32 %v10466_v25, %v9663_v14  ;;  %v8576_v25 = vld [vmem:[%s9182_s19 + $0x3b4] sm:$0xf]  ;;  %v6244_v56 = vor.u32 %v8562_v1, %v6243_v58 }
 0x208   : > { %5377 = vmatpush.bf16.msra.mxu2 %v4271_v33  ;;  %5357 = vmatpush.bf16.msra.mxu1 %v8404_v5  ;;  %v6356_v38 = vor.u32 %v8576_v25, %v6353_v6  ;;  %v10530_v33 = vpop.f32.mrf.mxu1  ;;  %v8724_v5 = vld [vmem:[%s9182_s19 + $0x850] sm:$0xf0] }
 0x209   : > { %5300 = vmatmul.bf16.vlgmr.msrb.gmra.mxu1 %v10317_v21  ;;  %v4990_v51 = vadd.f32 %v4989_v43, %v4977_v32  ;;  %v8873_v32 = vld [vmem:[%s9182_s19 + $0xcfc] sm:$0xf]  ;;  %v8940_v25 = vld [vmem:[%s9182_s19 + $0xf10] sm:$0xf0] }
 0x20a   : > { %5345 = vmatpush.bf16.msra.mxu0 %v7432_v62  ;;  %v6135_v62 = vld [vmem:[%s9182_s19 + $0x200] sm:$0xf] }
 0x20b   : > { %5331 = vmatpush.bf16.msra.mxu3 %v6676_v42  ;;  %v8188_v42 = vor.u32 %v9048_v18, %v8187_v10  ;;  %v5003_v3 = vadd.f32 %v5002_v27, %v4990_v51  ;;  %v6136_v15 = vor.u32 %v8535_v61, %v6135_v62  ;;  %v10544_v27 = vpop.f32.mrf.mxu2  ;;  %v9089_v10 = vld [vmem:[%s9182_s19 + $0x13bc] sm:$0xf]  ;;  %v8405_v18 = vld [vmem:[%s9182_s19 + $0x1424] sm:$0xf0]  ;;  %v8846_v51 = vld [vmem:[%s9182_s19 + $0xc24] sm:$0xf] }
 0x20c   : > { %5383 = vmatpush.bf16.msrb.mxu2 %v6680_v16  ;;  %5358 = vmatpush.bf16.msra.mxu1 %v8296_v29  ;;  %v6891_v16 = vld [vmem:[%s9182_s19 + $0x7e8] sm:$0xf]  ;;  %v10552_v40 = vpop.f32.mrf.mxu0  ;;  %v8408_v43 = vor.u32 %v9089_v10, %v8405_v18  ;;  %v5921_v62 = vld [vmem:[%s9182_s19 + $0xbc] sm:$0xf0]  ;;  %v8913_v61 = vld [vmem:[%s9182_s19 + $0xe38] sm:$0xf0] }
 0x20d   : > { %v5016_v4 = vadd.f32 %v10485_v19, %v5003_v3  ;;  %v8522_v19 = vld [vmem:[%s9182_s19 + $0x204] sm:$0xf]  ;;  %v4991_v22 = vpop.f32.mrf.mxu3  ;;  %v6892_v36 = vor.u32 %v8724_v5, %v6891_v16  ;;  %v8300_v3 = vor.u32 %v9062_v30, %v8297_v12  ;;  %v5924_v16 = vor.u32 %v8468_v48, %v5921_v62  ;;  %v8833_v10 = vld [vmem:[%s9182_s19 + $0xbb8] sm:$0xf0]  ;;  %v7001_v30 = vld [vmem:[%s9182_s19 + $0x92c] sm:$0xf0] }
 0x20e   : > { %5346 = vmatpush.bf16.msra.mxu0 %v7324_v54  ;;  %v8508_v54 = vld [vmem:[%s9182_s19 + $0x190] sm:$0xf0]  ;;  %v6140_v35 = vor.u32 %v8522_v19, %v6137_v44  ;;  %v10616_v48 = vld [vmem:[%s9182_s19 + $0x1498] sm:$0xff]  ;;  %v7115_v62 = vld [vmem:[%s9182_s19 + $0x9a0] sm:$0xf] }
 0x20f   : > { %5332 = vmatpush.bf16.msra.mxu3 %v6568_v37  ;;  %v8549_v37 = vld [vmem:[%s9182_s19 + $0x2dc] sm:$0xf]  ;;  %v5727_v55 = vrot.slane %v5016_v4, 4  ;;  %v6028_v29 = vor.u32 %v8508_v54, %v6027_v39  ;;  %v8819_v4 = vld [vmem:[%s9182_s19 + $0xb4c] sm:$0xf] }
 0x210   : > { %5384 = vmatpush.bf16.msrb.mxu2 %v6572_v28  ;;  %5359 = vmatpush.bf16.msra.mxu1 %v8188_v42  ;;  %v6248_v47 = vor.u32 %v8549_v37, %v6245_v46  ;;  %v5030_v58 = vpop.f32.mrf.mxu1  ;;  %v7755_v42 = vld [vmem:[%s9182_s19 + $0xea8] sm:$0xf]  ;;  %v8887_v37 = vld [vmem:[%s9182_s19 + $0xd68] sm:$0xf0]  ;;  %v6683_v54 = vld [vmem:[%s9182_s19 + $0x640] sm:$0xf] }
 0x211   : > { %v5740_v28 = vsel %vm4209_vm0, %v4964_v17, %v5727_v55  ;;  %v7756_v31 = vor.u32 %v8940_v25, %v7755_v42  ;;  %v8671_v17 = vld [vmem:[%s9182_s19 + $0x6a8] sm:$0xf0]  ;;  %v8860_v19 = vld [vmem:[%s9182_s19 + $0xc90] sm:$0xf0]  ;;  %v7223_v25 = vld [vmem:[%s9182_s19 + $0xa78] sm:$0xf] }
 0x212   : > { %5347 = vmatpush.bf16.msra.mxu0 %v7216_v7  ;;  %v6783_v7 = vld [vmem:[%s9182_s19 + $0x710] sm:$0xf]  ;;  %5766 = vst [vmem:[%s9714_s25 + $0x30] sm:$0x77] %v5740_v28  ;;  %v8792_v44 = vld [vmem:[%s9182_s19 + $0xa74] sm:$0xf] }
 0x213   : > { %5333 = vmatpush.bf16.msra.mxu3 %v6460_v8  ;;  %v7972_v8 = vor.u32 %v8994_v13, %v7971_v11  ;;  %v6784_v1 = vor.u32 %v8697_v0, %v6783_v7  ;;  %v5043_v60 = vpop.f32.mrf.mxu2  ;;  %v9035_v11 = vld [vmem:[%s9182_s19 + $0x120c] sm:$0xf]  ;;  %v8189_v13 = vld [vmem:[%s9182_s19 + $0x1274] sm:$0xf0]  ;;  %v6575_v28 = vld [vmem:[%s9182_s19 + $0x568] sm:$0xf]  ;;  %v7220_v18 = vor.u32 %v8792_v44, %v7217_v57 }
 0x214   : > { %5385 = vmatpush.bf16.msrb.mxu2 %v6464_v41  ;;  %5360 = vmatpush.bf16.msra.mxu1 %v8080_v50  ;;  %v6029_v41 = vld [vmem:[%s9182_s19 + $0x194] sm:$0xf0]  ;;  %v7547_v50 = vld [vmem:[%s9182_s19 + $0xd00] sm:$0xf]  ;;  %v8192_v55 = vor.u32 %v9035_v11, %v8189_v13  ;;  %v7331_v0 = vld [vmem:[%s9182_s19 + $0xb50] sm:$0xf] }
 0x215   : > { %v6032_v59 = vor.u32 %v8495_v20, %v6029_v41  ;;  %v7548_v39 = vor.u32 %v8887_v37, %v7547_v50  ;;  %v7332_v58 = vor.u32 %v8833_v10, %v7331_v0  ;;  %v8617_v41 = vld [vmem:[%s9182_s19 + $0x4f8] sm:$0xf0]  ;;  %v8927_v50 = vld [vmem:[%s9182_s19 + $0xeac] sm:$0xf]  ;;  %v7757_v37 = vld [vmem:[%s9182_s19 + $0xf14] sm:$0xf0] }
 0x216   : > { %8448 = vmatmul.msk.bf16.vlgmr.msrb.gmra.mxu3 %vm4206_vm1, %v10260_v34  ;;  %5348 = vmatpush.bf16.msra.mxu0 %v7108_v49  ;;  %v2877_v49 = vunpack.c.h.b16 %v10458_v52  ;;  %v7647_v52 = vld [vmem:[%s9182_s19 + $0xdd0] sm:$0xf]  ;;  %v8411_v44 = vld [vmem:[%s9182_s19 + $0x13c0] sm:$0xf] }
 0x217   : > { %5334 = vmatpush.bf16.msra.mxu3 %v6352_v9  ;;  %8449 = vmatmul.msk.bf16.vlgmr.msra.gmra.mxu2 %vm4206_vm1, %v10260_v34  ;;  %v7541_v9 = vld [vmem:[%s9182_s19 + $0xd64] sm:$0xf0]  ;;  %v5920_v34 = vor.u32 %v8481_v26, %v5919_v23  ;;  %v7648_v5 = vor.u32 %v8913_v61, %v7647_v52  ;;  %v9008_v23 = vld [vmem:[%s9182_s19 + $0x1134] sm:$0xf]  ;;  %v8779_v52 = vld [vmem:[%s9182_s19 + $0xa08] sm:$0xf0] }
 0x218   : > { %5386 = vmatpush.bf16.msrb.mxu2 %v6356_v38  ;;  %5361 = vmatpush.bf16.msra.mxu1 %v7972_v8  ;;  %v7544_v6 = vor.u32 %v8873_v32, %v7541_v9  ;;  %v5069_v38 = vpop.f32.mrf.mxu0  ;;  %v7439_v8 = vld [vmem:[%s9182_s19 + $0xc28] sm:$0xf]  ;;  %v8981_v32 = vld [vmem:[%s9182_s19 + $0x105c] sm:$0xf] }
 0x219   : > { %v7440_v24 = vor.u32 %v8860_v19, %v7439_v8  ;;  %v7973_v9 = vld [vmem:[%s9182_s19 + $0x10c4] sm:$0xf0] }
 0x21a   : > { %5349 = vmatpush.bf16.msra.mxu0 %v7000_v2  ;;  %v3552_v2 = vpack.c.b16 %v2877_v49, %v2877_v49  ;;  %v8954_v49 = vld [vmem:[%s9182_s19 + $0xf84] sm:$0xf] }
 0x21b   : > { %5335 = vmatpush.bf16.msra.mxu3 %v6244_v56  ;;  %v7433_v56 = vld [vmem:[%s9182_s19 + $0xc8c] sm:$0xf0] }
 0x21c   : > { %5387 = vmatpush.bf16.msrb.mxu2 %v6248_v47  ;;  %5362 = vmatpush.bf16.msra.mxu1 %v7864_v45  ;;  %v7436_v46 = vor.u32 %v8846_v51, %v7433_v56  ;;  %v4274_v47 = vsel %vm4209_vm0, %v3552_v2, 0  ;;  %v7109_v45 = vld [vmem:[%s9182_s19 + $0xa04] sm:$0xf0]  ;;  %v8711_v2 = vld [vmem:[%s9182_s19 + $0x7ec] sm:$0xf] }
 0x21e   : > { %5350 = vmatpush.bf16.msra.mxu0 %v6892_v36  ;;  %v8081_v36 = vld [vmem:[%s9182_s19 + $0x119c] sm:$0xf0] }
 0x21f   : > { %5336 = vmatpush.bf16.msra.mxu3 %v6136_v15  ;;  %v7325_v15 = vld [vmem:[%s9182_s19 + $0xbb4] sm:$0xf0]  ;;  %v8084_v26 = vor.u32 %v9008_v23, %v8081_v36  ;;  %v7649_v23 = vld [vmem:[%s9182_s19 + $0xe3c] sm:$0xf0] }
 0x220   : > { %5388 = vmatpush.bf16.msrb.mxu2 %v6140_v35  ;;  %5363 = vmatpush.bf16.msra.mxu1 %v7756_v31  ;;  %v7328_v22 = vor.u32 %v8819_v4, %v7325_v15  ;;  %v5080_v7 = vpop.f32.mrf.mxu0  ;;  %v8765_v35 = vld [vmem:[%s9182_s19 + $0x99c] sm:$0xf]  ;;  %v8590_v31 = vld [vmem:[%s9182_s19 + $0x420] sm:$0xf0]  ;;  %v2878_v4 = vunpack.c.l.b16 %v10616_v48  ;;  %v5029_v15 = vadd.f32 %v10530_v33, %v9663_v14  ;;  %v8684_v33 = vld [vmem:[%s9182_s19 + $0x714] sm:$0xf] }
 0x221   : > { %v5081_v38 = vadd.f32 %v5080_v7, %v9663_v14  ;;  %v6785_v36 = vld [vmem:[%s9182_s19 + $0x77c] sm:$0xf0]  ;;  %v8536_v7 = vld [vmem:[%s9182_s19 + $0x270] sm:$0xf0] }
 0x222   : > { %5351 = vmatpush.bf16.msra.mxu0 %v6784_v1  ;;  %v6467_v1 = vld [vmem:[%s9182_s19 + $0x490] sm:$0xf]  ;;  %v5093_v51 = vpop.f32.mrf.mxu1 }
 0x223   : > { %5337 = vmatpush.bf16.msra.mxu3 %v6028_v29  ;;  %v8644_v29 = vld [vmem:[%s9182_s19 + $0x5d0] sm:$0xf0]  ;;  %v6468_v12 = vor.u32 %v8617_v41, %v6467_v1  ;;  %v5094_v8 = vadd.f32 %v5093_v51, %v5081_v38  ;;  %v8303_v1 = vld [vmem:[%s9182_s19 + $0x12e8] sm:$0xf]  ;;  %v6791_v51 = vld [vmem:[%s9182_s19 + $0x718] sm:$0xf] }
 0x224   : > { %5389 = vmatpush.bf16.msrb.mxu2 %v6032_v59  ;;  %5364 = vmatpush.bf16.msra.mxu1 %v7648_v5  ;;  %v6576_v20 = vor.u32 %v8644_v29, %v6575_v28  ;;  %v6359_v59 = vld [vmem:[%s9182_s19 + $0x3b8] sm:$0xf]  ;;  %v6251_v5 = vld [vmem:[%s9182_s19 + $0x2e0] sm:$0xf]  ;;  %v9103_v28 = vld [vmem:[%s9182_s19 + $0x1428] sm:$0xf0] }
 0x225   : > { %5352 = vmatmul.bf16.vlgmr.msra.gmra.mxu0 %v10317_v21  ;;  %v6684_v21 = vor.u32 %v8671_v17, %v6683_v54  ;;  %v10605_v42 = vpop.f32.mrf.mxu3  ;;  %v6360_v13 = vor.u32 %v8590_v31, %v6359_v59  ;;  %v7760_v17 = vor.u32 %v8927_v50, %v7757_v37  ;;  %v9090_v59 = vld [vmem:[%s9182_s19 + $0x13c4] sm:$0xf] }
 0x226   : > { %5409 = vmatpush.bf16.msrb.mxu0 %v8408_v43  ;;  %v7112_v43 = vor.u32 %v8765_v35, %v7109_v45  ;;  %v5106_v11 = vpop.f32.mrf.mxu2  ;;  %v6788_v35 = vor.u32 %v8684_v33, %v6785_v36  ;;  %v8658_v45 = vld [vmem:[%s9182_s19 + $0x644] sm:$0xf] }
 0x227   : > { %5338 = vmatpush.bf16.msra.mxu3 %v5920_v34  ;;  %5365 = vmatmul.bf16.vlgmr.msra.gmra.mxu1 %v10331_v53  ;;  %v7976_v53 = vor.u32 %v8981_v32, %v7973_v9  ;;  %v8806_v34 = vld [vmem:[%s9182_s19 + $0xae0] sm:$0xf0]  ;;  %v8725_v32 = vld [vmem:[%s9182_s19 + $0x858] sm:$0xf0]  ;;  %v5107_v9 = vadd.f32 %v5106_v11, %v5094_v8  ;;  %v5927_v11 = vld [vmem:[%s9182_s19 + $0x58] sm:$0xf] }
 0x228   : > { %5390 = vmatpush.bf16.msrb.mxu2 %v5924_v16  ;;  %5429 = vmatpush.bf16.msrb.mxu1 %v4274_v47  ;;  %v7224_v56 = vor.u32 %v8806_v34, %v7223_v25  ;;  %v5082_v61 = vpop.f32.mrf.mxu0  ;;  %v7116_v16 = vor.u32 %v8779_v52, %v7115_v62  ;;  %v8752_v47 = vld [vmem:[%s9182_s19 + $0x930] sm:$0xf0]  ;;  %v6577_v62 = vld [vmem:[%s9182_s19 + $0x5d4] sm:$0xf0]  ;;  %v9022_v33 = vld [vmem:[%s9182_s19 + $0x11a0] sm:$0xf0] }
 0x229   : > { %v8195_v61 = vld [vmem:[%s9182_s19 + $0x1210] sm:$0xf] }
 0x22a   : > { %5339 = vmatmul.bf16.vlgmr.msra.gmra.mxu3 %v10312_v63  ;;  %5410 = vmatpush.bf16.msrb.mxu0 %v8300_v3  ;;  %v5095_v0 = vpop.f32.mrf.mxu1 }
 0x22b   : > { %5396 = vmatpush.bf16.msrb.mxu3 %v7544_v6  ;;  %5391 = vmatmul.bf16.vlgmr.msrb.gmra.mxu2 %v10312_v63  ;;  %v7865_v6 = vld [vmem:[%s9182_s19 + $0xfec] sm:$0xf0]  ;;  %v8738_v63 = vld [vmem:[%s9182_s19 + $0x8c4] sm:$0xf]  ;;  %v6361_v0 = vld [vmem:[%s9182_s19 + $0x424] sm:$0xf0] }
 0x22c   : > { %5448 = vmatpush.bf16.msra.mxu2 %v7548_v39  ;;  %5435 = vmatpush.bf16.msra.mxu1 %v6684_v21  ;;  %v7868_v60 = vor.u32 %v8954_v49, %v7865_v6  ;;  %v7004_v3 = vor.u32 %v8738_v63, %v7001_v30  ;;  %v8563_v39 = vld [vmem:[%s9182_s19 + $0x348] sm:$0xf0]  ;;  %v3553_v21 = vpack.c.b16 %v2878_v4, %v2878_v4  ;;  %v6035_v6 = vld [vmem:[%s9182_s19 + $0x130] sm:$0xf]  ;;  %v8509_v63 = vld [vmem:[%s9182_s19 + $0x198] sm:$0xf0] }
 0x22d   : > { %v5056_v54 = vpop.f32.mrf.mxu3  ;;  %v6252_v57 = vor.u32 %v8563_v39, %v6251_v5  ;;  %v6036_v38 = vor.u32 %v8509_v63, %v6035_v6  ;;  %v10669_v4 = vld.sshfl [vmem:[#allocation1 + $0x8] sm:$0xff pattern:$0x73625140]  ;;  %v7549_v5 = vld [vmem:[%s9182_s19 + $0xd6c] sm:$0xf0] }
 0x22e   : > { %5411 = vmatpush.bf16.msrb.mxu0 %v8192_v55  ;;  %v7007_v55 = vld [vmem:[%s9182_s19 + $0x8c8] sm:$0xf]  ;;  %v5108_v25 = vpop.f32.mrf.mxu2  ;;  %v9063_v39 = vld [vmem:[%s9182_s19 + $0x12ec] sm:$0xf] }
 0x22f   : > { %5397 = vmatpush.bf16.msrb.mxu3 %v7436_v46  ;;  %v6893_v46 = vld [vmem:[%s9182_s19 + $0x854] sm:$0xf0]  ;;  %v7008_v29 = vor.u32 %v8752_v47, %v7007_v55  ;;  %v8604_v55 = vld [vmem:[%s9182_s19 + $0x494] sm:$0xf]  ;;  %v6469_v47 = vld [vmem:[%s9182_s19 + $0x4fc] sm:$0xf0] }
 0x230   : > { %5449 = vmatpush.bf16.msra.mxu2 %v7440_v24  ;;  %5436 = vmatpush.bf16.msra.mxu1 %v6576_v20  ;;  %v6896_v19 = vor.u32 %v8711_v2, %v6893_v46  ;;  %v5042_v24 = vadd.f32 %v10544_v27, %v5029_v15  ;;  %v6685_v20 = vld [vmem:[%s9182_s19 + $0x6ac] sm:$0xf0]  ;;  %v10645_v27 = vld.sshfl [vmem:[#allocation1 + $0x18] sm:$0xff pattern:$0x73625140] }
 0x231   : > { %v10664_v2 = vld.sshfl [vmem:[#allocation1 + $0x10] sm:$0xff pattern:$0x73625140]  ;;  %v8550_v25 = vld [vmem:[%s9182_s19 + $0x2e4] sm:$0xf] }
 0x232   : > { %5412 = vmatpush.bf16.msrb.mxu0 %v8084_v26  ;;  %v6143_v26 = vld [vmem:[%s9182_s19 + $0x208] sm:$0xf]  ;;  %v5055_v34 = vadd.f32 %v10605_v42, %v5042_v24  ;;  %v8413_v42 = vld [vmem:[%s9182_s19 + $0x142c] sm:$0xf0]  ;;  %v8847_v24 = vld [vmem:[%s9182_s19 + $0xc2c] sm:$0xf] }
 0x233   : > { %5398 = vmatpush.bf16.msrb.mxu3 %v7328_v22  ;;  %v8900_v22 = vld [vmem:[%s9182_s19 + $0xdd4] sm:$0xf]  ;;  %v6144_v41 = vor.u32 %v8536_v7, %v6143_v26  ;;  %v8197_v26 = vld [vmem:[%s9182_s19 + $0x127c] sm:$0xf0]  ;;  %v8577_v7 = vld [vmem:[%s9182_s19 + $0x3bc] sm:$0xf] }
 0x234   : > { %5450 = vmatpush.bf16.msra.mxu2 %v7332_v58  ;;  %5437 = vmatpush.bf16.msra.mxu1 %v6468_v12  ;;  %v7652_v10 = vor.u32 %v8900_v22, %v7649_v23  ;;  %v8412_v58 = vor.u32 %v9103_v28, %v8411_v44  ;;  %v6688_v12 = vor.u32 %v8658_v45, %v6685_v20  ;;  %v8087_v23 = vld [vmem:[%s9182_s19 + $0x1138] sm:$0xf]  ;;  %v7871_v63 = vld [vmem:[%s9182_s19 + $0xf88] sm:$0xf] }
 0x235   : > { %v5119_v30 = vpop.f32.mrf.mxu3  ;;  %v5068_v50 = vadd.f32 %v10552_v40, %v5055_v34  ;;  %v8416_v40 = vor.u32 %v9090_v59, %v8413_v42  ;;  %v7441_v28 = vld [vmem:[%s9182_s19 + $0xc94] sm:$0xf0]  ;;  %v6364_v20 = vor.u32 %v8577_v7, %v6361_v0  ;;  %v6253_v34 = vld [vmem:[%s9182_s19 + $0x34c] sm:$0xf0]  ;;  %v7225_v42 = vld [vmem:[%s9182_s19 + $0xae4] sm:$0xf0] }
 0x236   : > { %5413 = vmatpush.bf16.msrb.mxu0 %v7976_v53  ;;  %v4277_v53 = vsel %vm4209_vm0, %v3553_v21, 0  ;;  %v5120_v31 = vadd.f32 %v5119_v30, %v5107_v9  ;;  %v10680_v22 = vpop.f32.mrf.mxu2  ;;  %v6472_v21 = vor.u32 %v8604_v55, %v6469_v47  ;;  %v8995_v9 = vld [vmem:[%s9182_s19 + $0x10c8] sm:$0xf0]  ;;  %v8968_v30 = vld [vmem:[%s9182_s19 + $0xff0] sm:$0xf0]  ;;  %v6256_v59 = vor.u32 %v8550_v25, %v6253_v34 }
 0x237   : > { %5399 = vmatpush.bf16.msrb.mxu3 %v7220_v18  ;;  %v6899_v18 = vld [vmem:[%s9182_s19 + $0x7f0] sm:$0xf]  ;;  %8450 = vmatmul.msk.bf16.vlgmr.msrb.gmra.mxu1 %vm4206_vm1, %v10645_v27  ;;  %v6037_v55 = vld [vmem:[%s9182_s19 + $0x19c] sm:$0xf0]  ;;  %v8469_v0 = vld [vmem:[%s9182_s19 + $0x5c] sm:$0xf] }
 0x238   : > { %5451 = vmatpush.bf16.msra.mxu2 %v7224_v56  ;;  %5438 = vmatpush.bf16.msra.mxu1 %v6360_v13  ;;  %v6900_v49 = vor.u32 %v8725_v32, %v6899_v18  ;;  %v8698_v56 = vld [vmem:[%s9182_s19 + $0x780] sm:$0xf0]  ;;  %v5728_v37 = vrot.slane %v5120_v31, 4  ;;  %v7979_v32 = vld [vmem:[%s9182_s19 + $0x1060] sm:$0xf] }
 0x239   : > { %v6792_v46 = vor.u32 %v8698_v56, %v6791_v51  ;;  %v8482_v13 = vld [vmem:[%s9182_s19 + $0xc0] sm:$0xf0]  ;;  %v8793_v31 = vld [vmem:[%s9182_s19 + $0xa7c] sm:$0xf]  ;;  %v7765_v7 = vld [vmem:[%s9182_s19 + $0xf1c] sm:$0xf0] }
 0x23a   : > { %5414 = vmatpush.bf16.msrb.mxu0 %v7868_v60  ;;  %v8631_v60 = vld [vmem:[%s9182_s19 + $0x56c] sm:$0xf]  ;;  %v5741_v54 = vsel %vm4209_vm0, %v5068_v50, %v5728_v37  ;;  %v7763_v37 = vld [vmem:[%s9182_s19 + $0xeb0] sm:$0xf]  ;;  %v8712_v34 = vld [vmem:[%s9182_s19 + $0x7f4] sm:$0xf] }
 0x23b   : > { %5400 = vmatpush.bf16.msrb.mxu3 %v7112_v43  ;;  %v9076_v43 = vld [vmem:[%s9182_s19 + $0x1350] sm:$0xf0]  ;;  %v6580_v15 = vor.u32 %v8631_v60, %v6577_v62  ;;  %5767 = vst [vmem:[%s9714_s25 + $0x38] sm:$0x77] %v5741_v54  ;;  %v8982_v60 = vld [vmem:[%s9182_s19 + $0x1064] sm:$0xf] }
 0x23c   : > { %5452 = vmatpush.bf16.msra.mxu2 %v7116_v16  ;;  %5439 = vmatpush.bf16.msra.mxu1 %v6252_v57  ;;  %v8304_v52 = vor.u32 %v9076_v43, %v8303_v1  ;;  %v8874_v16 = vld [vmem:[%s9182_s19 + $0xd04] sm:$0xf]  ;;  %v7333_v1 = vld [vmem:[%s9182_s19 + $0xbbc] sm:$0xf0]  ;;  %v7873_v54 = vld [vmem:[%s9182_s19 + $0xff4] sm:$0xf0] }
 0x23d   : > { %v7552_v36 = vor.u32 %v8874_v16, %v7549_v5  ;;  %v5121_v44 = vpop.f32.mrf.mxu3  ;;  %v10701_v43 = vld.sshfl [vmem:[#allocation1] sm:$0xff pattern:$0x73625140]  ;;  %v7117_v5 = vld [vmem:[%s9182_s19 + $0xa0c] sm:$0xf0] }
 0x23e   : > { %5415 = vmatpush.bf16.msrb.mxu0 %v7760_v17  ;;  %v8305_v17 = vld [vmem:[%s9182_s19 + $0x1354] sm:$0xf0]  ;;  %v10690_v18 = vpop.f32.mrf.mxu0  ;;  %v5173_v6 = vpop.f32.mrf.mxu2  ;;  %v8766_v16 = vld [vmem:[%s9182_s19 + $0x9a4] sm:$0xf] }
 0x23f   : > { %5401 = vmatpush.bf16.msrb.mxu3 %v7004_v3  ;;  %v9049_v3 = vld [vmem:[%s9182_s19 + $0x1278] sm:$0xf0]  ;;  %v8308_v57 = vor.u32 %v9063_v39, %v8305_v17  ;;  %v8955_v39 = vld [vmem:[%s9182_s19 + $0xf8c] sm:$0xf]  ;;  %v8496_v17 = vld [vmem:[%s9182_s19 + $0x134] sm:$0xf] }
 0x240   : > { %5453 = vmatpush.bf16.msra.mxu2 %v7008_v29  ;;  %5440 = vmatpush.bf16.msra.mxu1 %v6144_v41  ;;  %v8196_v8 = vor.u32 %v9049_v3, %v8195_v61  ;;  %v9036_v29 = vld [vmem:[%s9182_s19 + $0x1214] sm:$0xf]  ;;  %v9009_v41 = vld [vmem:[%s9182_s19 + $0x113c] sm:$0xf]  ;;  %v10711_v62 = vpop.f32.mrf.mxu1  ;;  %v8523_v61 = vld [vmem:[%s9182_s19 + $0x20c] sm:$0xf]  ;;  %v7876_v44 = vor.u32 %v8955_v39, %v7873_v54 }
 0x241   : > { %v8200_v45 = vor.u32 %v9036_v29, %v8197_v26  ;;  %v6145_v3 = vld [vmem:[%s9182_s19 + $0x274] sm:$0xf0]  ;;  %v8928_v29 = vld [vmem:[%s9182_s19 + $0xeb4] sm:$0xf]  ;;  %v8834_v39 = vld [vmem:[%s9182_s19 + $0xbc0] sm:$0xf0] }
 0x242   : > { %5416 = vmatpush.bf16.msrb.mxu0 %v7652_v10  ;;  %v8088_v10 = vor.u32 %v9022_v33, %v8087_v23  ;;  %v7120_v23 = vor.u32 %v8766_v16, %v7117_v5  ;;  %v7339_v5 = vld [vmem:[%s9182_s19 + $0xb58] sm:$0xf] }
 0x243   : > { %5402 = vmatpush.bf16.msrb.mxu3 %v6896_v19  ;;  %v5928_v19 = vor.u32 %v8482_v13, %v5927_v11  ;;  %v7228_v11 = vor.u32 %v8793_v31, %v7225_v42  ;;  %v6583_v42 = vld [vmem:[%s9182_s19 + $0x570] sm:$0xf] }
 0x244   : > { %5454 = vmatpush.bf16.msra.mxu2 %v6900_v49  ;;  %5441 = vmatpush.bf16.msra.mxu1 %v6036_v38  ;;  %v7980_v49 = vor.u32 %v8995_v9, %v7979_v32  ;;  %v7872_v38 = vor.u32 %v8968_v30, %v7871_v63  ;;  %v7555_v9 = vld [vmem:[%s9182_s19 + $0xd08] sm:$0xf]  ;;  %v8901_v63 = vld [vmem:[%s9182_s19 + $0xddc] sm:$0xf] }
 0x245   : > { %5417 = vmatmul.bf16.vlgmr.msrb.gmra.mxu0 %v10664_v2  ;;  %v7657_v30 = vld [vmem:[%s9182_s19 + $0xe44] sm:$0xf0] }
 0x246   : > { %5481 = vmatpush.bf16.msra.mxu0 %v4277_v53  ;;  %v8089_v53 = vld [vmem:[%s9182_s19 + $0x11a4] sm:$0xf0]  ;;  %v5147_v50 = vpop.f32.mrf.mxu0 }
 0x247   : > { %5403 = vmatpush.bf16.msrb.mxu3 %v6788_v35  ;;  %v7444_v35 = vor.u32 %v8847_v24, %v7441_v28  ;;  %v8092_v51 = vor.u32 %v9009_v41, %v8089_v53  ;;  %v8739_v24 = vld [vmem:[%s9182_s19 + $0x8cc] sm:$0xf]  ;;  %v7009_v28 = vld [vmem:[%s9182_s19 + $0x934] sm:$0xf0]  ;;  %v7768_v53 = vor.u32 %v8928_v29, %v7765_v7  ;;  %v6793_v50 = vld [vmem:[%s9182_s19 + $0x784] sm:$0xf0] }
 0x248   : > { %5455 = vmatpush.bf16.msra.mxu2 %v6792_v46  ;;  %5442 = vmatpush.bf16.msra.mxu1 %v5928_v19  ;;  %v8941_v46 = vld [vmem:[%s9182_s19 + $0xf18] sm:$0xf0]  ;;  %v8914_v19 = vld [vmem:[%s9182_s19 + $0xe40] sm:$0xf0]  ;;  %v5160_v26 = vpop.f32.mrf.mxu1  ;;  %v7231_v29 = vld [vmem:[%s9182_s19 + $0xa80] sm:$0xf] }
 0x249   : > { %v10706_v56 = vpop.f32.mrf.mxu3  ;;  %v7764_v47 = vor.u32 %v8941_v46, %v7763_v37  ;;  %v8659_v46 = vld [vmem:[%s9182_s19 + $0x64c] sm:$0xf] }
 0x24a   : > { %5404 = vmatmul.bf16.vlgmr.msrb.gmra.mxu3 %v10669_v4  ;;  %5487 = vmatpush.bf16.msrb.mxu0 %v6688_v12  ;;  %v10729_v33 = vpop.f32.mrf.mxu2  ;;  %v8807_v26 = vld [vmem:[%s9182_s19 + $0xae8] sm:$0xf0]  ;;  %v5133_v7 = vadd.f32 %v10706_v56, %v9663_v14  ;;  %v8203_v56 = vld [vmem:[%s9182_s19 + $0x1218] sm:$0xf] }
 0x24b   : > { %5461 = vmatpush.bf16.msra.mxu3 %v8412_v58  ;;  %5456 = vmatmul.bf16.vlgmr.msra.gmra.mxu2 %v10669_v4  ;;  %v8820_v58 = vld [vmem:[%s9182_s19 + $0xb54] sm:$0xf] }
 0x24c   : > { %5513 = vmatpush.bf16.msrb.mxu2 %v8416_v40  ;;  %5500 = vmatpush.bf16.msrb.mxu1 %v7552_v36  ;;  %v7336_v12 = vor.u32 %v8820_v58, %v7333_v1  ;;  %v6148_v40 = vor.u32 %v8523_v61, %v6145_v3  ;;  %v8672_v58 = vld [vmem:[%s9182_s19 + $0x6b0] sm:$0xf0]  ;;  %v7012_v1 = vor.u32 %v8739_v24, %v7009_v28 }
 0x24d   : > { %5443 = vmatmul.bf16.vlgmr.msra.gmra.mxu1 %v10701_v43  ;;  %v7660_v3 = vor.u32 %v8901_v63, %v7657_v30  ;;  %v8564_v63 = vld [vmem:[%s9182_s19 + $0x350] sm:$0xf0] }
 0x24e   : > { %5488 = vmatpush.bf16.msrb.mxu0 %v6580_v15  ;;  %v2879_v15 = vunpack.c.h.b16 %v10616_v48  ;;  %v10732_v48 = vld [vmem:[%s9182_s19 + $0x14a0] sm:$0xff] }
 0x24f   : > { %5462 = vmatpush.bf16.msra.mxu3 %v8304_v52  ;;  %v7981_v52 = vld [vmem:[%s9182_s19 + $0x10cc] sm:$0xf0] }
 0x250   : > { %5514 = vmatpush.bf16.msrb.mxu2 %v8308_v57  ;;  %5501 = vmatpush.bf16.msrb.mxu1 %v7444_v35  ;;  %v7984_v13 = vor.u32 %v8982_v60, %v7981_v52  ;;  %v3554_v36 = vpack.c.b16 %v2879_v15, %v2879_v15  ;;  %v8888_v35 = vld [vmem:[%s9182_s19 + $0xd70] sm:$0xf0]  ;;  %v8645_v60 = vld [vmem:[%s9182_s19 + $0x5d8] sm:$0xf0]  ;;  %v10756_v37 = vpop.f32.mrf.mxu1 }
 0x251   : > { %v5134_v57 = vpop.f32.mrf.mxu3  ;;  %v7556_v6 = vor.u32 %v8888_v35, %v7555_v9  ;;  %v9104_v15 = vld [vmem:[%s9182_s19 + $0x1430] sm:$0xf0]  ;;  %v6584_v16 = vor.u32 %v8645_v60, %v6583_v42  ;;  %v8095_v42 = vld [vmem:[%s9182_s19 + $0x1140] sm:$0xf]  ;;  %v9023_v60 = vld [vmem:[%s9182_s19 + $0x11a8] sm:$0xf0] }
 0x252   : > { %5489 = vmatpush.bf16.msrb.mxu0 %v6472_v21  ;;  %v6040_v21 = vor.u32 %v8496_v17, %v6037_v55  ;;  %v4280_v41 = vsel %vm4209_vm0, %v3554_v36, 0  ;;  %v5186_v61 = vpop.f32.mrf.mxu2  ;;  %v6475_v17 = vld [vmem:[%s9182_s19 + $0x498] sm:$0xf]  ;;  %v8618_v55 = vld [vmem:[%s9182_s19 + $0x500] sm:$0xf0]  ;;  %v7340_v36 = vor.u32 %v8834_v39, %v7339_v5 }
 0x253   : > { %5463 = vmatpush.bf16.msra.mxu3 %v8196_v8  ;;  %v7655_v8 = vld [vmem:[%s9182_s19 + $0xdd8] sm:$0xf]  ;;  %v8311_v57 = vld [vmem:[%s9182_s19 + $0x12f0] sm:$0xf]  ;;  %v6476_v24 = vor.u32 %v8618_v55, %v6475_v17  ;;  %v8551_v5 = vld [vmem:[%s9182_s19 + $0x2ec] sm:$0xf] }
 0x254   : > { %5515 = vmatpush.bf16.msrb.mxu2 %v8200_v45  ;;  %5502 = vmatpush.bf16.msrb.mxu1 %v7336_v12  ;;  %v7656_v32 = vor.u32 %v8914_v19, %v7655_v8  ;;  %v2880_v45 = vunpack.c.l.b16 %v10732_v48  ;;  %v8996_v17 = vld [vmem:[%s9182_s19 + $0x10d0] sm:$0xf0] }
 0x255   : > { %8451 = vmatmul.msk.bf16.vlgmr.msra.gmra.mxu0 %vm4206_vm1, %v10645_v27 }
 0x256   : > { %5490 = vmatpush.bf16.msrb.mxu0 %v6364_v20  ;;  %v6691_v20 = vld [vmem:[%s9182_s19 + $0x648] sm:$0xf]  ;;  %v3555_v31 = vpack.c.b16 %v2880_v45, %v2880_v45  ;;  %v8605_v45 = vld [vmem:[%s9182_s19 + $0x49c] sm:$0xf] }
 0x257   : > { %5464 = vmatpush.bf16.msra.mxu3 %v8088_v10  ;;  %v5929_v10 = vld [vmem:[%s9182_s19 + $0xc4] sm:$0xf0]  ;;  %v6692_v12 = vor.u32 %v8672_v58, %v6691_v20  ;;  %v7232_v20 = vor.u32 %v8807_v26, %v7231_v29  ;;  %v5935_v26 = vld [vmem:[%s9182_s19 + $0x60] sm:$0xf] }
 0x258   : > { %5516 = vmatpush.bf16.msrb.mxu2 %v8092_v51  ;;  %5503 = vmatpush.bf16.msrb.mxu1 %v7228_v11  ;;  %v5932_v25 = vor.u32 %v8469_v0, %v5929_v10  ;;  %v7447_v51 = vld [vmem:[%s9182_s19 + $0xc30] sm:$0xf]  ;;  %v4283_v54 = vsel %vm4209_vm0, %v3555_v31, 0  ;;  %v6367_v0 = vld [vmem:[%s9182_s19 + $0x3c0] sm:$0xf]  ;;  %v5225_v35 = vpop.f32.mrf.mxu1 }
 0x259   : > { %v8591_v10 = vld [vmem:[%s9182_s19 + $0x428] sm:$0xf0]  ;;  %v6477_v58 = vld [vmem:[%s9182_s19 + $0x504] sm:$0xf0]  ;;  %v6369_v31 = vld [vmem:[%s9182_s19 + $0x42c] sm:$0xf0] }
 0x25a   : > { %5491 = vmatpush.bf16.msrb.mxu0 %v6256_v59  ;;  %v8861_v59 = vld [vmem:[%s9182_s19 + $0xc98] sm:$0xf0]  ;;  %v6480_v30 = vor.u32 %v8605_v45, %v6477_v58  ;;  %v8483_v35 = vld [vmem:[%s9182_s19 + $0xc8] sm:$0xf0] }
 0x25b   : > { %5465 = vmatpush.bf16.msra.mxu3 %v7980_v49  ;;  %v6901_v49 = vld [vmem:[%s9182_s19 + $0x85c] sm:$0xf0]  ;;  %v7448_v11 = vor.u32 %v8861_v59, %v7447_v51  ;;  %v8699_v58 = vld [vmem:[%s9182_s19 + $0x788] sm:$0xf0] }
 0x25c   : > { %5517 = vmatpush.bf16.msrb.mxu2 %v7984_v13  ;;  %5504 = vmatpush.bf16.msrb.mxu1 %v7120_v23  ;;  %v6904_v52 = vor.u32 %v8712_v34, %v6901_v49  ;;  %v6693_v13 = vld [vmem:[%s9182_s19 + $0x6b4] sm:$0xf0]  ;;  %v8632_v23 = vld [vmem:[%s9182_s19 + $0x574] sm:$0xf]  ;;  %v5146_v49 = vadd.f32 %v10690_v18, %v5133_v7 }
 0x25d   : > { %v6696_v8 = vor.u32 %v8659_v46, %v6693_v13  ;;  %v8780_v34 = vld [vmem:[%s9182_s19 + $0xa10] sm:$0xf0]  ;;  %v6151_v46 = vld [vmem:[%s9182_s19 + $0x210] sm:$0xf] }
 0x25e   : > { %5492 = vmatpush.bf16.msrb.mxu0 %v6148_v40  ;;  %v8419_v40 = vld [vmem:[%s9182_s19 + $0x13c8] sm:$0xf]  ;;  %v5210_v28 = vpop.f32.mrf.mxu0 }
 0x25f   : > { %5466 = vmatpush.bf16.msra.mxu3 %v7872_v38  ;;  %v8685_v38 = vld [vmem:[%s9182_s19 + $0x71c] sm:$0xf]  ;;  %v8420_v19 = vor.u32 %v9104_v15, %v8419_v40  ;;  %v8096_v15 = vor.u32 %v9023_v60, %v8095_v42  ;;  %v9064_v60 = vld [vmem:[%s9182_s19 + $0x12f4] sm:$0xf] }
 0x260   : > { %5518 = vmatpush.bf16.msrb.mxu2 %v7876_v44  ;;  %5505 = vmatpush.bf16.msrb.mxu1 %v7012_v1  ;;  %v6585_v44 = vld [vmem:[%s9182_s19 + $0x5dc] sm:$0xf0]  ;;  %v9050_v1 = vld [vmem:[%s9182_s19 + $0x1280] sm:$0xf0] }
 0x262   : > { %5493 = vmatpush.bf16.msrb.mxu0 %v6040_v21  ;;  %v9077_v21 = vld [vmem:[%s9182_s19 + $0x1358] sm:$0xf0] }
 0x263   : > { %5467 = vmatpush.bf16.msra.mxu3 %v7764_v47  ;;  %v6796_v47 = vor.u32 %v8685_v38, %v6793_v50  ;;  %v8312_v9 = vor.u32 %v9077_v21, %v8311_v57  ;;  %v8753_v38 = vld [vmem:[%s9182_s19 + $0x938] sm:$0xf0]  ;;  %v5159_v50 = vadd.f32 %v10711_v62, %v5146_v49  ;;  %v6261_v62 = vld [vmem:[%s9182_s19 + $0x354] sm:$0xf0] }
 0x264   : > { %5519 = vmatpush.bf16.msrb.mxu2 %v7768_v53  ;;  %5506 = vmatpush.bf16.msrb.mxu1 %v6904_v52  ;;  %v6368_v53 = vor.u32 %v8591_v10, %v6367_v0  ;;  %v6264_v21 = vor.u32 %v8551_v5, %v6261_v62  ;;  %v7879_v0 = vld [vmem:[%s9182_s19 + $0xf90] sm:$0xf]  ;;  %v8969_v10 = vld [vmem:[%s9182_s19 + $0xff8] sm:$0xf0] }
 0x265   : > { %v7563_v5 = vld [vmem:[%s9182_s19 + $0xd10] sm:$0xf] }
 0x266   : > { %5494 = vmatpush.bf16.msrb.mxu0 %v5932_v25  ;;  %v7123_v25 = vld [vmem:[%s9182_s19 + $0x9a8] sm:$0xf]  ;;  %v5212_v61 = vpop.f32.mrf.mxu0 }
 0x267   : > { %5468 = vmatpush.bf16.msra.mxu3 %v7656_v32  ;;  %v6588_v32 = vor.u32 %v8632_v23, %v6585_v44  ;;  %v7124_v59 = vor.u32 %v8780_v34, %v7123_v25  ;;  %v6043_v23 = vld [vmem:[%s9182_s19 + $0x138] sm:$0xf]  ;;  %v5172_v44 = vadd.f32 %v10680_v22, %v5159_v50  ;;  %v6153_v22 = vld [vmem:[%s9182_s19 + $0x27c] sm:$0xf0]  ;;  %v7880_v34 = vor.u32 %v8969_v10, %v7879_v0  ;;  %v8794_v0 = vld [vmem:[%s9182_s19 + $0xa84] sm:$0xf] }
 0x268   : > { %5520 = vmatpush.bf16.msrb.mxu2 %v7660_v3  ;;  %5507 = vmatpush.bf16.msrb.mxu1 %v6796_v47  ;;  %v7015_v3 = vld [vmem:[%s9182_s19 + $0x8d0] sm:$0xf]  ;;  %v7449_v61 = vld [vmem:[%s9182_s19 + $0xc9c] sm:$0xf0] }
 0x269   : > { %5495 = vmatmul.bf16.vlgmr.msrb.gmra.mxu0 %v10701_v43  ;;  %v5197_v51 = vpop.f32.mrf.mxu3  ;;  %v7016_v39 = vor.u32 %v8753_v38, %v7015_v3  ;;  %v7233_v10 = vld [vmem:[%s9182_s19 + $0xaec] sm:$0xf0] }
 0x26a   : > { %5469 = vmatmul.bf16.vlgmr.msra.gmra.mxu3 %v10664_v2  ;;  %5552 = vmatpush.bf16.msra.mxu0 %v7556_v6  ;;  %v6259_v6 = vld [vmem:[%s9182_s19 + $0x2e8] sm:$0xf] }
 0x26b   : > { %5533 = vmatpush.bf16.msrb.mxu3 %v4280_v41  ;;  %5521 = vmatmul.bf16.vlgmr.msrb.gmra.mxu2 %v10664_v2  ;;  %v5185_v41 = vadd.f32 %v10729_v33, %v9663_v14  ;;  %v8578_v33 = vld [vmem:[%s9182_s19 + $0x3c4] sm:$0xf]  ;;  %v6260_v18 = vor.u32 %v8564_v63, %v6259_v6  ;;  %v8497_v6 = vld [vmem:[%s9182_s19 + $0x13c] sm:$0xf] }
 0x26c   : > { %5585 = vmatpush.bf16.msra.mxu2 %v4283_v54  ;;  %5565 = vmatpush.bf16.msra.mxu1 %v8420_v19  ;;  %v6372_v40 = vor.u32 %v8578_v33, %v6369_v31  ;;  %v7987_v54 = vld [vmem:[%s9182_s19 + $0x1068] sm:$0xf]  ;;  %v8726_v19 = vld [vmem:[%s9182_s19 + $0x860] sm:$0xf0]  ;;  %v2881_v31 = vunpack.c.h.b16 %v10732_v48  ;;  %v7663_v48 = vld [vmem:[%s9182_s19 + $0xde0] sm:$0xf] }
 0x26d   : > { %5508 = vmatmul.bf16.vlgmr.msrb.gmra.mxu1 %v10669_v4  ;;  %v5198_v52 = vadd.f32 %v5197_v51, %v5185_v41  ;;  %v8875_v41 = vld [vmem:[%s9182_s19 + $0xd0c] sm:$0xf]  ;;  %v8942_v33 = vld [vmem:[%s9182_s19 + $0xf20] sm:$0xf0]  ;;  %v5936_v51 = vor.u32 %v8483_v35, %v5935_v26  ;;  %v6591_v35 = vld [vmem:[%s9182_s19 + $0x578] sm:$0xf] }
 0x26e   : > { %5553 = vmatpush.bf16.msra.mxu0 %v7448_v11  ;;  %v8537_v11 = vld [vmem:[%s9182_s19 + $0x278] sm:$0xf0]  ;;  %v10824_v45 = vpop.f32.mrf.mxu0  ;;  %v3556_v62 = vpack.c.b16 %v2881_v31, %v2881_v31  ;;  %v7239_v31 = vld [vmem:[%s9182_s19 + $0xa88] sm:$0xf] }
 0x26f   : > { %5539 = vmatpush.bf16.msra.mxu3 %v6692_v12  ;;  %v8204_v12 = vor.u32 %v9050_v1, %v8203_v56  ;;  %v5211_v13 = vadd.f32 %v5210_v28, %v5198_v52  ;;  %v6152_v47 = vor.u32 %v8537_v11, %v6151_v46  ;;  %v8524_v28 = vld [vmem:[%s9182_s19 + $0x214] sm:$0xf]  ;;  %v9091_v56 = vld [vmem:[%s9182_s19 + $0x13cc] sm:$0xf]  ;;  %v8421_v1 = vld [vmem:[%s9182_s19 + $0x1434] sm:$0xf0] }
 0x270   : > { %5591 = vmatpush.bf16.msrb.mxu2 %v6696_v8  ;;  %5566 = vmatpush.bf16.msra.mxu1 %v8312_v9  ;;  %v6907_v8 = vld [vmem:[%s9182_s19 + $0x7f8] sm:$0xf]  ;;  %v6156_v25 = vor.u32 %v8524_v28, %v6153_v22  ;;  %v8313_v52 = vld [vmem:[%s9182_s19 + $0x135c] sm:$0xf0]  ;;  %v8470_v46 = vld [vmem:[%s9182_s19 + $0x64] sm:$0xf] }
 0x271   : > { %v5224_v55 = vadd.f32 %v10756_v37, %v5211_v13  ;;  %v7988_v37 = vor.u32 %v8996_v17, %v7987_v54  ;;  %v5199_v29 = vpop.f32.mrf.mxu3  ;;  %v6908_v7 = vor.u32 %v8726_v19, %v6907_v8  ;;  %v5937_v11 = vld [vmem:[%s9182_s19 + $0xcc] sm:$0xf0]  ;;  %v8915_v13 = vld [vmem:[%s9182_s19 + $0xe48] sm:$0xf0]  ;;  %v9037_v17 = vld [vmem:[%s9182_s19 + $0x121c] sm:$0xf] }
 0x272   : > { %5554 = vmatpush.bf16.msra.mxu0 %v7340_v36  ;;  %v8510_v36 = vld [vmem:[%s9182_s19 + $0x1a0] sm:$0xf0]  ;;  %v7341_v8 = vld [vmem:[%s9182_s19 + $0xbc4] sm:$0xf0]  ;;  %v5940_v19 = vor.u32 %v8470_v46, %v5937_v11  ;;  %v7455_v28 = vld [vmem:[%s9182_s19 + $0xc38] sm:$0xf] }
 0x273   : > { %5540 = vmatpush.bf16.msra.mxu3 %v6584_v16  ;;  %v10801_v16 = vpop.f32.mrf.mxu1  ;;  %v5729_v57 = vrot.slane %v5224_v55, 4  ;;  %v6044_v9 = vor.u32 %v8510_v36, %v6043_v23  ;;  %v8205_v55 = vld [vmem:[%s9182_s19 + $0x1284] sm:$0xf0]  ;;  %v7664_v23 = vor.u32 %v8915_v13, %v7663_v48  ;;  %v8862_v29 = vld [vmem:[%s9182_s19 + $0xca0] sm:$0xf0] }
 0x274   : > { %5592 = vmatpush.bf16.msrb.mxu2 %v6588_v32  ;;  %5567 = vmatpush.bf16.msra.mxu1 %v8204_v12  ;;  %v7771_v12 = vld [vmem:[%s9182_s19 + $0xeb8] sm:$0xf]  ;;  %v8097_v22 = vld [vmem:[%s9182_s19 + $0x11ac] sm:$0xf0]  ;;  %v6375_v11 = vld [vmem:[%s9182_s19 + $0x3c8] sm:$0xf] }
 0x275   : > { %v5742_v32 = vsel %vm4209_vm0, %v5172_v44, %v5729_v57  ;;  %v7772_v50 = vor.u32 %v8942_v33, %v7771_v12  ;;  %v6699_v44 = vld [vmem:[%s9182_s19 + $0x650] sm:$0xf]  ;;  %v8673_v57 = vld [vmem:[%s9182_s19 + $0x6b8] sm:$0xf0]  ;;  %v6483_v12 = vld [vmem:[%s9182_s19 + $0x4a0] sm:$0xf] }
 0x276   : > { %5555 = vmatpush.bf16.msra.mxu0 %v7232_v20  ;;  %v6799_v20 = vld [vmem:[%s9182_s19 + $0x720] sm:$0xf]  ;;  %5768 = vst [vmem:[%s9714_s25 + $0x40] sm:$0x77] %v5742_v32  ;;  %v6700_v32 = vor.u32 %v8673_v57, %v6699_v44  ;;  %v8619_v33 = vld [vmem:[%s9182_s19 + $0x508] sm:$0xf0] }
 0x277   : > { %5541 = vmatpush.bf16.msra.mxu3 %v6476_v24  ;;  %v10815_v24 = vpop.f32.mrf.mxu2  ;;  %v6800_v63 = vor.u32 %v8699_v58, %v6799_v20  ;;  %v8646_v20 = vld [vmem:[%s9182_s19 + $0x5e0] sm:$0xf0]  ;;  %v8592_v48 = vld [vmem:[%s9182_s19 + $0x430] sm:$0xf0]  ;;  %v6267_v57 = vld [vmem:[%s9182_s19 + $0x2f0] sm:$0xf] }
 0x278   : > { %5593 = vmatpush.bf16.msrb.mxu2 %v6480_v30  ;;  %5568 = vmatpush.bf16.msra.mxu1 %v8096_v15  ;;  %v6045_v30 = vld [vmem:[%s9182_s19 + $0x1a4] sm:$0xf0]  ;;  %v5277_v15 = vpop.f32.mrf.mxu0 }
 0x279   : > { %v6048_v3 = vor.u32 %v8497_v6, %v6045_v30  ;;  %v7125_v6 = vld [vmem:[%s9182_s19 + $0xa14] sm:$0xf0]  ;;  %v8781_v15 = vld [vmem:[%s9182_s19 + $0xa18] sm:$0xf0] }
 0x27a   : > { %8452 = vmatmul.msk.bf16.vlgmr.msrb.gmra.mxu3 %vm4206_vm1, %v10645_v27  ;;  %5556 = vmatpush.bf16.msra.mxu0 %v7124_v59  ;;  %v8424_v59 = vor.u32 %v9091_v56, %v8421_v1  ;;  %v7347_v1 = vld [vmem:[%s9182_s19 + $0xb60] sm:$0xf] }
 0x27b   : > { %5542 = vmatpush.bf16.msra.mxu3 %v6368_v53  ;;  %8453 = vmatmul.msk.bf16.vlgmr.msra.gmra.mxu2 %vm4206_vm1, %v10645_v27  ;;  %v7557_v53 = vld [vmem:[%s9182_s19 + $0xd74] sm:$0xf0]  ;;  %v5238_v49 = vpop.f32.mrf.mxu1 }
 0x27c   : > { %5594 = vmatpush.bf16.msrb.mxu2 %v6372_v40  ;;  %5569 = vmatpush.bf16.msra.mxu1 %v7988_v37  ;;  %v7560_v42 = vor.u32 %v8875_v41, %v7557_v53  ;;  %v8316_v40 = vor.u32 %v9064_v60, %v8313_v52  ;;  %v4286_v37 = vsel %vm4209_vm0, %v3556_v62, 0  ;;  %v8835_v41 = vld [vmem:[%s9182_s19 + $0xbc8] sm:$0xf0]  ;;  %v7236_v53 = vor.u32 %v8794_v0, %v7233_v10  ;;  %v8956_v52 = vld [vmem:[%s9182_s19 + $0xf94] sm:$0xf] }
 0x27d   : > { %v8767_v49 = vld [vmem:[%s9182_s19 + $0x9ac] sm:$0xf]  ;;  %v7348_v30 = vor.u32 %v8835_v41, %v7347_v1  ;;  %v7665_v10 = vld [vmem:[%s9182_s19 + $0xe4c] sm:$0xf0]  ;;  %v9105_v1 = vld [vmem:[%s9182_s19 + $0x1438] sm:$0xf0] }
 0x27e   : > { %5557 = vmatpush.bf16.msra.mxu0 %v7016_v39  ;;  %v8889_v39 = vld [vmem:[%s9182_s19 + $0xd78] sm:$0xf0]  ;;  %v7128_v60 = vor.u32 %v8767_v49, %v7125_v6  ;;  %v6915_v6 = vld [vmem:[%s9182_s19 + $0x800] sm:$0xf] }
 0x27f   : > { %5543 = vmatpush.bf16.msra.mxu3 %v6260_v18  ;;  %v8848_v18 = vld [vmem:[%s9182_s19 + $0xc34] sm:$0xf]  ;;  %v5251_v38 = vpop.f32.mrf.mxu2  ;;  %v7564_v36 = vor.u32 %v8889_v39, %v7563_v5 }
 0x280   : > { %5595 = vmatpush.bf16.msrb.mxu2 %v6264_v21  ;;  %5570 = vmatpush.bf16.msra.mxu1 %v7880_v34  ;;  %v7452_v54 = vor.u32 %v8848_v18, %v7449_v61  ;;  %v8208_v21 = vor.u32 %v9037_v17, %v8205_v55  ;;  %v7989_v34 = vld [vmem:[%s9182_s19 + $0x10d4] sm:$0xf0]  ;;  %v7881_v18 = vld [vmem:[%s9182_s19 + $0xffc] sm:$0xf0]  ;;  %v8740_v61 = vld [vmem:[%s9182_s19 + $0x8d4] sm:$0xf]  ;;  %v6484_v38 = vor.u32 %v8619_v33, %v6483_v12 }
 0x281   : > { %v7884_v13 = vor.u32 %v8956_v52, %v7881_v18  ;;  %v7773_v17 = vld [vmem:[%s9182_s19 + $0xf24] sm:$0xf0]  ;;  %v8713_v55 = vld [vmem:[%s9182_s19 + $0x7fc] sm:$0xf]  ;;  %v8319_v33 = vld [vmem:[%s9182_s19 + $0x12f8] sm:$0xf] }
 0x282   : > { %5558 = vmatpush.bf16.msra.mxu0 %v6908_v7  ;;  %v9010_v7 = vld [vmem:[%s9182_s19 + $0x1144] sm:$0xf]  ;;  %v5288_v56 = vpop.f32.mrf.mxu0 }
 0x283   : > { %5544 = vmatpush.bf16.msra.mxu3 %v6152_v47  ;;  %v8821_v47 = vld [vmem:[%s9182_s19 + $0xb5c] sm:$0xf]  ;;  %v8100_v58 = vor.u32 %v9010_v7, %v8097_v22  ;;  %v5289_v62 = vadd.f32 %v5288_v56, %v9663_v14  ;;  %v8754_v7 = vld [vmem:[%s9182_s19 + $0x940] sm:$0xf0] }
 0x284   : > { %5596 = vmatpush.bf16.msrb.mxu2 %v6156_v25  ;;  %5571 = vmatpush.bf16.msra.mxu1 %v7772_v50  ;;  %v7344_v26 = vor.u32 %v8821_v47, %v7341_v8  ;;  %v8983_v25 = vld [vmem:[%s9182_s19 + $0x106c] sm:$0xf]  ;;  %v6909_v47 = vld [vmem:[%s9182_s19 + $0x864] sm:$0xf0]  ;;  %v9078_v52 = vld [vmem:[%s9182_s19 + $0x1360] sm:$0xf0] }
 0x285   : > { %v6912_v0 = vor.u32 %v8713_v55, %v6909_v47  ;;  %v8103_v55 = vld [vmem:[%s9182_s19 + $0x1148] sm:$0xf]  ;;  %v9024_v47 = vld [vmem:[%s9182_s19 + $0x11b0] sm:$0xf0] }
 0x286   : > { %5559 = vmatpush.bf16.msra.mxu0 %v6800_v63  ;;  %v6592_v63 = vor.u32 %v8646_v20, %v6591_v35  ;;  %v5301_v50 = vpop.f32.mrf.mxu1  ;;  %v8427_v35 = vld [vmem:[%s9182_s19 + $0x13d0] sm:$0xf] }
 0x287   : > { %5545 = vmatpush.bf16.msra.mxu3 %v6044_v9  ;;  %v7456_v9 = vor.u32 %v8862_v29, %v7455_v28  ;;  %v5302_v22 = vadd.f32 %v5301_v50, %v5289_v62  ;;  %v8700_v50 = vld [vmem:[%s9182_s19 + $0x790] sm:$0xf0] }
 0x288   : > { %5597 = vmatpush.bf16.msrb.mxu2 %v6048_v3  ;;  %5572 = vmatpush.bf16.msra.mxu1 %v7664_v23  ;;  %v7017_v3 = vld [vmem:[%s9182_s19 + $0x93c] sm:$0xf0]  ;;  %v858_v23 = vld [vmem:[%s9182_s19 + $0x14a8] sm:$0xf]  ;;  %v8484_v62 = vld [vmem:[%s9182_s19 + $0xd0] sm:$0xf0] }
 0x289   : > { %5560 = vmatmul.bf16.vlgmr.msra.gmra.mxu0 %v10669_v4  ;;  %v7020_v39 = vor.u32 %v8740_v61, %v7017_v3  ;;  %v6051_v61 = vld [vmem:[%s9182_s19 + $0x140] sm:$0xf]  ;;  %v8511_v3 = vld [vmem:[%s9182_s19 + $0x1a8] sm:$0xf0] }
 0x28a   : > { %5617 = vmatpush.bf16.msrb.mxu0 %v8424_v59  ;;  %v7992_v59 = vor.u32 %v8983_v25, %v7989_v34  ;;  %v5290_v5 = vpop.f32.mrf.mxu0  ;;  %v5314_v8 = vpop.f32.mrf.mxu2  ;;  %v8538_v25 = vld [vmem:[%s9182_s19 + $0x280] sm:$0xf0] }
 0x28b   : > { %5546 = vmatpush.bf16.msra.mxu3 %v5936_v51  ;;  %5573 = vmatmul.bf16.vlgmr.msra.gmra.mxu1 %v10664_v2  ;;  %v10877_v51 = vpop.f32.mrf.mxu3 }
 0x28c   : > { %5598 = vmatpush.bf16.msrb.mxu2 %v5940_v19  ;;  %5637 = vmatpush.bf16.msrb.mxu1 %v4286_v37  ;;  %v6376_v19 = vor.u32 %v8592_v48, %v6375_v11  ;;  %v2882_v37 = vunpack.c.l.b16 %v858_v23  ;;  %v8320_v11 = vor.u32 %v9078_v52, %v8319_v33 }
 0x28e   : > { %5547 = vmatmul.bf16.vlgmr.msra.gmra.mxu3 %v10701_v43  ;;  %5618 = vmatpush.bf16.msrb.mxu0 %v8316_v40  ;;  %v7131_v40 = vld [vmem:[%s9182_s19 + $0x9b0] sm:$0xf]  ;;  %v5303_v34 = vpop.f32.mrf.mxu1 }
 0x28f   : > { %5604 = vmatpush.bf16.msrb.mxu3 %v7560_v42  ;;  %5599 = vmatmul.bf16.vlgmr.msrb.gmra.mxu2 %v10701_v43  ;;  %v8808_v42 = vld [vmem:[%s9182_s19 + $0xaf0] sm:$0xf0]  ;;  %v7132_v44 = vor.u32 %v8781_v15, %v7131_v40  ;;  %v8211_v40 = vld [vmem:[%s9182_s19 + $0x1220] sm:$0xf]  ;;  %v9051_v15 = vld [vmem:[%s9182_s19 + $0x1288] sm:$0xf0] }
 0x290   : > { %5656 = vmatpush.bf16.msra.mxu2 %v7564_v36  ;;  %5643 = vmatpush.bf16.msra.mxu1 %v6700_v32  ;;  %v7240_v46 = vor.u32 %v8808_v42, %v7239_v31  ;;  %v5237_v36 = vadd.f32 %v10801_v16, %v9663_v14  ;;  %v8902_v16 = vld [vmem:[%s9182_s19 + $0xde4] sm:$0xf] }
 0x291   : > { %v8686_v32 = vld [vmem:[%s9182_s19 + $0x724] sm:$0xf]  ;;  %v7668_v49 = vor.u32 %v8902_v16, %v7665_v10  ;;  %v9134_v16 = vld.sshfl [vmem:[#allocation1 + $0x18] sm:$0xff pattern:$0x73625140] }
 0x292   : > { %5619 = vmatpush.bf16.msrb.mxu0 %v8208_v21  ;;  %v8565_v21 = vld [vmem:[%s9182_s19 + $0x358] sm:$0xf0]  ;;  %v5250_v56 = vadd.f32 %v10815_v24, %v5237_v36  ;;  %v8428_v24 = vor.u32 %v9105_v1, %v8427_v35  ;;  %v7995_v36 = vld [vmem:[%s9182_s19 + $0x1070] sm:$0xf] }
 0x293   : > { %5605 = vmatpush.bf16.msrb.mxu3 %v7452_v54  ;;  %v8929_v54 = vld [vmem:[%s9182_s19 + $0xebc] sm:$0xf]  ;;  %v5264_v28 = vpop.f32.mrf.mxu3  ;;  %v6268_v20 = vor.u32 %v8565_v21, %v6267_v57 }
 0x294   : > { %5657 = vmatpush.bf16.msra.mxu2 %v7456_v9  ;;  %5644 = vmatpush.bf16.msra.mxu1 %v6592_v63  ;;  %v7776_v29 = vor.u32 %v8929_v54, %v7773_v17  ;;  %v6801_v9 = vld [vmem:[%s9182_s19 + $0x78c] sm:$0xf0]  ;;  %v8727_v63 = vld [vmem:[%s9182_s19 + $0x868] sm:$0xf0]  ;;  %v8970_v28 = vld [vmem:[%s9182_s19 + $0x1000] sm:$0xf0] }
 0x295   : > { %v6804_v12 = vor.u32 %v8686_v32, %v6801_v9  ;;  %v6916_v18 = vor.u32 %v8727_v63, %v6915_v6  ;;  %v7671_v32 = vld [vmem:[%s9182_s19 + $0xde8] sm:$0xf]  ;;  %v8916_v9 = vld [vmem:[%s9182_s19 + $0xe50] sm:$0xf0] }
 0x296   : > { %5620 = vmatpush.bf16.msrb.mxu0 %v8100_v58  ;;  %v3557_v58 = vpack.c.b16 %v2882_v37, %v2882_v37  ;;  %v7887_v37 = vld [vmem:[%s9182_s19 + $0xf98] sm:$0xf] }
 0x297   : > { %5606 = vmatpush.bf16.msrb.mxu3 %v7344_v26  ;;  %v7023_v26 = vld [vmem:[%s9182_s19 + $0x8d8] sm:$0xf] }
 0x298   : > { %5658 = vmatpush.bf16.msra.mxu2 %v7348_v30  ;;  %5645 = vmatpush.bf16.msra.mxu1 %v6484_v38  ;;  %v7024_v41 = vor.u32 %v8754_v7, %v7023_v26  ;;  %v5315_v30 = vadd.f32 %v5314_v8, %v5302_v22  ;;  %v4289_v42 = vsel %vm4209_vm0, %v3557_v58, 0  ;;  %v7888_v7 = vor.u32 %v8970_v28, %v7887_v37  ;;  %v7779_v22 = vld [vmem:[%s9182_s19 + $0xec0] sm:$0xf] }
 0x299   : > { %v7672_v58 = vor.u32 %v8916_v9, %v7671_v32 }
 0x29a   : > { %5621 = vmatpush.bf16.msrb.mxu0 %v7992_v59  ;;  %v5316_v59 = vpop.f32.mrf.mxu2 }
 0x29b   : > { %5607 = vmatpush.bf16.msrb.mxu3 %v7236_v53  ;;  %v6159_v53 = vld [vmem:[%s9182_s19 + $0x218] sm:$0xf]  ;;  %8454 = vmatmul.msk.bf16.vlgmr.msrb.gmra.mxu1 %vm4206_vm1, %v10645_v27  ;;  %v5327_v38 = vpop.f32.mrf.mxu3  ;;  %v6807_v27 = vld [vmem:[%s9182_s19 + $0x728] sm:$0xf] }
 0x29c   : > { %5659 = vmatpush.bf16.msra.mxu2 %v7240_v46  ;;  %5646 = vmatpush.bf16.msra.mxu1 %v6376_v19  ;;  %v6160_v31 = vor.u32 %v8538_v25, %v6159_v53  ;;  %v5328_v46 = vadd.f32 %v5327_v38, %v5315_v30  ;;  %v6808_v5 = vor.u32 %v8700_v50, %v6807_v27 }
 0x29d   : > { %v8104_v19 = vor.u32 %v9024_v47, %v8103_v55 }
 0x29e   : > { %5622 = vmatpush.bf16.msrb.mxu0 %v7884_v13  ;;  %v5730_v13 = vrot.slane %v5328_v46, 4 }
 0x29f   : > { %5608 = vmatpush.bf16.msrb.mxu3 %v7128_v60  ;;  %v5263_v60 = vadd.f32 %v10877_v51, %v5250_v56  ;;  %v6052_v51 = vor.u32 %v8511_v3, %v6051_v61 }
 0x2a0   : > { %5660 = vmatpush.bf16.msra.mxu2 %v7132_v44  ;;  %5647 = vmatpush.bf16.msra.mxu1 %v6268_v20  ;;  %v8997_v44 = vld [vmem:[%s9182_s19 + $0x10d8] sm:$0xf0] }
 0x2a1   : > { %v5276_v48 = vadd.f32 %v10824_v45, %v5263_v60  ;;  %v8212_v45 = vor.u32 %v9051_v15, %v8211_v40  ;;  %v7996_v57 = vor.u32 %v8997_v44, %v7995_v36 }
 0x2a2   : > { %5623 = vmatpush.bf16.msrb.mxu0 %v7776_v29  ;;  %v5379_v17 = vpop.f32.mrf.mxu2  ;;  %v5353_v23 = vpop.f32.mrf.mxu0 }
 0x2a3   : > { %5609 = vmatpush.bf16.msrb.mxu3 %v7020_v39  ;;  %v5943_v39 = vld [vmem:[%s9182_s19 + $0x68] sm:$0xf]  ;;  %v5743_v54 = vsel %vm4209_vm0, %v5276_v48, %v5730_v13  ;;  %v5329_v8 = vpop.f32.mrf.mxu3 }
 0x2a4   : > { %5661 = vmatpush.bf16.msra.mxu2 %v7024_v41  ;;  %5648 = vmatpush.bf16.msra.mxu1 %v6160_v31  ;;  %5769 = vst [vmem:[%s9714_s25 + $0x48] sm:$0x77] %v5743_v54  ;;  %v5366_v26 = vpop.f32.mrf.mxu1  ;;  %v9135_v41 = vld.sshfl [vmem:[#allocation1 + $0x10] sm:$0xff pattern:$0x73625140] }
 0x2a6   : > { %5624 = vmatpush.bf16.msrb.mxu0 %v7668_v49 }
 0x2a7   : > { %5610 = vmatpush.bf16.msrb.mxu3 %v6912_v0  ;;  %v8943_v0 = vld [vmem:[%s9182_s19 + $0xf28] sm:$0xf0] }
 0x2a8   : > { %5662 = vmatpush.bf16.msra.mxu2 %v6916_v18  ;;  %5649 = vmatpush.bf16.msra.mxu1 %v6052_v51  ;;  %v7780_v10 = vor.u32 %v8943_v0, %v7779_v22 }
 0x2a9   : > { %5625 = vmatmul.bf16.vlgmr.msrb.gmra.mxu0 %v10664_v2  ;;  %v5944_v2 = vor.u32 %v8484_v62, %v5943_v39 }
 0x2aa   : > { %5689 = vmatpush.bf16.msra.mxu0 %v4289_v42  ;;  %v5381_v21 = vpop.f32.mrf.mxu2 }
 0x2ab   : > { %5611 = vmatpush.bf16.msrb.mxu3 %v6804_v12 }
 0x2ac   : > { %5663 = vmatpush.bf16.msra.mxu2 %v6808_v5  ;;  %5650 = vmatpush.bf16.msra.mxu1 %v5944_v2  ;;  %v5368_v20 = vpop.f32.mrf.mxu1 }
 0x2ad   : > { %v5340_v29 = vpop.f32.mrf.mxu3 }
 0x2ae   : > { %5612 = vmatmul.bf16.vlgmr.msrb.gmra.mxu3 %v10669_v4  ;;  %v5341_v25 = vadd.f32 %v5340_v29, %v9663_v14 }
 0x2af   : > { %5669 = vmatpush.bf16.msra.mxu3 %v8428_v24  ;;  %5664 = vmatmul.bf16.vlgmr.msra.gmra.mxu2 %v10669_v4  ;;  %v5355_v4 = vpop.f32.mrf.mxu0 }
 0x2b0   : > { %5651 = vmatmul.bf16.vlgmr.msra.gmra.mxu1 %v10701_v43  ;;  %v5354_v6 = vadd.f32 %v5353_v23, %v5341_v25 }
 0x2b2   : > { %v5392_v35 = vpop.f32.mrf.mxu2  ;;  %v5367_v24 = vadd.f32 %v5366_v26, %v5354_v6 }
 0x2b3   : > { %5670 = vmatpush.bf16.msra.mxu3 %v8320_v11  ;;  %v5393_v49 = vadd.f32 %v5392_v35, %v9663_v14 }
 0x2b4   : > { %v5431_v1 = vpop.f32.mrf.mxu1  ;;  %v5380_v42 = vadd.f32 %v5379_v17, %v5367_v24 }
 0x2b5   : > { %v5342_v43 = vpop.f32.mrf.mxu3 }
 0x2b7   : > { %5671 = vmatpush.bf16.msra.mxu3 %v8212_v45 }
 0x2b9   : > { %8455 = vmatmul.msk.bf16.vlgmr.msra.gmra.mxu0 %vm4206_vm1, %v9134_v16 }
 0x2ba   : > { %v5394_v56 = vpop.f32.mrf.mxu2 }
 0x2bb   : > { %5672 = vmatpush.bf16.msra.mxu3 %v8104_v19 }
 0x2bc   : > { %v5433_v34 = vpop.f32.mrf.mxu1 }
 0x2bf   : > { %5673 = vmatpush.bf16.msra.mxu3 %v7996_v57 }
 0x2c2   : > { %v5418_v53 = vpop.f32.mrf.mxu0 }
 0x2c3   : > { %5674 = vmatpush.bf16.msra.mxu3 %v7888_v7 }
 0x2c7   : > { %5675 = vmatpush.bf16.msra.mxu3 %v7780_v10 }
 0x2ca   : > { %v5420_v12 = vpop.f32.mrf.mxu0  ;;  %v5444_v59 = vpop.f32.mrf.mxu1 }
 0x2cb   : > { %5676 = vmatpush.bf16.msra.mxu3 %v7672_v58  ;;  %v5445_v15 = vadd.f32 %v5444_v59, %v9663_v14 }
 0x2cd   : > { %v5405_v63 = vpop.f32.mrf.mxu3 }
 0x2ce   : > { %5677 = vmatmul.bf16.vlgmr.msra.gmra.mxu3 %v9135_v41  ;;  %v5406_v30 = vadd.f32 %v5405_v63, %v5393_v49  ;;  %v5457_v52 = vpop.f32.mrf.mxu2 }
 0x2cf   : > { %v5458_v62 = vadd.f32 %v5457_v52, %v5445_v15 }
 0x2d0   : > { %v5419_v33 = vadd.f32 %v5418_v53, %v5406_v30 }
 0x2d2   : > { %v5432_v31 = vadd.f32 %v5431_v1, %v5419_v33  ;;  %v5483_v3 = vpop.f32.mrf.mxu0  ;;  %v5446_v38 = vpop.f32.mrf.mxu1 }
 0x2d4   : > { %v5731_v60 = vrot.slane %v5432_v31, 4 }
 0x2d5   : > { %v5407_v18 = vpop.f32.mrf.mxu3 }
 0x2d6   : > { %v5744_v61 = vsel %vm4209_vm0, %v5380_v42, %v5731_v60  ;;  %v5459_v27 = vpop.f32.mrf.mxu2 }
 0x2d7   : > { %5770 = vst [vmem:[%s9714_s25 + $0x50] sm:$0x77] %v5744_v61 }
 0x2da   : > { %v5485_v50 = vpop.f32.mrf.mxu0 }
 0x2e6   : > { %v5496_v46 = vpop.f32.mrf.mxu0 }
 0x2e7   : > { %v5497_v13 = vadd.f32 %v5496_v46, %v9663_v14 }
 0x2ea   : > { %v5509_v51 = vpop.f32.mrf.mxu1 }
 0x2eb   : > { %v5510_v39 = vadd.f32 %v5509_v51, %v5497_v13 }
 0x2ed   : > { %v5470_v11 = vpop.f32.mrf.mxu3 }
 0x2ee   : > { %v5498_v48 = vpop.f32.mrf.mxu0  ;;  %v5522_v40 = vpop.f32.mrf.mxu2  ;;  %v5471_v55 = vadd.f32 %v5470_v11, %v5458_v62 }
 0x2ef   : > { %v5523_v45 = vadd.f32 %v5522_v40, %v5510_v39 }
 0x2f0   : > { %v5484_v8 = vadd.f32 %v5483_v3, %v5471_v55 }
 0x2f2   : > { %v5511_v54 = vpop.f32.mrf.mxu1 }
 0x2f5   : > { %v5472_v5 = vpop.f32.mrf.mxu3 }
 0x2f6   : > { %v5524_v17 = vpop.f32.mrf.mxu2 }
 0x2fd   : > { %v5535_v47 = vpop.f32.mrf.mxu3 }
 0x2fe   : > { %v5536_v2 = vadd.f32 %v5535_v47, %v5523_v45  ;;  %v5587_v36 = vpop.f32.mrf.mxu2 }
 0x300   : > { %v5732_v19 = vrot.slane %v5536_v2, 4 }
 0x302   : > { %v5745_v23 = vsel %vm4209_vm0, %v5484_v8, %v5732_v19 }
 0x303   : > { %5771 = vst [vmem:[%s9714_s25 + $0x58] sm:$0x77] %v5745_v23 }
 0x305   : > { %v5537_v44 = vpop.f32.mrf.mxu3 }
 0x306   : > { %v5561_v57 = vpop.f32.mrf.mxu0  ;;  %v5589_v21 = vpop.f32.mrf.mxu2 }
 0x308   : > { %v5574_v28 = vpop.f32.mrf.mxu1 }
 0x30e   : > { %v5563_v29 = vpop.f32.mrf.mxu0 }
 0x310   : > { %v5576_v4 = vpop.f32.mrf.mxu1 }
 0x311   : > { %v5548_v37 = vpop.f32.mrf.mxu3 }
 0x312   : > { %v5600_v26 = vpop.f32.mrf.mxu2  ;;  %v5549_v10 = vadd.f32 %v5548_v37, %v9663_v14 }
 0x313   : > { %v5601_v9 = vadd.f32 %v5600_v26, %v9663_v14 }
 0x314   : > { %v5562_v35 = vadd.f32 %v5561_v57, %v5549_v10 }
 0x316   : > { %v5575_v56 = vadd.f32 %v5574_v28, %v5562_v35 }
 0x318   : > { %v5639_v0 = vpop.f32.mrf.mxu1  ;;  %v5588_v34 = vadd.f32 %v5587_v36, %v5575_v56 }
 0x319   : > { %v5550_v7 = vpop.f32.mrf.mxu3 }
 0x31a   : > { %v5602_v22 = vpop.f32.mrf.mxu2 }
 0x320   : > { %v5641_v32 = vpop.f32.mrf.mxu1 }
 0x326   : > { %v5626_v16 = vpop.f32.mrf.mxu0 }
 0x32d   : > { %v5652_v41 = vpop.f32.mrf.mxu1 }
 0x32e   : > { %v5628_v58 = vpop.f32.mrf.mxu0  ;;  %v5653_v59 = vadd.f32 %v5652_v41, %v9663_v14 }
 0x331   : > { %v5613_v43 = vpop.f32.mrf.mxu3 }
 0x332   : > { %v5614_v20 = vadd.f32 %v5613_v43, %v5601_v9  ;;  %v5665_v25 = vpop.f32.mrf.mxu2 }
 0x333   : > { %v5666_v31 = vadd.f32 %v5665_v25, %v5653_v59 }
 0x334   : > { %v5627_v1 = vadd.f32 %v5626_v16, %v5614_v20 }
 0x335   : > { %v5654_v12 = vpop.f32.mrf.mxu1 }
 0x336   : > { %v5640_v53 = vadd.f32 %v5639_v0, %v5627_v1  ;;  %v5691_v30 = vpop.f32.mrf.mxu0 }
 0x338   : > { %v5733_v49 = vrot.slane %v5640_v53, 4 }
 0x339   : > { %v5615_v6 = vpop.f32.mrf.mxu3 }
 0x33a   : > { %v5746_v63 = vsel %vm4209_vm0, %v5588_v34, %v5733_v49  ;;  %v5667_v24 = vpop.f32.mrf.mxu2 }
 0x33b   : > { %5772 = vst [vmem:[%s9714_s25 + $0x60] sm:$0x77] %v5746_v63 }
 0x33e   : > { %v5693_v33 = vpop.f32.mrf.mxu0 }
 0x351   : > { %v5678_v42 = vpop.f32.mrf.mxu3 }
 0x352   : > { %v5679_v60 = vadd.f32 %v5678_v42, %v5666_v31 }
 0x354   : > { %v5692_v52 = vadd.f32 %v5691_v30, %v5679_v60 }
 0x356   : > { %5774 = vst.msk [vmem:[%s9714_s25 + $0x68] sm:$0x7] %vm5773_vm2, %v5692_v52 }
 0x359   : > { %v5680_v18 = vpop.f32.mrf.mxu3 }
 0x35a PF: > { %s13_s12 = sadd.s32 1, %s9142_s12  }
 0x35b   : > { %p10_p4 = scmp.ge.s32.totalorder %s13_s12, 4  }
 0x35d   :  { %12 = sbr.rel (!%p10_p4) target bundleno = 1 (0x1), region = 62 }

</bundles_post_ra>
